<compile_context>
chip_gen: v7x
topology: tpu7x:2x2x1
jax: 0.10.0
libtpu: 0.0.40
codegen_flags: <defaults>
</compile_context>

<pallas_src>
import numpy as np
import jax
import jax.numpy as jnp
from jax.experimental import pallas as pl
from jax.experimental.pallas import tpu as pltpu


# ----------------------------------------------------------------------------
# Constant 0/1 gather / scatter matrices (built once with numpy, trace-time)
# ----------------------------------------------------------------------------
def _conv_gather_matrices(H, W, k, s, p):
    """Per-tap gather matrices: conv-with-padding becomes matmuls.
    G[t, h*W+w, oh*OW+ow] = 1 iff input pixel (h,w) feeds output (oh,ow) at tap t."""
    OH = (H + 2 * p - k) // s + 1
    OW = (W + 2 * p - k) // s + 1
    g = np.zeros((k * k, H * W, OH * OW), np.float32)
    for i in range(k):
        for j in range(k):
            t = i * k + j
            for oh in range(OH):
                ih = oh * s + i - p
                if not (0 <= ih < H):
                    continue
                for ow in range(OW):
                    iw = ow * s + j - p
                    if not (0 <= iw < W):
                        continue
                    g[t, ih * W + iw, oh * OW + ow] = 1.0
    return g, OH, OW


def _convT_scatter_matrices(H, W, k, s, p):
    """Per-tap scatter matrices: PyTorch ConvTranspose2d becomes matmuls.
    S[t, h*W+w, oh*OW+ow] = 1 iff oh = h*s + i - p and ow = w*s + j - p (in bounds)."""
    OH = (H - 1) * s - 2 * p + k
    OW = (W - 1) * s - 2 * p + k
    g = np.zeros((k * k, H * W, OH * OW), np.float32)
    for i in range(k):
        for j in range(k):
            t = i * k + j
            for h in range(H):
                oh = h * s + i - p
                if not (0 <= oh < OH):
                    continue
                for w in range(W):
                    ow = w * s + j - p
                    if not (0 <= ow < OW):
                        continue
                    g[t, h * W + w, oh * OW + ow] = 1.0
    return g, OH, OW


# ----------------------------------------------------------------------------
# Weight packing: per-tap (OC, IC) matrices
# ----------------------------------------------------------------------------
def _pack_conv_weight(w):   # torch Conv2d layout (OC, IC, kh, kw) -> (kh*kw, OC, IC)
    oc, ic, kh, kw = w.shape
    return jnp.transpose(w, (2, 3, 0, 1)).reshape(kh * kw, oc, ic)


def _pack_convT_weight(w):  # torch ConvTranspose2d layout (IC, OC, kh, kw) -> (kh*kw, OC, IC)
    ic, oc, kh, kw = w.shape
    return jnp.transpose(w, (2, 3, 1, 0)).reshape(kh * kw, oc, ic)


# ----------------------------------------------------------------------------
# Fused Pallas kernel: whole forward pass for one image per grid step
# ----------------------------------------------------------------------------
def _fused_ae_kernel(x_ref,
                     w1_ref, b1_ref, g1_ref, p1_ref,
                     w2_ref, b2_ref, g2_ref, p2_ref,
                     w3_ref, b3_ref, g3_ref,
                     w4_ref, b4_ref, g4_ref,
                     w5_ref, b5_ref, g5_ref,
                     o_ref):
    f32 = jnp.float32

    def conv_like(a, w_ref, b_ref, g_ref, act):
        # a: (IC, HWin); w_ref: (KK, OC, IC); g_ref: (KK, HWin, HWout); b_ref: (OC, 1)
        kk, oc, _ = w_ref.shape
        hw_out = g_ref.shape[2]
        acc = jnp.zeros((oc, hw_out), f32)
        for t in range(kk):                      # static unrolled loop over taps
            taps = jnp.dot(a, g_ref[t], preferred_element_type=f32)          # (IC, HWout)
            acc = acc + jnp.dot(w_ref[t], taps, preferred_element_type=f32)  # (OC, HWout)
        y = acc + b_ref[...]
        if act == "relu":
            y = jnp.maximum(y, 0.0)
        else:  # tanh
            y = jnp.tanh(y)
        return y

    def maxpool(a, g_ref):
        kk = g_ref.shape[0]
        y = jnp.dot(a, g_ref[0], preferred_element_type=f32)
        for t in range(1, kk):
            y = jnp.maximum(y, jnp.dot(a, g_ref[t], preferred_element_type=f32))
        return y

    a = x_ref[0].astype(f32)                            # (1, 28*28)
    a = conv_like(a, w1_ref, b1_ref, g1_ref, "relu")    # (16, 100)
    a = maxpool(a, p1_ref)                              # (16, 25)
    a = conv_like(a, w2_ref, b2_ref, g2_ref, "relu")    # (8, 9)
    a = maxpool(a, p2_ref)                              # (8, 4)
    a = conv_like(a, w3_ref, b3_ref, g3_ref, "relu")    # (16, 25)
    a = conv_like(a, w4_ref, b4_ref, g4_ref, "relu")    # (8, 225)
    a = conv_like(a, w5_ref, b5_ref, g5_ref, "tanh")    # (1, 784)
    o_ref[0] = a.astype(o_ref.dtype)


# ----------------------------------------------------------------------------
# Forward pass (matches torch autoencoder.forward)
# ----------------------------------------------------------------------------
def autoencoder_forward(x_nchw, params):
    N, C, H, W = x_nchw.shape

    # constant gather / scatter matrices for the fixed layer geometry
    g_enc1, h1, w1 = _conv_gather_matrices(H, W, 3, 3, 1)       # Conv2d(1,16,3,s=3,p=1)
    g_pool1, h1p, w1p = _conv_gather_matrices(h1, w1, 2, 2, 0)  # MaxPool2d(2,2)
    g_enc2, h2, w2 = _conv_gather_matrices(h1p, w1p, 3, 2, 1)   # Conv2d(16,8,3,s=2,p=1)
    g_pool2, h2p, w2p = _conv_gather_matrices(h2, w2, 2, 1, 0)  # MaxPool2d(2,1)
    s_dec1, h3, w3 = _convT_scatter_matrices(h2p, w2p, 3, 2, 0)  # ConvT(8,16,3,s=2)
    s_dec2, h4, w4 = _convT_scatter_matrices(h3, w3, 5, 3, 1)    # ConvT(16,8,5,s=3,p=1)
    s_dec3, h5, w5 = _convT_scatter_matrices(h4, w4, 2, 2, 1)    # ConvT(8,1,2,s=2,p=1)
    hw_out = h5 * w5

    operands = [
        x_nchw.astype(jnp.float32).reshape(N, C, H * W),
        _pack_conv_weight(params["enc1_w"]), params["enc1_b"].reshape(-1, 1),
        jnp.asarray(g_enc1), jnp.asarray(g_pool1),
        _pack_conv_weight(params["enc2_w"]), params["enc2_b"].reshape(-1, 1),
        jnp.asarray(g_enc2), jnp.asarray(g_pool2),
        _pack_convT_weight(params["dec1_w"]), params["dec1_b"].reshape(-1, 1),
        jnp.asarray(s_dec1),
        _pack_convT_weight(params["dec2_w"]), params["dec2_b"].reshape(-1, 1),
        jnp.asarray(s_dec2),
        _pack_convT_weight(params["dec3_w"]), params["dec3_b"].reshape(-1, 1),
        jnp.asarray(s_dec3),
    ]

    def const_spec(a):
        # full-array block, same block every grid step -> VMEM-resident constant
        return pl.BlockSpec(a.shape, lambda b, _nd=a.ndim: (0,) * _nd)

    in_specs = [pl.BlockSpec((1, C, H * W), lambda b: (b, 0, 0))]
    in_specs += [const_spec(a) for a in operands[1:]]

    out = pl.pallas_call(
        _fused_ae_kernel,
        out_shape=jax.ShapeDtypeStruct((N, 1, hw_out), jnp.float32),
        grid=(N,),
        in_specs=in_specs,
        out_specs=pl.BlockSpec((1, 1, hw_out), lambda b: (b, 0, 0)),
        compiler_params=pltpu.CompilerParams(
            dimension_semantics=("parallel",),       # v7x: split batch over 2 TCs
            vmem_limit_bytes=40 * 1024 * 1024,       # ~18 MiB used incl. double-buffering
        ),
    )(*operands)
    return out.reshape(N, 1, h5, w5)


# ----------------------------------------------------------------------------
# Parameters (deterministic, PyTorch-default-like uniform init)
# ----------------------------------------------------------------------------
def init_params(key):
    def uniform(key, shape, fan_in):
        bound = 1.0 / jnp.sqrt(jnp.float32(fan_in))
        return jax.random.uniform(key, shape, jnp.float32, -bound, bound)

    keys = jax.random.split(key, 10)
    p = {}
    # encoder (Conv2d weight layout: (out_ch, in_ch, kh, kw))
    p["enc1_w"] = uniform(keys[0], (16, 1, 3, 3), 1 * 3 * 3)
    p["enc1_b"] = uniform(keys[1], (16,), 1 * 3 * 3)
    p["enc2_w"] = uniform(keys[2], (8, 16, 3, 3), 16 * 3 * 3)
    p["enc2_b"] = uniform(keys[3], (8,), 16 * 3 * 3)
    # decoder (ConvTranspose2d weight layout: (in_ch, out_ch, kh, kw))
    p["dec1_w"] = uniform(keys[4], (8, 16, 3, 3), 16 * 3 * 3)
    p["dec1_b"] = uniform(keys[5], (16,), 16 * 3 * 3)
    p["dec2_w"] = uniform(keys[6], (16, 8, 5, 5), 8 * 5 * 5)
    p["dec2_b"] = uniform(keys[7], (8,), 8 * 5 * 5)
    p["dec3_w"] = uniform(keys[8], (8, 1, 2, 2), 1 * 2 * 2)
    p["dec3_b"] = uniform(keys[9], (1,), 1 * 2 * 2)
    return p


# ----------------------------------------------------------------------------
# Plain-XLA reference (test harness only) — same math via lax conv primitives
# ----------------------------------------------------------------------------
def _reference_forward(x, params):
    dn = ("NCHW", "OIHW", "NCHW")
    prec = jax.lax.Precision.HIGHEST

    def conv(x, w, b, s, p):
        y = jax.lax.conv_general_dilated(
            x, w, (s, s), ((p, p), (p, p)), dimension_numbers=dn, precision=prec)
        return y + b.reshape(1, -1, 1, 1)

    def convT(x, w, b, s, p):
        k = w.shape[2]
        wf = jnp.transpose(jnp.flip(w, (2, 3)), (1, 0, 2, 3))
        y = jax.lax.conv_general_dilated(
            x, wf, (1, 1), ((k - 1 - p, k - 1 - p),) * 2, lhs_dilation=(s, s),
            dimension_numbers=dn, precision=prec)
        return y + b.reshape(1, -1, 1, 1)

    def maxpool(x, k, s):
        return jax.lax.reduce_window(
            x, -jnp.inf, jax.lax.max, (1, 1, k, k), (1, 1, s, s), "VALID")

    x = jax.nn.relu(conv(x, params["enc1_w"], params["enc1_b"], 3, 1))
    x = maxpool(x, 2, 2)
    x = jax.nn.relu(conv(x, params["enc2_w"], params["enc2_b"], 2, 1))
    x = maxpool(x, 2, 1)
    x = jax.nn.relu(convT(x, params["dec1_w"], params["dec1_b"], 2, 0))
    x = jax.nn.relu(convT(x, params["dec2_w"], params["dec2_b"], 3, 1))
    x = jnp.tanh(convT(x, params["dec3_w"], params["dec3_b"], 2, 1))
    return x


if __name__ == "__main__":
    key = jax.random.PRNGKey(0)
    k_x, k_p = jax.random.split(key)
    x = jax.random.normal(k_x, (2, 1, 28, 28), jnp.float32)   # NCHW, MNIST-sized
    params = init_params(k_p)

    fwd = jax.jit(autoencoder_forward)
    y = fwd(x, params)
    jax.block_until_ready(y)

    assert y.shape == (2, 1, 28, 28), y.shape
    assert y.dtype == jnp.float32
    assert bool(jnp.all(jnp.isfinite(y)))
    assert bool(jnp.all(jnp.abs(y) <= 1.0))     # tanh output range

    # numerical sanity check against a plain-XLA reference of the same module
    y_ref = jax.jit(_reference_forward)(x, params)
    max_err = float(jnp.max(jnp.abs(y - y_ref)))
    assert bool(jnp.allclose(y, y_ref, atol=2e-2, rtol=2e-2)), f"max_err={max_err}"

    print("KERNEL_OK")
</pallas_src>

<mosaic_0001>
module attributes {stable_mosaic.version = 11 : i64} {
  func.func @_fused_ae_kernel(%arg0: i32, %arg1: memref<1x1x784xf32, #tpu.memory_space<vmem>>, %arg2: memref<9x16x1xf32, #tpu.memory_space<vmem>>, %arg3: memref<16x1xf32, #tpu.memory_space<vmem>>, %arg4: memref<9x784x100xf32, #tpu.memory_space<vmem>>, %arg5: memref<4x100x25xf32, #tpu.memory_space<vmem>>, %arg6: memref<9x8x16xf32, #tpu.memory_space<vmem>>, %arg7: memref<8x1xf32, #tpu.memory_space<vmem>>, %arg8: memref<9x25x9xf32, #tpu.memory_space<vmem>>, %arg9: memref<4x9x4xf32, #tpu.memory_space<vmem>>, %arg10: memref<9x16x8xf32, #tpu.memory_space<vmem>>, %arg11: memref<16x1xf32, #tpu.memory_space<vmem>>, %arg12: memref<9x4x25xf32, #tpu.memory_space<vmem>>, %arg13: memref<25x8x16xf32, #tpu.memory_space<vmem>>, %arg14: memref<8x1xf32, #tpu.memory_space<vmem>>, %arg15: memref<25x25x225xf32, #tpu.memory_space<vmem>>, %arg16: memref<4x1x8xf32, #tpu.memory_space<vmem>>, %arg17: memref<1x1xf32, #tpu.memory_space<vmem>>, %arg18: memref<4x225x784xf32, #tpu.memory_space<vmem>>, %arg19: memref<1x1x784xf32, #tpu.memory_space<vmem>>) attributes {dimension_semantics = [#tpu.dimension_semantics<parallel>], iteration_bounds = array<i64: 2>, scalar_prefetch = 0 : i64, scratch_operands = 0 : i64, tpu.core_type = #tpu.core_type<tc>, window_params = [{transform_indices = @transform_0, window_bounds = array<i64: 1, 1, 784>}, {pipeline_mode = #tpu.pipeline_mode<synchronous>, transform_indices = @transform_1, window_bounds = array<i64: 9, 16, 1>}, {pipeline_mode = #tpu.pipeline_mode<synchronous>, transform_indices = @transform_2, window_bounds = array<i64: 16, 1>}, {pipeline_mode = #tpu.pipeline_mode<synchronous>, transform_indices = @transform_3, window_bounds = array<i64: 9, 784, 100>}, {pipeline_mode = #tpu.pipeline_mode<synchronous>, transform_indices = @transform_4, window_bounds = array<i64: 4, 100, 25>}, {pipeline_mode = #tpu.pipeline_mode<synchronous>, transform_indices = @transform_5, window_bounds = array<i64: 9, 8, 16>}, {pipeline_mode = #tpu.pipeline_mode<synchronous>, transform_indices = @transform_6, window_bounds = array<i64: 8, 1>}, {pipeline_mode = #tpu.pipeline_mode<synchronous>, transform_indices = @transform_7, window_bounds = array<i64: 9, 25, 9>}, {pipeline_mode = #tpu.pipeline_mode<synchronous>, transform_indices = @transform_8, window_bounds = array<i64: 4, 9, 4>}, {pipeline_mode = #tpu.pipeline_mode<synchronous>, transform_indices = @transform_9, window_bounds = array<i64: 9, 16, 8>}, {pipeline_mode = #tpu.pipeline_mode<synchronous>, transform_indices = @transform_10, window_bounds = array<i64: 16, 1>}, {pipeline_mode = #tpu.pipeline_mode<synchronous>, transform_indices = @transform_11, window_bounds = array<i64: 9, 4, 25>}, {pipeline_mode = #tpu.pipeline_mode<synchronous>, transform_indices = @transform_12, window_bounds = array<i64: 25, 8, 16>}, {pipeline_mode = #tpu.pipeline_mode<synchronous>, transform_indices = @transform_13, window_bounds = array<i64: 8, 1>}, {pipeline_mode = #tpu.pipeline_mode<synchronous>, transform_indices = @transform_14, window_bounds = array<i64: 25, 25, 225>}, {pipeline_mode = #tpu.pipeline_mode<synchronous>, transform_indices = @transform_15, window_bounds = array<i64: 4, 1, 8>}, {pipeline_mode = #tpu.pipeline_mode<synchronous>, transform_indices = @transform_16, window_bounds = array<i64: 1, 1>}, {pipeline_mode = #tpu.pipeline_mode<synchronous>, transform_indices = @transform_17, window_bounds = array<i64: 4, 225, 784>}, {transform_indices = @transform_18, window_bounds = array<i64: 1, 1, 784>}]} {
    %c0 = arith.constant 0 : index
    %c0_0 = arith.constant 0 : index
    %c0_1 = arith.constant 0 : index
    %0 = vector.load %arg1[%c0, %c0_0, %c0_1] : memref<1x1x784xf32, #tpu.memory_space<vmem>>, vector<1x1x784xf32>
    %1 = vector.shape_cast %0 : vector<1x1x784xf32> to vector<1x784xf32>
    %cst = arith.constant 0.000000e+00 : f32
    %2 = vector.broadcast %cst : f32 to vector<16x100xf32>
    %c0_2 = arith.constant 0 : index
    %c0_3 = arith.constant 0 : index
    %c0_4 = arith.constant 0 : index
    %3 = vector.load %arg4[%c0_2, %c0_3, %c0_4] : memref<9x784x100xf32, #tpu.memory_space<vmem>>, vector<1x784x100xf32>
    %4 = vector.shape_cast %3 : vector<1x784x100xf32> to vector<784x100xf32>
    %cst_5 = arith.constant dense<0.000000e+00> : vector<1x100xf32>
    %5 = tpu.matmul %1, %4, %cst_5 {dimension_numbers = #tpu.dot_dimension_numbers<[1], [0], [0], [1], [0, 0, 1, 1], [], []>} : vector<1x784xf32>, vector<784x100xf32>, vector<1x100xf32> -> vector<1x100xf32>
    %c0_6 = arith.constant 0 : index
    %c0_7 = arith.constant 0 : index
    %c0_8 = arith.constant 0 : index
    %6 = vector.load %arg2[%c0_6, %c0_7, %c0_8] : memref<9x16x1xf32, #tpu.memory_space<vmem>>, vector<1x16x1xf32>
    %7 = vector.shape_cast %6 : vector<1x16x1xf32> to vector<16x1xf32>
    %cst_9 = arith.constant dense<0.000000e+00> : vector<16x100xf32>
    %8 = tpu.matmul %7, %5, %cst_9 {dimension_numbers = #tpu.dot_dimension_numbers<[1], [0], [0], [1], [0, 0, 1, 1], [], []>} : vector<16x1xf32>, vector<1x100xf32>, vector<16x100xf32> -> vector<16x100xf32>
    %9 = arith.addf %2, %8 : vector<16x100xf32>
    %c1 = arith.constant 1 : index
    %c0_10 = arith.constant 0 : index
    %c0_11 = arith.constant 0 : index
    %10 = vector.load %arg4[%c1, %c0_10, %c0_11] : memref<9x784x100xf32, #tpu.memory_space<vmem>>, vector<1x784x100xf32>
    %11 = vector.shape_cast %10 : vector<1x784x100xf32> to vector<784x100xf32>
    %cst_12 = arith.constant dense<0.000000e+00> : vector<1x100xf32>
    %12 = tpu.matmul %1, %11, %cst_12 {dimension_numbers = #tpu.dot_dimension_numbers<[1], [0], [0], [1], [0, 0, 1, 1], [], []>} : vector<1x784xf32>, vector<784x100xf32>, vector<1x100xf32> -> vector<1x100xf32>
    %c1_13 = arith.constant 1 : index
    %c0_14 = arith.constant 0 : index
    %c0_15 = arith.constant 0 : index
    %13 = vector.load %arg2[%c1_13, %c0_14, %c0_15] : memref<9x16x1xf32, #tpu.memory_space<vmem>>, vector<1x16x1xf32>
    %14 = vector.shape_cast %13 : vector<1x16x1xf32> to vector<16x1xf32>
    %cst_16 = arith.constant dense<0.000000e+00> : vector<16x100xf32>
    %15 = tpu.matmul %14, %12, %cst_16 {dimension_numbers = #tpu.dot_dimension_numbers<[1], [0], [0], [1], [0, 0, 1, 1], [], []>} : vector<16x1xf32>, vector<1x100xf32>, vector<16x100xf32> -> vector<16x100xf32>
    %16 = arith.addf %9, %15 : vector<16x100xf32>
    %c2 = arith.constant 2 : index
    %c0_17 = arith.constant 0 : index
    %c0_18 = arith.constant 0 : index
    %17 = vector.load %arg4[%c2, %c0_17, %c0_18] : memref<9x784x100xf32, #tpu.memory_space<vmem>>, vector<1x784x100xf32>
    %18 = vector.shape_cast %17 : vector<1x784x100xf32> to vector<784x100xf32>
    %cst_19 = arith.constant dense<0.000000e+00> : vector<1x100xf32>
    %19 = tpu.matmul %1, %18, %cst_19 {dimension_numbers = #tpu.dot_dimension_numbers<[1], [0], [0], [1], [0, 0, 1, 1], [], []>} : vector<1x784xf32>, vector<784x100xf32>, vector<1x100xf32> -> vector<1x100xf32>
    %c2_20 = arith.constant 2 : index
    %c0_21 = arith.constant 0 : index
    %c0_22 = arith.constant 0 : index
    %20 = vector.load %arg2[%c2_20, %c0_21, %c0_22] : memref<9x16x1xf32, #tpu.memory_space<vmem>>, vector<1x16x1xf32>
    %21 = vector.shape_cast %20 : vector<1x16x1xf32> to vector<16x1xf32>
    %cst_23 = arith.constant dense<0.000000e+00> : vector<16x100xf32>
    %22 = tpu.matmul %21, %19, %cst_23 {dimension_numbers = #tpu.dot_dimension_numbers<[1], [0], [0], [1], [0, 0, 1, 1], [], []>} : vector<16x1xf32>, vector<1x100xf32>, vector<16x100xf32> -> vector<16x100xf32>
    %23 = arith.addf %16, %22 : vector<16x100xf32>
    %c3 = arith.constant 3 : index
    %c0_24 = arith.constant 0 : index
    %c0_25 = arith.constant 0 : index
    %24 = vector.load %arg4[%c3, %c0_24, %c0_25] : memref<9x784x100xf32, #tpu.memory_space<vmem>>, vector<1x784x100xf32>
    %25 = vector.shape_cast %24 : vector<1x784x100xf32> to vector<784x100xf32>
    %cst_26 = arith.constant dense<0.000000e+00> : vector<1x100xf32>
    %26 = tpu.matmul %1, %25, %cst_26 {dimension_numbers = #tpu.dot_dimension_numbers<[1], [0], [0], [1], [0, 0, 1, 1], [], []>} : vector<1x784xf32>, vector<784x100xf32>, vector<1x100xf32> -> vector<1x100xf32>
    %c3_27 = arith.constant 3 : index
    %c0_28 = arith.constant 0 : index
    %c0_29 = arith.constant 0 : index
    %27 = vector.load %arg2[%c3_27, %c0_28, %c0_29] : memref<9x16x1xf32, #tpu.memory_space<vmem>>, vector<1x16x1xf32>
    %28 = vector.shape_cast %27 : vector<1x16x1xf32> to vector<16x1xf32>
    %cst_30 = arith.constant dense<0.000000e+00> : vector<16x100xf32>
    %29 = tpu.matmul %28, %26, %cst_30 {dimension_numbers = #tpu.dot_dimension_numbers<[1], [0], [0], [1], [0, 0, 1, 1], [], []>} : vector<16x1xf32>, vector<1x100xf32>, vector<16x100xf32> -> vector<16x100xf32>
    %30 = arith.addf %23, %29 : vector<16x100xf32>
    %c4 = arith.constant 4 : index
    %c0_31 = arith.constant 0 : index
    %c0_32 = arith.constant 0 : index
    %31 = vector.load %arg4[%c4, %c0_31, %c0_32] : memref<9x784x100xf32, #tpu.memory_space<vmem>>, vector<1x784x100xf32>
    %32 = vector.shape_cast %31 : vector<1x784x100xf32> to vector<784x100xf32>
    %cst_33 = arith.constant dense<0.000000e+00> : vector<1x100xf32>
    %33 = tpu.matmul %1, %32, %cst_33 {dimension_numbers = #tpu.dot_dimension_numbers<[1], [0], [0], [1], [0, 0, 1, 1], [], []>} : vector<1x784xf32>, vector<784x100xf32>, vector<1x100xf32> -> vector<1x100xf32>
    %c4_34 = arith.constant 4 : index
    %c0_35 = arith.constant 0 : index
    %c0_36 = arith.constant 0 : index
    %34 = vector.load %arg2[%c4_34, %c0_35, %c0_36] : memref<9x16x1xf32, #tpu.memory_space<vmem>>, vector<1x16x1xf32>
    %35 = vector.shape_cast %34 : vector<1x16x1xf32> to vector<16x1xf32>
    %cst_37 = arith.constant dense<0.000000e+00> : vector<16x100xf32>
    %36 = tpu.matmul %35, %33, %cst_37 {dimension_numbers = #tpu.dot_dimension_numbers<[1], [0], [0], [1], [0, 0, 1, 1], [], []>} : vector<16x1xf32>, vector<1x100xf32>, vector<16x100xf32> -> vector<16x100xf32>
    %37 = arith.addf %30, %36 : vector<16x100xf32>
    %c5 = arith.constant 5 : index
    %c0_38 = arith.constant 0 : index
    %c0_39 = arith.constant 0 : index
    %38 = vector.load %arg4[%c5, %c0_38, %c0_39] : memref<9x784x100xf32, #tpu.memory_space<vmem>>, vector<1x784x100xf32>
    %39 = vector.shape_cast %38 : vector<1x784x100xf32> to vector<784x100xf32>
    %cst_40 = arith.constant dense<0.000000e+00> : vector<1x100xf32>
    %40 = tpu.matmul %1, %39, %cst_40 {dimension_numbers = #tpu.dot_dimension_numbers<[1], [0], [0], [1], [0, 0, 1, 1], [], []>} : vector<1x784xf32>, vector<784x100xf32>, vector<1x100xf32> -> vector<1x100xf32>
    %c5_41 = arith.constant 5 : index
    %c0_42 = arith.constant 0 : index
    %c0_43 = arith.constant 0 : index
    %41 = vector.load %arg2[%c5_41, %c0_42, %c0_43] : memref<9x16x1xf32, #tpu.memory_space<vmem>>, vector<1x16x1xf32>
    %42 = vector.shape_cast %41 : vector<1x16x1xf32> to vector<16x1xf32>
    %cst_44 = arith.constant dense<0.000000e+00> : vector<16x100xf32>
    %43 = tpu.matmul %42, %40, %cst_44 {dimension_numbers = #tpu.dot_dimension_numbers<[1], [0], [0], [1], [0, 0, 1, 1], [], []>} : vector<16x1xf32>, vector<1x100xf32>, vector<16x100xf32> -> vector<16x100xf32>
    %44 = arith.addf %37, %43 : vector<16x100xf32>
    %c6 = arith.constant 6 : index
    %c0_45 = arith.constant 0 : index
    %c0_46 = arith.constant 0 : index
    %45 = vector.load %arg4[%c6, %c0_45, %c0_46] : memref<9x784x100xf32, #tpu.memory_space<vmem>>, vector<1x784x100xf32>
    %46 = vector.shape_cast %45 : vector<1x784x100xf32> to vector<784x100xf32>
    %cst_47 = arith.constant dense<0.000000e+00> : vector<1x100xf32>
    %47 = tpu.matmul %1, %46, %cst_47 {dimension_numbers = #tpu.dot_dimension_numbers<[1], [0], [0], [1], [0, 0, 1, 1], [], []>} : vector<1x784xf32>, vector<784x100xf32>, vector<1x100xf32> -> vector<1x100xf32>
    %c6_48 = arith.constant 6 : index
    %c0_49 = arith.constant 0 : index
    %c0_50 = arith.constant 0 : index
    %48 = vector.load %arg2[%c6_48, %c0_49, %c0_50] : memref<9x16x1xf32, #tpu.memory_space<vmem>>, vector<1x16x1xf32>
    %49 = vector.shape_cast %48 : vector<1x16x1xf32> to vector<16x1xf32>
    %cst_51 = arith.constant dense<0.000000e+00> : vector<16x100xf32>
    %50 = tpu.matmul %49, %47, %cst_51 {dimension_numbers = #tpu.dot_dimension_numbers<[1], [0], [0], [1], [0, 0, 1, 1], [], []>} : vector<16x1xf32>, vector<1x100xf32>, vector<16x100xf32> -> vector<16x100xf32>
    %51 = arith.addf %44, %50 : vector<16x100xf32>
    %c7 = arith.constant 7 : index
    %c0_52 = arith.constant 0 : index
    %c0_53 = arith.constant 0 : index
    %52 = vector.load %arg4[%c7, %c0_52, %c0_53] : memref<9x784x100xf32, #tpu.memory_space<vmem>>, vector<1x784x100xf32>
    %53 = vector.shape_cast %52 : vector<1x784x100xf32> to vector<784x100xf32>
    %cst_54 = arith.constant dense<0.000000e+00> : vector<1x100xf32>
    %54 = tpu.matmul %1, %53, %cst_54 {dimension_numbers = #tpu.dot_dimension_numbers<[1], [0], [0], [1], [0, 0, 1, 1], [], []>} : vector<1x784xf32>, vector<784x100xf32>, vector<1x100xf32> -> vector<1x100xf32>
    %c7_55 = arith.constant 7 : index
    %c0_56 = arith.constant 0 : index
    %c0_57 = arith.constant 0 : index
    %55 = vector.load %arg2[%c7_55, %c0_56, %c0_57] : memref<9x16x1xf32, #tpu.memory_space<vmem>>, vector<1x16x1xf32>
    %56 = vector.shape_cast %55 : vector<1x16x1xf32> to vector<16x1xf32>
    %cst_58 = arith.constant dense<0.000000e+00> : vector<16x100xf32>
    %57 = tpu.matmul %56, %54, %cst_58 {dimension_numbers = #tpu.dot_dimension_numbers<[1], [0], [0], [1], [0, 0, 1, 1], [], []>} : vector<16x1xf32>, vector<1x100xf32>, vector<16x100xf32> -> vector<16x100xf32>
    %58 = arith.addf %51, %57 : vector<16x100xf32>
    %c8 = arith.constant 8 : index
    %c0_59 = arith.constant 0 : index
    %c0_60 = arith.constant 0 : index
    %59 = vector.load %arg4[%c8, %c0_59, %c0_60] : memref<9x784x100xf32, #tpu.memory_space<vmem>>, vector<1x784x100xf32>
    %60 = vector.shape_cast %59 : vector<1x784x100xf32> to vector<784x100xf32>
    %cst_61 = arith.constant dense<0.000000e+00> : vector<1x100xf32>
    %61 = tpu.matmul %1, %60, %cst_61 {dimension_numbers = #tpu.dot_dimension_numbers<[1], [0], [0], [1], [0, 0, 1, 1], [], []>} : vector<1x784xf32>, vector<784x100xf32>, vector<1x100xf32> -> vector<1x100xf32>
    %c8_62 = arith.constant 8 : index
    %c0_63 = arith.constant 0 : index
    %c0_64 = arith.constant 0 : index
    %62 = vector.load %arg2[%c8_62, %c0_63, %c0_64] : memref<9x16x1xf32, #tpu.memory_space<vmem>>, vector<1x16x1xf32>
    %63 = vector.shape_cast %62 : vector<1x16x1xf32> to vector<16x1xf32>
    %cst_65 = arith.constant dense<0.000000e+00> : vector<16x100xf32>
    %64 = tpu.matmul %63, %61, %cst_65 {dimension_numbers = #tpu.dot_dimension_numbers<[1], [0], [0], [1], [0, 0, 1, 1], [], []>} : vector<16x1xf32>, vector<1x100xf32>, vector<16x100xf32> -> vector<16x100xf32>
    %65 = arith.addf %58, %64 : vector<16x100xf32>
    %c0_66 = arith.constant 0 : index
    %c0_67 = arith.constant 0 : index
    %66 = vector.load %arg3[%c0_66, %c0_67] : memref<16x1xf32, #tpu.memory_space<vmem>>, vector<16x1xf32>
    %67 = vector.broadcast %66 : vector<16x1xf32> to vector<16x100xf32>
    %68 = arith.addf %65, %67 : vector<16x100xf32>
    %cst_68 = arith.constant 0.000000e+00 : f32
    %69 = vector.broadcast %cst_68 : f32 to vector<16x100xf32>
    %70 = arith.maximumf %68, %69 : vector<16x100xf32>
    %c0_69 = arith.constant 0 : index
    %c0_70 = arith.constant 0 : index
    %c0_71 = arith.constant 0 : index
    %71 = vector.load %arg5[%c0_69, %c0_70, %c0_71] : memref<4x100x25xf32, #tpu.memory_space<vmem>>, vector<1x100x25xf32>
    %72 = vector.shape_cast %71 : vector<1x100x25xf32> to vector<100x25xf32>
    %cst_72 = arith.constant dense<0.000000e+00> : vector<16x25xf32>
    %73 = tpu.matmul %70, %72, %cst_72 {dimension_numbers = #tpu.dot_dimension_numbers<[1], [0], [0], [1], [0, 0, 1, 1], [], []>} : vector<16x100xf32>, vector<100x25xf32>, vector<16x25xf32> -> vector<16x25xf32>
    %c1_73 = arith.constant 1 : index
    %c0_74 = arith.constant 0 : index
    %c0_75 = arith.constant 0 : index
    %74 = vector.load %arg5[%c1_73, %c0_74, %c0_75] : memref<4x100x25xf32, #tpu.memory_space<vmem>>, vector<1x100x25xf32>
    %75 = vector.shape_cast %74 : vector<1x100x25xf32> to vector<100x25xf32>
    %cst_76 = arith.constant dense<0.000000e+00> : vector<16x25xf32>
    %76 = tpu.matmul %70, %75, %cst_76 {dimension_numbers = #tpu.dot_dimension_numbers<[1], [0], [0], [1], [0, 0, 1, 1], [], []>} : vector<16x100xf32>, vector<100x25xf32>, vector<16x25xf32> -> vector<16x25xf32>
    %77 = arith.maximumf %73, %76 : vector<16x25xf32>
    %c2_77 = arith.constant 2 : index
    %c0_78 = arith.constant 0 : index
    %c0_79 = arith.constant 0 : index
    %78 = vector.load %arg5[%c2_77, %c0_78, %c0_79] : memref<4x100x25xf32, #tpu.memory_space<vmem>>, vector<1x100x25xf32>
    %79 = vector.shape_cast %78 : vector<1x100x25xf32> to vector<100x25xf32>
    %cst_80 = arith.constant dense<0.000000e+00> : vector<16x25xf32>
    %80 = tpu.matmul %70, %79, %cst_80 {dimension_numbers = #tpu.dot_dimension_numbers<[1], [0], [0], [1], [0, 0, 1, 1], [], []>} : vector<16x100xf32>, vector<100x25xf32>, vector<16x25xf32> -> vector<16x25xf32>
    %81 = arith.maximumf %77, %80 : vector<16x25xf32>
    %c3_81 = arith.constant 3 : index
    %c0_82 = arith.constant 0 : index
    %c0_83 = arith.constant 0 : index
    %82 = vector.load %arg5[%c3_81, %c0_82, %c0_83] : memref<4x100x25xf32, #tpu.memory_space<vmem>>, vector<1x100x25xf32>
    %83 = vector.shape_cast %82 : vector<1x100x25xf32> to vector<100x25xf32>
    %cst_84 = arith.constant dense<0.000000e+00> : vector<16x25xf32>
    %84 = tpu.matmul %70, %83, %cst_84 {dimension_numbers = #tpu.dot_dimension_numbers<[1], [0], [0], [1], [0, 0, 1, 1], [], []>} : vector<16x100xf32>, vector<100x25xf32>, vector<16x25xf32> -> vector<16x25xf32>
    %85 = arith.maximumf %81, %84 : vector<16x25xf32>
    %cst_85 = arith.constant 0.000000e+00 : f32
    %86 = vector.broadcast %cst_85 : f32 to vector<8x9xf32>
    %c0_86 = arith.constant 0 : index
    %c0_87 = arith.constant 0 : index
    %c0_88 = arith.constant 0 : index
    %87 = vector.load %arg8[%c0_86, %c0_87, %c0_88] : memref<9x25x9xf32, #tpu.memory_space<vmem>>, vector<1x25x9xf32>
    %88 = vector.shape_cast %87 : vector<1x25x9xf32> to vector<25x9xf32>
    %cst_89 = arith.constant dense<0.000000e+00> : vector<16x9xf32>
    %89 = tpu.matmul %85, %88, %cst_89 {dimension_numbers = #tpu.dot_dimension_numbers<[1], [0], [0], [1], [0, 0, 1, 1], [], []>} : vector<16x25xf32>, vector<25x9xf32>, vector<16x9xf32> -> vector<16x9xf32>
    %c0_90 = arith.constant 0 : index
    %c0_91 = arith.constant 0 : index
    %c0_92 = arith.constant 0 : index
    %90 = vector.load %arg6[%c0_90, %c0_91, %c0_92] : memref<9x8x16xf32, #tpu.memory_space<vmem>>, vector<1x8x16xf32>
    %91 = vector.shape_cast %90 : vector<1x8x16xf32> to vector<8x16xf32>
    %cst_93 = arith.constant dense<0.000000e+00> : vector<8x9xf32>
    %92 = tpu.matmul %91, %89, %cst_93 {dimension_numbers = #tpu.dot_dimension_numbers<[1], [0], [0], [1], [0, 0, 1, 1], [], []>} : vector<8x16xf32>, vector<16x9xf32>, vector<8x9xf32> -> vector<8x9xf32>
    %93 = arith.addf %86, %92 : vector<8x9xf32>
    %c1_94 = arith.constant 1 : index
    %c0_95 = arith.constant 0 : index
    %c0_96 = arith.constant 0 : index
    %94 = vector.load %arg8[%c1_94, %c0_95, %c0_96] : memref<9x25x9xf32, #tpu.memory_space<vmem>>, vector<1x25x9xf32>
    %95 = vector.shape_cast %94 : vector<1x25x9xf32> to vector<25x9xf32>
    %cst_97 = arith.constant dense<0.000000e+00> : vector<16x9xf32>
    %96 = tpu.matmul %85, %95, %cst_97 {dimension_numbers = #tpu.dot_dimension_numbers<[1], [0], [0], [1], [0, 0, 1, 1], [], []>} : vector<16x25xf32>, vector<25x9xf32>, vector<16x9xf32> -> vector<16x9xf32>
    %c1_98 = arith.constant 1 : index
    %c0_99 = arith.constant 0 : index
    %c0_100 = arith.constant 0 : index
    %97 = vector.load %arg6[%c1_98, %c0_99, %c0_100] : memref<9x8x16xf32, #tpu.memory_space<vmem>>, vector<1x8x16xf32>
    %98 = vector.shape_cast %97 : vector<1x8x16xf32> to vector<8x16xf32>
    %cst_101 = arith.constant dense<0.000000e+00> : vector<8x9xf32>
    %99 = tpu.matmul %98, %96, %cst_101 {dimension_numbers = #tpu.dot_dimension_numbers<[1], [0], [0], [1], [0, 0, 1, 1], [], []>} : vector<8x16xf32>, vector<16x9xf32>, vector<8x9xf32> -> vector<8x9xf32>
    %100 = arith.addf %93, %99 : vector<8x9xf32>
    %c2_102 = arith.constant 2 : index
    %c0_103 = arith.constant 0 : index
    %c0_104 = arith.constant 0 : index
    %101 = vector.load %arg8[%c2_102, %c0_103, %c0_104] : memref<9x25x9xf32, #tpu.memory_space<vmem>>, vector<1x25x9xf32>
    %102 = vector.shape_cast %101 : vector<1x25x9xf32> to vector<25x9xf32>
    %cst_105 = arith.constant dense<0.000000e+00> : vector<16x9xf32>
    %103 = tpu.matmul %85, %102, %cst_105 {dimension_numbers = #tpu.dot_dimension_numbers<[1], [0], [0], [1], [0, 0, 1, 1], [], []>} : vector<16x25xf32>, vector<25x9xf32>, vector<16x9xf32> -> vector<16x9xf32>
    %c2_106 = arith.constant 2 : index
    %c0_107 = arith.constant 0 : index
    %c0_108 = arith.constant 0 : index
    %104 = vector.load %arg6[%c2_106, %c0_107, %c0_108] : memref<9x8x16xf32, #tpu.memory_space<vmem>>, vector<1x8x16xf32>
    %105 = vector.shape_cast %104 : vector<1x8x16xf32> to vector<8x16xf32>
    %cst_109 = arith.constant dense<0.000000e+00> : vector<8x9xf32>
    %106 = tpu.matmul %105, %103, %cst_109 {dimension_numbers = #tpu.dot_dimension_numbers<[1], [0], [0], [1], [0, 0, 1, 1], [], []>} : vector<8x16xf32>, vector<16x9xf32>, vector<8x9xf32> -> vector<8x9xf32>
    %107 = arith.addf %100, %106 : vector<8x9xf32>
    %c3_110 = arith.constant 3 : index
    %c0_111 = arith.constant 0 : index
    %c0_112 = arith.constant 0 : index
    %108 = vector.load %arg8[%c3_110, %c0_111, %c0_112] : memref<9x25x9xf32, #tpu.memory_space<vmem>>, vector<1x25x9xf32>
    %109 = vector.shape_cast %108 : vector<1x25x9xf32> to vector<25x9xf32>
    %cst_113 = arith.constant dense<0.000000e+00> : vector<16x9xf32>
    %110 = tpu.matmul %85, %109, %cst_113 {dimension_numbers = #tpu.dot_dimension_numbers<[1], [0], [0], [1], [0, 0, 1, 1], [], []>} : vector<16x25xf32>, vector<25x9xf32>, vector<16x9xf32> -> vector<16x9xf32>
    %c3_114 = arith.constant 3 : index
    %c0_115 = arith.constant 0 : index
    %c0_116 = arith.constant 0 : index
    %111 = vector.load %arg6[%c3_114, %c0_115, %c0_116] : memref<9x8x16xf32, #tpu.memory_space<vmem>>, vector<1x8x16xf32>
    %112 = vector.shape_cast %111 : vector<1x8x16xf32> to vector<8x16xf32>
    %cst_117 = arith.constant dense<0.000000e+00> : vector<8x9xf32>
    %113 = tpu.matmul %112, %110, %cst_117 {dimension_numbers = #tpu.dot_dimension_numbers<[1], [0], [0], [1], [0, 0, 1, 1], [], []>} : vector<8x16xf32>, vector<16x9xf32>, vector<8x9xf32> -> vector<8x9xf32>
    %114 = arith.addf %107, %113 : vector<8x9xf32>
    %c4_118 = arith.constant 4 : index
    %c0_119 = arith.constant 0 : index
    %c0_120 = arith.constant 0 : index
    %115 = vector.load %arg8[%c4_118, %c0_119, %c0_120] : memref<9x25x9xf32, #tpu.memory_space<vmem>>, vector<1x25x9xf32>
    %116 = vector.shape_cast %115 : vector<1x25x9xf32> to vector<25x9xf32>
    %cst_121 = arith.constant dense<0.000000e+00> : vector<16x9xf32>
    %117 = tpu.matmul %85, %116, %cst_121 {dimension_numbers = #tpu.dot_dimension_numbers<[1], [0], [0], [1], [0, 0, 1, 1], [], []>} : vector<16x25xf32>, vector<25x9xf32>, vector<16x9xf32> -> vector<16x9xf32>
    %c4_122 = arith.constant 4 : index
    %c0_123 = arith.constant 0 : index
    %c0_124 = arith.constant 0 : index
    %118 = vector.load %arg6[%c4_122, %c0_123, %c0_124] : memref<9x8x16xf32, #tpu.memory_space<vmem>>, vector<1x8x16xf32>
    %119 = vector.shape_cast %118 : vector<1x8x16xf32> to vector<8x16xf32>
    %cst_125 = arith.constant dense<0.000000e+00> : vector<8x9xf32>
    %120 = tpu.matmul %119, %117, %cst_125 {dimension_numbers = #tpu.dot_dimension_numbers<[1], [0], [0], [1], [0, 0, 1, 1], [], []>} : vector<8x16xf32>, vector<16x9xf32>, vector<8x9xf32> -> vector<8x9xf32>
    %121 = arith.addf %114, %120 : vector<8x9xf32>
    %c5_126 = arith.constant 5 : index
    %c0_127 = arith.constant 0 : index
    %c0_128 = arith.constant 0 : index
    %122 = vector.load %arg8[%c5_126, %c0_127, %c0_128] : memref<9x25x9xf32, #tpu.memory_space<vmem>>, vector<1x25x9xf32>
    %123 = vector.shape_cast %122 : vector<1x25x9xf32> to vector<25x9xf32>
    %cst_129 = arith.constant dense<0.000000e+00> : vector<16x9xf32>
    %124 = tpu.matmul %85, %123, %cst_129 {dimension_numbers = #tpu.dot_dimension_numbers<[1], [0], [0], [1], [0, 0, 1, 1], [], []>} : vector<16x25xf32>, vector<25x9xf32>, vector<16x9xf32> -> vector<16x9xf32>
    %c5_130 = arith.constant 5 : index
    %c0_131 = arith.constant 0 : index
    %c0_132 = arith.constant 0 : index
    %125 = vector.load %arg6[%c5_130, %c0_131, %c0_132] : memref<9x8x16xf32, #tpu.memory_space<vmem>>, vector<1x8x16xf32>
    %126 = vector.shape_cast %125 : vector<1x8x16xf32> to vector<8x16xf32>
    %cst_133 = arith.constant dense<0.000000e+00> : vector<8x9xf32>
    %127 = tpu.matmul %126, %124, %cst_133 {dimension_numbers = #tpu.dot_dimension_numbers<[1], [0], [0], [1], [0, 0, 1, 1], [], []>} : vector<8x16xf32>, vector<16x9xf32>, vector<8x9xf32> -> vector<8x9xf32>
    %128 = arith.addf %121, %127 : vector<8x9xf32>
    %c6_134 = arith.constant 6 : index
    %c0_135 = arith.constant 0 : index
    %c0_136 = arith.constant 0 : index
    %129 = vector.load %arg8[%c6_134, %c0_135, %c0_136] : memref<9x25x9xf32, #tpu.memory_space<vmem>>, vector<1x25x9xf32>
    %130 = vector.shape_cast %129 : vector<1x25x9xf32> to vector<25x9xf32>
    %cst_137 = arith.constant dense<0.000000e+00> : vector<16x9xf32>
    %131 = tpu.matmul %85, %130, %cst_137 {dimension_numbers = #tpu.dot_dimension_numbers<[1], [0], [0], [1], [0, 0, 1, 1], [], []>} : vector<16x25xf32>, vector<25x9xf32>, vector<16x9xf32> -> vector<16x9xf32>
    %c6_138 = arith.constant 6 : index
    %c0_139 = arith.constant 0 : index
    %c0_140 = arith.constant 0 : index
    %132 = vector.load %arg6[%c6_138, %c0_139, %c0_140] : memref<9x8x16xf32, #tpu.memory_space<vmem>>, vector<1x8x16xf32>
    %133 = vector.shape_cast %132 : vector<1x8x16xf32> to vector<8x16xf32>
    %cst_141 = arith.constant dense<0.000000e+00> : vector<8x9xf32>
    %134 = tpu.matmul %133, %131, %cst_141 {dimension_numbers = #tpu.dot_dimension_numbers<[1], [0], [0], [1], [0, 0, 1, 1], [], []>} : vector<8x16xf32>, vector<16x9xf32>, vector<8x9xf32> -> vector<8x9xf32>
    %135 = arith.addf %128, %134 : vector<8x9xf32>
    %c7_142 = arith.constant 7 : index
    %c0_143 = arith.constant 0 : index
    %c0_144 = arith.constant 0 : index
    %136 = vector.load %arg8[%c7_142, %c0_143, %c0_144] : memref<9x25x9xf32, #tpu.memory_space<vmem>>, vector<1x25x9xf32>
    %137 = vector.shape_cast %136 : vector<1x25x9xf32> to vector<25x9xf32>
    %cst_145 = arith.constant dense<0.000000e+00> : vector<16x9xf32>
    %138 = tpu.matmul %85, %137, %cst_145 {dimension_numbers = #tpu.dot_dimension_numbers<[1], [0], [0], [1], [0, 0, 1, 1], [], []>} : vector<16x25xf32>, vector<25x9xf32>, vector<16x9xf32> -> vector<16x9xf32>
    %c7_146 = arith.constant 7 : index
    %c0_147 = arith.constant 0 : index
    %c0_148 = arith.constant 0 : index
    %139 = vector.load %arg6[%c7_146, %c0_147, %c0_148] : memref<9x8x16xf32, #tpu.memory_space<vmem>>, vector<1x8x16xf32>
    %140 = vector.shape_cast %139 : vector<1x8x16xf32> to vector<8x16xf32>
    %cst_149 = arith.constant dense<0.000000e+00> : vector<8x9xf32>
    %141 = tpu.matmul %140, %138, %cst_149 {dimension_numbers = #tpu.dot_dimension_numbers<[1], [0], [0], [1], [0, 0, 1, 1], [], []>} : vector<8x16xf32>, vector<16x9xf32>, vector<8x9xf32> -> vector<8x9xf32>
    %142 = arith.addf %135, %141 : vector<8x9xf32>
    %c8_150 = arith.constant 8 : index
    %c0_151 = arith.constant 0 : index
    %c0_152 = arith.constant 0 : index
    %143 = vector.load %arg8[%c8_150, %c0_151, %c0_152] : memref<9x25x9xf32, #tpu.memory_space<vmem>>, vector<1x25x9xf32>
    %144 = vector.shape_cast %143 : vector<1x25x9xf32> to vector<25x9xf32>
    %cst_153 = arith.constant dense<0.000000e+00> : vector<16x9xf32>
    %145 = tpu.matmul %85, %144, %cst_153 {dimension_numbers = #tpu.dot_dimension_numbers<[1], [0], [0], [1], [0, 0, 1, 1], [], []>} : vector<16x25xf32>, vector<25x9xf32>, vector<16x9xf32> -> vector<16x9xf32>
    %c8_154 = arith.constant 8 : index
    %c0_155 = arith.constant 0 : index
    %c0_156 = arith.constant 0 : index
    %146 = vector.load %arg6[%c8_154, %c0_155, %c0_156] : memref<9x8x16xf32, #tpu.memory_space<vmem>>, vector<1x8x16xf32>
    %147 = vector.shape_cast %146 : vector<1x8x16xf32> to vector<8x16xf32>
    %cst_157 = arith.constant dense<0.000000e+00> : vector<8x9xf32>
    %148 = tpu.matmul %147, %145, %cst_157 {dimension_numbers = #tpu.dot_dimension_numbers<[1], [0], [0], [1], [0, 0, 1, 1], [], []>} : vector<8x16xf32>, vector<16x9xf32>, vector<8x9xf32> -> vector<8x9xf32>
    %149 = arith.addf %142, %148 : vector<8x9xf32>
    %c0_158 = arith.constant 0 : index
    %c0_159 = arith.constant 0 : index
    %150 = vector.load %arg7[%c0_158, %c0_159] : memref<8x1xf32, #tpu.memory_space<vmem>>, vector<8x1xf32>
    %151 = vector.broadcast %150 : vector<8x1xf32> to vector<8x9xf32>
    %152 = arith.addf %149, %151 : vector<8x9xf32>
    %cst_160 = arith.constant 0.000000e+00 : f32
    %153 = vector.broadcast %cst_160 : f32 to vector<8x9xf32>
    %154 = arith.maximumf %152, %153 : vector<8x9xf32>
    %c0_161 = arith.constant 0 : index
    %c0_162 = arith.constant 0 : index
    %c0_163 = arith.constant 0 : index
    %155 = vector.load %arg9[%c0_161, %c0_162, %c0_163] : memref<4x9x4xf32, #tpu.memory_space<vmem>>, vector<1x9x4xf32>
    %156 = vector.shape_cast %155 : vector<1x9x4xf32> to vector<9x4xf32>
    %cst_164 = arith.constant dense<0.000000e+00> : vector<8x4xf32>
    %157 = tpu.matmul %154, %156, %cst_164 {dimension_numbers = #tpu.dot_dimension_numbers<[1], [0], [0], [1], [0, 0, 1, 1], [], []>} : vector<8x9xf32>, vector<9x4xf32>, vector<8x4xf32> -> vector<8x4xf32>
    %c1_165 = arith.constant 1 : index
    %c0_166 = arith.constant 0 : index
    %c0_167 = arith.constant 0 : index
    %158 = vector.load %arg9[%c1_165, %c0_166, %c0_167] : memref<4x9x4xf32, #tpu.memory_space<vmem>>, vector<1x9x4xf32>
    %159 = vector.shape_cast %158 : vector<1x9x4xf32> to vector<9x4xf32>
    %cst_168 = arith.constant dense<0.000000e+00> : vector<8x4xf32>
    %160 = tpu.matmul %154, %159, %cst_168 {dimension_numbers = #tpu.dot_dimension_numbers<[1], [0], [0], [1], [0, 0, 1, 1], [], []>} : vector<8x9xf32>, vector<9x4xf32>, vector<8x4xf32> -> vector<8x4xf32>
    %161 = arith.maximumf %157, %160 : vector<8x4xf32>
    %c2_169 = arith.constant 2 : index
    %c0_170 = arith.constant 0 : index
    %c0_171 = arith.constant 0 : index
    %162 = vector.load %arg9[%c2_169, %c0_170, %c0_171] : memref<4x9x4xf32, #tpu.memory_space<vmem>>, vector<1x9x4xf32>
    %163 = vector.shape_cast %162 : vector<1x9x4xf32> to vector<9x4xf32>
    %cst_172 = arith.constant dense<0.000000e+00> : vector<8x4xf32>
    %164 = tpu.matmul %154, %163, %cst_172 {dimension_numbers = #tpu.dot_dimension_numbers<[1], [0], [0], [1], [0, 0, 1, 1], [], []>} : vector<8x9xf32>, vector<9x4xf32>, vector<8x4xf32> -> vector<8x4xf32>
    %165 = arith.maximumf %161, %164 : vector<8x4xf32>
    %c3_173 = arith.constant 3 : index
    %c0_174 = arith.constant 0 : index
    %c0_175 = arith.constant 0 : index
    %166 = vector.load %arg9[%c3_173, %c0_174, %c0_175] : memref<4x9x4xf32, #tpu.memory_space<vmem>>, vector<1x9x4xf32>
    %167 = vector.shape_cast %166 : vector<1x9x4xf32> to vector<9x4xf32>
    %cst_176 = arith.constant dense<0.000000e+00> : vector<8x4xf32>
    %168 = tpu.matmul %154, %167, %cst_176 {dimension_numbers = #tpu.dot_dimension_numbers<[1], [0], [0], [1], [0, 0, 1, 1], [], []>} : vector<8x9xf32>, vector<9x4xf32>, vector<8x4xf32> -> vector<8x4xf32>
    %169 = arith.maximumf %165, %168 : vector<8x4xf32>
    %cst_177 = arith.constant 0.000000e+00 : f32
    %170 = vector.broadcast %cst_177 : f32 to vector<16x25xf32>
    %c0_178 = arith.constant 0 : index
    %c0_179 = arith.constant 0 : index
    %c0_180 = arith.constant 0 : index
    %171 = vector.load %arg12[%c0_178, %c0_179, %c0_180] : memref<9x4x25xf32, #tpu.memory_space<vmem>>, vector<1x4x25xf32>
    %172 = vector.shape_cast %171 : vector<1x4x25xf32> to vector<4x25xf32>
    %cst_181 = arith.constant dense<0.000000e+00> : vector<8x25xf32>
    %173 = tpu.matmul %169, %172, %cst_181 {dimension_numbers = #tpu.dot_dimension_numbers<[1], [0], [0], [1], [0, 0, 1, 1], [], []>} : vector<8x4xf32>, vector<4x25xf32>, vector<8x25xf32> -> vector<8x25xf32>
    %c0_182 = arith.constant 0 : index
    %c0_183 = arith.constant 0 : index
    %c0_184 = arith.constant 0 : index
    %174 = vector.load %arg10[%c0_182, %c0_183, %c0_184] : memref<9x16x8xf32, #tpu.memory_space<vmem>>, vector<1x16x8xf32>
    %175 = vector.shape_cast %174 : vector<1x16x8xf32> to vector<16x8xf32>
    %cst_185 = arith.constant dense<0.000000e+00> : vector<16x25xf32>
    %176 = tpu.matmul %175, %173, %cst_185 {dimension_numbers = #tpu.dot_dimension_numbers<[1], [0], [0], [1], [0, 0, 1, 1], [], []>} : vector<16x8xf32>, vector<8x25xf32>, vector<16x25xf32> -> vector<16x25xf32>
    %177 = arith.addf %170, %176 : vector<16x25xf32>
    %c1_186 = arith.constant 1 : index
    %c0_187 = arith.constant 0 : index
    %c0_188 = arith.constant 0 : index
    %178 = vector.load %arg12[%c1_186, %c0_187, %c0_188] : memref<9x4x25xf32, #tpu.memory_space<vmem>>, vector<1x4x25xf32>
    %179 = vector.shape_cast %178 : vector<1x4x25xf32> to vector<4x25xf32>
    %cst_189 = arith.constant dense<0.000000e+00> : vector<8x25xf32>
    %180 = tpu.matmul %169, %179, %cst_189 {dimension_numbers = #tpu.dot_dimension_numbers<[1], [0], [0], [1], [0, 0, 1, 1], [], []>} : vector<8x4xf32>, vector<4x25xf32>, vector<8x25xf32> -> vector<8x25xf32>
    %c1_190 = arith.constant 1 : index
    %c0_191 = arith.constant 0 : index
    %c0_192 = arith.constant 0 : index
    %181 = vector.load %arg10[%c1_190, %c0_191, %c0_192] : memref<9x16x8xf32, #tpu.memory_space<vmem>>, vector<1x16x8xf32>
    %182 = vector.shape_cast %181 : vector<1x16x8xf32> to vector<16x8xf32>
    %cst_193 = arith.constant dense<0.000000e+00> : vector<16x25xf32>
    %183 = tpu.matmul %182, %180, %cst_193 {dimension_numbers = #tpu.dot_dimension_numbers<[1], [0], [0], [1], [0, 0, 1, 1], [], []>} : vector<16x8xf32>, vector<8x25xf32>, vector<16x25xf32> -> vector<16x25xf32>
    %184 = arith.addf %177, %183 : vector<16x25xf32>
    %c2_194 = arith.constant 2 : index
    %c0_195 = arith.constant 0 : index
    %c0_196 = arith.constant 0 : index
    %185 = vector.load %arg12[%c2_194, %c0_195, %c0_196] : memref<9x4x25xf32, #tpu.memory_space<vmem>>, vector<1x4x25xf32>
    %186 = vector.shape_cast %185 : vector<1x4x25xf32> to vector<4x25xf32>
    %cst_197 = arith.constant dense<0.000000e+00> : vector<8x25xf32>
    %187 = tpu.matmul %169, %186, %cst_197 {dimension_numbers = #tpu.dot_dimension_numbers<[1], [0], [0], [1], [0, 0, 1, 1], [], []>} : vector<8x4xf32>, vector<4x25xf32>, vector<8x25xf32> -> vector<8x25xf32>
    %c2_198 = arith.constant 2 : index
    %c0_199 = arith.constant 0 : index
    %c0_200 = arith.constant 0 : index
    %188 = vector.load %arg10[%c2_198, %c0_199, %c0_200] : memref<9x16x8xf32, #tpu.memory_space<vmem>>, vector<1x16x8xf32>
    %189 = vector.shape_cast %188 : vector<1x16x8xf32> to vector<16x8xf32>
    %cst_201 = arith.constant dense<0.000000e+00> : vector<16x25xf32>
    %190 = tpu.matmul %189, %187, %cst_201 {dimension_numbers = #tpu.dot_dimension_numbers<[1], [0], [0], [1], [0, 0, 1, 1], [], []>} : vector<16x8xf32>, vector<8x25xf32>, vector<16x25xf32> -> vector<16x25xf32>
    %191 = arith.addf %184, %190 : vector<16x25xf32>
    %c3_202 = arith.constant 3 : index
    %c0_203 = arith.constant 0 : index
    %c0_204 = arith.constant 0 : index
    %192 = vector.load %arg12[%c3_202, %c0_203, %c0_204] : memref<9x4x25xf32, #tpu.memory_space<vmem>>, vector<1x4x25xf32>
    %193 = vector.shape_cast %192 : vector<1x4x25xf32> to vector<4x25xf32>
    %cst_205 = arith.constant dense<0.000000e+00> : vector<8x25xf32>
    %194 = tpu.matmul %169, %193, %cst_205 {dimension_numbers = #tpu.dot_dimension_numbers<[1], [0], [0], [1], [0, 0, 1, 1], [], []>} : vector<8x4xf32>, vector<4x25xf32>, vector<8x25xf32> -> vector<8x25xf32>
    %c3_206 = arith.constant 3 : index
    %c0_207 = arith.constant 0 : index
    %c0_208 = arith.constant 0 : index
    %195 = vector.load %arg10[%c3_206, %c0_207, %c0_208] : memref<9x16x8xf32, #tpu.memory_space<vmem>>, vector<1x16x8xf32>
    %196 = vector.shape_cast %195 : vector<1x16x8xf32> to vector<16x8xf32>
    %cst_209 = arith.constant dense<0.000000e+00> : vector<16x25xf32>
    %197 = tpu.matmul %196, %194, %cst_209 {dimension_numbers = #tpu.dot_dimension_numbers<[1], [0], [0], [1], [0, 0, 1, 1], [], []>} : vector<16x8xf32>, vector<8x25xf32>, vector<16x25xf32> -> vector<16x25xf32>
    %198 = arith.addf %191, %197 : vector<16x25xf32>
    %c4_210 = arith.constant 4 : index
    %c0_211 = arith.constant 0 : index
    %c0_212 = arith.constant 0 : index
    %199 = vector.load %arg12[%c4_210, %c0_211, %c0_212] : memref<9x4x25xf32, #tpu.memory_space<vmem>>, vector<1x4x25xf32>
    %200 = vector.shape_cast %199 : vector<1x4x25xf32> to vector<4x25xf32>
    %cst_213 = arith.constant dense<0.000000e+00> : vector<8x25xf32>
    %201 = tpu.matmul %169, %200, %cst_213 {dimension_numbers = #tpu.dot_dimension_numbers<[1], [0], [0], [1], [0, 0, 1, 1], [], []>} : vector<8x4xf32>, vector<4x25xf32>, vector<8x25xf32> -> vector<8x25xf32>
    %c4_214 = arith.constant 4 : index
    %c0_215 = arith.constant 0 : index
    %c0_216 = arith.constant 0 : index
    %202 = vector.load %arg10[%c4_214, %c0_215, %c0_216] : memref<9x16x8xf32, #tpu.memory_space<vmem>>, vector<1x16x8xf32>
    %203 = vector.shape_cast %202 : vector<1x16x8xf32> to vector<16x8xf32>
    %cst_217 = arith.constant dense<0.000000e+00> : vector<16x25xf32>
    %204 = tpu.matmul %203, %201, %cst_217 {dimension_numbers = #tpu.dot_dimension_numbers<[1], [0], [0], [1], [0, 0, 1, 1], [], []>} : vector<16x8xf32>, vector<8x25xf32>, vector<16x25xf32> -> vector<16x25xf32>
    %205 = arith.addf %198, %204 : vector<16x25xf32>
    %c5_218 = arith.constant 5 : index
    %c0_219 = arith.constant 0 : index
    %c0_220 = arith.constant 0 : index
    %206 = vector.load %arg12[%c5_218, %c0_219, %c0_220] : memref<9x4x25xf32, #tpu.memory_space<vmem>>, vector<1x4x25xf32>
    %207 = vector.shape_cast %206 : vector<1x4x25xf32> to vector<4x25xf32>
    %cst_221 = arith.constant dense<0.000000e+00> : vector<8x25xf32>
    %208 = tpu.matmul %169, %207, %cst_221 {dimension_numbers = #tpu.dot_dimension_numbers<[1], [0], [0], [1], [0, 0, 1, 1], [], []>} : vector<8x4xf32>, vector<4x25xf32>, vector<8x25xf32> -> vector<8x25xf32>
    %c5_222 = arith.constant 5 : index
    %c0_223 = arith.constant 0 : index
    %c0_224 = arith.constant 0 : index
    %209 = vector.load %arg10[%c5_222, %c0_223, %c0_224] : memref<9x16x8xf32, #tpu.memory_space<vmem>>, vector<1x16x8xf32>
    %210 = vector.shape_cast %209 : vector<1x16x8xf32> to vector<16x8xf32>
    %cst_225 = arith.constant dense<0.000000e+00> : vector<16x25xf32>
    %211 = tpu.matmul %210, %208, %cst_225 {dimension_numbers = #tpu.dot_dimension_numbers<[1], [0], [0], [1], [0, 0, 1, 1], [], []>} : vector<16x8xf32>, vector<8x25xf32>, vector<16x25xf32> -> vector<16x25xf32>
    %212 = arith.addf %205, %211 : vector<16x25xf32>
    %c6_226 = arith.constant 6 : index
    %c0_227 = arith.constant 0 : index
    %c0_228 = arith.constant 0 : index
    %213 = vector.load %arg12[%c6_226, %c0_227, %c0_228] : memref<9x4x25xf32, #tpu.memory_space<vmem>>, vector<1x4x25xf32>
    %214 = vector.shape_cast %213 : vector<1x4x25xf32> to vector<4x25xf32>
    %cst_229 = arith.constant dense<0.000000e+00> : vector<8x25xf32>
    %215 = tpu.matmul %169, %214, %cst_229 {dimension_numbers = #tpu.dot_dimension_numbers<[1], [0], [0], [1], [0, 0, 1, 1], [], []>} : vector<8x4xf32>, vector<4x25xf32>, vector<8x25xf32> -> vector<8x25xf32>
    %c6_230 = arith.constant 6 : index
    %c0_231 = arith.constant 0 : index
    %c0_232 = arith.constant 0 : index
    %216 = vector.load %arg10[%c6_230, %c0_231, %c0_232] : memref<9x16x8xf32, #tpu.memory_space<vmem>>, vector<1x16x8xf32>
    %217 = vector.shape_cast %216 : vector<1x16x8xf32> to vector<16x8xf32>
    %cst_233 = arith.constant dense<0.000000e+00> : vector<16x25xf32>
    %218 = tpu.matmul %217, %215, %cst_233 {dimension_numbers = #tpu.dot_dimension_numbers<[1], [0], [0], [1], [0, 0, 1, 1], [], []>} : vector<16x8xf32>, vector<8x25xf32>, vector<16x25xf32> -> vector<16x25xf32>
    %219 = arith.addf %212, %218 : vector<16x25xf32>
    %c7_234 = arith.constant 7 : index
    %c0_235 = arith.constant 0 : index
    %c0_236 = arith.constant 0 : index
    %220 = vector.load %arg12[%c7_234, %c0_235, %c0_236] : memref<9x4x25xf32, #tpu.memory_space<vmem>>, vector<1x4x25xf32>
    %221 = vector.shape_cast %220 : vector<1x4x25xf32> to vector<4x25xf32>
    %cst_237 = arith.constant dense<0.000000e+00> : vector<8x25xf32>
    %222 = tpu.matmul %169, %221, %cst_237 {dimension_numbers = #tpu.dot_dimension_numbers<[1], [0], [0], [1], [0, 0, 1, 1], [], []>} : vector<8x4xf32>, vector<4x25xf32>, vector<8x25xf32> -> vector<8x25xf32>
    %c7_238 = arith.constant 7 : index
    %c0_239 = arith.constant 0 : index
    %c0_240 = arith.constant 0 : index
    %223 = vector.load %arg10[%c7_238, %c0_239, %c0_240] : memref<9x16x8xf32, #tpu.memory_space<vmem>>, vector<1x16x8xf32>
    %224 = vector.shape_cast %223 : vector<1x16x8xf32> to vector<16x8xf32>
    %cst_241 = arith.constant dense<0.000000e+00> : vector<16x25xf32>
    %225 = tpu.matmul %224, %222, %cst_241 {dimension_numbers = #tpu.dot_dimension_numbers<[1], [0], [0], [1], [0, 0, 1, 1], [], []>} : vector<16x8xf32>, vector<8x25xf32>, vector<16x25xf32> -> vector<16x25xf32>
    %226 = arith.addf %219, %225 : vector<16x25xf32>
    %c8_242 = arith.constant 8 : index
    %c0_243 = arith.constant 0 : index
    %c0_244 = arith.constant 0 : index
    %227 = vector.load %arg12[%c8_242, %c0_243, %c0_244] : memref<9x4x25xf32, #tpu.memory_space<vmem>>, vector<1x4x25xf32>
    %228 = vector.shape_cast %227 : vector<1x4x25xf32> to vector<4x25xf32>
    %cst_245 = arith.constant dense<0.000000e+00> : vector<8x25xf32>
    %229 = tpu.matmul %169, %228, %cst_245 {dimension_numbers = #tpu.dot_dimension_numbers<[1], [0], [0], [1], [0, 0, 1, 1], [], []>} : vector<8x4xf32>, vector<4x25xf32>, vector<8x25xf32> -> vector<8x25xf32>
    %c8_246 = arith.constant 8 : index
    %c0_247 = arith.constant 0 : index
    %c0_248 = arith.constant 0 : index
    %230 = vector.load %arg10[%c8_246, %c0_247, %c0_248] : memref<9x16x8xf32, #tpu.memory_space<vmem>>, vector<1x16x8xf32>
    %231 = vector.shape_cast %230 : vector<1x16x8xf32> to vector<16x8xf32>
    %cst_249 = arith.constant dense<0.000000e+00> : vector<16x25xf32>
    %232 = tpu.matmul %231, %229, %cst_249 {dimension_numbers = #tpu.dot_dimension_numbers<[1], [0], [0], [1], [0, 0, 1, 1], [], []>} : vector<16x8xf32>, vector<8x25xf32>, vector<16x25xf32> -> vector<16x25xf32>
    %233 = arith.addf %226, %232 : vector<16x25xf32>
    %c0_250 = arith.constant 0 : index
    %c0_251 = arith.constant 0 : index
    %234 = vector.load %arg11[%c0_250, %c0_251] : memref<16x1xf32, #tpu.memory_space<vmem>>, vector<16x1xf32>
    %235 = vector.broadcast %234 : vector<16x1xf32> to vector<16x25xf32>
    %236 = arith.addf %233, %235 : vector<16x25xf32>
    %cst_252 = arith.constant 0.000000e+00 : f32
    %237 = vector.broadcast %cst_252 : f32 to vector<16x25xf32>
    %238 = arith.maximumf %236, %237 : vector<16x25xf32>
    %cst_253 = arith.constant 0.000000e+00 : f32
    %239 = vector.broadcast %cst_253 : f32 to vector<8x225xf32>
    %c0_254 = arith.constant 0 : index
    %c0_255 = arith.constant 0 : index
    %c0_256 = arith.constant 0 : index
    %240 = vector.load %arg15[%c0_254, %c0_255, %c0_256] : memref<25x25x225xf32, #tpu.memory_space<vmem>>, vector<1x25x225xf32>
    %241 = vector.shape_cast %240 : vector<1x25x225xf32> to vector<25x225xf32>
    %cst_257 = arith.constant dense<0.000000e+00> : vector<16x225xf32>
    %242 = tpu.matmul %238, %241, %cst_257 {dimension_numbers = #tpu.dot_dimension_numbers<[1], [0], [0], [1], [0, 0, 1, 1], [], []>} : vector<16x25xf32>, vector<25x225xf32>, vector<16x225xf32> -> vector<16x225xf32>
    %c0_258 = arith.constant 0 : index
    %c0_259 = arith.constant 0 : index
    %c0_260 = arith.constant 0 : index
    %243 = vector.load %arg13[%c0_258, %c0_259, %c0_260] : memref<25x8x16xf32, #tpu.memory_space<vmem>>, vector<1x8x16xf32>
    %244 = vector.shape_cast %243 : vector<1x8x16xf32> to vector<8x16xf32>
    %cst_261 = arith.constant dense<0.000000e+00> : vector<8x225xf32>
    %245 = tpu.matmul %244, %242, %cst_261 {dimension_numbers = #tpu.dot_dimension_numbers<[1], [0], [0], [1], [0, 0, 1, 1], [], []>} : vector<8x16xf32>, vector<16x225xf32>, vector<8x225xf32> -> vector<8x225xf32>
    %246 = arith.addf %239, %245 : vector<8x225xf32>
    %c1_262 = arith.constant 1 : index
    %c0_263 = arith.constant 0 : index
    %c0_264 = arith.constant 0 : index
    %247 = vector.load %arg15[%c1_262, %c0_263, %c0_264] : memref<25x25x225xf32, #tpu.memory_space<vmem>>, vector<1x25x225xf32>
    %248 = vector.shape_cast %247 : vector<1x25x225xf32> to vector<25x225xf32>
    %cst_265 = arith.constant dense<0.000000e+00> : vector<16x225xf32>
    %249 = tpu.matmul %238, %248, %cst_265 {dimension_numbers = #tpu.dot_dimension_numbers<[1], [0], [0], [1], [0, 0, 1, 1], [], []>} : vector<16x25xf32>, vector<25x225xf32>, vector<16x225xf32> -> vector<16x225xf32>
    %c1_266 = arith.constant 1 : index
    %c0_267 = arith.constant 0 : index
    %c0_268 = arith.constant 0 : index
    %250 = vector.load %arg13[%c1_266, %c0_267, %c0_268] : memref<25x8x16xf32, #tpu.memory_space<vmem>>, vector<1x8x16xf32>
    %251 = vector.shape_cast %250 : vector<1x8x16xf32> to vector<8x16xf32>
    %cst_269 = arith.constant dense<0.000000e+00> : vector<8x225xf32>
    %252 = tpu.matmul %251, %249, %cst_269 {dimension_numbers = #tpu.dot_dimension_numbers<[1], [0], [0], [1], [0, 0, 1, 1], [], []>} : vector<8x16xf32>, vector<16x225xf32>, vector<8x225xf32> -> vector<8x225xf32>
    %253 = arith.addf %246, %252 : vector<8x225xf32>
    %c2_270 = arith.constant 2 : index
    %c0_271 = arith.constant 0 : index
    %c0_272 = arith.constant 0 : index
    %254 = vector.load %arg15[%c2_270, %c0_271, %c0_272] : memref<25x25x225xf32, #tpu.memory_space<vmem>>, vector<1x25x225xf32>
    %255 = vector.shape_cast %254 : vector<1x25x225xf32> to vector<25x225xf32>
    %cst_273 = arith.constant dense<0.000000e+00> : vector<16x225xf32>
    %256 = tpu.matmul %238, %255, %cst_273 {dimension_numbers = #tpu.dot_dimension_numbers<[1], [0], [0], [1], [0, 0, 1, 1], [], []>} : vector<16x25xf32>, vector<25x225xf32>, vector<16x225xf32> -> vector<16x225xf32>
    %c2_274 = arith.constant 2 : index
    %c0_275 = arith.constant 0 : index
    %c0_276 = arith.constant 0 : index
    %257 = vector.load %arg13[%c2_274, %c0_275, %c0_276] : memref<25x8x16xf32, #tpu.memory_space<vmem>>, vector<1x8x16xf32>
    %258 = vector.shape_cast %257 : vector<1x8x16xf32> to vector<8x16xf32>
    %cst_277 = arith.constant dense<0.000000e+00> : vector<8x225xf32>
    %259 = tpu.matmul %258, %256, %cst_277 {dimension_numbers = #tpu.dot_dimension_numbers<[1], [0], [0], [1], [0, 0, 1, 1], [], []>} : vector<8x16xf32>, vector<16x225xf32>, vector<8x225xf32> -> vector<8x225xf32>
    %260 = arith.addf %253, %259 : vector<8x225xf32>
    %c3_278 = arith.constant 3 : index
    %c0_279 = arith.constant 0 : index
    %c0_280 = arith.constant 0 : index
    %261 = vector.load %arg15[%c3_278, %c0_279, %c0_280] : memref<25x25x225xf32, #tpu.memory_space<vmem>>, vector<1x25x225xf32>
    %262 = vector.shape_cast %261 : vector<1x25x225xf32> to vector<25x225xf32>
    %cst_281 = arith.constant dense<0.000000e+00> : vector<16x225xf32>
    %263 = tpu.matmul %238, %262, %cst_281 {dimension_numbers = #tpu.dot_dimension_numbers<[1], [0], [0], [1], [0, 0, 1, 1], [], []>} : vector<16x25xf32>, vector<25x225xf32>, vector<16x225xf32> -> vector<16x225xf32>
    %c3_282 = arith.constant 3 : index
    %c0_283 = arith.constant 0 : index
    %c0_284 = arith.constant 0 : index
    %264 = vector.load %arg13[%c3_282, %c0_283, %c0_284] : memref<25x8x16xf32, #tpu.memory_space<vmem>>, vector<1x8x16xf32>
    %265 = vector.shape_cast %264 : vector<1x8x16xf32> to vector<8x16xf32>
    %cst_285 = arith.constant dense<0.000000e+00> : vector<8x225xf32>
    %266 = tpu.matmul %265, %263, %cst_285 {dimension_numbers = #tpu.dot_dimension_numbers<[1], [0], [0], [1], [0, 0, 1, 1], [], []>} : vector<8x16xf32>, vector<16x225xf32>, vector<8x225xf32> -> vector<8x225xf32>
    %267 = arith.addf %260, %266 : vector<8x225xf32>
    %c4_286 = arith.constant 4 : index
    %c0_287 = arith.constant 0 : index
    %c0_288 = arith.constant 0 : index
    %268 = vector.load %arg15[%c4_286, %c0_287, %c0_288] : memref<25x25x225xf32, #tpu.memory_space<vmem>>, vector<1x25x225xf32>
    %269 = vector.shape_cast %268 : vector<1x25x225xf32> to vector<25x225xf32>
    %cst_289 = arith.constant dense<0.000000e+00> : vector<16x225xf32>
    %270 = tpu.matmul %238, %269, %cst_289 {dimension_numbers = #tpu.dot_dimension_numbers<[1], [0], [0], [1], [0, 0, 1, 1], [], []>} : vector<16x25xf32>, vector<25x225xf32>, vector<16x225xf32> -> vector<16x225xf32>
    %c4_290 = arith.constant 4 : index
    %c0_291 = arith.constant 0 : index
    %c0_292 = arith.constant 0 : index
    %271 = vector.load %arg13[%c4_290, %c0_291, %c0_292] : memref<25x8x16xf32, #tpu.memory_space<vmem>>, vector<1x8x16xf32>
    %272 = vector.shape_cast %271 : vector<1x8x16xf32> to vector<8x16xf32>
    %cst_293 = arith.constant dense<0.000000e+00> : vector<8x225xf32>
    %273 = tpu.matmul %272, %270, %cst_293 {dimension_numbers = #tpu.dot_dimension_numbers<[1], [0], [0], [1], [0, 0, 1, 1], [], []>} : vector<8x16xf32>, vector<16x225xf32>, vector<8x225xf32> -> vector<8x225xf32>
    %274 = arith.addf %267, %273 : vector<8x225xf32>
    %c5_294 = arith.constant 5 : index
    %c0_295 = arith.constant 0 : index
    %c0_296 = arith.constant 0 : index
    %275 = vector.load %arg15[%c5_294, %c0_295, %c0_296] : memref<25x25x225xf32, #tpu.memory_space<vmem>>, vector<1x25x225xf32>
    %276 = vector.shape_cast %275 : vector<1x25x225xf32> to vector<25x225xf32>
    %cst_297 = arith.constant dense<0.000000e+00> : vector<16x225xf32>
    %277 = tpu.matmul %238, %276, %cst_297 {dimension_numbers = #tpu.dot_dimension_numbers<[1], [0], [0], [1], [0, 0, 1, 1], [], []>} : vector<16x25xf32>, vector<25x225xf32>, vector<16x225xf32> -> vector<16x225xf32>
    %c5_298 = arith.constant 5 : index
    %c0_299 = arith.constant 0 : index
    %c0_300 = arith.constant 0 : index
    %278 = vector.load %arg13[%c5_298, %c0_299, %c0_300] : memref<25x8x16xf32, #tpu.memory_space<vmem>>, vector<1x8x16xf32>
    %279 = vector.shape_cast %278 : vector<1x8x16xf32> to vector<8x16xf32>
    %cst_301 = arith.constant dense<0.000000e+00> : vector<8x225xf32>
    %280 = tpu.matmul %279, %277, %cst_301 {dimension_numbers = #tpu.dot_dimension_numbers<[1], [0], [0], [1], [0, 0, 1, 1], [], []>} : vector<8x16xf32>, vector<16x225xf32>, vector<8x225xf32> -> vector<8x225xf32>
    %281 = arith.addf %274, %280 : vector<8x225xf32>
    %c6_302 = arith.constant 6 : index
    %c0_303 = arith.constant 0 : index
    %c0_304 = arith.constant 0 : index
    %282 = vector.load %arg15[%c6_302, %c0_303, %c0_304] : memref<25x25x225xf32, #tpu.memory_space<vmem>>, vector<1x25x225xf32>
    %283 = vector.shape_cast %282 : vector<1x25x225xf32> to vector<25x225xf32>
    %cst_305 = arith.constant dense<0.000000e+00> : vector<16x225xf32>
    %284 = tpu.matmul %238, %283, %cst_305 {dimension_numbers = #tpu.dot_dimension_numbers<[1], [0], [0], [1], [0, 0, 1, 1], [], []>} : vector<16x25xf32>, vector<25x225xf32>, vector<16x225xf32> -> vector<16x225xf32>
    %c6_306 = arith.constant 6 : index
    %c0_307 = arith.constant 0 : index
    %c0_308 = arith.constant 0 : index
    %285 = vector.load %arg13[%c6_306, %c0_307, %c0_308] : memref<25x8x16xf32, #tpu.memory_space<vmem>>, vector<1x8x16xf32>
    %286 = vector.shape_cast %285 : vector<1x8x16xf32> to vector<8x16xf32>
    %cst_309 = arith.constant dense<0.000000e+00> : vector<8x225xf32>
    %287 = tpu.matmul %286, %284, %cst_309 {dimension_numbers = #tpu.dot_dimension_numbers<[1], [0], [0], [1], [0, 0, 1, 1], [], []>} : vector<8x16xf32>, vector<16x225xf32>, vector<8x225xf32> -> vector<8x225xf32>
    %288 = arith.addf %281, %287 : vector<8x225xf32>
    %c7_310 = arith.constant 7 : index
    %c0_311 = arith.constant 0 : index
    %c0_312 = arith.constant 0 : index
    %289 = vector.load %arg15[%c7_310, %c0_311, %c0_312] : memref<25x25x225xf32, #tpu.memory_space<vmem>>, vector<1x25x225xf32>
    %290 = vector.shape_cast %289 : vector<1x25x225xf32> to vector<25x225xf32>
    %cst_313 = arith.constant dense<0.000000e+00> : vector<16x225xf32>
    %291 = tpu.matmul %238, %290, %cst_313 {dimension_numbers = #tpu.dot_dimension_numbers<[1], [0], [0], [1], [0, 0, 1, 1], [], []>} : vector<16x25xf32>, vector<25x225xf32>, vector<16x225xf32> -> vector<16x225xf32>
    %c7_314 = arith.constant 7 : index
    %c0_315 = arith.constant 0 : index
    %c0_316 = arith.constant 0 : index
    %292 = vector.load %arg13[%c7_314, %c0_315, %c0_316] : memref<25x8x16xf32, #tpu.memory_space<vmem>>, vector<1x8x16xf32>
    %293 = vector.shape_cast %292 : vector<1x8x16xf32> to vector<8x16xf32>
    %cst_317 = arith.constant dense<0.000000e+00> : vector<8x225xf32>
    %294 = tpu.matmul %293, %291, %cst_317 {dimension_numbers = #tpu.dot_dimension_numbers<[1], [0], [0], [1], [0, 0, 1, 1], [], []>} : vector<8x16xf32>, vector<16x225xf32>, vector<8x225xf32> -> vector<8x225xf32>
    %295 = arith.addf %288, %294 : vector<8x225xf32>
    %c8_318 = arith.constant 8 : index
    %c0_319 = arith.constant 0 : index
    %c0_320 = arith.constant 0 : index
    %296 = vector.load %arg15[%c8_318, %c0_319, %c0_320] : memref<25x25x225xf32, #tpu.memory_space<vmem>>, vector<1x25x225xf32>
    %297 = vector.shape_cast %296 : vector<1x25x225xf32> to vector<25x225xf32>
    %cst_321 = arith.constant dense<0.000000e+00> : vector<16x225xf32>
    %298 = tpu.matmul %238, %297, %cst_321 {dimension_numbers = #tpu.dot_dimension_numbers<[1], [0], [0], [1], [0, 0, 1, 1], [], []>} : vector<16x25xf32>, vector<25x225xf32>, vector<16x225xf32> -> vector<16x225xf32>
    %c8_322 = arith.constant 8 : index
    %c0_323 = arith.constant 0 : index
    %c0_324 = arith.constant 0 : index
    %299 = vector.load %arg13[%c8_322, %c0_323, %c0_324] : memref<25x8x16xf32, #tpu.memory_space<vmem>>, vector<1x8x16xf32>
    %300 = vector.shape_cast %299 : vector<1x8x16xf32> to vector<8x16xf32>
    %cst_325 = arith.constant dense<0.000000e+00> : vector<8x225xf32>
    %301 = tpu.matmul %300, %298, %cst_325 {dimension_numbers = #tpu.dot_dimension_numbers<[1], [0], [0], [1], [0, 0, 1, 1], [], []>} : vector<8x16xf32>, vector<16x225xf32>, vector<8x225xf32> -> vector<8x225xf32>
    %302 = arith.addf %295, %301 : vector<8x225xf32>
    %c9 = arith.constant 9 : index
    %c0_326 = arith.constant 0 : index
    %c0_327 = arith.constant 0 : index
    %303 = vector.load %arg15[%c9, %c0_326, %c0_327] : memref<25x25x225xf32, #tpu.memory_space<vmem>>, vector<1x25x225xf32>
    %304 = vector.shape_cast %303 : vector<1x25x225xf32> to vector<25x225xf32>
    %cst_328 = arith.constant dense<0.000000e+00> : vector<16x225xf32>
    %305 = tpu.matmul %238, %304, %cst_328 {dimension_numbers = #tpu.dot_dimension_numbers<[1], [0], [0], [1], [0, 0, 1, 1], [], []>} : vector<16x25xf32>, vector<25x225xf32>, vector<16x225xf32> -> vector<16x225xf32>
    %c9_329 = arith.constant 9 : index
    %c0_330 = arith.constant 0 : index
    %c0_331 = arith.constant 0 : index
    %306 = vector.load %arg13[%c9_329, %c0_330, %c0_331] : memref<25x8x16xf32, #tpu.memory_space<vmem>>, vector<1x8x16xf32>
    %307 = vector.shape_cast %306 : vector<1x8x16xf32> to vector<8x16xf32>
    %cst_332 = arith.constant dense<0.000000e+00> : vector<8x225xf32>
    %308 = tpu.matmul %307, %305, %cst_332 {dimension_numbers = #tpu.dot_dimension_numbers<[1], [0], [0], [1], [0, 0, 1, 1], [], []>} : vector<8x16xf32>, vector<16x225xf32>, vector<8x225xf32> -> vector<8x225xf32>
    %309 = arith.addf %302, %308 : vector<8x225xf32>
    %c10 = arith.constant 10 : index
    %c0_333 = arith.constant 0 : index
    %c0_334 = arith.constant 0 : index
    %310 = vector.load %arg15[%c10, %c0_333, %c0_334] : memref<25x25x225xf32, #tpu.memory_space<vmem>>, vector<1x25x225xf32>
    %311 = vector.shape_cast %310 : vector<1x25x225xf32> to vector<25x225xf32>
    %cst_335 = arith.constant dense<0.000000e+00> : vector<16x225xf32>
    %312 = tpu.matmul %238, %311, %cst_335 {dimension_numbers = #tpu.dot_dimension_numbers<[1], [0], [0], [1], [0, 0, 1, 1], [], []>} : vector<16x25xf32>, vector<25x225xf32>, vector<16x225xf32> -> vector<16x225xf32>
    %c10_336 = arith.constant 10 : index
    %c0_337 = arith.constant 0 : index
    %c0_338 = arith.constant 0 : index
    %313 = vector.load %arg13[%c10_336, %c0_337, %c0_338] : memref<25x8x16xf32, #tpu.memory_space<vmem>>, vector<1x8x16xf32>
    %314 = vector.shape_cast %313 : vector<1x8x16xf32> to vector<8x16xf32>
    %cst_339 = arith.constant dense<0.000000e+00> : vector<8x225xf32>
    %315 = tpu.matmul %314, %312, %cst_339 {dimension_numbers = #tpu.dot_dimension_numbers<[1], [0], [0], [1], [0, 0, 1, 1], [], []>} : vector<8x16xf32>, vector<16x225xf32>, vector<8x225xf32> -> vector<8x225xf32>
    %316 = arith.addf %309, %315 : vector<8x225xf32>
    %c11 = arith.constant 11 : index
    %c0_340 = arith.constant 0 : index
    %c0_341 = arith.constant 0 : index
    %317 = vector.load %arg15[%c11, %c0_340, %c0_341] : memref<25x25x225xf32, #tpu.memory_space<vmem>>, vector<1x25x225xf32>
    %318 = vector.shape_cast %317 : vector<1x25x225xf32> to vector<25x225xf32>
    %cst_342 = arith.constant dense<0.000000e+00> : vector<16x225xf32>
    %319 = tpu.matmul %238, %318, %cst_342 {dimension_numbers = #tpu.dot_dimension_numbers<[1], [0], [0], [1], [0, 0, 1, 1], [], []>} : vector<16x25xf32>, vector<25x225xf32>, vector<16x225xf32> -> vector<16x225xf32>
    %c11_343 = arith.constant 11 : index
    %c0_344 = arith.constant 0 : index
    %c0_345 = arith.constant 0 : index
    %320 = vector.load %arg13[%c11_343, %c0_344, %c0_345] : memref<25x8x16xf32, #tpu.memory_space<vmem>>, vector<1x8x16xf32>
    %321 = vector.shape_cast %320 : vector<1x8x16xf32> to vector<8x16xf32>
    %cst_346 = arith.constant dense<0.000000e+00> : vector<8x225xf32>
    %322 = tpu.matmul %321, %319, %cst_346 {dimension_numbers = #tpu.dot_dimension_numbers<[1], [0], [0], [1], [0, 0, 1, 1], [], []>} : vector<8x16xf32>, vector<16x225xf32>, vector<8x225xf32> -> vector<8x225xf32>
    %323 = arith.addf %316, %322 : vector<8x225xf32>
    %c12 = arith.constant 12 : index
    %c0_347 = arith.constant 0 : index
    %c0_348 = arith.constant 0 : index
    %324 = vector.load %arg15[%c12, %c0_347, %c0_348] : memref<25x25x225xf32, #tpu.memory_space<vmem>>, vector<1x25x225xf32>
    %325 = vector.shape_cast %324 : vector<1x25x225xf32> to vector<25x225xf32>
    %cst_349 = arith.constant dense<0.000000e+00> : vector<16x225xf32>
    %326 = tpu.matmul %238, %325, %cst_349 {dimension_numbers = #tpu.dot_dimension_numbers<[1], [0], [0], [1], [0, 0, 1, 1], [], []>} : vector<16x25xf32>, vector<25x225xf32>, vector<16x225xf32> -> vector<16x225xf32>
    %c12_350 = arith.constant 12 : index
    %c0_351 = arith.constant 0 : index
    %c0_352 = arith.constant 0 : index
    %327 = vector.load %arg13[%c12_350, %c0_351, %c0_352] : memref<25x8x16xf32, #tpu.memory_space<vmem>>, vector<1x8x16xf32>
    %328 = vector.shape_cast %327 : vector<1x8x16xf32> to vector<8x16xf32>
    %cst_353 = arith.constant dense<0.000000e+00> : vector<8x225xf32>
    %329 = tpu.matmul %328, %326, %cst_353 {dimension_numbers = #tpu.dot_dimension_numbers<[1], [0], [0], [1], [0, 0, 1, 1], [], []>} : vector<8x16xf32>, vector<16x225xf32>, vector<8x225xf32> -> vector<8x225xf32>
    %330 = arith.addf %323, %329 : vector<8x225xf32>
    %c13 = arith.constant 13 : index
    %c0_354 = arith.constant 0 : index
    %c0_355 = arith.constant 0 : index
    %331 = vector.load %arg15[%c13, %c0_354, %c0_355] : memref<25x25x225xf32, #tpu.memory_space<vmem>>, vector<1x25x225xf32>
    %332 = vector.shape_cast %331 : vector<1x25x225xf32> to vector<25x225xf32>
    %cst_356 = arith.constant dense<0.000000e+00> : vector<16x225xf32>
    %333 = tpu.matmul %238, %332, %cst_356 {dimension_numbers = #tpu.dot_dimension_numbers<[1], [0], [0], [1], [0, 0, 1, 1], [], []>} : vector<16x25xf32>, vector<25x225xf32>, vector<16x225xf32> -> vector<16x225xf32>
    %c13_357 = arith.constant 13 : index
    %c0_358 = arith.constant 0 : index
    %c0_359 = arith.constant 0 : index
    %334 = vector.load %arg13[%c13_357, %c0_358, %c0_359] : memref<25x8x16xf32, #tpu.memory_space<vmem>>, vector<1x8x16xf32>
    %335 = vector.shape_cast %334 : vector<1x8x16xf32> to vector<8x16xf32>
    %cst_360 = arith.constant dense<0.000000e+00> : vector<8x225xf32>
    %336 = tpu.matmul %335, %333, %cst_360 {dimension_numbers = #tpu.dot_dimension_numbers<[1], [0], [0], [1], [0, 0, 1, 1], [], []>} : vector<8x16xf32>, vector<16x225xf32>, vector<8x225xf32> -> vector<8x225xf32>
    %337 = arith.addf %330, %336 : vector<8x225xf32>
    %c14 = arith.constant 14 : index
    %c0_361 = arith.constant 0 : index
    %c0_362 = arith.constant 0 : index
    %338 = vector.load %arg15[%c14, %c0_361, %c0_362] : memref<25x25x225xf32, #tpu.memory_space<vmem>>, vector<1x25x225xf32>
    %339 = vector.shape_cast %338 : vector<1x25x225xf32> to vector<25x225xf32>
    %cst_363 = arith.constant dense<0.000000e+00> : vector<16x225xf32>
    %340 = tpu.matmul %238, %339, %cst_363 {dimension_numbers = #tpu.dot_dimension_numbers<[1], [0], [0], [1], [0, 0, 1, 1], [], []>} : vector<16x25xf32>, vector<25x225xf32>, vector<16x225xf32> -> vector<16x225xf32>
    %c14_364 = arith.constant 14 : index
    %c0_365 = arith.constant 0 : index
    %c0_366 = arith.constant 0 : index
    %341 = vector.load %arg13[%c14_364, %c0_365, %c0_366] : memref<25x8x16xf32, #tpu.memory_space<vmem>>, vector<1x8x16xf32>
    %342 = vector.shape_cast %341 : vector<1x8x16xf32> to vector<8x16xf32>
    %cst_367 = arith.constant dense<0.000000e+00> : vector<8x225xf32>
    %343 = tpu.matmul %342, %340, %cst_367 {dimension_numbers = #tpu.dot_dimension_numbers<[1], [0], [0], [1], [0, 0, 1, 1], [], []>} : vector<8x16xf32>, vector<16x225xf32>, vector<8x225xf32> -> vector<8x225xf32>
    %344 = arith.addf %337, %343 : vector<8x225xf32>
    %c15 = arith.constant 15 : index
    %c0_368 = arith.constant 0 : index
    %c0_369 = arith.constant 0 : index
    %345 = vector.load %arg15[%c15, %c0_368, %c0_369] : memref<25x25x225xf32, #tpu.memory_space<vmem>>, vector<1x25x225xf32>
    %346 = vector.shape_cast %345 : vector<1x25x225xf32> to vector<25x225xf32>
    %cst_370 = arith.constant dense<0.000000e+00> : vector<16x225xf32>
    %347 = tpu.matmul %238, %346, %cst_370 {dimension_numbers = #tpu.dot_dimension_numbers<[1], [0], [0], [1], [0, 0, 1, 1], [], []>} : vector<16x25xf32>, vector<25x225xf32>, vector<16x225xf32> -> vector<16x225xf32>
    %c15_371 = arith.constant 15 : index
    %c0_372 = arith.constant 0 : index
    %c0_373 = arith.constant 0 : index
    %348 = vector.load %arg13[%c15_371, %c0_372, %c0_373] : memref<25x8x16xf32, #tpu.memory_space<vmem>>, vector<1x8x16xf32>
    %349 = vector.shape_cast %348 : vector<1x8x16xf32> to vector<8x16xf32>
    %cst_374 = arith.constant dense<0.000000e+00> : vector<8x225xf32>
    %350 = tpu.matmul %349, %347, %cst_374 {dimension_numbers = #tpu.dot_dimension_numbers<[1], [0], [0], [1], [0, 0, 1, 1], [], []>} : vector<8x16xf32>, vector<16x225xf32>, vector<8x225xf32> -> vector<8x225xf32>
    %351 = arith.addf %344, %350 : vector<8x225xf32>
    %c16 = arith.constant 16 : index
    %c0_375 = arith.constant 0 : index
    %c0_376 = arith.constant 0 : index
    %352 = vector.load %arg15[%c16, %c0_375, %c0_376] : memref<25x25x225xf32, #tpu.memory_space<vmem>>, vector<1x25x225xf32>
    %353 = vector.shape_cast %352 : vector<1x25x225xf32> to vector<25x225xf32>
    %cst_377 = arith.constant dense<0.000000e+00> : vector<16x225xf32>
    %354 = tpu.matmul %238, %353, %cst_377 {dimension_numbers = #tpu.dot_dimension_numbers<[1], [0], [0], [1], [0, 0, 1, 1], [], []>} : vector<16x25xf32>, vector<25x225xf32>, vector<16x225xf32> -> vector<16x225xf32>
    %c16_378 = arith.constant 16 : index
    %c0_379 = arith.constant 0 : index
    %c0_380 = arith.constant 0 : index
    %355 = vector.load %arg13[%c16_378, %c0_379, %c0_380] : memref<25x8x16xf32, #tpu.memory_space<vmem>>, vector<1x8x16xf32>
    %356 = vector.shape_cast %355 : vector<1x8x16xf32> to vector<8x16xf32>
    %cst_381 = arith.constant dense<0.000000e+00> : vector<8x225xf32>
    %357 = tpu.matmul %356, %354, %cst_381 {dimension_numbers = #tpu.dot_dimension_numbers<[1], [0], [0], [1], [0, 0, 1, 1], [], []>} : vector<8x16xf32>, vector<16x225xf32>, vector<8x225xf32> -> vector<8x225xf32>
    %358 = arith.addf %351, %357 : vector<8x225xf32>
    %c17 = arith.constant 17 : index
    %c0_382 = arith.constant 0 : index
    %c0_383 = arith.constant 0 : index
    %359 = vector.load %arg15[%c17, %c0_382, %c0_383] : memref<25x25x225xf32, #tpu.memory_space<vmem>>, vector<1x25x225xf32>
    %360 = vector.shape_cast %359 : vector<1x25x225xf32> to vector<25x225xf32>
    %cst_384 = arith.constant dense<0.000000e+00> : vector<16x225xf32>
    %361 = tpu.matmul %238, %360, %cst_384 {dimension_numbers = #tpu.dot_dimension_numbers<[1], [0], [0], [1], [0, 0, 1, 1], [], []>} : vector<16x25xf32>, vector<25x225xf32>, vector<16x225xf32> -> vector<16x225xf32>
    %c17_385 = arith.constant 17 : index
    %c0_386 = arith.constant 0 : index
    %c0_387 = arith.constant 0 : index
    %362 = vector.load %arg13[%c17_385, %c0_386, %c0_387] : memref<25x8x16xf32, #tpu.memory_space<vmem>>, vector<1x8x16xf32>
    %363 = vector.shape_cast %362 : vector<1x8x16xf32> to vector<8x16xf32>
    %cst_388 = arith.constant dense<0.000000e+00> : vector<8x225xf32>
    %364 = tpu.matmul %363, %361, %cst_388 {dimension_numbers = #tpu.dot_dimension_numbers<[1], [0], [0], [1], [0, 0, 1, 1], [], []>} : vector<8x16xf32>, vector<16x225xf32>, vector<8x225xf32> -> vector<8x225xf32>
    %365 = arith.addf %358, %364 : vector<8x225xf32>
    %c18 = arith.constant 18 : index
    %c0_389 = arith.constant 0 : index
    %c0_390 = arith.constant 0 : index
    %366 = vector.load %arg15[%c18, %c0_389, %c0_390] : memref<25x25x225xf32, #tpu.memory_space<vmem>>, vector<1x25x225xf32>
    %367 = vector.shape_cast %366 : vector<1x25x225xf32> to vector<25x225xf32>
    %cst_391 = arith.constant dense<0.000000e+00> : vector<16x225xf32>
    %368 = tpu.matmul %238, %367, %cst_391 {dimension_numbers = #tpu.dot_dimension_numbers<[1], [0], [0], [1], [0, 0, 1, 1], [], []>} : vector<16x25xf32>, vector<25x225xf32>, vector<16x225xf32> -> vector<16x225xf32>
    %c18_392 = arith.constant 18 : index
    %c0_393 = arith.constant 0 : index
    %c0_394 = arith.constant 0 : index
    %369 = vector.load %arg13[%c18_392, %c0_393, %c0_394] : memref<25x8x16xf32, #tpu.memory_space<vmem>>, vector<1x8x16xf32>
    %370 = vector.shape_cast %369 : vector<1x8x16xf32> to vector<8x16xf32>
    %cst_395 = arith.constant dense<0.000000e+00> : vector<8x225xf32>
    %371 = tpu.matmul %370, %368, %cst_395 {dimension_numbers = #tpu.dot_dimension_numbers<[1], [0], [0], [1], [0, 0, 1, 1], [], []>} : vector<8x16xf32>, vector<16x225xf32>, vector<8x225xf32> -> vector<8x225xf32>
    %372 = arith.addf %365, %371 : vector<8x225xf32>
    %c19 = arith.constant 19 : index
    %c0_396 = arith.constant 0 : index
    %c0_397 = arith.constant 0 : index
    %373 = vector.load %arg15[%c19, %c0_396, %c0_397] : memref<25x25x225xf32, #tpu.memory_space<vmem>>, vector<1x25x225xf32>
    %374 = vector.shape_cast %373 : vector<1x25x225xf32> to vector<25x225xf32>
    %cst_398 = arith.constant dense<0.000000e+00> : vector<16x225xf32>
    %375 = tpu.matmul %238, %374, %cst_398 {dimension_numbers = #tpu.dot_dimension_numbers<[1], [0], [0], [1], [0, 0, 1, 1], [], []>} : vector<16x25xf32>, vector<25x225xf32>, vector<16x225xf32> -> vector<16x225xf32>
    %c19_399 = arith.constant 19 : index
    %c0_400 = arith.constant 0 : index
    %c0_401 = arith.constant 0 : index
    %376 = vector.load %arg13[%c19_399, %c0_400, %c0_401] : memref<25x8x16xf32, #tpu.memory_space<vmem>>, vector<1x8x16xf32>
    %377 = vector.shape_cast %376 : vector<1x8x16xf32> to vector<8x16xf32>
    %cst_402 = arith.constant dense<0.000000e+00> : vector<8x225xf32>
    %378 = tpu.matmul %377, %375, %cst_402 {dimension_numbers = #tpu.dot_dimension_numbers<[1], [0], [0], [1], [0, 0, 1, 1], [], []>} : vector<8x16xf32>, vector<16x225xf32>, vector<8x225xf32> -> vector<8x225xf32>
    %379 = arith.addf %372, %378 : vector<8x225xf32>
    %c20 = arith.constant 20 : index
    %c0_403 = arith.constant 0 : index
    %c0_404 = arith.constant 0 : index
    %380 = vector.load %arg15[%c20, %c0_403, %c0_404] : memref<25x25x225xf32, #tpu.memory_space<vmem>>, vector<1x25x225xf32>
    %381 = vector.shape_cast %380 : vector<1x25x225xf32> to vector<25x225xf32>
    %cst_405 = arith.constant dense<0.000000e+00> : vector<16x225xf32>
    %382 = tpu.matmul %238, %381, %cst_405 {dimension_numbers = #tpu.dot_dimension_numbers<[1], [0], [0], [1], [0, 0, 1, 1], [], []>} : vector<16x25xf32>, vector<25x225xf32>, vector<16x225xf32> -> vector<16x225xf32>
    %c20_406 = arith.constant 20 : index
    %c0_407 = arith.constant 0 : index
    %c0_408 = arith.constant 0 : index
    %383 = vector.load %arg13[%c20_406, %c0_407, %c0_408] : memref<25x8x16xf32, #tpu.memory_space<vmem>>, vector<1x8x16xf32>
    %384 = vector.shape_cast %383 : vector<1x8x16xf32> to vector<8x16xf32>
    %cst_409 = arith.constant dense<0.000000e+00> : vector<8x225xf32>
    %385 = tpu.matmul %384, %382, %cst_409 {dimension_numbers = #tpu.dot_dimension_numbers<[1], [0], [0], [1], [0, 0, 1, 1], [], []>} : vector<8x16xf32>, vector<16x225xf32>, vector<8x225xf32> -> vector<8x225xf32>
    %386 = arith.addf %379, %385 : vector<8x225xf32>
    %c21 = arith.constant 21 : index
    %c0_410 = arith.constant 0 : index
    %c0_411 = arith.constant 0 : index
    %387 = vector.load %arg15[%c21, %c0_410, %c0_411] : memref<25x25x225xf32, #tpu.memory_space<vmem>>, vector<1x25x225xf32>
    %388 = vector.shape_cast %387 : vector<1x25x225xf32> to vector<25x225xf32>
    %cst_412 = arith.constant dense<0.000000e+00> : vector<16x225xf32>
    %389 = tpu.matmul %238, %388, %cst_412 {dimension_numbers = #tpu.dot_dimension_numbers<[1], [0], [0], [1], [0, 0, 1, 1], [], []>} : vector<16x25xf32>, vector<25x225xf32>, vector<16x225xf32> -> vector<16x225xf32>
    %c21_413 = arith.constant 21 : index
    %c0_414 = arith.constant 0 : index
    %c0_415 = arith.constant 0 : index
    %390 = vector.load %arg13[%c21_413, %c0_414, %c0_415] : memref<25x8x16xf32, #tpu.memory_space<vmem>>, vector<1x8x16xf32>
    %391 = vector.shape_cast %390 : vector<1x8x16xf32> to vector<8x16xf32>
    %cst_416 = arith.constant dense<0.000000e+00> : vector<8x225xf32>
    %392 = tpu.matmul %391, %389, %cst_416 {dimension_numbers = #tpu.dot_dimension_numbers<[1], [0], [0], [1], [0, 0, 1, 1], [], []>} : vector<8x16xf32>, vector<16x225xf32>, vector<8x225xf32> -> vector<8x225xf32>
    %393 = arith.addf %386, %392 : vector<8x225xf32>
    %c22 = arith.constant 22 : index
    %c0_417 = arith.constant 0 : index
    %c0_418 = arith.constant 0 : index
    %394 = vector.load %arg15[%c22, %c0_417, %c0_418] : memref<25x25x225xf32, #tpu.memory_space<vmem>>, vector<1x25x225xf32>
    %395 = vector.shape_cast %394 : vector<1x25x225xf32> to vector<25x225xf32>
    %cst_419 = arith.constant dense<0.000000e+00> : vector<16x225xf32>
    %396 = tpu.matmul %238, %395, %cst_419 {dimension_numbers = #tpu.dot_dimension_numbers<[1], [0], [0], [1], [0, 0, 1, 1], [], []>} : vector<16x25xf32>, vector<25x225xf32>, vector<16x225xf32> -> vector<16x225xf32>
    %c22_420 = arith.constant 22 : index
    %c0_421 = arith.constant 0 : index
    %c0_422 = arith.constant 0 : index
    %397 = vector.load %arg13[%c22_420, %c0_421, %c0_422] : memref<25x8x16xf32, #tpu.memory_space<vmem>>, vector<1x8x16xf32>
    %398 = vector.shape_cast %397 : vector<1x8x16xf32> to vector<8x16xf32>
    %cst_423 = arith.constant dense<0.000000e+00> : vector<8x225xf32>
    %399 = tpu.matmul %398, %396, %cst_423 {dimension_numbers = #tpu.dot_dimension_numbers<[1], [0], [0], [1], [0, 0, 1, 1], [], []>} : vector<8x16xf32>, vector<16x225xf32>, vector<8x225xf32> -> vector<8x225xf32>
    %400 = arith.addf %393, %399 : vector<8x225xf32>
    %c23 = arith.constant 23 : index
    %c0_424 = arith.constant 0 : index
    %c0_425 = arith.constant 0 : index
    %401 = vector.load %arg15[%c23, %c0_424, %c0_425] : memref<25x25x225xf32, #tpu.memory_space<vmem>>, vector<1x25x225xf32>
    %402 = vector.shape_cast %401 : vector<1x25x225xf32> to vector<25x225xf32>
    %cst_426 = arith.constant dense<0.000000e+00> : vector<16x225xf32>
    %403 = tpu.matmul %238, %402, %cst_426 {dimension_numbers = #tpu.dot_dimension_numbers<[1], [0], [0], [1], [0, 0, 1, 1], [], []>} : vector<16x25xf32>, vector<25x225xf32>, vector<16x225xf32> -> vector<16x225xf32>
    %c23_427 = arith.constant 23 : index
    %c0_428 = arith.constant 0 : index
    %c0_429 = arith.constant 0 : index
    %404 = vector.load %arg13[%c23_427, %c0_428, %c0_429] : memref<25x8x16xf32, #tpu.memory_space<vmem>>, vector<1x8x16xf32>
    %405 = vector.shape_cast %404 : vector<1x8x16xf32> to vector<8x16xf32>
    %cst_430 = arith.constant dense<0.000000e+00> : vector<8x225xf32>
    %406 = tpu.matmul %405, %403, %cst_430 {dimension_numbers = #tpu.dot_dimension_numbers<[1], [0], [0], [1], [0, 0, 1, 1], [], []>} : vector<8x16xf32>, vector<16x225xf32>, vector<8x225xf32> -> vector<8x225xf32>
    %407 = arith.addf %400, %406 : vector<8x225xf32>
    %c24 = arith.constant 24 : index
    %c0_431 = arith.constant 0 : index
    %c0_432 = arith.constant 0 : index
    %408 = vector.load %arg15[%c24, %c0_431, %c0_432] : memref<25x25x225xf32, #tpu.memory_space<vmem>>, vector<1x25x225xf32>
    %409 = vector.shape_cast %408 : vector<1x25x225xf32> to vector<25x225xf32>
    %cst_433 = arith.constant dense<0.000000e+00> : vector<16x225xf32>
    %410 = tpu.matmul %238, %409, %cst_433 {dimension_numbers = #tpu.dot_dimension_numbers<[1], [0], [0], [1], [0, 0, 1, 1], [], []>} : vector<16x25xf32>, vector<25x225xf32>, vector<16x225xf32> -> vector<16x225xf32>
    %c24_434 = arith.constant 24 : index
    %c0_435 = arith.constant 0 : index
    %c0_436 = arith.constant 0 : index
    %411 = vector.load %arg13[%c24_434, %c0_435, %c0_436] : memref<25x8x16xf32, #tpu.memory_space<vmem>>, vector<1x8x16xf32>
    %412 = vector.shape_cast %411 : vector<1x8x16xf32> to vector<8x16xf32>
    %cst_437 = arith.constant dense<0.000000e+00> : vector<8x225xf32>
    %413 = tpu.matmul %412, %410, %cst_437 {dimension_numbers = #tpu.dot_dimension_numbers<[1], [0], [0], [1], [0, 0, 1, 1], [], []>} : vector<8x16xf32>, vector<16x225xf32>, vector<8x225xf32> -> vector<8x225xf32>
    %414 = arith.addf %407, %413 : vector<8x225xf32>
    %c0_438 = arith.constant 0 : index
    %c0_439 = arith.constant 0 : index
    %415 = vector.load %arg14[%c0_438, %c0_439] : memref<8x1xf32, #tpu.memory_space<vmem>>, vector<8x1xf32>
    %416 = vector.broadcast %415 : vector<8x1xf32> to vector<8x225xf32>
    %417 = arith.addf %414, %416 : vector<8x225xf32>
    %cst_440 = arith.constant 0.000000e+00 : f32
    %418 = vector.broadcast %cst_440 : f32 to vector<8x225xf32>
    %419 = arith.maximumf %417, %418 : vector<8x225xf32>
    %cst_441 = arith.constant 0.000000e+00 : f32
    %420 = vector.broadcast %cst_441 : f32 to vector<1x784xf32>
    %c0_442 = arith.constant 0 : index
    %c0_443 = arith.constant 0 : index
    %c0_444 = arith.constant 0 : index
    %421 = vector.load %arg18[%c0_442, %c0_443, %c0_444] : memref<4x225x784xf32, #tpu.memory_space<vmem>>, vector<1x225x784xf32>
    %422 = vector.shape_cast %421 : vector<1x225x784xf32> to vector<225x784xf32>
    %cst_445 = arith.constant dense<0.000000e+00> : vector<8x784xf32>
    %423 = tpu.matmul %419, %422, %cst_445 {dimension_numbers = #tpu.dot_dimension_numbers<[1], [0], [0], [1], [0, 0, 1, 1], [], []>} : vector<8x225xf32>, vector<225x784xf32>, vector<8x784xf32> -> vector<8x784xf32>
    %c0_446 = arith.constant 0 : index
    %c0_447 = arith.constant 0 : index
    %c0_448 = arith.constant 0 : index
    %424 = vector.load %arg16[%c0_446, %c0_447, %c0_448] : memref<4x1x8xf32, #tpu.memory_space<vmem>>, vector<1x1x8xf32>
    %425 = vector.shape_cast %424 : vector<1x1x8xf32> to vector<1x8xf32>
    %cst_449 = arith.constant dense<0.000000e+00> : vector<1x784xf32>
    %426 = tpu.matmul %425, %423, %cst_449 {dimension_numbers = #tpu.dot_dimension_numbers<[1], [0], [0], [1], [0, 0, 1, 1], [], []>} : vector<1x8xf32>, vector<8x784xf32>, vector<1x784xf32> -> vector<1x784xf32>
    %427 = arith.addf %420, %426 : vector<1x784xf32>
    %c1_450 = arith.constant 1 : index
    %c0_451 = arith.constant 0 : index
    %c0_452 = arith.constant 0 : index
    %428 = vector.load %arg18[%c1_450, %c0_451, %c0_452] : memref<4x225x784xf32, #tpu.memory_space<vmem>>, vector<1x225x784xf32>
    %429 = vector.shape_cast %428 : vector<1x225x784xf32> to vector<225x784xf32>
    %cst_453 = arith.constant dense<0.000000e+00> : vector<8x784xf32>
    %430 = tpu.matmul %419, %429, %cst_453 {dimension_numbers = #tpu.dot_dimension_numbers<[1], [0], [0], [1], [0, 0, 1, 1], [], []>} : vector<8x225xf32>, vector<225x784xf32>, vector<8x784xf32> -> vector<8x784xf32>
    %c1_454 = arith.constant 1 : index
    %c0_455 = arith.constant 0 : index
    %c0_456 = arith.constant 0 : index
    %431 = vector.load %arg16[%c1_454, %c0_455, %c0_456] : memref<4x1x8xf32, #tpu.memory_space<vmem>>, vector<1x1x8xf32>
    %432 = vector.shape_cast %431 : vector<1x1x8xf32> to vector<1x8xf32>
    %cst_457 = arith.constant dense<0.000000e+00> : vector<1x784xf32>
    %433 = tpu.matmul %432, %430, %cst_457 {dimension_numbers = #tpu.dot_dimension_numbers<[1], [0], [0], [1], [0, 0, 1, 1], [], []>} : vector<1x8xf32>, vector<8x784xf32>, vector<1x784xf32> -> vector<1x784xf32>
    %434 = arith.addf %427, %433 : vector<1x784xf32>
    %c2_458 = arith.constant 2 : index
    %c0_459 = arith.constant 0 : index
    %c0_460 = arith.constant 0 : index
    %435 = vector.load %arg18[%c2_458, %c0_459, %c0_460] : memref<4x225x784xf32, #tpu.memory_space<vmem>>, vector<1x225x784xf32>
    %436 = vector.shape_cast %435 : vector<1x225x784xf32> to vector<225x784xf32>
    %cst_461 = arith.constant dense<0.000000e+00> : vector<8x784xf32>
    %437 = tpu.matmul %419, %436, %cst_461 {dimension_numbers = #tpu.dot_dimension_numbers<[1], [0], [0], [1], [0, 0, 1, 1], [], []>} : vector<8x225xf32>, vector<225x784xf32>, vector<8x784xf32> -> vector<8x784xf32>
    %c2_462 = arith.constant 2 : index
    %c0_463 = arith.constant 0 : index
    %c0_464 = arith.constant 0 : index
    %438 = vector.load %arg16[%c2_462, %c0_463, %c0_464] : memref<4x1x8xf32, #tpu.memory_space<vmem>>, vector<1x1x8xf32>
    %439 = vector.shape_cast %438 : vector<1x1x8xf32> to vector<1x8xf32>
    %cst_465 = arith.constant dense<0.000000e+00> : vector<1x784xf32>
    %440 = tpu.matmul %439, %437, %cst_465 {dimension_numbers = #tpu.dot_dimension_numbers<[1], [0], [0], [1], [0, 0, 1, 1], [], []>} : vector<1x8xf32>, vector<8x784xf32>, vector<1x784xf32> -> vector<1x784xf32>
    %441 = arith.addf %434, %440 : vector<1x784xf32>
    %c3_466 = arith.constant 3 : index
    %c0_467 = arith.constant 0 : index
    %c0_468 = arith.constant 0 : index
    %442 = vector.load %arg18[%c3_466, %c0_467, %c0_468] : memref<4x225x784xf32, #tpu.memory_space<vmem>>, vector<1x225x784xf32>
    %443 = vector.shape_cast %442 : vector<1x225x784xf32> to vector<225x784xf32>
    %cst_469 = arith.constant dense<0.000000e+00> : vector<8x784xf32>
    %444 = tpu.matmul %419, %443, %cst_469 {dimension_numbers = #tpu.dot_dimension_numbers<[1], [0], [0], [1], [0, 0, 1, 1], [], []>} : vector<8x225xf32>, vector<225x784xf32>, vector<8x784xf32> -> vector<8x784xf32>
    %c3_470 = arith.constant 3 : index
    %c0_471 = arith.constant 0 : index
    %c0_472 = arith.constant 0 : index
    %445 = vector.load %arg16[%c3_470, %c0_471, %c0_472] : memref<4x1x8xf32, #tpu.memory_space<vmem>>, vector<1x1x8xf32>
    %446 = vector.shape_cast %445 : vector<1x1x8xf32> to vector<1x8xf32>
    %cst_473 = arith.constant dense<0.000000e+00> : vector<1x784xf32>
    %447 = tpu.matmul %446, %444, %cst_473 {dimension_numbers = #tpu.dot_dimension_numbers<[1], [0], [0], [1], [0, 0, 1, 1], [], []>} : vector<1x8xf32>, vector<8x784xf32>, vector<1x784xf32> -> vector<1x784xf32>
    %448 = arith.addf %441, %447 : vector<1x784xf32>
    %c0_474 = arith.constant 0 : index
    %c0_475 = arith.constant 0 : index
    %449 = vector.load %arg17[%c0_474, %c0_475] : memref<1x1xf32, #tpu.memory_space<vmem>>, vector<1x1xf32>
    %450 = vector.broadcast %449 : vector<1x1xf32> to vector<1x784xf32>
    %451 = arith.addf %448, %450 : vector<1x784xf32>
    %452 = math.tanh %451 : vector<1x784xf32>
    %c0_476 = arith.constant 0 : index
    %c0_477 = arith.constant 0 : index
    %c0_478 = arith.constant 0 : index
    %453 = vector.load %arg19[%c0_476, %c0_477, %c0_478] : memref<1x1x784xf32, #tpu.memory_space<vmem>>, vector<1x1x784xf32>
    %454 = vector.shape_cast %453 : vector<1x1x784xf32> to vector<1x784xf32>
    %455 = vector.shape_cast %452 : vector<1x784xf32> to vector<1x1x784xf32>
    tpu.vector_store %arg19[%c0_476, %c0_477, %c0_478], %455 {strides = array<i32>} : memref<1x1x784xf32, #tpu.memory_space<vmem>>, vector<1x1x784xf32>,
    return
  }
  func.func @transform_0(%arg0: i32) -> (i32, i32, i32) {
    %c0_i32 = arith.constant 0 : i32
    %c0_i32_0 = arith.constant 0 : i32
    %c0_i32_1 = arith.constant 0 : i32
    return %arg0, %c0_i32, %c0_i32_0 : i32, i32, i32
  }
  func.func @transform_1(%arg0: i32) -> (i32, i32, i32) {
    %c0_i32 = arith.constant 0 : i32
    %c0_i32_0 = arith.constant 0 : i32
    %c0_i32_1 = arith.constant 0 : i32
    %c0_i32_2 = arith.constant 0 : i32
    return %c0_i32, %c0_i32_0, %c0_i32_1 : i32, i32, i32
  }
  func.func @transform_2(%arg0: i32) -> (i32, i32) {
    %c0_i32 = arith.constant 0 : i32
    %c0_i32_0 = arith.constant 0 : i32
    %c0_i32_1 = arith.constant 0 : i32
    return %c0_i32, %c0_i32_0 : i32, i32
  }
  func.func @transform_3(%arg0: i32) -> (i32, i32, i32) {
    %c0_i32 = arith.constant 0 : i32
    %c0_i32_0 = arith.constant 0 : i32
    %c0_i32_1 = arith.constant 0 : i32
    %c0_i32_2 = arith.constant 0 : i32
    return %c0_i32, %c0_i32_0, %c0_i32_1 : i32, i32, i32
  }
  func.func @transform_4(%arg0: i32) -> (i32, i32, i32) {
    %c0_i32 = arith.constant 0 : i32
    %c0_i32_0 = arith.constant 0 : i32
    %c0_i32_1 = arith.constant 0 : i32
    %c0_i32_2 = arith.constant 0 : i32
    return %c0_i32, %c0_i32_0, %c0_i32_1 : i32, i32, i32
  }
  func.func @transform_5(%arg0: i32) -> (i32, i32, i32) {
    %c0_i32 = arith.constant 0 : i32
    %c0_i32_0 = arith.constant 0 : i32
    %c0_i32_1 = arith.constant 0 : i32
    %c0_i32_2 = arith.constant 0 : i32
    return %c0_i32, %c0_i32_0, %c0_i32_1 : i32, i32, i32
  }
  func.func @transform_6(%arg0: i32) -> (i32, i32) {
    %c0_i32 = arith.constant 0 : i32
    %c0_i32_0 = arith.constant 0 : i32
    %c0_i32_1 = arith.constant 0 : i32
    return %c0_i32, %c0_i32_0 : i32, i32
  }
  func.func @transform_7(%arg0: i32) -> (i32, i32, i32) {
    %c0_i32 = arith.constant 0 : i32
    %c0_i32_0 = arith.constant 0 : i32
    %c0_i32_1 = arith.constant 0 : i32
    %c0_i32_2 = arith.constant 0 : i32
    return %c0_i32, %c0_i32_0, %c0_i32_1 : i32, i32, i32
  }
  func.func @transform_8(%arg0: i32) -> (i32, i32, i32) {
    %c0_i32 = arith.constant 0 : i32
    %c0_i32_0 = arith.constant 0 : i32
    %c0_i32_1 = arith.constant 0 : i32
    %c0_i32_2 = arith.constant 0 : i32
    return %c0_i32, %c0_i32_0, %c0_i32_1 : i32, i32, i32
  }
  func.func @transform_9(%arg0: i32) -> (i32, i32, i32) {
    %c0_i32 = arith.constant 0 : i32
    %c0_i32_0 = arith.constant 0 : i32
    %c0_i32_1 = arith.constant 0 : i32
    %c0_i32_2 = arith.constant 0 : i32
    return %c0_i32, %c0_i32_0, %c0_i32_1 : i32, i32, i32
  }
  func.func @transform_10(%arg0: i32) -> (i32, i32) {
    %c0_i32 = arith.constant 0 : i32
    %c0_i32_0 = arith.constant 0 : i32
    %c0_i32_1 = arith.constant 0 : i32
    return %c0_i32, %c0_i32_0 : i32, i32
  }
  func.func @transform_11(%arg0: i32) -> (i32, i32, i32) {
    %c0_i32 = arith.constant 0 : i32
    %c0_i32_0 = arith.constant 0 : i32
    %c0_i32_1 = arith.constant 0 : i32
    %c0_i32_2 = arith.constant 0 : i32
    return %c0_i32, %c0_i32_0, %c0_i32_1 : i32, i32, i32
  }
  func.func @transform_12(%arg0: i32) -> (i32, i32, i32) {
    %c0_i32 = arith.constant 0 : i32
    %c0_i32_0 = arith.constant 0 : i32
    %c0_i32_1 = arith.constant 0 : i32
    %c0_i32_2 = arith.constant 0 : i32
    return %c0_i32, %c0_i32_0, %c0_i32_1 : i32, i32, i32
  }
  func.func @transform_13(%arg0: i32) -> (i32, i32) {
    %c0_i32 = arith.constant 0 : i32
    %c0_i32_0 = arith.constant 0 : i32
    %c0_i32_1 = arith.constant 0 : i32
    return %c0_i32, %c0_i32_0 : i32, i32
  }
  func.func @transform_14(%arg0: i32) -> (i32, i32, i32) {
    %c0_i32 = arith.constant 0 : i32
    %c0_i32_0 = arith.constant 0 : i32
    %c0_i32_1 = arith.constant 0 : i32
    %c0_i32_2 = arith.constant 0 : i32
    return %c0_i32, %c0_i32_0, %c0_i32_1 : i32, i32, i32
  }
  func.func @transform_15(%arg0: i32) -> (i32, i32, i32) {
    %c0_i32 = arith.constant 0 : i32
    %c0_i32_0 = arith.constant 0 : i32
    %c0_i32_1 = arith.constant 0 : i32
    %c0_i32_2 = arith.constant 0 : i32
    return %c0_i32, %c0_i32_0, %c0_i32_1 : i32, i32, i32
  }
  func.func @transform_16(%arg0: i32) -> (i32, i32) {
    %c0_i32 = arith.constant 0 : i32
    %c0_i32_0 = arith.constant 0 : i32
    %c0_i32_1 = arith.constant 0 : i32
    return %c0_i32, %c0_i32_0 : i32, i32
  }
  func.func @transform_17(%arg0: i32) -> (i32, i32, i32) {
    %c0_i32 = arith.constant 0 : i32
    %c0_i32_0 = arith.constant 0 : i32
    %c0_i32_1 = arith.constant 0 : i32
    %c0_i32_2 = arith.constant 0 : i32
    return %c0_i32, %c0_i32_0, %c0_i32_1 : i32, i32, i32
  }
  func.func @transform_18(%arg0: i32) -> (i32, i32, i32) {
    %c0_i32 = arith.constant 0 : i32
    %c0_i32_0 = arith.constant 0 : i32
    %c0_i32_1 = arith.constant 0 : i32
    return %arg0, %c0_i32, %c0_i32_0 : i32, i32, i32
  }
}

</mosaic_0001>

<bundles_post_ra>
// kernel: autoencoder_forward.1
= control target key start
LH: loop header
LB: loop body
LE: loop exit
PB: predicated region body
PF: predicated region fallthrough
CT: control target
= control target key end

     0   :  { %s23020_s0 = inlined_call_operand.vmem [shape: f32[2,1,784], index: 0, kind: input, shape index: {}]   ;;  %s23021_s1 = inlined_call_operand.vmem [shape: f32[9,16,1], index: 1, kind: input, shape index: {}]   ;;  %s23022_s2 = inlined_call_operand.vmem [shape: f32[16,1], index: 2, kind: input, shape index: {}]   ;;  %s23023_s3 = inlined_call_operand.hbm [shape: f32[9,784,100], index: 3, kind: input, shape index: {}]   ;;  %s23024_s4 = inlined_call_operand.hbm [shape: f32[4,100,25], index: 4, kind: input, shape index: {}]   ;;  %s23025_s5 = inlined_call_operand.hbm [shape: f32[9,8,16], index: 5, kind: input, shape index: {}]   ;;  %s23026_s6 = inlined_call_operand.vmem [shape: f32[8,1], index: 6, kind: input, shape index: {}]   ;;  %s23027_s7 = inlined_call_operand.hbm [shape: f32[9,25,9], index: 7, kind: input, shape index: {}]   ;;  %s23028_s8 = inlined_call_operand.hbm [shape: f32[4,9,4], index: 8, kind: input, shape index: {}]   ;;  %s23029_s9 = inlined_call_operand.vmem [shape: f32[9,16,8], index: 9, kind: input, shape index: {}]   ;;  %s23030_s10 = inlined_call_operand.vmem [shape: f32[16,1], index: 10, kind: input, shape index: {}]   ;;  %s23031_s11 = inlined_call_operand.hbm [shape: f32[9,4,25], index: 11, kind: input, shape index: {}]   ;;  %s23032_s12 = inlined_call_operand.hbm [shape: f32[25,8,16], index: 12, kind: input, shape index: {}]   ;;  %s23033_s13 = inlined_call_operand.vmem [shape: f32[8,1], index: 13, kind: input, shape index: {}]   ;;  %s23034_s14 = inlined_call_operand.hbm [shape: f32[25,25,225], index: 14, kind: input, shape index: {}]   ;;  %s23035_s15 = inlined_call_operand.hbm [shape: f32[4,1,8], index: 15, kind: input, shape index: {}]   ;;  %s23036_s16 = inlined_call_operand.<no memory space> [shape: f32[1,1], index: 16, kind: input, shape index: {}]   ;;  %s23037_s17 = inlined_call_operand.hbm [shape: f32[4,225,784], index: 17, kind: input, shape index: {}]   ;;  %s23038_s18 = inlined_call_operand.vmem [shape: f32[2,1,784], index: 18, kind: output, shape index: {}]  }
   0x1   :  { %23070 = sst [smem:[#allocation40_spill]] %s23020_s0  ;;  %v23_v0 = vstv %s23036_s16 }
   0x2   :  { %23071 = sst [smem:[#allocation41_spill]] %s23021_s1  ;;  %24 = vst [vmem:[#allocation2] sm:$0x1] %v23_v0 }
   0x3   :  { %23072 = sst [smem:[#allocation42_spill]] %s23022_s2 }
   0x4   :  { %23073 = sst [smem:[#allocation43_spill]] %s23024_s4 }
   0x5   :  { %23074 = sst [smem:[#allocation44_spill]] %s23027_s7 }
   0x6   :  { %23075 = sst [smem:[#allocation45_spill]] %s23029_s9 }
   0x7   :  { %23076 = sst [smem:[#allocation46_spill]] %s23038_s18 }
   0x8   :  { %25 = vsyncpa [#allocation4], 0 }
   0x9   :  { %26 = vsyncpa [#allocation6], 0 }
   0xa   :  { %27 = vsyncpa [#allocation9], 0 }
   0xb   :  { %28 = vsyncpa [#allocation12], 0 }
   0xc   :  { %29 = vsyncpa [#allocation15], 0 }
   0xd   :  { %30 = vsyncpa [#allocation18], 0  ;;  %s21360_s29 = smov 0  }
   0xe LB: > { %23077 = sst [smem:[#allocation25_spill]] %s21235_s29  ;;  %s21366_s30 = sadd.s32 4294967295, %s21235_s29   ;;  %s21235_s29 = sphi %s21360_s29, %s36_s29  }
   0xf   : > { %p16277_p0 = scmp.ge.s32.totalorder %s21235_s29, 1  ;;  %p450_p1 = scmp.lt.s32.totalorder %s21235_s29, 3 }
  0x10   : > { %p23047_p2 = scmp.eq.s32.totalorder %s21366_s30, 0  ;;  %s21237_s0 = smov [#allocation5]  }
  0x11   : > { %p21371_p3 = pnand %p16277_p0, %p450_p1  ;;  %s481_s19 = sshll.u32 %s21237_s0, 4  ;;  %s21375_s19 = int_to_ptr.vmem [resolvable:$true] %s481_s19 }
  0x12   : > { %s21238_s1 = smov [#allocation8]   ;;  %s21239_s22 = smov [#allocation11]  }
  0x13   : > { %s23078_s16 = scalar_select %p21371_p3, 1, 0 }
  0x14   : > { %p20825_p4 = pneg %p21371_p3  ;;  %s510_s20 = sshll.u32 %s21238_s1, 4  ;;  %s21379_s20 = int_to_ptr.vmem [resolvable:$true] %s510_s20 }
  0x15   : > { %s542_s2 = sshll.u32 %s21239_s22, 4  ;;  %s23080_s4 = sld [smem:[#allocation43_spill]]  ;;  %s21387_s2 = int_to_ptr.vmem [resolvable:$true] %s542_s2 }
  0x16   : > { %p21383_p5 = pnand %p23047_p2, %p20825_p4 }
  0x18   : > { %p21397_p7 = pneg %p21383_p5 }
  0x1b   : > { %s20925_s25 = scalar_lea.hbm %s23080_s4, 6656 }
  0x1c   : > { %p20926_p6 = scmp.ne.s32.totalorder %s23080_s4, %s20925_s25  ;;  %p20932_p10 = scmp.lt.u32.totalorder %s20925_s25, %s23080_s4 }
  0x1e   : > { %p20928_p8 = pnand %p21397_p7, %p20926_p6 }
  0x20   : > { %p20929_p9 = pneg %p20928_p8 }
  0x22   : > { %p20934_p11 = pnand %p20932_p10, %p20929_p9 }
  0x24   : > { %20937 = shalt.err (!%p20934_p11)
}
  0x25   : > { %s20938_s22 = scalar_lea.vmem %s21375_s19, 6656  ;;  %p20946_p1 = scmp.lt.s32.totalorder %s21375_s19, %s21375_s19 }
  0x26   : > { %p20939_p12 = scmp.ne.s32.totalorder %s21375_s19, %s20938_s22  ;;  %p20947_p4 = scmp.lt.s32.totalorder %s20938_s22, %s20938_s22 }
  0x28   : > { %p20941_p13 = pnand %p20939_p12, %p21397_p7  ;;  %p20948_p6 = por %p20947_p4, %p20946_p1 }
  0x2a   : > { %p20942_p0 = pneg %p20941_p13 }
  0x2c   : > { %p20949_p8 = pnand %p20948_p6, %p20942_p0 }
  0x2e   : > { %20952 = shalt.err (!%p20949_p8)
}
  0x2f   : > { %s23043_s23 = smov 128   ;;  %s23045_s24 = smov 8  }
  0x30   : > { %20831 = dma.hbm_to_vmem [thread:$0]  (!%p21383_p5), %s23080_s4, 6656, %s21375_s19, [#allocation6], %s23043_s23, %s23043_s23, %s23045_s24  }
  0x31   : > { %s23082_s7 = sld [smem:[#allocation44_spill]] }
  0x37   : > { %s20953_s1 = scalar_lea.hbm %s23082_s7, 4608 }
  0x38   : > { %p20954_p9 = scmp.ne.s32.totalorder %s23082_s7, %s20953_s1  ;;  %p20960_p12 = scmp.lt.u32.totalorder %s20953_s1, %s23082_s7 }
  0x3a   : > { %p20956_p10 = pnand %p20954_p9, %p21397_p7 }
  0x3c   : > { %p20957_p11 = pneg %p20956_p10 }
  0x3e   : > { %p20962_p13 = pnand %p20960_p12, %p20957_p11 }
  0x40   : > { %20965 = shalt.err (!%p20962_p13)
}
  0x41   : > { %s20966_s19 = scalar_lea.vmem %s21379_s20, 4608  ;;  %p20974_p6 = scmp.lt.s32.totalorder %s21379_s20, %s21379_s20 }
  0x42   : > { %p20967_p0 = scmp.ne.s32.totalorder %s21379_s20, %s20966_s19  ;;  %p20975_p8 = scmp.lt.s32.totalorder %s20966_s19, %s20966_s19 }
  0x44   : > { %p20969_p1 = pnand %p20967_p0, %p21397_p7  ;;  %p20976_p9 = por %p20975_p8, %p20974_p6 }
  0x46   : > { %p20970_p4 = pneg %p20969_p1 }
  0x48   : > { %p20977_p10 = pnand %p20976_p9, %p20970_p4 }
  0x4a   : > { %20980 = shalt.err (!%p20977_p10)
}
  0x4b   : > { %20837 = dma.hbm_to_vmem [thread:$0]  (!%p21383_p5), %s23082_s7, 4608, %s21379_s20, [#allocation9], %s23043_s23, %s23043_s23, %s23045_s24  }
  0x4c   : > { %s20981_s26 = scalar_lea.hbm %s23031_s11, 576 }
  0x4d   : > { %p20982_p11 = scmp.ne.s32.totalorder %s23031_s11, %s20981_s26  ;;  %p20988_p0 = scmp.lt.u32.totalorder %s20981_s26, %s23031_s11 }
  0x4f   : > { %p20984_p12 = pnand %p20982_p11, %p21397_p7 }
  0x51   : > { %p20985_p13 = pneg %p20984_p12 }
  0x53   : > { %p20990_p1 = pnand %p20988_p0, %p20985_p13 }
  0x55   : > { %20993 = shalt.err (!%p20990_p1)
}
  0x56   : > { %s20994_s20 = scalar_lea.vmem %s21387_s2, 576  ;;  %p21002_p9 = scmp.lt.s32.totalorder %s21387_s2, %s21387_s2 }
  0x57   : > { %p20995_p4 = scmp.ne.s32.totalorder %s21387_s2, %s20994_s20  ;;  %p21003_p10 = scmp.lt.s32.totalorder %s20994_s20, %s20994_s20 }
  0x59   : > { %p20997_p6 = pnand %p20995_p4, %p21397_p7  ;;  %p21004_p11 = por %p21003_p10, %p21002_p9 }
  0x5b   : > { %p20998_p8 = pneg %p20997_p6 }
  0x5d   : > { %p21005_p12 = pnand %p21004_p11, %p20998_p8 }
  0x5f   : > { %21008 = shalt.err (!%p21005_p12)
}
  0x60   : > { %s21242_s19 = smov 64   ;;  %s21243_s9 = smov 4  }
  0x61   : > { %20843 = dma.hbm_to_vmem [thread:$0]  (!%p21383_p5), %s23031_s11, 576, %s21387_s2, [#allocation12], %s21242_s19, %s21242_s19, %s21243_s9  }
  0x62   : > { %s21244_s25 = smov [#allocation14]   ;;  %s21009_s1 = scalar_lea.hbm %s23034_s14, 25600 }
  0x63   : > { %s571_s26 = sshll.u32 %s21244_s25, 4  ;;  %p21010_p13 = scmp.ne.s32.totalorder %s23034_s14, %s21009_s1  ;;  %s572_s26 = int_to_ptr.vmem [resolvable:$true] %s571_s26 }
  0x64   : > { %p21016_p4 = scmp.lt.u32.totalorder %s21009_s1, %s23034_s14 }
  0x65   : > { %p21012_p0 = pnand %p21010_p13, %p21397_p7 }
  0x67   : > { %p21013_p1 = pneg %p21012_p0 }
  0x69   : > { %p21018_p6 = pnand %p21016_p4, %p21013_p1 }
  0x6b   : > { %21021 = shalt.err (!%p21018_p6)
}
  0x6c   : > { %s21022_s2 = scalar_lea.vmem %s572_s26, 25600  ;;  %p21030_p11 = scmp.lt.s32.totalorder %s572_s26, %s572_s26 }
  0x6d   : > { %p21023_p8 = scmp.ne.s32.totalorder %s572_s26, %s21022_s2  ;;  %p21031_p12 = scmp.lt.s32.totalorder %s21022_s2, %s21022_s2 }
  0x6f   : > { %p21025_p9 = pnand %p21023_p8, %p21397_p7  ;;  %p21032_p2 = por %p21031_p12, %p21030_p11 }
  0x71   : > { %p21026_p10 = pneg %p21025_p9 }
  0x73   : > { %p21033_p3 = pnand %p21032_p2, %p21026_p10 }
  0x75   : > { %21036 = shalt.err (!%p21033_p3)
}
  0x76   : > { %s21245_s19 = smov 256   ;;  %s21246_s9 = smov 16  }
  0x77   : > { %20849 = dma.hbm_to_vmem [thread:$0]  (!%p21383_p5), %s23034_s14, 25600, %s572_s26, [#allocation15], %s21245_s19, %s21245_s19, %s21246_s9  }
  0x78   : > { %s21247_s18 = smov [#allocation3]   ;;  %s21248_s25 = smov [#allocation7]  }
  0x79   : > { %s468_s29 = sshll.u32 %s21247_s18, 4  ;;  %s494_s27 = sshll.u32 %s21248_s25, 4  ;;  %s469_s29 = int_to_ptr.vmem [resolvable:$true] %s468_s29  ;;  %s495_s27 = int_to_ptr.vmem [resolvable:$true] %s494_s27 }
  0x7a   : > { %s21037_s22 = scalar_lea.hbm %s23023_s3, 112896 }
  0x7b   : > { %p21038_p2 = scmp.ne.s32.totalorder %s23023_s3, %s21037_s22  ;;  %p21044_p0 = scmp.lt.u32.totalorder %s21037_s22, %s23023_s3 }
  0x7d   : > { %p21040_p3 = pnand %p21038_p2, %p21397_p7 }
  0x7f   : > { %p21041_p13 = pneg %p21040_p3 }
  0x81   : > { %p21046_p1 = pnand %p21044_p0, %p21041_p13 }
  0x83   : > { %21049 = shalt.err (!%p21046_p1)
}
  0x84   : > { %s21050_s26 = scalar_lea.vmem %s469_s29, 112896  ;;  %p21058_p9 = scmp.lt.s32.totalorder %s469_s29, %s469_s29 }
  0x85   : > { %p21051_p4 = scmp.ne.s32.totalorder %s469_s29, %s21050_s26  ;;  %p21059_p10 = scmp.lt.s32.totalorder %s21050_s26, %s21050_s26 }
  0x87   : > { %p21053_p6 = pnand %p21051_p4, %p21397_p7  ;;  %p21060_p11 = por %p21059_p10, %p21058_p9 }
  0x89   : > { %p21054_p8 = pneg %p21053_p6 }
  0x8b   : > { %p21061_p12 = pnand %p21060_p11, %p21054_p8 }
  0x8d   : > { %21064 = shalt.err (!%p21061_p12)
}
  0x8e   : > { %s23083_s19 = smov 8   ;;  %s23084_s23 = smov 128  }
  0x8f   : > { %20828 = dma.hbm_to_vmem [thread:$0]  (!%p21383_p5), %s23023_s3, 112896, %s469_s29, [#allocation4], %s23084_s23, %s23084_s23, %s23083_s19  }
  0x90   : > { %s21065_s25 = scalar_lea.hbm %s23025_s5, 1152 }
  0x91   : > { %p21066_p2 = scmp.ne.s32.totalorder %s23025_s5, %s21065_s25  ;;  %p21072_p0 = scmp.lt.u32.totalorder %s21065_s25, %s23025_s5 }
  0x93   : > { %p21068_p3 = pnand %p21066_p2, %p21397_p7 }
  0x95   : > { %p21069_p13 = pneg %p21068_p3 }
  0x97   : > { %p21074_p1 = pnand %p21072_p0, %p21069_p13 }
  0x99   : > { %21077 = shalt.err (!%p21074_p1)
}
  0x9a   : > { %s21078_s2 = scalar_lea.vmem %s495_s27, 1152  ;;  %p21086_p9 = scmp.lt.s32.totalorder %s495_s27, %s495_s27 }
  0x9b   : > { %p21079_p4 = scmp.ne.s32.totalorder %s495_s27, %s21078_s2  ;;  %p21087_p10 = scmp.lt.s32.totalorder %s21078_s2, %s21078_s2 }
  0x9d   : > { %p21081_p6 = pnand %p21079_p4, %p21397_p7  ;;  %p21088_p11 = por %p21087_p10, %p21086_p9 }
  0x9f   : > { %p21082_p8 = pneg %p21081_p6 }
  0xa1   : > { %p21089_p12 = pnand %p21088_p11, %p21082_p8 }
  0xa3   : > { %21092 = shalt.err (!%p21089_p12)
}
  0xa4   : > { %20834 = dma.hbm_to_vmem [thread:$0]  (!%p21383_p5), %s23025_s5, 1152, %s495_s27, [#allocation6], %s23084_s23, %s23084_s23, %s23083_s19  }
  0xa5   : > { %s21249_s4 = smov [#allocation10]   ;;  %s21250_s24 = smov [#allocation13]  }
  0xa6   : > { %s523_s7 = sshll.u32 %s21249_s4, 4  ;;  %s555_s18 = sshll.u32 %s21250_s24, 4  ;;  %s524_s7 = int_to_ptr.vmem [resolvable:$true] %s523_s7  ;;  %s556_s18 = int_to_ptr.vmem [resolvable:$true] %s555_s18 }
  0xa7   : > { %s21093_s1 = scalar_lea.hbm %s23028_s8, 1024 }
  0xa8   : > { %p21094_p2 = scmp.ne.s32.totalorder %s23028_s8, %s21093_s1  ;;  %p21100_p0 = scmp.lt.u32.totalorder %s21093_s1, %s23028_s8 }
  0xaa   : > { %p21096_p3 = pnand %p21094_p2, %p21397_p7 }
  0xac   : > { %p21097_p13 = pneg %p21096_p3 }
  0xae   : > { %p21102_p1 = pnand %p21100_p0, %p21097_p13 }
  0xb0   : > { %21105 = shalt.err (!%p21102_p1)
}
  0xb1   : > { %s21106_s27 = scalar_lea.vmem %s524_s7, 1024  ;;  %p21114_p9 = scmp.lt.s32.totalorder %s524_s7, %s524_s7 }
  0xb2   : > { %p21107_p4 = scmp.ne.s32.totalorder %s524_s7, %s21106_s27  ;;  %p21115_p10 = scmp.lt.s32.totalorder %s21106_s27, %s21106_s27 }
  0xb4   : > { %p21109_p6 = pnand %p21107_p4, %p21397_p7  ;;  %p21116_p11 = por %p21115_p10, %p21114_p9 }
  0xb6   : > { %p21110_p8 = pneg %p21109_p6 }
  0xb8   : > { %p21117_p12 = pnand %p21116_p11, %p21110_p8 }
  0xba   : > { %21120 = shalt.err (!%p21117_p12)
}
  0xbb   : > { %20840 = dma.hbm_to_vmem [thread:$0]  (!%p21383_p5), %s23028_s8, 1024, %s524_s7, [#allocation9], %s23084_s23, %s23084_s23, %s23083_s19  }
  0xbc   : > { %s21121_s0 = scalar_lea.hbm %s23032_s12, 3200 }
  0xbd   : > { %p21122_p2 = scmp.ne.s32.totalorder %s23032_s12, %s21121_s0  ;;  %p21128_p0 = scmp.lt.u32.totalorder %s21121_s0, %s23032_s12 }
  0xbf   : > { %p21124_p3 = pnand %p21122_p2, %p21397_p7 }
  0xc1   : > { %p21125_p13 = pneg %p21124_p3 }
  0xc3   : > { %p21130_p1 = pnand %p21128_p0, %p21125_p13 }
  0xc5   : > { %21133 = shalt.err (!%p21130_p1)
}
  0xc6   : > { %s21134_s29 = scalar_lea.vmem %s556_s18, 3200  ;;  %p21142_p9 = scmp.lt.s32.totalorder %s556_s18, %s556_s18 }
  0xc7   : > { %p21135_p4 = scmp.ne.s32.totalorder %s556_s18, %s21134_s29  ;;  %p21143_p10 = scmp.lt.s32.totalorder %s21134_s29, %s21134_s29 }
  0xc9   : > { %p21137_p6 = pnand %p21135_p4, %p21397_p7  ;;  %p21144_p11 = por %p21143_p10, %p21142_p9 }
  0xcb   : > { %p21138_p8 = pneg %p21137_p6 }
  0xcd   : > { %p21145_p12 = pnand %p21144_p11, %p21138_p8 }
  0xcf   : > { %21148 = shalt.err (!%p21145_p12)
}
  0xd0   : > { %20846 = dma.hbm_to_vmem [thread:$0]  (!%p21383_p5), %s23032_s12, 3200, %s556_s18, [#allocation12], %s23084_s23, %s23084_s23, %s23083_s19  }
  0xd1   : > { %s21251_s26 = smov [#allocation16]   ;;  %s21149_s0 = scalar_lea.hbm %s23035_s15, 64 }
  0xd2   : > { %s584_s4 = sshll.u32 %s21251_s26, 4  ;;  %p21150_p2 = scmp.ne.s32.totalorder %s23035_s15, %s21149_s0  ;;  %s585_s4 = int_to_ptr.vmem [resolvable:$true] %s584_s4 }
  0xd3   : > { %p21156_p0 = scmp.lt.u32.totalorder %s21149_s0, %s23035_s15 }
  0xd4   : > { %p21152_p3 = pnand %p21150_p2, %p21397_p7 }
  0xd6   : > { %p21153_p13 = pneg %p21152_p3 }
  0xd8   : > { %p21158_p1 = pnand %p21156_p0, %p21153_p13 }
  0xda   : > { %21161 = shalt.err (!%p21158_p1)
}
  0xdb   : > { %s21162_s19 = scalar_lea.vmem %s585_s4, 64  ;;  %p21170_p9 = scmp.lt.s32.totalorder %s585_s4, %s585_s4 }
  0xdc   : > { %p21163_p4 = scmp.ne.s32.totalorder %s585_s4, %s21162_s19  ;;  %p21171_p10 = scmp.lt.s32.totalorder %s21162_s19, %s21162_s19 }
  0xde   : > { %p21165_p6 = pnand %p21163_p4, %p21397_p7  ;;  %p21172_p11 = por %p21171_p10, %p21170_p9 }
  0xe0   : > { %p21166_p8 = pneg %p21165_p6 }
  0xe2   : > { %p21173_p12 = pnand %p21172_p11, %p21166_p8 }
  0xe4   : > { %21176 = shalt.err (!%p21173_p12)
}
  0xe5   : > { %s21252_s23 = smov 1   ;;  %s21253_s7 = smov [#allocation17]  }
  0xe6   : > { %20852 = dma.hbm_to_vmem [thread:$0]  (!%p21383_p5), %s23035_s15, 64, %s585_s4, [#allocation15], %s21246_s9, %s21246_s9, %s21252_s23  }
  0xe7   : > { %s600_s27 = sshll.u32 %s21253_s7, 4  ;;  %s21177_s25 = scalar_lea.hbm %s23037_s17, 103936  ;;  %s601_s27 = int_to_ptr.vmem [resolvable:$true] %s600_s27 }
  0xe8   : > { %p21178_p2 = scmp.ne.s32.totalorder %s23037_s17, %s21177_s25  ;;  %p21184_p0 = scmp.lt.u32.totalorder %s21177_s25, %s23037_s17 }
  0xea   : > { %p21180_p3 = pnand %p21178_p2, %p21397_p7 }
  0xec   : > { %p21181_p13 = pneg %p21180_p3 }
  0xee   : > { %p21186_p1 = pnand %p21184_p0, %p21181_p13 }
  0xf0   : > { %21189 = shalt.err (!%p21186_p1)
}
  0xf1   : > { %s21190_s9 = scalar_lea.vmem %s601_s27, 103936  ;;  %p21198_p9 = scmp.lt.s32.totalorder %s601_s27, %s601_s27 }
  0xf2   : > { %p21191_p4 = scmp.ne.s32.totalorder %s601_s27, %s21190_s9  ;;  %p21199_p10 = scmp.lt.s32.totalorder %s21190_s9, %s21190_s9 }
  0xf4   : > { %p21193_p6 = pnand %p21191_p4, %p21397_p7  ;;  %p21200_p11 = por %p21199_p10, %p21198_p9 }
  0xf6   : > { %p21194_p8 = pneg %p21193_p6 }
  0xf8   : > { %p21201_p12 = pnand %p21200_p11, %p21194_p8 }
  0xfa   : > { %21204 = shalt.err (!%p21201_p12)
}
  0xfb   : > { %s21254_s4 = smov 896   ;;  %s21255_s2 = smov 56  }
  0xfc   : > { %20855 = dma.hbm_to_vmem [thread:$0]  (!%p21383_p5), %s23037_s17, 103936, %s601_s27, [#allocation18], %s21254_s4, %s21254_s4, %s21255_s2  }
  0xfd   : > { %p23085_p2 = scmp.ne.s32.totalorder %s23078_s16, 0 }
  0xff   : > { %623 = sbr.rel (%p23085_p2) target bundleno = 8528 (0x2150), region = 92 }
 0x106   : > { %p23086_p3 = scmp.eq.s32.totalorder %s21366_s30, 0 }
 0x108   : > { %21210 = dma.done.wait (%p23086_p3), [#allocation4], 112896   ;;  %p23087_p7 = pmov %p23086_p3 }
 0x109   : > { %p23088_p13 = pmov %p23086_p3 }
 0x10a   : > { %21212 = vsyncadd (%p23087_p7), [#allocation4], 4294854400 }
 0x10b   : > { %21214 = dma.done.wait (%p23088_p13), [#allocation6], 7808   ;;  %p23089_p0 = pmov %p23086_p3 }
 0x10d   : > { %21216 = vsyncadd (%p23089_p0), [#allocation6], 4294959488  ;;  %p23090_p1 = pmov %p23089_p0 }
 0x10e   : > { %p23091_p5 = pmov %p23089_p0 }
 0x10f   : > { %21218 = dma.done.wait (%p23090_p1), [#allocation9], 5632  }
 0x110   : > { %21220 = vsyncadd (%p23091_p5), [#allocation9], 4294961664  ;;  %p23092_p4 = pmov %p23089_p0 }
 0x111   : > { %p23093_p6 = pmov %p23089_p0 }
 0x112   : > { %21222 = dma.done.wait (%p23092_p4), [#allocation12], 3776  }
 0x113   : > { %21224 = vsyncadd (%p23093_p6), [#allocation12], 4294963520  ;;  %p23094_p8 = pmov %p23089_p0 }
 0x114   : > { %p23095_p9 = pmov %p23089_p0 }
 0x115   : > { %21226 = dma.done.wait (%p23094_p8), [#allocation15], 25664  }
 0x116   : > { %21228 = vsyncadd (%p23095_p9), [#allocation15], 4294941632  ;;  %p23096_p10 = pmov %p23089_p0 }
 0x117   : > { %p23097_p11 = pmov %p23089_p0 }
 0x118   : > { %21230 = dma.done.wait (%p23096_p10), [#allocation18], 103936  }
 0x119   : > { %21232 = vsyncadd (%p23097_p11), [#allocation18], 4294863360  ;;  %v736_v1 = vld [vmem:[#allocation3 + $0x80] sm:$0xff]  ;;  %v737_v2 = vld [vmem:[#allocation3 + $0x88] sm:$0xff]  ;;  %p711_p12 = scmp.lt.s32.totalorder %s21366_s30, 1  ;;  %v23049_v48 = vlaneseq  ;;  %s23099_s18 = sld [smem:[#allocation40_spill]] }
 0x11a   : > { %v768_v3 = vld [vmem:[#allocation3 + $0x180] sm:$0xff]  ;;  %v18376_v4 = vpack.c.bf16 %v737_v2, %v736_v1  ;;  %v769_v5 = vld [vmem:[#allocation3 + $0x188] sm:$0xff]  ;;  %v738_v12 = vld [vmem:[#allocation3 + $0x90] sm:$0xff]  ;;  %vm21257_vm0 = vmmov 0   ;;  %vm853_vm1 = vcmask 130048   ;;  %s23100_s26 = sld [smem:[#allocation41_spill]] }
 0x11b   : > { %v720_v6 = vld [vmem:[#allocation3] sm:$0xff]  ;;  %v721_v7 = vld [vmem:[#allocation3 + $0x8] sm:$0xff]  ;;  %v18408_v8 = vpack.c.bf16 %v769_v5, %v768_v3  ;;  %v739_v14 = vld [vmem:[#allocation3 + $0x98] sm:$0xff]  ;;  %s23171_s30 = smov (!%p711_p12, %s21366_s30), 1  ;;  %v21645_v62 = vshrl.u32 %v23049_v48, 7  ;;  %vm1520_vm2 = vcmask 7168  }
 0x11c   : > { %v18378_v9 = vpack.c.bf16 %v721_v7, %v720_v6  ;;  %v752_v10 = vld [vmem:[#allocation3 + $0x100] sm:$0xff]  ;;  %v753_v11 = vld [vmem:[#allocation3 + $0x108] sm:$0xff]  ;;  %18377 = vmatprep.subr.bf16.mxu0 %v18376_v4  ;;  %v770_v15 = vld [vmem:[#allocation3 + $0x190] sm:$0xff]  ;;  %v18380_v17 = vpack.c.bf16 %v739_v14, %v738_v12  ;;  %s20784_s16 = smul.u32 7, %s23171_s30  ;;  %vm1527_vm3 = vcmask 1040384   ;;  %s23101_s24 = sld [smem:[#allocation42_spill]] }
 0x11d   : > { %v18410_v13 = vpack.c.bf16 %v753_v11, %v752_v10  ;;  %v771_v16 = vld [vmem:[#allocation3 + $0x198] sm:$0xff]  ;;  %18409 = vmatprep.subr.bf16.mxu1 %v18408_v8  ;;  %v722_v19 = vld [vmem:[#allocation3 + $0x10] sm:$0xff]  ;;  %v740_v24 = vld [vmem:[#allocation3 + $0xa0] sm:$0xff]  ;;  %23098 = vst [vmem:[#allocation26_spill] sm:$0xff] %v21645_v62  ;;  %v825_v11 = vsub.s32 1, %v21645_v62  ;;  %v833_v12 = vsub.s32 3, %v21645_v62 }
 0x11e   : > { %18379 = vmatpush3.bf16.msra.mxu0 %v18378_v9  ;;  %v18412_v18 = vpack.c.bf16 %v771_v16, %v770_v15  ;;  %v723_v20 = vld [vmem:[#allocation3 + $0x18] sm:$0xff]  ;;  %v754_v21 = vld [vmem:[#allocation3 + $0x110] sm:$0xff]  ;;  %v741_v25 = vld [vmem:[#allocation3 + $0xa8] sm:$0xff]  ;;  %vm5002_vm4 = vcmask 1043456   ;;  %vm4995_vm5 = vcmask 818176   ;;  %vm21260_vm6 = vmmov 1  }
 0x11f   : > { %18411 = vmatpush3.bf16.msra.mxu1 %v18410_v13  ;;  %v18382_v22 = vpack.c.bf16 %v723_v20, %v722_v19  ;;  %v755_v23 = vld [vmem:[#allocation3 + $0x118] sm:$0xff]  ;;  %18381 = vmatprep.subr.bf16.mxu0 %v18380_v17  ;;  %v18384_v27 = vpack.c.bf16 %v741_v25, %v740_v24  ;;  %v772_v28 = vld [vmem:[#allocation3 + $0x1a0] sm:$0xff]  ;;  %v773_v29 = vld [vmem:[#allocation3 + $0x1a8] sm:$0xff]  ;;  %s714_s29 = scalar_lea.vmem %s23099_s18, %s20784_s16  ;;  %vm5367_vm8 = vcmask 203776   ;;  %vm6807_vm9 = vcmask 72704   ;;  %s23104_s7 = sld [smem:[#allocation45_spill]] }
 0x120   : > { %18413 = vmatprep.subr.bf16.mxu1 %v18412_v18  ;;  %v18414_v26 = vpack.c.bf16 %v755_v23, %v754_v21  ;;  %v724_v30 = vld [vmem:[#allocation3 + $0x20] sm:$0xff]  ;;  %v18416_v31 = vpack.c.bf16 %v773_v29, %v772_v28  ;;  %v725_v32 = vld [vmem:[#allocation3 + $0x28] sm:$0xff]  ;;  %v742_v36 = vld [vmem:[#allocation3 + $0xb0] sm:$0xff]  ;;  %vm7116_vm10 = vcmask 31744   ;;  %vm7273_vm11 = vcmask 64512   ;;  %s23167_s9 = sld [smem:[#allocation46_spill]] }
 0x121   : > { %v756_v33 = vld [vmem:[#allocation3 + $0x120] sm:$0xff]  ;;  %v757_v34 = vld [vmem:[#allocation3 + $0x128] sm:$0xff]  ;;  %v18386_v35 = vpack.c.bf16 %v725_v32, %v724_v30  ;;  %v743_v37 = vld [vmem:[#allocation3 + $0xb8] sm:$0xff]  ;;  %vm13042_vm12 = vcmask 793600  }
 0x122   : > { %18383 = vmatpush3.bf16.msra.mxu0 %v18382_v22  ;;  %v774_v38 = vld [vmem:[#allocation3 + $0x1b0] sm:$0xff]  ;;  %v18418_v39 = vpack.c.bf16 %v757_v34, %v756_v33  ;;  %v18388_v40 = vpack.c.bf16 %v743_v37, %v742_v36  ;;  %v775_v41 = vld [vmem:[#allocation3 + $0x1b8] sm:$0xff]  ;;  %v744_v47 = vld [vmem:[#allocation3 + $0xc0] sm:$0xff] }
 0x123   : > { %18415 = vmatpush3.bf16.msra.mxu1 %v18414_v26  ;;  %18385 = vmatprep.subr.bf16.mxu0 %v18384_v27  ;;  %v726_v42 = vld [vmem:[#allocation3 + $0x30] sm:$0xff]  ;;  %v727_v43 = vld [vmem:[#allocation3 + $0x38] sm:$0xff]  ;;  %v18420_v44 = vpack.c.bf16 %v775_v41, %v774_v38  ;;  %v745_v49 = vld [vmem:[#allocation3 + $0xc8] sm:$0xff] }
 0x124   : > { %18417 = vmatprep.subr.bf16.mxu1 %v18416_v31  ;;  %v758_v45 = vld [vmem:[#allocation3 + $0x130] sm:$0xff]  ;;  %v759_v46 = vld [vmem:[#allocation3 + $0x138] sm:$0xff]  ;;  %v776_v50 = vld [vmem:[#allocation3 + $0x1c0] sm:$0xff]  ;;  %v18390_v52 = vpack.c.bf16 %v727_v43, %v726_v42  ;;  %v18392_v54 = vpack.c.bf16 %v745_v49, %v744_v47 }
 0x125   : > { %v777_v51 = vld [vmem:[#allocation3 + $0x1c8] sm:$0xff]  ;;  %v18422_v53 = vpack.c.bf16 %v759_v46, %v758_v45  ;;  %v728_v55 = vld [vmem:[#allocation3 + $0x40] sm:$0xff]  ;;  %v746_v60 = vld [vmem:[#allocation3 + $0xd0] sm:$0xff] }
 0x126   : > { %18387 = vmatpush3.bf16.msra.mxu0 %v18386_v35  ;;  %v729_v56 = vld [vmem:[#allocation3 + $0x48] sm:$0xff]  ;;  %v760_v57 = vld [vmem:[#allocation3 + $0x140] sm:$0xff]  ;;  %v18424_v58 = vpack.c.bf16 %v777_v51, %v776_v50  ;;  %v747_v61 = vld [vmem:[#allocation3 + $0xd8] sm:$0xff]  ;;  %s718_s4 = scalar_lea.vmem %s23167_s9, %s20784_s16 }
 0x127   : > { %18419 = vmatpush3.bf16.msra.mxu1 %v18418_v39  ;;  %18389 = vmatprep.subr.bf16.mxu0 %v18388_v40  ;;  %v761_v59 = vld [vmem:[#allocation3 + $0x148] sm:$0xff]  ;;  %v778_v63 = vld [vmem:[#allocation3 + $0x1d0] sm:$0xff]  ;;  %v779_v0 = vld [vmem:[#allocation3 + $0x1d8] sm:$0xff]  ;;  %v18394_v1 = vpack.c.bf16 %v729_v56, %v728_v55  ;;  %v18396_v3 = vpack.c.bf16 %v747_v61, %v746_v60  ;;  %v23050_v40 = vsub.s32 0, %v21645_v62  ;;  %v841_v55 = vsub.s32 5, %v21645_v62 }
 0x128   : > { %18421 = vmatprep.subr.bf16.mxu1 %v18420_v44  ;;  %v18426_v2 = vpack.c.bf16 %v761_v59, %v760_v57  ;;  %v730_v4 = vld [vmem:[#allocation3 + $0x50] sm:$0xff]  ;;  %v731_v5 = vld [vmem:[#allocation3 + $0x58] sm:$0xff]  ;;  %v18428_v7 = vpack.c.bf16 %v779_v0, %v778_v63  ;;  %v748_v9 = vld [vmem:[#allocation3 + $0xe0] sm:$0xff]  ;;  %v829_v44 = vsub.s32 2, %v21645_v62 }
 0x129   : > { %v762_v6 = vld [vmem:[#allocation3 + $0x150] sm:$0xff]  ;;  %v763_v8 = vld [vmem:[#allocation3 + $0x158] sm:$0xff]  ;;  %v749_v10 = vld [vmem:[#allocation3 + $0xe8] sm:$0xff]  ;;  %v18398_v15 = vpack.c.bf16 %v731_v5, %v730_v4 }
 0x12a   : > { %18391 = vmatpush3.bf16.msra.mxu0 %v18390_v52  ;;  %v780_v13 = vld [vmem:[#allocation3 + $0x1e0] sm:$0xff]  ;;  %v781_v14 = vld [vmem:[#allocation3 + $0x1e8] sm:$0xff]  ;;  %v18430_v17 = vpack.c.bf16 %v763_v8, %v762_v6  ;;  %v18400_v18 = vpack.c.bf16 %v749_v10, %v748_v9  ;;  %v750_v24 = vld [vmem:[#allocation3 + $0xf0] sm:$0xff] }
 0x12b   : > { %18423 = vmatpush3.bf16.msra.mxu1 %v18422_v53  ;;  %18393 = vmatprep.subr.bf16.mxu0 %v18392_v54  ;;  %v732_v16 = vld [vmem:[#allocation3 + $0x60] sm:$0xff]  ;;  %v733_v19 = vld [vmem:[#allocation3 + $0x68] sm:$0xff]  ;;  %v18432_v22 = vpack.c.bf16 %v781_v14, %v780_v13  ;;  %v751_v25 = vld [vmem:[#allocation3 + $0xf8] sm:$0xff] }
 0x12c   : > { %18425 = vmatprep.subr.bf16.mxu1 %v18424_v58  ;;  %v764_v20 = vld [vmem:[#allocation3 + $0x160] sm:$0xff]  ;;  %v765_v23 = vld [vmem:[#allocation3 + $0x168] sm:$0xff]  ;;  %v782_v28 = vld [vmem:[#allocation3 + $0x1f0] sm:$0xff]  ;;  %v18402_v30 = vpack.c.bf16 %v733_v19, %v732_v16  ;;  %v18404_v32 = vpack.c.bf16 %v751_v25, %v750_v24 }
 0x12d   : > { %v21654_v21 = vld [vmem:[%s714_s29] sm:$0x7f]  ;;  %v18434_v31 = vpack.c.bf16 %v765_v23, %v764_v20  ;;  %v734_v33 = vld [vmem:[#allocation3 + $0x70] sm:$0xff]  ;;  %v801_v39 = vld [vmem:[#allocation3 + $0x288] sm:$0xff] }
 0x12e   : > { %18395 = vmatpush3.bf16.msra.mxu0 %v18394_v1  ;;  %v21657_v26 = vrot.slane %v21654_v21, %v825_v11  ;;  %v21660_v27 = vrot.slane %v21654_v21, %v833_v12  ;;  %v783_v29 = vld [vmem:[#allocation3 + $0x1f8] sm:$0xff]  ;;  %v766_v35 = vld [vmem:[#allocation3 + $0x170] sm:$0xff]  ;;  %v800_v38 = vld [vmem:[#allocation3 + $0x280] sm:$0xff]  ;;  %v21670_v56 = vrot.slane %v21654_v21, %v23050_v40  ;;  %v21673_v59 = vrot.slane %v21654_v21, %v829_v44 }
 0x12f   : > { %18427 = vmatpush3.bf16.msra.mxu1 %v18426_v2  ;;  %18397 = vmatprep.subr.bf16.mxu0 %v18396_v3  ;;  %v735_v34 = vld [vmem:[#allocation3 + $0x78] sm:$0xff]  ;;  %v18436_v36 = vpack.c.bf16 %v783_v29, %v782_v28  ;;  %v1155_v41 = vld [vmem:[#allocation3 + $0x390] sm:$0xff]  ;;  %v18440_v46 = vpack.c.bf16 %v801_v39, %v800_v38  ;;  %v784_v47 = vld [vmem:[#allocation3 + $0x200] sm:$0xff] }
 0x130   : > { %18429 = vmatprep.subr.bf16.mxu1 %v18428_v7  ;;  %920 = vmatprep.mubr.f32.mxu0 %v21657_v26  ;;  %v767_v37 = vld [vmem:[#allocation3 + $0x178] sm:$0xff]  ;;  %v18406_v43 = vpack.c.bf16 %v735_v34, %v734_v33  ;;  %v785_v49 = vld [vmem:[#allocation3 + $0x208] sm:$0xff]  ;;  %v802_v50 = vld [vmem:[#allocation3 + $0x290] sm:$0xff]  ;;  %v21676_v7 = vrot.slane %v21654_v21, %v841_v55 }
 0x131   : > { %990 = vmatprep.mubr.f32.mxu1 %v21660_v27  ;;  %v1156_v42 = vld [vmem:[#allocation3 + $0x398] sm:$0xff]  ;;  %v18438_v45 = vpack.c.bf16 %v767_v37, %v766_v35  ;;  %v1139_v53 = vld [vmem:[#allocation3 + $0x310] sm:$0xff]  ;;  %v1157_v57 = vld [vmem:[#allocation3 + $0x3a0] sm:$0xff]  ;;  %v18442_v60 = vpack.c.bf16 %v785_v49, %v784_v47 }
 0x132   : > { %18399 = vmatpush3.bf16.msra.mxu0 %v18398_v15  ;;  %v803_v51 = vld [vmem:[#allocation3 + $0x298] sm:$0xff]  ;;  %v18475_v52 = vpack.c.bf16 %v1156_v42, %v1155_v41  ;;  %v1158_v58 = vld [vmem:[#allocation3 + $0x3a8] sm:$0xff]  ;;  %v786_v63 = vld [vmem:[#allocation3 + $0x210] sm:$0xff] }
 0x133   : > { %18431 = vmatpush3.bf16.msra.mxu1 %v18430_v17  ;;  %18401 = vmatprep.subr.bf16.mxu0 %v18400_v18  ;;  %v1140_v54 = vld [vmem:[#allocation3 + $0x318] sm:$0xff]  ;;  %v18444_v61 = vpack.c.bf16 %v803_v51, %v802_v50  ;;  %v804_v2 = vld [vmem:[#allocation3 + $0x2a0] sm:$0xff]  ;;  %v805_v3 = vld [vmem:[#allocation3 + $0x2a8] sm:$0xff]  ;;  %v18479_v4 = vpack.c.bf16 %v1158_v58, %v1157_v57 }
 0x134   : > { %18433 = vmatprep.subr.bf16.mxu1 %v18432_v22  ;;  %v787_v0 = vld [vmem:[#allocation3 + $0x218] sm:$0xff]  ;;  %v18477_v1 = vpack.c.bf16 %v1140_v54, %v1139_v53  ;;  %v1141_v5 = vld [vmem:[#allocation3 + $0x320] sm:$0xff]  ;;  %v1142_v6 = vld [vmem:[#allocation3 + $0x328] sm:$0xff]  ;;  %v18448_v11 = vpack.c.bf16 %v805_v3, %v804_v2 }
 0x135   : > { %v1159_v8 = vld [vmem:[#allocation3 + $0x3b0] sm:$0xff]  ;;  %v1160_v9 = vld [vmem:[#allocation3 + $0x3b8] sm:$0xff]  ;;  %v18446_v10 = vpack.c.bf16 %v787_v0, %v786_v63  ;;  %v788_v12 = vld [vmem:[#allocation3 + $0x220] sm:$0xff]  ;;  %v18481_v14 = vpack.c.bf16 %v1142_v6, %v1141_v5 }
 0x136   : > { %18403 = vmatpush3.bf16.msra.mxu0 %v18402_v30  ;;  %v789_v13 = vld [vmem:[#allocation3 + $0x228] sm:$0xff]  ;;  %v806_v15 = vld [vmem:[#allocation3 + $0x2b0] sm:$0xff]  ;;  %v807_v16 = vld [vmem:[#allocation3 + $0x2b8] sm:$0xff]  ;;  %v18483_v17 = vpack.c.bf16 %v1160_v9, %v1159_v8 }
 0x137   : > { %18435 = vmatpush3.bf16.msra.mxu1 %v18434_v31  ;;  %18405 = vmatprep.subr.bf16.mxu0 %v18404_v32  ;;  %v1143_v18 = vld [vmem:[#allocation3 + $0x330] sm:$0xff]  ;;  %v1144_v19 = vld [vmem:[#allocation3 + $0x338] sm:$0xff]  ;;  %v1161_v20 = vld [vmem:[#allocation3 + $0x3c0] sm:$0xff]  ;;  %v18450_v23 = vpack.c.bf16 %v789_v13, %v788_v12  ;;  %v18452_v24 = vpack.c.bf16 %v807_v16, %v806_v15 }
 0x138   : > { %18437 = vmatprep.subr.bf16.mxu1 %v18436_v36  ;;  %v1162_v22 = vld [vmem:[#allocation3 + $0x3c8] sm:$0xff]  ;;  %v790_v25 = vld [vmem:[#allocation3 + $0x230] sm:$0xff]  ;;  %v791_v28 = vld [vmem:[#allocation3 + $0x238] sm:$0xff]  ;;  %v18485_v29 = vpack.c.bf16 %v1144_v19, %v1143_v18 }
 0x139   : > { %v808_v30 = vld [vmem:[#allocation3 + $0x2c0] sm:$0xff]  ;;  %v809_v31 = vld [vmem:[#allocation3 + $0x2c8] sm:$0xff]  ;;  %v18487_v32 = vpack.c.bf16 %v1162_v22, %v1161_v20  ;;  %v1163_v35 = vld [vmem:[#allocation3 + $0x3d0] sm:$0xff]  ;;  %v18454_v37 = vpack.c.bf16 %v791_v28, %v790_v25 }
 0x13a   : > { %18407 = vmatpush3.bf16.msra.mxu0 %v18406_v43  ;;  %v1145_v33 = vld [vmem:[#allocation3 + $0x340] sm:$0xff]  ;;  %v1146_v34 = vld [vmem:[#allocation3 + $0x348] sm:$0xff]  ;;  %v1164_v36 = vld [vmem:[#allocation3 + $0x3d8] sm:$0xff]  ;;  %v18456_v38 = vpack.c.bf16 %v809_v31, %v808_v30 }
 0x13b   : > { %18439 = vmatpush3.bf16.msra.mxu1 %v18438_v45  ;;  %18441 = vmatprep.subr.bf16.mxu0 %v18440_v46  ;;  %v792_v39 = vld [vmem:[#allocation3 + $0x240] sm:$0xff]  ;;  %v793_v41 = vld [vmem:[#allocation3 + $0x248] sm:$0xff]  ;;  %v18489_v42 = vpack.c.bf16 %v1146_v34, %v1145_v33  ;;  %v810_v43 = vld [vmem:[#allocation3 + $0x2d0] sm:$0xff]  ;;  %v18491_v45 = vpack.c.bf16 %v1164_v36, %v1163_v35 }
 0x13c   : > { %18476 = vmatprep.subr.bf16.mxu1 %v18475_v52  ;;  %v811_v44 = vld [vmem:[#allocation3 + $0x2d8] sm:$0xff]  ;;  %v1147_v46 = vld [vmem:[#allocation3 + $0x350] sm:$0xff]  ;;  %v1165_v49 = vld [vmem:[#allocation3 + $0x3e0] sm:$0xff]  ;;  %v18458_v51 = vpack.c.bf16 %v793_v41, %v792_v39 }
 0x13d   : > { %921 = vmatmul.mubr.f32.vlgmr.msra.gmra.mrb[0].mxu0 %v21670_v56  ;;  %v1148_v47 = vld [vmem:[#allocation3 + $0x358] sm:$0xff]  ;;  %v1166_v50 = vld [vmem:[#allocation3 + $0x3e8] sm:$0xff]  ;;  %v18460_v52 = vpack.c.bf16 %v811_v44, %v810_v43  ;;  %v794_v53 = vld [vmem:[#allocation3 + $0x250] sm:$0xff]  ;;  %v23051_v44 = vmov 0.0|0.0  }
 0x13e   : > { %991 = vmatmul.mubr.f32.vlgmr.msra.gmra.mrb[0].mxu1 %v21673_v59  ;;  %18443 = vmatpush3.bf16.msra.mxu0 %v18442_v60  ;;  %v795_v54 = vld [vmem:[#allocation3 + $0x258] sm:$0xff]  ;;  %v18493_v55 = vpack.c.bf16 %v1148_v47, %v1147_v46  ;;  %v812_v57 = vld [vmem:[#allocation3 + $0x2e0] sm:$0xff]  ;;  %v813_v58 = vld [vmem:[#allocation3 + $0x2e8] sm:$0xff]  ;;  %v18495_v60 = vpack.c.bf16 %v1166_v50, %v1165_v49 }
 0x13f   : > { %18445 = vmatprep.subr.bf16.mxu0 %v18444_v61  ;;  %18478 = vmatpush3.bf16.msra.mxu1 %v18477_v1  ;;  %v1149_v61 = vld [vmem:[#allocation3 + $0x360] sm:$0xff]  ;;  %v1150_v63 = vld [vmem:[#allocation3 + $0x368] sm:$0xff]  ;;  %v1167_v0 = vld [vmem:[#allocation3 + $0x3f0] sm:$0xff]  ;;  %v18462_v2 = vpack.c.bf16 %v795_v54, %v794_v53  ;;  %v18464_v3 = vpack.c.bf16 %v813_v58, %v812_v57  ;;  %v23053_v57 = vmov 0.0  }
 0x140   : > { %18480 = vmatprep.subr.bf16.mxu1 %v18479_v4  ;;  %1060 = vmatprep.mubr.f32.mxu0 %v21676_v7  ;;  %v1168_v1 = vld [vmem:[#allocation3 + $0x3f8] sm:$0xff]  ;;  %v796_v4 = vld [vmem:[#allocation3 + $0x260] sm:$0xff]  ;;  %v797_v5 = vld [vmem:[#allocation3 + $0x268] sm:$0xff]  ;;  %v18497_v6 = vpack.c.bf16 %v1150_v63, %v1149_v61 }
 0x141   : > { %1301 = vmatprep.mubr.f32.mxu1 %v21657_v26  ;;  %v814_v8 = vld [vmem:[#allocation3 + $0x2f0] sm:$0xff]  ;;  %v815_v9 = vld [vmem:[#allocation3 + $0x2f8] sm:$0xff]  ;;  %v1169_v13 = vld [vmem:[#allocation3 + $0x400] sm:$0xff]  ;;  %v18466_v15 = vpack.c.bf16 %v797_v5, %v796_v4 }
 0x142   : > { %18447 = vmatpush3.bf16.msra.mxu0 %v18446_v10  ;;  %v18499_v10 = vpack.c.bf16 %v1168_v1, %v1167_v0  ;;  %v1152_v12 = vld [vmem:[#allocation3 + $0x378] sm:$0xff]  ;;  %v18468_v16 = vpack.c.bf16 %v815_v9, %v814_v8  ;;  %v1153_v22 = vld [vmem:[#allocation3 + $0x380] sm:$0xff]  ;;  %v1219_v25 = vld [vmem:[#allocation3 + $0x590] sm:$0xff] }
 0x143   : > { %18449 = vmatprep.subr.bf16.mxu0 %v18448_v11  ;;  %18482 = vmatpush3.bf16.msra.mxu1 %v18481_v14  ;;  %v1151_v11 = vld [vmem:[#allocation3 + $0x370] sm:$0xff]  ;;  %v1170_v14 = vld [vmem:[#allocation3 + $0x408] sm:$0xff]  ;;  %v799_v18 = vld [vmem:[#allocation3 + $0x278] sm:$0xff] }
 0x144   : > { %18484 = vmatprep.subr.bf16.mxu1 %v18483_v17  ;;  %v798_v17 = vld [vmem:[#allocation3 + $0x270] sm:$0xff]  ;;  %v18501_v19 = vpack.c.bf16 %v1152_v12, %v1151_v11  ;;  %v18503_v20 = vpack.c.bf16 %v1170_v14, %v1169_v13  ;;  %v1220_v28 = vld [vmem:[#allocation3 + $0x598] sm:$0xff]  ;;  %v816_v30 = vld [vmem:[#allocation3 + $0x300] sm:$0xff] }
 0x145   : > { %v817_v31 = vld [vmem:[#allocation3 + $0x308] sm:$0xff]  ;;  %v1187_v33 = vld [vmem:[#allocation3 + $0x490] sm:$0xff]  ;;  %v1188_v34 = vld [vmem:[#allocation3 + $0x498] sm:$0xff]  ;;  %v18539_v35 = vpack.c.bf16 %v1220_v28, %v1219_v25 }
 0x146   : > { %18451 = vmatpush3.bf16.msra.mxu0 %v18450_v23  ;;  %v1154_v23 = vld [vmem:[#allocation3 + $0x388] sm:$0xff]  ;;  %v1204_v39 = vld [vmem:[#allocation3 + $0x518] sm:$0xff]  ;;  %v18473_v41 = vpack.c.bf16 %v817_v31, %v816_v30  ;;  %v1171_v46 = vld [vmem:[#allocation3 + $0x410] sm:$0xff] }
 0x147   : > { %18453 = vmatprep.subr.bf16.mxu0 %v18452_v24  ;;  %18486 = vmatpush3.bf16.msra.mxu1 %v18485_v29  ;;  %v837_v24 = vsub.s32 4, %v21645_v62  ;;  %v18470_v29 = vpack.c.bf16 %v799_v18, %v798_v17  ;;  %v1222_v43 = vld [vmem:[#allocation3 + $0x5a8] sm:$0xff]  ;;  %v1172_v47 = vld [vmem:[#allocation3 + $0x418] sm:$0xff]  ;;  %v1189_v50 = vld [vmem:[#allocation3 + $0x4a0] sm:$0xff] }
 0x148   : > { %18488 = vmatprep.subr.bf16.mxu1 %v18487_v32  ;;  %v18505_v32 = vpack.c.bf16 %v1154_v23, %v1153_v22  ;;  %v1205_v54 = vld [vmem:[#allocation3 + $0x520] sm:$0xff]  ;;  %v18509_v58 = vpack.c.bf16 %v1172_v47, %v1171_v46  ;;  %v1224_v61 = vld [vmem:[#allocation3 + $0x5b8] sm:$0xff]  ;;  %v1207_v5 = vld [vmem:[#allocation3 + $0x530] sm:$0xff] }
 0x149   : > { %v21684_v36 = vrot.slane %v21654_v21, %v837_v24  ;;  %v1173_v0 = vld [vmem:[#allocation3 + $0x420] sm:$0xff]  ;;  %v1175_v12 = vld [vmem:[#allocation3 + $0x430] sm:$0xff]  ;;  %v1176_v13 = vld [vmem:[#allocation3 + $0x438] sm:$0xff] }
 0x14a   : > { %18455 = vmatpush3.bf16.msra.mxu0 %v18454_v37  ;;  %v845_v37 = vsub.s32 6, %v21645_v62  ;;  %v1225_v9 = vld [vmem:[#allocation3 + $0x5c0] sm:$0xff]  ;;  %v1227_v22 = vld [vmem:[#allocation3 + $0x5d0] sm:$0xff]  ;;  %v1228_v23 = vld [vmem:[#allocation3 + $0x5d8] sm:$0xff] }
 0x14b   : > { %18457 = vmatprep.subr.bf16.mxu0 %v18456_v38  ;;  %18490 = vmatpush3.bf16.msra.mxu1 %v18489_v42  ;;  %v1203_v38 = vld [vmem:[#allocation3 + $0x510] sm:$0xff]  ;;  %v1221_v42 = vld [vmem:[#allocation3 + $0x5a0] sm:$0xff]  ;;  %v1178_v28 = vld [vmem:[#allocation3 + $0x448] sm:$0xff] }
 0x14c   : > { %18492 = vmatprep.subr.bf16.mxu1 %v18491_v45  ;;  %v18507_v45 = vpack.c.bf16 %v1188_v34, %v1187_v33  ;;  %v18541_v49 = vpack.c.bf16 %v1204_v39, %v1203_v38  ;;  %v18543_v53 = vpack.c.bf16 %v1222_v43, %v1221_v42  ;;  %v1209_v18 = vld [vmem:[#allocation3 + $0x540] sm:$0xff]  ;;  %v1195_v30 = vld [vmem:[#allocation3 + $0x4d0] sm:$0xff]  ;;  %v1196_v31 = vld [vmem:[#allocation3 + $0x4d8] sm:$0xff] }
 0x14d   : > { %v1177_v25 = vld [vmem:[#allocation3 + $0x440] sm:$0xff]  ;;  %v1211_v33 = vld [vmem:[#allocation3 + $0x550] sm:$0xff]  ;;  %v1212_v34 = vld [vmem:[#allocation3 + $0x558] sm:$0xff]  ;;  %v18523_v39 = vpack.c.bf16 %v1196_v31, %v1195_v30 }
 0x14e   : > { %18459 = vmatpush3.bf16.msra.mxu0 %v18458_v51  ;;  %v1190_v51 = vld [vmem:[#allocation3 + $0x4a8] sm:$0xff]  ;;  %v1180_v42 = vld [vmem:[#allocation3 + $0x458] sm:$0xff]  ;;  %v18557_v43 = vpack.c.bf16 %v1212_v34, %v1211_v33  ;;  %v1691_v30 = vld [vmem:[#allocation3 + $0x620] sm:$0xff] }
 0x14f   : > { %18461 = vmatprep.subr.bf16.mxu0 %v18460_v52  ;;  %18494 = vmatpush3.bf16.msra.mxu1 %v18493_v55  ;;  %v21690_v52 = vrot.slane %v21654_v21, %v845_v37  ;;  %v1206_v55 = vld [vmem:[#allocation3 + $0x528] sm:$0xff]  ;;  %v18511_v63 = vpack.c.bf16 %v1190_v51, %v1189_v50  ;;  %v1229_v37 = vld [vmem:[#allocation3 + $0x5e0] sm:$0xff]  ;;  %v1709_v33 = vld [vmem:[#allocation3 + $0x6b0] sm:$0xff] }
 0x150   : > { %18496 = vmatprep.subr.bf16.mxu1 %v18495_v60  ;;  %v1223_v60 = vld [vmem:[#allocation3 + $0x5b0] sm:$0xff]  ;;  %v1174_v21 = vld [vmem:[#allocation3 + $0x428] sm:$0xff]  ;;  %v18545_v1 = vpack.c.bf16 %v1206_v55, %v1205_v54  ;;  %v1232_v54 = vld [vmem:[#allocation3 + $0x5f8] sm:$0xff] }
 0x151   : > { %v18547_v4 = vpack.c.bf16 %v1224_v61, %v1223_v60  ;;  %v18513_v8 = vpack.c.bf16 %v1174_v21, %v1173_v0  ;;  %v1230_v38 = vld [vmem:[#allocation3 + $0x5e8] sm:$0xff]  ;;  %v1200_v0 = vld [vmem:[#allocation3 + $0x4f8] sm:$0xff]  ;;  %vm21938_vm7 = vmpackc.low %vm1527_vm3, %vm21260_vm6 }
 0x152   : > { %18463 = vmatpush3.bf16.msra.mxu0 %v18462_v2  ;;  %v1191_v2 = vld [vmem:[#allocation3 + $0x4b0] sm:$0xff]  ;;  %v1198_v46 = vld [vmem:[#allocation3 + $0x4e8] sm:$0xff]  ;;  %v18559_v47 = vpack.c.bf16 %v1230_v38, %v1229_v37  ;;  %v1710_v34 = vld [vmem:[#allocation3 + $0x6b8] sm:$0xff] }
 0x153   : > { %18465 = vmatprep.subr.bf16.mxu0 %v18464_v3  ;;  %18498 = vmatpush3.bf16.msra.mxu1 %v18497_v6  ;;  %v1192_v3 = vld [vmem:[#allocation3 + $0x4b8] sm:$0xff]  ;;  %v1214_v50 = vld [vmem:[#allocation3 + $0x568] sm:$0xff]  ;;  %v18578_v37 = vpack.c.bf16 %v1710_v34, %v1709_v33  ;;  %v1693_v38 = vld [vmem:[#allocation3 + $0x630] sm:$0xff] }
 0x154   : > { %18500 = vmatprep.subr.bf16.mxu1 %v18499_v10  ;;  %v1208_v6 = vld [vmem:[#allocation3 + $0x538] sm:$0xff]  ;;  %v1226_v10 = vld [vmem:[#allocation3 + $0x5c8] sm:$0xff]  ;;  %v18515_v11 = vpack.c.bf16 %v1192_v3, %v1191_v2  ;;  %v1757_v33 = vld [vmem:[#allocation3 + $0x830] sm:$0xff] }
 0x155   : > { %v18549_v14 = vpack.c.bf16 %v1208_v6, %v1207_v5  ;;  %v18551_v17 = vpack.c.bf16 %v1226_v10, %v1225_v9  ;;  %v1182_v60 = vld [vmem:[#allocation3 + $0x468] sm:$0xff]  ;;  %v1216_v2 = vld [vmem:[#allocation3 + $0x578] sm:$0xff] }
 0x156   : > { %18467 = vmatpush3.bf16.msra.mxu0 %v18466_v15  ;;  %v1193_v15 = vld [vmem:[#allocation3 + $0x4c0] sm:$0xff]  ;;  %v1234_v5 = vld [vmem:[#allocation3 + $0x608] sm:$0xff]  ;;  %v1184_v9 = vld [vmem:[#allocation3 + $0x478] sm:$0xff] }
 0x157   : > { %18469 = vmatprep.subr.bf16.mxu0 %v18468_v16  ;;  %18502 = vmatpush3.bf16.msra.mxu1 %v18501_v19  ;;  %v1194_v16 = vld [vmem:[#allocation3 + $0x4c8] sm:$0xff]  ;;  %v1758_v34 = vld [vmem:[#allocation3 + $0x838] sm:$0xff] }
 0x158   : > { %18504 = vmatprep.subr.bf16.mxu1 %v18503_v20  ;;  %v1210_v19 = vld [vmem:[#allocation3 + $0x548] sm:$0xff]  ;;  %v18517_v20 = vpack.c.bf16 %v1176_v13, %v1175_v12  ;;  %v18519_v24 = vpack.c.bf16 %v1194_v16, %v1193_v15 }
 0x159   : > { %v1202_v12 = vld [vmem:[#allocation3 + $0x508] sm:$0xff] }
 0x15a   : > { %18471 = vmatpush3.bf16.msra.mxu0 %v18470_v29  ;;  %v18553_v29 = vpack.c.bf16 %v1210_v19, %v1209_v18  ;;  %v1218_v15 = vld [vmem:[#allocation3 + $0x588] sm:$0xff]  ;;  %v1185_v18 = vld [vmem:[#allocation3 + $0x480] sm:$0xff] }
 0x15b   : > { %18472 = vmatprep.subr.bf16.mxu0 %v23051_v44  ;;  %18506 = vmatpush3.bf16.msra.mxu1 %v18505_v32  ;;  %v18555_v32 = vpack.c.bf16 %v1228_v23, %v1227_v22  ;;  %v1186_v19 = vld [vmem:[#allocation3 + $0x488] sm:$0xff]  ;;  %v1235_v23 = vld [vmem:[#allocation3 + $0x610] sm:$0xff] }
 0x15c   : > { %18540 = vmatprep.subr.bf16.mxu1 %v18539_v35  ;;  %v18521_v35 = vpack.c.bf16 %v1178_v28, %v1177_v25  ;;  %v18537_v22 = vpack.c.bf16 %v1186_v19, %v1185_v18  ;;  %v1707_v28 = vld [vmem:[#allocation3 + $0x6a0] sm:$0xff]  ;;  %v1705_v18 = vld [vmem:[#allocation3 + $0x690] sm:$0xff] }
 0x15d   : > { %1061 = vmatmul.mubr.f32.vlgmr.msra.gmra.mrb[2].mxu0 %v21684_v36 }
 0x15e   : > { %18474 = vmatpush3.bf16.msra.mxu0 %v18473_v41  ;;  %17856 = vmatprep.mubr.msk.f32.mxu0 %vm21257_vm0, %v23053_v57  ;;  %v1179_v41 = vld [vmem:[#allocation3 + $0x450] sm:$0xff] }
 0x15f   : > { %18508 = vmatprep.subr.bf16.mxu0 %v18507_v45  ;;  %1302 = vmatmul.mubr.f32.vlgmr.msra.gmra.mrb[2].mxu1 %v21670_v56  ;;  %v1197_v45 = vld [vmem:[#allocation3 + $0x4e0] sm:$0xff]  ;;  %v18525_v51 = vpack.c.bf16 %v1180_v42, %v1179_v41  ;;  %v1712_v42 = vld [vmem:[#allocation3 + $0x6c8] sm:$0xff] }
 0x160   : > { %18542 = vmatpush3.bf16.msra.mxu1 %v18541_v49  ;;  %1441 = vmatprep.mubr.f32.mxu1 %v21676_v7  ;;  %v1213_v49 = vld [vmem:[#allocation3 + $0x560] sm:$0xff]  ;;  %v18527_v55 = vpack.c.bf16 %v1198_v46, %v1197_v45 }
 0x161   : > { %17857 = vmatmul.mubr.msk.f32.vlgmr.msra.gmra.mrb[4].mxu0 %vm853_vm1, %v21690_v52  ;;  %18544 = vmatprep.subr.bf16.mxu1 %v18543_v53  ;;  %v1231_v53 = vld [vmem:[#allocation3 + $0x5f0] sm:$0xff]  ;;  %v18561_v61 = vpack.c.bf16 %v1214_v50, %v1213_v49  ;;  %v1711_v41 = vld [vmem:[#allocation3 + $0x6c0] sm:$0xff] }
 0x162   : > { %18510 = vmatpush3.bf16.msra.mxu0 %v18509_v58  ;;  %1371 = vmatprep.mubr.f32.mxu0 %v21660_v27  ;;  %v1181_v58 = vld [vmem:[#allocation3 + $0x460] sm:$0xff]  ;;  %v18563_v21 = vpack.c.bf16 %v1232_v54, %v1231_v53  ;;  %v18582_v45 = vpack.c.bf16 %v1712_v42, %v1711_v41  ;;  %v1713_v50 = vld [vmem:[#allocation3 + $0x6d0] sm:$0xff]  ;;  %v1760_v42 = vld [vmem:[#allocation3 + $0x848] sm:$0xff] }
 0x163   : > { %18512 = vmatprep.subr.bf16.mxu0 %v18511_v63  ;;  %v1199_v63 = vld [vmem:[#allocation3 + $0x4f0] sm:$0xff]  ;;  %v18529_v3 = vpack.c.bf16 %v1182_v60, %v1181_v58  ;;  %v1695_v46 = vld [vmem:[#allocation3 + $0x640] sm:$0xff] }
 0x164   : > { %18546 = vmatpush3.bf16.msra.mxu1 %v18545_v1  ;;  %v1215_v1 = vld [vmem:[#allocation3 + $0x570] sm:$0xff]  ;;  %v18531_v6 = vpack.c.bf16 %v1200_v0, %v1199_v63  ;;  %v1715_v60 = vld [vmem:[#allocation3 + $0x6e0] sm:$0xff] }
 0x165   : > { %18548 = vmatprep.subr.bf16.mxu1 %v18547_v4  ;;  %v1233_v4 = vld [vmem:[#allocation3 + $0x600] sm:$0xff]  ;;  %v18565_v10 = vpack.c.bf16 %v1216_v2, %v1215_v1  ;;  %v1697_v54 = vld [vmem:[#allocation3 + $0x650] sm:$0xff] }
 0x166   : > { %18514 = vmatpush3.bf16.msra.mxu0 %v18513_v8  ;;  %v1183_v8 = vld [vmem:[#allocation3 + $0x470] sm:$0xff]  ;;  %v18567_v13 = vpack.c.bf16 %v1234_v5, %v1233_v4  ;;  %v1699_v0 = vld [vmem:[#allocation3 + $0x660] sm:$0xff] }
 0x167   : > { %18516 = vmatprep.subr.bf16.mxu0 %v18515_v11  ;;  %v1201_v11 = vld [vmem:[#allocation3 + $0x500] sm:$0xff]  ;;  %v18533_v16 = vpack.c.bf16 %v1184_v9, %v1183_v8  ;;  %v1717_v2 = vld [vmem:[#allocation3 + $0x6f0] sm:$0xff] }
 0x168   : > { %18550 = vmatpush3.bf16.msra.mxu1 %v18549_v14  ;;  %v1217_v14 = vld [vmem:[#allocation3 + $0x580] sm:$0xff]  ;;  %v1701_v5 = vld [vmem:[#allocation3 + $0x670] sm:$0xff] }
 0x169   : > { %18552 = vmatprep.subr.bf16.mxu1 %v18551_v17  ;;  %v18535_v17 = vpack.c.bf16 %v1202_v12, %v1201_v11  ;;  %v1719_v9 = vld [vmem:[#allocation3 + $0x700] sm:$0xff]  ;;  %v16302_v11 = vld [vmem:[%s23100_s26 + $0x10] sm:$0xff] }
 0x16a   : > { %18518 = vmatpush3.bf16.msra.mxu0 %v18517_v20  ;;  %v18569_v20 = vpack.c.bf16 %v1218_v15, %v1217_v14  ;;  %v1704_v14 = vld [vmem:[#allocation3 + $0x688] sm:$0xff]  ;;  %v1759_v41 = vld [vmem:[#allocation3 + $0x840] sm:$0xff] }
 0x16b   : > { %18520 = vmatprep.subr.bf16.mxu0 %v18519_v24  ;;  %v1236_v24 = vld [vmem:[#allocation3 + $0x618] sm:$0xff] }
 0x16c   : > { %18554 = vmatpush3.bf16.msra.mxu1 %v18553_v29  ;;  %v18572_v25 = vpack.c.bf16 %v1236_v24, %v1235_v23  ;;  %v1708_v29 = vld [vmem:[#allocation3 + $0x6a8] sm:$0xff]  ;;  %v1771_v23 = vld [vmem:[#allocation3 + $0x8a0] sm:$0xff] }
 0x16d   : > { %18556 = vmatprep.subr.bf16.mxu1 %v18555_v32  ;;  %v18574_v31 = vpack.c.bf16 %v1708_v29, %v1707_v28  ;;  %v1692_v32 = vld [vmem:[#allocation3 + $0x628] sm:$0xff] }
 0x16e   : > { %18522 = vmatpush3.bf16.msra.mxu0 %v18521_v35  ;;  %v18576_v35 = vpack.c.bf16 %v1692_v32, %v1691_v30  ;;  %v1772_v24 = vld [vmem:[#allocation3 + $0x8a8] sm:$0xff]  ;;  %v1774_v32 = vld [vmem:[#allocation3 + $0x8b8] sm:$0xff] }
 0x16f   : > { %18524 = vmatprep.subr.bf16.mxu0 %v18523_v39  ;;  %v1694_v39 = vld [vmem:[#allocation3 + $0x638] sm:$0xff]  ;;  %v1756_v28 = vld [vmem:[#allocation3 + $0x828] sm:$0xff]  ;;  %v18638_v29 = vpack.c.bf16 %v1772_v24, %v1771_v23 }
 0x170   : > { %18558 = vmatpush3.bf16.msra.mxu1 %v18557_v43  ;;  %v18580_v43 = vpack.c.bf16 %v1694_v39, %v1693_v38  ;;  %v1775_v38 = vld [vmem:[#allocation3 + $0x8c0] sm:$0xff]  ;;  %v1776_v39 = vld [vmem:[#allocation3 + $0x8c8] sm:$0xff] }
 0x171   : > { %18560 = vmatprep.subr.bf16.mxu1 %v18559_v47  ;;  %v1696_v47 = vld [vmem:[#allocation3 + $0x648] sm:$0xff] }
 0x172   : > { %18526 = vmatpush3.bf16.msra.mxu0 %v18525_v51  ;;  %v18584_v49 = vpack.c.bf16 %v1696_v47, %v1695_v46  ;;  %v1714_v51 = vld [vmem:[#allocation3 + $0x6d8] sm:$0xff]  ;;  %v1777_v46 = vld [vmem:[#allocation3 + $0x8d0] sm:$0xff] }
 0x173   : > { %18528 = vmatprep.subr.bf16.mxu0 %v18527_v55  ;;  %v18586_v53 = vpack.c.bf16 %v1714_v51, %v1713_v50  ;;  %v1698_v55 = vld [vmem:[#allocation3 + $0x658] sm:$0xff] }
 0x174   : > { %18562 = vmatpush3.bf16.msra.mxu1 %v18561_v61  ;;  %v18588_v58 = vpack.c.bf16 %v1698_v55, %v1697_v54  ;;  %v1716_v61 = vld [vmem:[#allocation3 + $0x6e8] sm:$0xff]  ;;  %v1778_v47 = vld [vmem:[#allocation3 + $0x8d8] sm:$0xff]  ;;  %v1779_v54 = vld [vmem:[#allocation3 + $0x8e0] sm:$0xff] }
 0x175   : > { %18564 = vmatprep.subr.bf16.mxu1 %v18563_v21  ;;  %v18590_v63 = vpack.c.bf16 %v1716_v61, %v1715_v60  ;;  %v1700_v21 = vld [vmem:[#allocation3 + $0x668] sm:$0xff]  ;;  %v1762_v50 = vld [vmem:[#allocation3 + $0x858] sm:$0xff]  ;;  %v18650_v51 = vpack.c.bf16 %v1778_v47, %v1777_v46 }
 0x176   : > { %18530 = vmatpush3.bf16.msra.mxu0 %v18529_v3  ;;  %v18592_v1 = vpack.c.bf16 %v1700_v21, %v1699_v0  ;;  %v1718_v3 = vld [vmem:[#allocation3 + $0x6f8] sm:$0xff]  ;;  %v1780_v55 = vld [vmem:[#allocation3 + $0x8e8] sm:$0xff]  ;;  %v1781_v0 = vld [vmem:[#allocation3 + $0x8f0] sm:$0xff] }
 0x177   : > { %18532 = vmatprep.subr.bf16.mxu0 %v18531_v6  ;;  %v18594_v4 = vpack.c.bf16 %v1718_v3, %v1717_v2  ;;  %v1702_v6 = vld [vmem:[#allocation3 + $0x678] sm:$0xff]  ;;  %v1764_v60 = vld [vmem:[#allocation3 + $0x868] sm:$0xff]  ;;  %v18654_v61 = vpack.c.bf16 %v1780_v55, %v1779_v54 }
 0x178   : > { %18566 = vmatpush3.bf16.msra.mxu1 %v18565_v10  ;;  %v18596_v8 = vpack.c.bf16 %v1702_v6, %v1701_v5  ;;  %v1720_v10 = vld [vmem:[#allocation3 + $0x708] sm:$0xff]  ;;  %v1782_v21 = vld [vmem:[#allocation3 + $0x8f8] sm:$0xff]  ;;  %v1783_v5 = vld [vmem:[#allocation3 + $0x900] sm:$0xff] }
 0x179   : > { %18568 = vmatprep.subr.bf16.mxu1 %v18567_v13  ;;  %v18598_v12 = vpack.c.bf16 %v1720_v10, %v1719_v9  ;;  %v1703_v13 = vld [vmem:[#allocation3 + $0x680] sm:$0xff]  ;;  %v1766_v2 = vld [vmem:[#allocation3 + $0x878] sm:$0xff]  ;;  %v18658_v3 = vpack.c.bf16 %v1782_v21, %v1781_v0  ;;  %v1784_v6 = vld [vmem:[#allocation3 + $0x908] sm:$0xff] }
 0x17a   : > { %18534 = vmatpush3.bf16.msra.mxu0 %v18533_v16  ;;  %v18600_v15 = vpack.c.bf16 %v1704_v14, %v1703_v13  ;;  %v1721_v16 = vld [vmem:[#allocation3 + $0x710] sm:$0xff]  ;;  %v1768_v9 = vld [vmem:[#allocation3 + $0x888] sm:$0xff]  ;;  %v18662_v10 = vpack.c.bf16 %v1784_v6, %v1783_v5  ;;  %v1786_v13 = vld [vmem:[#allocation3 + $0x918] sm:$0xff] }
 0x17b   : > { %18536 = vmatprep.subr.bf16.mxu0 %v18535_v17  ;;  %v1722_v17 = vld [vmem:[#allocation3 + $0x718] sm:$0xff]  ;;  %v1769_v14 = vld [vmem:[#allocation3 + $0x890] sm:$0xff]  ;;  %v1740_v54 = vld [vmem:[#allocation3 + $0x7a8] sm:$0xff] }
 0x17c   : > { %18570 = vmatpush3.bf16.msra.mxu1 %v18569_v20  ;;  %v18602_v19 = vpack.c.bf16 %v1722_v17, %v1721_v16  ;;  %v1706_v20 = vld [vmem:[#allocation3 + $0x698] sm:$0xff]  ;;  %v1724_v0 = vld [vmem:[#allocation3 + $0x728] sm:$0xff]  ;;  %v1741_v21 = vld [vmem:[#allocation3 + $0x7b0] sm:$0xff] }
 0x17d   : > { %18575 = vmatprep.subr.bf16.mxu1 %v18574_v31  ;;  %v1773_v31 = vld [vmem:[#allocation3 + $0x8b0] sm:$0xff]  ;;  %v1726_v6 = vld [vmem:[#allocation3 + $0x738] sm:$0xff] }
 0x17e   : > { %18538 = vmatpush3.bf16.msra.mxu0 %v18537_v22  ;;  %v18604_v22 = vpack.c.bf16 %v1706_v20, %v1705_v18  ;;  %v1725_v5 = vld [vmem:[#allocation3 + $0x730] sm:$0xff] }
 0x17f   : > { %1442 = vmatmul.mubr.f32.vlgmr.msra.gmra.mrb[4].mxu1 %v21684_v36  ;;  %18571 = vmatprep.subr.bf16.mxu0 %v23051_v44 }
 0x180   : > { %1853 = vmatprep.mubr.f32.mxu1 %v21657_v26  ;;  %18577 = vmatpush3.bf16.msra.mxu1 %v18576_v35  ;;  %v18642_v35 = vpack.c.bf16 %v1774_v32, %v1773_v31 }
 0x181   : > { %1372 = vmatmul.mubr.f32.vlgmr.msra.gmra.mrb[6].mxu0 %v21673_v59  ;;  %18579 = vmatprep.subr.bf16.mxu1 %v18578_v37  ;;  %v18644_v37 = vpack.c.bf16 %v1758_v34, %v1757_v33 }
 0x182   : > { %18573 = vmatpush3.bf16.msra.mxu0 %v18572_v25  ;;  %17863 = vmatprep.mubr.msk.f32.mxu0 %vm21257_vm0, %v23053_v57  ;;  %v1755_v25 = vld [vmem:[#allocation3 + $0x820] sm:$0xff] }
 0x183   : > { %v18640_v30 = vpack.c.bf16 %v1756_v28, %v1755_v25 }
 0x184   : > { %18581 = vmatpush3.bf16.msra.mxu1 %v18580_v43  ;;  %v18646_v43 = vpack.c.bf16 %v1776_v39, %v1775_v38 }
 0x185   : > { %17864 = vmatmul.mubr.msk.f32.vlgmr.msra.gmra.mrb[8].mxu0 %vm853_vm1, %v21690_v52  ;;  %18583 = vmatprep.subr.bf16.mxu1 %v18582_v45  ;;  %v18648_v45 = vpack.c.bf16 %v1760_v42, %v1759_v41 }
 0x186   : > { %17868 = vmatprep.mubr.msk.f32.mxu0 %vm1520_vm2, %v16302_v11 }
 0x188   : > { %18585 = vmatpush3.bf16.msra.mxu1 %v18584_v49  ;;  %v1761_v49 = vld [vmem:[#allocation3 + $0x850] sm:$0xff] }
 0x189   : > { %18587 = vmatprep.subr.bf16.mxu1 %v18586_v53  ;;  %v18652_v53 = vpack.c.bf16 %v1762_v50, %v1761_v49 }
 0x18c   : > { %18589 = vmatpush3.bf16.msra.mxu1 %v18588_v58  ;;  %v1763_v58 = vld [vmem:[#allocation3 + $0x860] sm:$0xff] }
 0x18d   : > { %18591 = vmatprep.subr.bf16.mxu1 %v18590_v63  ;;  %v18656_v63 = vpack.c.bf16 %v1764_v60, %v1763_v58  ;;  %v16303_v58 = vld [vmem:[%s23100_s26 + $0x18] sm:$0xff]  ;;  %v1136_v60 = vld [vmem:[%s23100_s26] sm:$0xff] }
 0x190   : > { %18593 = vmatpush3.bf16.msra.mxu1 %v18592_v1  ;;  %v1765_v1 = vld [vmem:[#allocation3 + $0x870] sm:$0xff] }
 0x191   : > { %18595 = vmatprep.subr.bf16.mxu1 %v18594_v4  ;;  %v18660_v4 = vpack.c.bf16 %v1766_v2, %v1765_v1  ;;  %v1742_v1 = vld [vmem:[#allocation3 + $0x7b8] sm:$0xff]  ;;  %v1137_v2 = vld [vmem:[%s23100_s26 + $0x8] sm:$0xff] }
 0x194   : > { %18597 = vmatpush3.bf16.msra.mxu1 %v18596_v8  ;;  %v1767_v8 = vld [vmem:[#allocation3 + $0x880] sm:$0xff] }
 0x195   : > { %18599 = vmatprep.subr.bf16.mxu1 %v18598_v12  ;;  %v18664_v11 = vpack.c.bf16 %v1768_v9, %v1767_v8  ;;  %v1785_v12 = vld [vmem:[#allocation3 + $0x910] sm:$0xff]  ;;  %v1743_v8 = vld [vmem:[#allocation3 + $0x7c0] sm:$0xff]  ;;  %v1744_v9 = vld [vmem:[#allocation3 + $0x7c8] sm:$0xff] }
 0x196   : > { %v18666_v16 = vpack.c.bf16 %v1786_v13, %v1785_v12  ;;  %v1727_v12 = vld [vmem:[#allocation3 + $0x740] sm:$0xff]  ;;  %v1728_v13 = vld [vmem:[#allocation3 + $0x748] sm:$0xff] }
 0x198   : > { %18601 = vmatpush3.bf16.msra.mxu1 %v18600_v15  ;;  %v1770_v15 = vld [vmem:[#allocation3 + $0x898] sm:$0xff] }
 0x199   : > { %18603 = vmatprep.subr.bf16.mxu1 %v18602_v19  ;;  %v18668_v17 = vpack.c.bf16 %v1770_v15, %v1769_v14  ;;  %v1745_v14 = vld [vmem:[#allocation3 + $0x7d0] sm:$0xff]  ;;  %v1746_v15 = vld [vmem:[#allocation3 + $0x7d8] sm:$0xff] }
 0x19c   : > { %18605 = vmatpush3.bf16.msra.mxu1 %v18604_v22 }
 0x19d   : > { %18639 = vmatprep.subr.bf16.mxu1 %v18638_v29 }
 0x19f   : > { %1854 = vmatmul.mubr.f32.vlgmr.msra.gmra.mrb[6].mxu1 %v21670_v56 }
 0x1a0   : > { %18641 = vmatpush3.bf16.msra.mxu1 %v18640_v30  ;;  %1993 = vmatprep.mubr.f32.mxu1 %v21676_v7 }
 0x1a1   : > { %18643 = vmatprep.subr.bf16.mxu1 %v18642_v35 }
 0x1a4   : > { %18645 = vmatpush3.bf16.msra.mxu1 %v18644_v37 }
 0x1a5   : > { %18647 = vmatprep.subr.bf16.mxu1 %v18646_v43 }
 0x1a8   : > { %18649 = vmatpush3.bf16.msra.mxu1 %v18648_v45 }
 0x1a9   : > { %18651 = vmatprep.subr.bf16.mxu1 %v18650_v51 }
 0x1ac   : > { %18653 = vmatpush3.bf16.msra.mxu1 %v18652_v53  ;;  %v1739_v53 = vld [vmem:[#allocation3 + $0x7a0] sm:$0xff] }
 0x1ad   : > { %18655 = vmatprep.subr.bf16.mxu1 %v18654_v61  ;;  %v18606_v61 = vpack.c.bf16 %v1740_v54, %v1739_v53  ;;  %v1787_v53 = vld [vmem:[#allocation3 + $0x920] sm:$0xff]  ;;  %v1788_v54 = vld [vmem:[#allocation3 + $0x928] sm:$0xff] }
 0x1b0   : > { %18657 = vmatpush3.bf16.msra.mxu1 %v18656_v63  ;;  %v1723_v63 = vld [vmem:[#allocation3 + $0x720] sm:$0xff] }
 0x1b1   : > { %18659 = vmatprep.subr.bf16.mxu1 %v18658_v3  ;;  %v18608_v3 = vpack.c.bf16 %v1724_v0, %v1723_v63 }
 0x1b4   : > { %18661 = vmatpush3.bf16.msra.mxu1 %v18660_v4  ;;  %v18610_v4 = vpack.c.bf16 %v1742_v1, %v1741_v21  ;;  %v2207_v1 = vld [vmem:[#allocation3 + $0xab0] sm:$0xff] }
 0x1b5   : > { %18663 = vmatprep.subr.bf16.mxu1 %v18662_v10  ;;  %v18612_v10 = vpack.c.bf16 %v1726_v6, %v1725_v5  ;;  %v2191_v5 = vld [vmem:[#allocation3 + $0xa30] sm:$0xff]  ;;  %v2192_v6 = vld [vmem:[#allocation3 + $0xa38] sm:$0xff] }
 0x1b8   : > { %18665 = vmatpush3.bf16.msra.mxu1 %v18664_v11  ;;  %v18614_v11 = vpack.c.bf16 %v1744_v9, %v1743_v8  ;;  %v18707_v8 = vpack.c.bf16 %v2192_v6, %v2191_v5  ;;  %v2209_v9 = vld [vmem:[#allocation3 + $0xac0] sm:$0xff] }
 0x1b9   : > { %18667 = vmatprep.subr.bf16.mxu1 %v18666_v16  ;;  %v18616_v16 = vpack.c.bf16 %v1728_v13, %v1727_v12  ;;  %v2193_v12 = vld [vmem:[#allocation3 + $0xa40] sm:$0xff]  ;;  %v2194_v13 = vld [vmem:[#allocation3 + $0xa48] sm:$0xff] }
 0x1bc   : > { %18669 = vmatpush3.bf16.msra.mxu1 %v18668_v17  ;;  %v18618_v17 = vpack.c.bf16 %v1746_v15, %v1745_v14  ;;  %v18711_v14 = vpack.c.bf16 %v2194_v13, %v2193_v12  ;;  %v2211_v15 = vld [vmem:[#allocation3 + $0xad0] sm:$0xff] }
 0x1bd   : > { %v2159_v13 = vld [vmem:[#allocation3 + $0x930] sm:$0xff] }
 0x1bf   : > { %1994 = vmatmul.mubr.f32.vlgmr.msra.gmra.mrb[8].mxu1 %v21684_v36 }
 0x1c0   : > { %2391 = vmatprep.mubr.f32.mxu1 %v21660_v27 }
 0x210   : > { %v16679_v18 = vpop.f32.mrb[0].mxu0 }
 0x211   : > { %v16714_v19 = vpop.f32.mrb[0].mxu1  ;;  %v16680_v20 = vpop.f32.mrb[1].mxu0 }
 0x212   : > { %v16681_v22 = vadd.f32 %v16680_v20, %v16679_v18  ;;  %v16715_v23 = vpop.f32.mrb[1].mxu1  ;;  %v1729_v18 = vld [vmem:[#allocation3 + $0x750] sm:$0xff]  ;;  %v1747_v20 = vld [vmem:[#allocation3 + $0x7e0] sm:$0xff] }
 0x213   : > { %v16716_v24 = vadd.f32 %v16715_v23, %v16714_v19  ;;  %v1730_v19 = vld [vmem:[#allocation3 + $0x758] sm:$0xff] }
 0x214   : > { %v18620_v23 = vpack.c.bf16 %v1730_v19, %v1729_v18  ;;  %v2195_v18 = vld [vmem:[#allocation3 + $0xa50] sm:$0xff]  ;;  %v2196_v19 = vld [vmem:[#allocation3 + $0xa58] sm:$0xff] }
 0x215   : > { %v993_v25 = vadd.f32 %v16716_v24, %v16681_v22  ;;  %v1748_v22 = vld [vmem:[#allocation3 + $0x7e8] sm:$0xff] }
 0x216   : > { %v18622_v24 = vpack.c.bf16 %v1748_v22, %v1747_v20  ;;  %v18715_v20 = vpack.c.bf16 %v2196_v19, %v2195_v18  ;;  %v2213_v22 = vld [vmem:[#allocation3 + $0xae0] sm:$0xff] }
 0x217   : > { %v16312_v19 = vld [vmem:[%s23100_s26 + $0x28] sm:$0xff] }
 0x230   : > { %v16749_v28 = vpop.f32.mrb[2].mxu0 }
 0x231   : > { %v16750_v29 = vpop.f32.mrb[3].mxu0 }
 0x232   : > { %v16751_v30 = vadd.f32 %v16750_v29, %v16749_v28  ;;  %v16787_v31 = vpop.f32.mrb[2].mxu1  ;;  %v1732_v28 = vld [vmem:[#allocation3 + $0x768] sm:$0xff]  ;;  %v1749_v29 = vld [vmem:[#allocation3 + $0x7f0] sm:$0xff] }
 0x233   : > { %v16788_v32 = vpop.f32.mrb[3].mxu1 }
 0x234   : > { %v1063_v33 = vadd.f32 %v16751_v30, %v993_v25  ;;  %v1132_v34 = vpop.f32.mrb[4].mxu0  ;;  %v16789_v35 = vadd.f32 %v16788_v32, %v16787_v31  ;;  %v1731_v25 = vld [vmem:[#allocation3 + $0x760] sm:$0xff]  ;;  %v1750_v30 = vld [vmem:[#allocation3 + $0x7f8] sm:$0xff] }
 0x235   : > { %v17858_v37 = vpop.f32.mrb[5].mxu0  ;;  %v18624_v31 = vpack.c.bf16 %v1732_v28, %v1731_v25  ;;  %v18626_v32 = vpack.c.bf16 %v1750_v30, %v1749_v29  ;;  %v2197_v25 = vld [vmem:[#allocation3 + $0xa60] sm:$0xff]  ;;  %v2198_v28 = vld [vmem:[#allocation3 + $0xa68] sm:$0xff]  ;;  %v2215_v30 = vld [vmem:[#allocation3 + $0xaf0] sm:$0xff] }
 0x236   : > { %v1133_v38 = vadd.f32 %v1132_v34, %v1063_v33  ;;  %v1733_v33 = vld [vmem:[#allocation3 + $0x770] sm:$0xff]  ;;  %v1734_v34 = vld [vmem:[#allocation3 + $0x778] sm:$0xff]  ;;  %v1752_v37 = vld [vmem:[#allocation3 + $0x808] sm:$0xff]  ;;  %v18719_v29 = vpack.c.bf16 %v2198_v28, %v2197_v25 }
 0x252   : > { %v16857_v39 = vpop.f32.mrb[4].mxu1 }
 0x253   : > { %v16858_v41 = vpop.f32.mrb[5].mxu1 }
 0x254   : > { %v16822_v42 = vpop.f32.mrb[6].mxu0  ;;  %v16859_v43 = vadd.f32 %v16858_v41, %v16857_v39  ;;  %v1735_v41 = vld [vmem:[#allocation3 + $0x780] sm:$0xff] }
 0x255   : > { %v16823_v45 = vpop.f32.mrb[7].mxu0 }
 0x256   : > { %v16824_v46 = vadd.f32 %v16823_v45, %v16822_v42  ;;  %v1736_v42 = vld [vmem:[#allocation3 + $0x788] sm:$0xff]  ;;  %v1754_v45 = vld [vmem:[#allocation3 + $0x818] sm:$0xff] }
 0x258   : > { %v1374_v47 = vadd.f32 %v16824_v46, %v16789_v35  ;;  %v1513_v49 = vpop.f32.mrb[8].mxu0  ;;  %v1751_v35 = vld [vmem:[#allocation3 + $0x800] sm:$0xff]  ;;  %v18632_v46 = vpack.c.bf16 %v1736_v42, %v1735_v41  ;;  %v2202_v42 = vld [vmem:[#allocation3 + $0xa88] sm:$0xff] }
 0x259   : > { %v17865_v50 = vpop.f32.mrb[9].mxu0  ;;  %v18630_v39 = vpack.c.bf16 %v1752_v37, %v1751_v35  ;;  %v2217_v37 = vld [vmem:[#allocation3 + $0xb00] sm:$0xff] }
 0x25a   : > { %v1444_v51 = vadd.f32 %v16859_v43, %v1374_v47  ;;  %v1753_v43 = vld [vmem:[#allocation3 + $0x810] sm:$0xff]  ;;  %v1738_v50 = vld [vmem:[#allocation3 + $0x798] sm:$0xff]  ;;  %v2201_v41 = vld [vmem:[#allocation3 + $0xa80] sm:$0xff] }
 0x25b   : > { %v18634_v47 = vpack.c.bf16 %v1754_v45, %v1753_v43  ;;  %v18727_v43 = vpack.c.bf16 %v2202_v42, %v2201_v41  ;;  %v2219_v45 = vld [vmem:[#allocation3 + $0xb10] sm:$0xff] }
 0x25c   : > { %v1514_v55 = vadd.f32 %v1513_v49, %v1444_v51  ;;  %v1737_v49 = vld [vmem:[#allocation3 + $0x790] sm:$0xff] }
 0x25d   : > { %v18636_v51 = vpack.c.bf16 %v1738_v50, %v1737_v49  ;;  %v2203_v49 = vld [vmem:[#allocation3 + $0xa90] sm:$0xff]  ;;  %v2204_v50 = vld [vmem:[#allocation3 + $0xa98] sm:$0xff] }
 0x25e   : > { %17866 = vmatprep.subr.msk.mxu0 %vm1527_vm3, %v1514_v55 }
 0x25f   : > { %17867 = vmatpush3.msk.msra.mxu0 %vm1527_vm3, %v1514_v55  ;;  %v18671_v55 = vpack.c.bf16 %v1788_v54, %v1787_v53  ;;  %v2221_v53 = vld [vmem:[#allocation3 + $0xb20] sm:$0xff]  ;;  %v2222_v54 = vld [vmem:[#allocation3 + $0xb28] sm:$0xff] }
 0x260   : > { %17869 = vmatmul.mubr.msk.f32.vlgmr.msra.gmra.mrb[10].mxu0 %vm1520_vm2, %v16303_v58  ;;  %17871 = vmatprep.subr.msk.mxu0 %vm1527_vm3, %v1133_v38 }
 0x261   : > { %17872 = vmatpush3.msk.msra.mxu0 %vm1527_vm3, %v1133_v38  ;;  %17873 = vmatprep.mubr.msk.f32.mxu0 %vm1520_vm2, %v1136_v60  ;;  %v18628_v38 = vpack.c.bf16 %v1734_v34, %v1733_v33  ;;  %v2199_v33 = vld [vmem:[#allocation3 + $0xa70] sm:$0xff]  ;;  %v2200_v34 = vld [vmem:[#allocation3 + $0xa78] sm:$0xff] }
 0x262   : > { %18607 = vmatprep.subr.bf16.mxu0 %v18606_v61  ;;  %v18723_v35 = vpack.c.bf16 %v2200_v34, %v2199_v33 }
 0x268   : > { %17874 = vmatmul.mubr.msk.f32.vlgmr.msra.gmra.mrb[10].mxu0 %vm1520_vm2, %v1137_v2  ;;  %v2208_v2 = vld [vmem:[#allocation3 + $0xab8] sm:$0xff] }
 0x269   : > { %18609 = vmatpush3.bf16.msra.mxu0 %v18608_v3  ;;  %1923 = vmatprep.mubr.f32.mxu0 %v21660_v27  ;;  %v16311_v3 = vld [vmem:[%s23100_s26 + $0x20] sm:$0xff] }
 0x26a   : > { %18611 = vmatprep.subr.bf16.mxu0 %v18610_v4  ;;  %v18705_v4 = vpack.c.bf16 %v2208_v2, %v2207_v1  ;;  %v2256_v1 = vld [vmem:[#allocation3 + $0xc38] sm:$0xff] }
 0x26c   : > { %18706 = vmatprep.subr.bf16.mxu1 %v18705_v4 }
 0x26d   : > { %18613 = vmatpush3.bf16.msra.mxu0 %v18612_v10  ;;  %18708 = vmatpush3.bf16.msra.mxu1 %v18707_v8  ;;  %v2210_v10 = vld [vmem:[#allocation3 + $0xac8] sm:$0xff] }
 0x26e   : > { %18615 = vmatprep.subr.bf16.mxu0 %v18614_v11  ;;  %v18709_v11 = vpack.c.bf16 %v2210_v10, %v2209_v9  ;;  %v2175_v10 = vld [vmem:[#allocation3 + $0x9b0] sm:$0xff] }
 0x270   : > { %18710 = vmatprep.subr.bf16.mxu1 %v18709_v11  ;;  %v2176_v11 = vld [vmem:[#allocation3 + $0x9b8] sm:$0xff] }
 0x271   : > { %18617 = vmatpush3.bf16.msra.mxu0 %v18616_v16  ;;  %18712 = vmatpush3.bf16.msra.mxu1 %v18711_v14  ;;  %v2212_v16 = vld [vmem:[#allocation3 + $0xad8] sm:$0xff]  ;;  %v18673_v18 = vpack.c.bf16 %v2176_v11, %v2175_v10 }
 0x272   : > { %18619 = vmatprep.subr.bf16.mxu0 %v18618_v17  ;;  %v16901_v58 = vpop.f32.mrb[6].mxu1  ;;  %v18713_v17 = vpack.c.bf16 %v2212_v16, %v2211_v15  ;;  %v2160_v14 = vld [vmem:[#allocation3 + $0x938] sm:$0xff]  ;;  %v2177_v15 = vld [vmem:[#allocation3 + $0x9c0] sm:$0xff]  ;;  %v2178_v16 = vld [vmem:[#allocation3 + $0x9c8] sm:$0xff] }
 0x273   : > { %v16902_v60 = vpop.f32.mrb[7].mxu1 }
 0x274   : > { %v21738_v61 = vadd.f32 %v16902_v60, %v16901_v58  ;;  %18714 = vmatprep.subr.bf16.mxu1 %v18713_v17  ;;  %v2205_v58 = vld [vmem:[#allocation3 + $0xaa0] sm:$0xff]  ;;  %v2206_v60 = vld [vmem:[#allocation3 + $0xaa8] sm:$0xff] }
 0x275   : > { %18621 = vmatpush3.bf16.msra.mxu0 %v18620_v23  ;;  %18716 = vmatpush3.bf16.msra.mxu1 %v18715_v20  ;;  %v2214_v23 = vld [vmem:[#allocation3 + $0xae8] sm:$0xff]  ;;  %v18675_v20 = vpack.c.bf16 %v2160_v14, %v2159_v13  ;;  %v2224_v13 = vld [vmem:[#allocation3 + $0xb38] sm:$0xff]  ;;  %v2241_v14 = vld [vmem:[#allocation3 + $0xbc0] sm:$0xff] }
 0x276   : > { %18623 = vmatprep.subr.bf16.mxu0 %v18622_v24  ;;  %v18717_v24 = vpack.c.bf16 %v2214_v23, %v2213_v22  ;;  %v2161_v22 = vld [vmem:[#allocation3 + $0x940] sm:$0xff]  ;;  %v2162_v23 = vld [vmem:[#allocation3 + $0x948] sm:$0xff] }
 0x277   : > { %v18679_v25 = vpack.c.bf16 %v2162_v23, %v2161_v22 }
 0x278   : > { %18718 = vmatprep.subr.bf16.mxu1 %v18717_v24  ;;  %v2179_v24 = vld [vmem:[#allocation3 + $0x9d0] sm:$0xff] }
 0x279   : > { %18625 = vmatpush3.bf16.msra.mxu0 %v18624_v31  ;;  %18720 = vmatpush3.bf16.msra.mxu1 %v18719_v29  ;;  %v2216_v31 = vld [vmem:[#allocation3 + $0xaf8] sm:$0xff]  ;;  %v2163_v29 = vld [vmem:[#allocation3 + $0x950] sm:$0xff] }
 0x27a   : > { %18627 = vmatprep.subr.bf16.mxu0 %v18626_v32  ;;  %v18721_v32 = vpack.c.bf16 %v2216_v31, %v2215_v30  ;;  %v2164_v30 = vld [vmem:[#allocation3 + $0x958] sm:$0xff]  ;;  %v2181_v31 = vld [vmem:[#allocation3 + $0x9e0] sm:$0xff] }
 0x27b   : > { %v18683_v33 = vpack.c.bf16 %v2164_v30, %v2163_v29 }
 0x27c   : > { %18722 = vmatprep.subr.bf16.mxu1 %v18721_v32  ;;  %v2182_v32 = vld [vmem:[#allocation3 + $0x9e8] sm:$0xff] }
 0x27d   : > { %18629 = vmatpush3.bf16.msra.mxu0 %v18628_v38  ;;  %18724 = vmatpush3.bf16.msra.mxu1 %v18723_v35  ;;  %v2218_v38 = vld [vmem:[#allocation3 + $0xb08] sm:$0xff]  ;;  %v18685_v34 = vpack.c.bf16 %v2182_v32, %v2181_v31  ;;  %v2165_v35 = vld [vmem:[#allocation3 + $0x960] sm:$0xff] }
 0x27e   : > { %18631 = vmatprep.subr.bf16.mxu0 %v18630_v39  ;;  %v18725_v39 = vpack.c.bf16 %v2218_v38, %v2217_v37  ;;  %v2166_v37 = vld [vmem:[#allocation3 + $0x968] sm:$0xff]  ;;  %v2183_v38 = vld [vmem:[#allocation3 + $0x9f0] sm:$0xff]  ;;  %v2229_v31 = vld [vmem:[#allocation3 + $0xb60] sm:$0xff] }
 0x27f   : > { %v18687_v41 = vpack.c.bf16 %v2166_v37, %v2165_v35  ;;  %v2230_v32 = vld [vmem:[#allocation3 + $0xb68] sm:$0xff] }
 0x280   : > { %18726 = vmatprep.subr.bf16.mxu1 %v18725_v39  ;;  %v2184_v39 = vld [vmem:[#allocation3 + $0x9f8] sm:$0xff]  ;;  %v18751_v35 = vpack.c.bf16 %v2230_v32, %v2229_v31  ;;  %v2651_v32 = vld [vmem:[#allocation3 + $0xd00] sm:$0xff] }
 0x281   : > { %18633 = vmatpush3.bf16.msra.mxu0 %v18632_v46  ;;  %18728 = vmatpush3.bf16.msra.mxu1 %v18727_v43  ;;  %v2220_v46 = vld [vmem:[#allocation3 + $0xb18] sm:$0xff]  ;;  %v18689_v42 = vpack.c.bf16 %v2184_v39, %v2183_v38  ;;  %v2167_v43 = vld [vmem:[#allocation3 + $0x970] sm:$0xff] }
 0x282   : > { %18635 = vmatprep.subr.bf16.mxu0 %v18634_v47  ;;  %v18729_v47 = vpack.c.bf16 %v2220_v46, %v2219_v45  ;;  %v2168_v45 = vld [vmem:[#allocation3 + $0x978] sm:$0xff]  ;;  %v2185_v46 = vld [vmem:[#allocation3 + $0xa00] sm:$0xff]  ;;  %v2231_v38 = vld [vmem:[#allocation3 + $0xb70] sm:$0xff] }
 0x283   : > { %v2232_v39 = vld [vmem:[#allocation3 + $0xb78] sm:$0xff] }
 0x284   : > { %18730 = vmatprep.subr.bf16.mxu1 %v18729_v47  ;;  %v2186_v47 = vld [vmem:[#allocation3 + $0xa08] sm:$0xff]  ;;  %v2634_v31 = vld [vmem:[#allocation3 + $0xc78] sm:$0xff] }
 0x285   : > { %18637 = vmatpush3.bf16.msra.mxu0 %v18636_v51  ;;  %v18731_v51 = vpack.c.bf16 %v2204_v50, %v2203_v49  ;;  %v18691_v49 = vpack.c.bf16 %v2168_v45, %v2167_v43  ;;  %v18693_v50 = vpack.c.bf16 %v2186_v47, %v2185_v46  ;;  %v18755_v43 = vpack.c.bf16 %v2232_v39, %v2231_v38  ;;  %v2233_v46 = vld [vmem:[#allocation3 + $0xb80] sm:$0xff]  ;;  %v2234_v47 = vld [vmem:[#allocation3 + $0xb88] sm:$0xff]  ;;  %v2653_v39 = vld [vmem:[#allocation3 + $0xd10] sm:$0xff] }
 0x286   : > { %18670 = vmatprep.subr.bf16.mxu0 %v23051_v44  ;;  %v2636_v38 = vld [vmem:[#allocation3 + $0xc88] sm:$0xff] }
 0x287   : > { %18732 = vmatpush3.bf16.msra.mxu1 %v18731_v51  ;;  %v2169_v51 = vld [vmem:[#allocation3 + $0x980] sm:$0xff] }
 0x288   : > { %1924 = vmatmul.mubr.f32.vlgmr.msra.gmra.mrb[12].mxu0 %v21673_v59 }
 0x289   : > { %18672 = vmatpush3.bf16.msra.mxu0 %v18671_v55  ;;  %17880 = vmatprep.mubr.msk.f32.mxu0 %vm21257_vm0, %v23053_v57  ;;  %v18733_v55 = vpack.c.bf16 %v2222_v54, %v2221_v53  ;;  %v2170_v53 = vld [vmem:[#allocation3 + $0x988] sm:$0xff]  ;;  %v2187_v54 = vld [vmem:[#allocation3 + $0xa10] sm:$0xff] }
 0x28b   : > { %18734 = vmatprep.subr.bf16.mxu1 %v18733_v55  ;;  %v2188_v55 = vld [vmem:[#allocation3 + $0xa18] sm:$0xff] }
 0x28c   : > { %17881 = vmatmul.mubr.msk.f32.vlgmr.msra.gmra.mrb[14].mxu0 %vm853_vm1, %v21690_v52 }
 0x28d   : > { %17885 = vmatprep.mubr.msk.f32.mxu0 %vm1520_vm2, %v16311_v3 }
 0x292   : > { %v16971_v63 = vpop.f32.mrb[8].mxu1 }
 0x293   : > { %v16972_v0 = vpop.f32.mrb[9].mxu1 }
 0x294   : > { %v21740_v21 = vadd.f32 %v16972_v0, %v16971_v63  ;;  %v18735_v63 = vpack.c.bf16 %v2206_v60, %v2205_v58  ;;  %v2255_v0 = vld [vmem:[#allocation3 + $0xc30] sm:$0xff]  ;;  %v18695_v58 = vpack.c.bf16 %v2170_v53, %v2169_v51  ;;  %v18697_v60 = vpack.c.bf16 %v2188_v55, %v2187_v54  ;;  %v2236_v55 = vld [vmem:[#allocation3 + $0xb98] sm:$0xff] }
 0x295   : > { %v18770_v2 = vpack.c.bf16 %v2256_v1, %v2255_v0  ;;  %v2172_v0 = vld [vmem:[#allocation3 + $0x998] sm:$0xff]  ;;  %v2189_v1 = vld [vmem:[#allocation3 + $0xa20] sm:$0xff]  ;;  %v18759_v51 = vpack.c.bf16 %v2234_v47, %v2233_v46  ;;  %v2235_v54 = vld [vmem:[#allocation3 + $0xb90] sm:$0xff] }
 0x296   : > { %18736 = vmatpush3.bf16.msra.mxu1 %v18735_v63  ;;  %v2171_v63 = vld [vmem:[#allocation3 + $0x990] sm:$0xff]  ;;  %v2638_v46 = vld [vmem:[#allocation3 + $0xc98] sm:$0xff] }
 0x297   : > { %18769 = vmatprep.subr.bf16.mxu1 %v23051_v44 }
 0x299   : > { %2392 = vmatmul.mubr.f32.vlgmr.msra.gmra.mrb[10].mxu1 %v21673_v59 }
 0x29a   : > { %17892 = vmatprep.mubr.msk.f32.mxu1 %vm21257_vm0, %v23053_v57  ;;  %18771 = vmatpush3.bf16.msra.mxu1 %v18770_v2  ;;  %v2190_v2 = vld [vmem:[#allocation3 + $0xa28] sm:$0xff] }
 0x29d   : > { %17893 = vmatmul.mubr.msk.f32.vlgmr.msra.gmra.mrb[12].mxu1 %vm853_vm1, %v21690_v52 }
 0x29e   : > { %2789 = vmatprep.mubr.f32.mxu1 %v21657_v26 }
 0x35b   : > { %v16936_v3 = vpop.f32.mrb[12].mxu0 }
 0x35c   : > { %v16937_v4 = vpop.f32.mrb[13].mxu0 }
 0x35d   : > { %v16938_v5 = vadd.f32 %v16937_v4, %v16936_v3  ;;  %v18699_v3 = vpack.c.bf16 %v2172_v0, %v2171_v63  ;;  %v18701_v4 = vpack.c.bf16 %v2190_v2, %v2189_v1  ;;  %v18763_v63 = vpack.c.bf16 %v2236_v55, %v2235_v54  ;;  %v2237_v1 = vld [vmem:[#allocation3 + $0xba0] sm:$0xff]  ;;  %v2238_v2 = vld [vmem:[#allocation3 + $0xba8] sm:$0xff] }
 0x35e   : > { %v2640_v54 = vld [vmem:[#allocation3 + $0xca8] sm:$0xff] }
 0x35f   : > { %v1926_v6 = vadd.f32 %v16938_v5, %v21738_v61  ;;  %v2065_v8 = vpop.f32.mrb[14].mxu0  ;;  %v18677_v61 = vpack.c.bf16 %v2178_v16, %v2177_v15  ;;  %v2173_v5 = vld [vmem:[#allocation3 + $0x9a0] sm:$0xff]  ;;  %v2242_v15 = vld [vmem:[#allocation3 + $0xbc8] sm:$0xff] }
 0x360   : > { %v17882_v9 = vpop.f32.mrb[15].mxu0 }
 0x361   : > { %v1996_v12 = vadd.f32 %v21740_v21, %v1926_v6  ;;  %v2180_v21 = vld [vmem:[#allocation3 + $0x9d8] sm:$0xff]  ;;  %v2174_v6 = vld [vmem:[#allocation3 + $0x9a8] sm:$0xff] }
 0x362   : > { %v18681_v28 = vpack.c.bf16 %v2180_v21, %v2179_v24  ;;  %v2240_v9 = vld [vmem:[#allocation3 + $0xbb8] sm:$0xff]  ;;  %v18703_v10 = vpack.c.bf16 %v2174_v6, %v2173_v5  ;;  %v2227_v24 = vld [vmem:[#allocation3 + $0xb50] sm:$0xff] }
 0x363   : > { %v2066_v17 = vadd.f32 %v2065_v8, %v1996_v12  ;;  %v2239_v8 = vld [vmem:[#allocation3 + $0xbb0] sm:$0xff]  ;;  %v2228_v21 = vld [vmem:[#allocation3 + $0xb58] sm:$0xff] }
 0x364   : > { %v18737_v11 = vpack.c.bf16 %v2240_v9, %v2239_v8  ;;  %v2223_v12 = vld [vmem:[#allocation3 + $0xb30] sm:$0xff]  ;;  %v18747_v29 = vpack.c.bf16 %v2228_v21, %v2227_v24  ;;  %v2643_v8 = vld [vmem:[#allocation3 + $0xcc0] sm:$0xff]  ;;  %v2644_v9 = vld [vmem:[#allocation3 + $0xcc8] sm:$0xff] }
 0x365   : > { %17883 = vmatprep.subr.msk.mxu0 %vm1527_vm3, %v2066_v17  ;;  %v18739_v16 = vpack.c.bf16 %v2224_v13, %v2223_v12  ;;  %v2628_v12 = vld [vmem:[#allocation3 + $0xc48] sm:$0xff]  ;;  %v2645_v13 = vld [vmem:[#allocation3 + $0xcd0] sm:$0xff] }
 0x366   : > { %17884 = vmatpush3.msk.msra.mxu0 %vm1527_vm3, %v2066_v17  ;;  %v18741_v17 = vpack.c.bf16 %v2242_v15, %v2241_v14  ;;  %v2646_v14 = vld [vmem:[#allocation3 + $0xcd8] sm:$0xff]  ;;  %v2632_v24 = vld [vmem:[#allocation3 + $0xc68] sm:$0xff]  ;;  %v2649_v21 = vld [vmem:[#allocation3 + $0xcf0] sm:$0xff] }
 0x367   : > { %18674 = vmatprep.subr.bf16.mxu0 %v18673_v18  ;;  %17886 = vmatmul.mubr.msk.f32.vlgmr.msra.gmra.mrb[10].mxu0 %vm1520_vm2, %v16312_v19  ;;  %v2225_v18 = vld [vmem:[#allocation3 + $0xb40] sm:$0xff]  ;;  %v2226_v19 = vld [vmem:[#allocation3 + $0xb48] sm:$0xff] }
 0x368   : > { %18676 = vmatpush3.bf16.msra.mxu0 %v18675_v20  ;;  %2321 = vmatprep.mubr.f32.mxu0 %v21657_v26  ;;  %v2243_v20 = vld [vmem:[#allocation3 + $0xbd0] sm:$0xff]  ;;  %v18743_v22 = vpack.c.bf16 %v2226_v19, %v2225_v18  ;;  %v2630_v18 = vld [vmem:[#allocation3 + $0xc58] sm:$0xff]  ;;  %v2647_v19 = vld [vmem:[#allocation3 + $0xce0] sm:$0xff] }
 0x369   : > { %18678 = vmatprep.subr.bf16.mxu0 %v18677_v61  ;;  %v2244_v61 = vld [vmem:[#allocation3 + $0xbd8] sm:$0xff] }
 0x36a   : > { %v18745_v23 = vpack.c.bf16 %v2244_v61, %v2243_v20  ;;  %v2648_v20 = vld [vmem:[#allocation3 + $0xce8] sm:$0xff] }
 0x36c   : > { %18680 = vmatpush3.bf16.msra.mxu0 %v18679_v25  ;;  %v2245_v25 = vld [vmem:[#allocation3 + $0xbe0] sm:$0xff] }
 0x36d   : > { %18682 = vmatprep.subr.bf16.mxu0 %v18681_v28  ;;  %v2246_v28 = vld [vmem:[#allocation3 + $0xbe8] sm:$0xff] }
 0x36e   : > { %v18749_v30 = vpack.c.bf16 %v2246_v28, %v2245_v25  ;;  %v2650_v25 = vld [vmem:[#allocation3 + $0xcf8] sm:$0xff] }
 0x370   : > { %18684 = vmatpush3.bf16.msra.mxu0 %v18683_v33  ;;  %v2247_v33 = vld [vmem:[#allocation3 + $0xbf0] sm:$0xff] }
 0x371   : > { %18686 = vmatprep.subr.bf16.mxu0 %v18685_v34  ;;  %v2248_v34 = vld [vmem:[#allocation3 + $0xbf8] sm:$0xff] }
 0x372   : > { %v18753_v37 = vpack.c.bf16 %v2248_v34, %v2247_v33  ;;  %v2652_v33 = vld [vmem:[#allocation3 + $0xd08] sm:$0xff] }
 0x374   : > { %18688 = vmatpush3.bf16.msra.mxu0 %v18687_v41  ;;  %v2249_v41 = vld [vmem:[#allocation3 + $0xc00] sm:$0xff] }
 0x375   : > { %18690 = vmatprep.subr.bf16.mxu0 %v18689_v42  ;;  %v2250_v42 = vld [vmem:[#allocation3 + $0xc08] sm:$0xff] }
 0x376   : > { %v18757_v45 = vpack.c.bf16 %v2250_v42, %v2249_v41  ;;  %v2654_v41 = vld [vmem:[#allocation3 + $0xd18] sm:$0xff] }
 0x378   : > { %18692 = vmatpush3.bf16.msra.mxu0 %v18691_v49  ;;  %v2251_v49 = vld [vmem:[#allocation3 + $0xc10] sm:$0xff] }
 0x379   : > { %18694 = vmatprep.subr.bf16.mxu0 %v18693_v50  ;;  %v2252_v50 = vld [vmem:[#allocation3 + $0xc18] sm:$0xff] }
 0x37a   : > { %v18761_v53 = vpack.c.bf16 %v2252_v50, %v2251_v49  ;;  %v2655_v49 = vld [vmem:[#allocation3 + $0xd20] sm:$0xff]  ;;  %v2656_v50 = vld [vmem:[#allocation3 + $0xd28] sm:$0xff] }
 0x37c   : > { %18696 = vmatpush3.bf16.msra.mxu0 %v18695_v58  ;;  %v2253_v58 = vld [vmem:[#allocation3 + $0xc20] sm:$0xff] }
 0x37d   : > { %18698 = vmatprep.subr.bf16.mxu0 %v18697_v60  ;;  %v2254_v60 = vld [vmem:[#allocation3 + $0xc28] sm:$0xff] }
 0x37e   : > { %v18765_v0 = vpack.c.bf16 %v2254_v60, %v2253_v58  ;;  %v2657_v60 = vld [vmem:[#allocation3 + $0xd30] sm:$0xff] }
 0x380   : > { %18700 = vmatpush3.bf16.msra.mxu0 %v18699_v3  ;;  %v18767_v3 = vpack.c.bf16 %v2238_v2, %v2237_v1  ;;  %v2641_v2 = vld [vmem:[#allocation3 + $0xcb0] sm:$0xff] }
 0x381   : > { %18702 = vmatprep.subr.bf16.mxu0 %v18701_v4  ;;  %v17047_v4 = vpop.f32.mrb[10].mxu1 }
 0x382   : > { %v17048_v5 = vpop.f32.mrb[11].mxu1 }
 0x383   : > { %v21765_v6 = vadd.f32 %v17048_v5, %v17047_v4  ;;  %v21767_v58 = vpop.f32.mrb[12].mxu1  ;;  %v2707_v5 = vld [vmem:[#allocation3 + $0xec0] sm:$0xff] }
 0x384   : > { %18704 = vmatpush3.bf16.msra.mxu0 %v18703_v10  ;;  %v2627_v10 = vld [vmem:[#allocation3 + $0xc40] sm:$0xff] }
 0x385   : > { %18738 = vmatprep.subr.bf16.mxu0 %v18737_v11  ;;  %v18772_v11 = vpack.c.bf16 %v2644_v9, %v2643_v8  ;;  %v18774_v15 = vpack.c.bf16 %v2628_v12, %v2627_v10  ;;  %v16317_v8 = vld [vmem:[%s23100_s26 + $0x30] sm:$0xff]  ;;  %v2691_v10 = vld [vmem:[#allocation3 + $0xe40] sm:$0xff] }
 0x386   : > { %v2708_v9 = vld [vmem:[#allocation3 + $0xec8] sm:$0xff] }
 0x387   : > { %2322 = vmatmul.mubr.f32.vlgmr.msra.gmra.mrb[16].mxu0 %v21670_v56  ;;  %18773 = vmatprep.subr.bf16.mxu1 %v18772_v11  ;;  %v18836_v11 = vpack.c.bf16 %v2708_v9, %v2707_v5  ;;  %v2692_v12 = vld [vmem:[#allocation3 + $0xe48] sm:$0xff] }
 0x388   : > { %18740 = vmatpush3.bf16.msra.mxu0 %v18739_v16  ;;  %2461 = vmatprep.mubr.f32.mxu0 %v21676_v7  ;;  %v18776_v16 = vpack.c.bf16 %v2646_v14, %v2645_v13  ;;  %v18838_v13 = vpack.c.bf16 %v2692_v12, %v2691_v10  ;;  %v2709_v14 = vld [vmem:[#allocation3 + $0xed0] sm:$0xff] }
 0x389   : > { %18742 = vmatprep.subr.bf16.mxu0 %v18741_v17  ;;  %v2629_v17 = vld [vmem:[#allocation3 + $0xc50] sm:$0xff]  ;;  %18775 = vmatpush3.bf16.msra.mxu1 %v18774_v15  ;;  %v2710_v15 = vld [vmem:[#allocation3 + $0xed8] sm:$0xff] }
 0x38a   : > { %v18778_v61 = vpack.c.bf16 %v2630_v18, %v2629_v17  ;;  %18777 = vmatprep.subr.bf16.mxu1 %v18776_v16  ;;  %v2693_v16 = vld [vmem:[#allocation3 + $0xe50] sm:$0xff]  ;;  %v2694_v17 = vld [vmem:[#allocation3 + $0xe58] sm:$0xff]  ;;  %v18840_v18 = vpack.c.bf16 %v2710_v15, %v2709_v14  ;;  %v2676_v14 = vld [vmem:[#allocation3 + $0xdc8] sm:$0xff] }
 0x38c   : > { %18744 = vmatpush3.bf16.msra.mxu0 %v18743_v22  ;;  %v18780_v22 = vpack.c.bf16 %v2648_v20, %v2647_v19  ;;  %v18842_v19 = vpack.c.bf16 %v2694_v17, %v2693_v16  ;;  %v2711_v20 = vld [vmem:[#allocation3 + $0xee0] sm:$0xff]  ;;  %v2660_v17 = vld [vmem:[#allocation3 + $0xd48] sm:$0xff] }
 0x38d   : > { %18746 = vmatprep.subr.bf16.mxu0 %v18745_v23  ;;  %v2631_v23 = vld [vmem:[#allocation3 + $0xc60] sm:$0xff]  ;;  %18779 = vmatpush3.bf16.msra.mxu1 %v18778_v61  ;;  %v2712_v61 = vld [vmem:[#allocation3 + $0xee8] sm:$0xff] }
 0x38e   : > { %v18782_v28 = vpack.c.bf16 %v2632_v24, %v2631_v23  ;;  %18781 = vmatprep.subr.bf16.mxu1 %v18780_v22  ;;  %v2695_v22 = vld [vmem:[#allocation3 + $0xe60] sm:$0xff]  ;;  %v2696_v23 = vld [vmem:[#allocation3 + $0xe68] sm:$0xff]  ;;  %v18844_v24 = vpack.c.bf16 %v2712_v61, %v2711_v20 }
 0x38f   : > { %v2659_v16 = vld [vmem:[#allocation3 + $0xd40] sm:$0xff] }
 0x390   : > { %18748 = vmatpush3.bf16.msra.mxu0 %v18747_v29  ;;  %v18784_v29 = vpack.c.bf16 %v2650_v25, %v2649_v21  ;;  %v18846_v21 = vpack.c.bf16 %v2696_v23, %v2695_v22  ;;  %v2713_v25 = vld [vmem:[#allocation3 + $0xef0] sm:$0xff]  ;;  %v18806_v23 = vpack.c.bf16 %v2660_v17, %v2659_v16 }
 0x391   : > { %18750 = vmatprep.subr.bf16.mxu0 %v18749_v30  ;;  %v2633_v30 = vld [vmem:[#allocation3 + $0xc70] sm:$0xff]  ;;  %18783 = vmatpush3.bf16.msra.mxu1 %v18782_v28  ;;  %v2714_v28 = vld [vmem:[#allocation3 + $0xef8] sm:$0xff] }
 0x392   : > { %v18786_v34 = vpack.c.bf16 %v2634_v31, %v2633_v30  ;;  %18785 = vmatprep.subr.bf16.mxu1 %v18784_v29  ;;  %v2697_v29 = vld [vmem:[#allocation3 + $0xe70] sm:$0xff]  ;;  %v2698_v30 = vld [vmem:[#allocation3 + $0xe78] sm:$0xff]  ;;  %v18848_v31 = vpack.c.bf16 %v2714_v28, %v2713_v25  ;;  %v2679_v25 = vld [vmem:[#allocation3 + $0xde0] sm:$0xff] }
 0x393   : > { %v16318_v22 = vld [vmem:[%s23100_s26 + $0x38] sm:$0xff]  ;;  %v2680_v28 = vld [vmem:[#allocation3 + $0xde8] sm:$0xff] }
 0x394   : > { %18752 = vmatpush3.bf16.msra.mxu0 %v18751_v35  ;;  %v18788_v35 = vpack.c.bf16 %v2652_v33, %v2651_v32  ;;  %v18850_v32 = vpack.c.bf16 %v2698_v30, %v2697_v29  ;;  %v2715_v33 = vld [vmem:[#allocation3 + $0xf00] sm:$0xff]  ;;  %v18812_v29 = vpack.c.bf16 %v2680_v28, %v2679_v25 }
 0x395   : > { %18754 = vmatprep.subr.bf16.mxu0 %v18753_v37  ;;  %v2635_v37 = vld [vmem:[#allocation3 + $0xc80] sm:$0xff]  ;;  %18787 = vmatpush3.bf16.msra.mxu1 %v18786_v34  ;;  %v2716_v34 = vld [vmem:[#allocation3 + $0xf08] sm:$0xff] }
 0x396   : > { %v18790_v42 = vpack.c.bf16 %v2636_v38, %v2635_v37  ;;  %18789 = vmatprep.subr.bf16.mxu1 %v18788_v35  ;;  %v2699_v35 = vld [vmem:[#allocation3 + $0xe80] sm:$0xff]  ;;  %v2700_v37 = vld [vmem:[#allocation3 + $0xe88] sm:$0xff]  ;;  %v18852_v38 = vpack.c.bf16 %v2716_v34, %v2715_v33  ;;  %v2682_v33 = vld [vmem:[#allocation3 + $0xdf8] sm:$0xff] }
 0x397   : > { %v2663_v30 = vld [vmem:[#allocation3 + $0xd60] sm:$0xff] }
 0x398   : > { %18756 = vmatpush3.bf16.msra.mxu0 %v18755_v43  ;;  %v18792_v43 = vpack.c.bf16 %v2654_v41, %v2653_v39  ;;  %v18854_v39 = vpack.c.bf16 %v2700_v37, %v2699_v35  ;;  %v2717_v41 = vld [vmem:[#allocation3 + $0xf10] sm:$0xff]  ;;  %v3145_v28 = vld [vmem:[#allocation3 + $0x10e0] sm:$0xff] }
 0x399   : > { %18758 = vmatprep.subr.bf16.mxu0 %v18757_v45  ;;  %18791 = vmatpush3.bf16.msra.mxu1 %v18790_v42  ;;  %v2637_v45 = vld [vmem:[#allocation3 + $0xc90] sm:$0xff]  ;;  %v2718_v42 = vld [vmem:[#allocation3 + $0xf18] sm:$0xff] }
 0x39a   : > { %18793 = vmatprep.subr.bf16.mxu1 %v18792_v43  ;;  %v18794_v47 = vpack.c.bf16 %v2638_v46, %v2637_v45  ;;  %v2701_v43 = vld [vmem:[#allocation3 + $0xe90] sm:$0xff]  ;;  %v2702_v45 = vld [vmem:[#allocation3 + $0xe98] sm:$0xff]  ;;  %v18856_v46 = vpack.c.bf16 %v2718_v42, %v2717_v41  ;;  %v2684_v41 = vld [vmem:[#allocation3 + $0xe08] sm:$0xff] }
 0x39b   : > { %v2665_v37 = vld [vmem:[#allocation3 + $0xd70] sm:$0xff] }
 0x39c   : > { %18760 = vmatpush3.bf16.msra.mxu0 %v18759_v51  ;;  %v18796_v51 = vpack.c.bf16 %v2656_v50, %v2655_v49  ;;  %v2719_v49 = vld [vmem:[#allocation3 + $0xf20] sm:$0xff]  ;;  %v2720_v50 = vld [vmem:[#allocation3 + $0xf28] sm:$0xff] }
 0x39d   : > { %18762 = vmatprep.subr.bf16.mxu0 %v18761_v53  ;;  %18795 = vmatpush3.bf16.msra.mxu1 %v18794_v47  ;;  %v2639_v53 = vld [vmem:[#allocation3 + $0xca0] sm:$0xff]  ;;  %v18858_v47 = vpack.c.bf16 %v2702_v45, %v2701_v43 }
 0x39e   : > { %v18798_v55 = vpack.c.bf16 %v2640_v54, %v2639_v53  ;;  %18797 = vmatprep.subr.bf16.mxu1 %v18796_v51  ;;  %v2703_v51 = vld [vmem:[#allocation3 + $0xea0] sm:$0xff]  ;;  %v2704_v53 = vld [vmem:[#allocation3 + $0xea8] sm:$0xff]  ;;  %v18860_v54 = vpack.c.bf16 %v2720_v50, %v2719_v49  ;;  %v2686_v49 = vld [vmem:[#allocation3 + $0xe18] sm:$0xff] }
 0x39f   : > { %v2667_v45 = vld [vmem:[#allocation3 + $0xd80] sm:$0xff] }
 0x3a0   : > { %18764 = vmatpush3.bf16.msra.mxu0 %v18763_v63  ;;  %v2658_v63 = vld [vmem:[#allocation3 + $0xd38] sm:$0xff] }
 0x3a1   : > { %18766 = vmatprep.subr.bf16.mxu0 %v18765_v0  ;;  %18799 = vmatpush3.bf16.msra.mxu1 %v18798_v55  ;;  %v17894_v0 = vpop.f32.mrb[13].mxu1  ;;  %v18800_v1 = vpack.c.bf16 %v2658_v63, %v2657_v60  ;;  %v18862_v55 = vpack.c.bf16 %v2704_v53, %v2703_v51  ;;  %v2721_v60 = vld [vmem:[#allocation3 + $0xf30] sm:$0xff]  ;;  %v2722_v63 = vld [vmem:[#allocation3 + $0xf38] sm:$0xff] }
 0x3a2   : > { %v2705_v0 = vld [vmem:[#allocation3 + $0xeb0] sm:$0xff] }
 0x3a3   : > { %18801 = vmatprep.subr.bf16.mxu1 %v18800_v1  ;;  %v2706_v1 = vld [vmem:[#allocation3 + $0xeb8] sm:$0xff]  ;;  %v2669_v53 = vld [vmem:[#allocation3 + $0xd90] sm:$0xff] }
 0x3a4   : > { %18768 = vmatpush3.bf16.msra.mxu0 %v18767_v3  ;;  %v2642_v3 = vld [vmem:[#allocation3 + $0xcb8] sm:$0xff] }
 0x3a5   : > { %v18802_v4 = vpack.c.bf16 %v2642_v3, %v2641_v2  ;;  %v18864_v2 = vpack.c.bf16 %v2722_v63, %v2721_v60  ;;  %v18866_v3 = vpack.c.bf16 %v2706_v1, %v2705_v0  ;;  %v2688_v60 = vld [vmem:[#allocation3 + $0xe28] sm:$0xff]  ;;  %v2671_v1 = vld [vmem:[#allocation3 + $0xda0] sm:$0xff] }
 0x3a7   : > { %2462 = vmatmul.mubr.f32.vlgmr.msra.gmra.mrb[18].mxu0 %v21684_v36  ;;  %18803 = vmatpush3.bf16.msra.mxu1 %v18802_v4 }
 0x3a8   : > { %17897 = vmatprep.mubr.msk.f32.mxu0 %vm1520_vm2, %v16317_v8  ;;  %18837 = vmatprep.subr.bf16.mxu1 %v18836_v11 }
 0x3aa   : > { %2790 = vmatmul.mubr.f32.vlgmr.msra.gmra.mrb[14].mxu1 %v21670_v56 }
 0x3ab   : > { %2929 = vmatprep.mubr.f32.mxu1 %v21676_v7  ;;  %18839 = vmatpush3.bf16.msra.mxu1 %v18838_v13  ;;  %v2675_v13 = vld [vmem:[#allocation3 + $0xdc0] sm:$0xff] }
 0x3ac   : > { %18841 = vmatprep.subr.bf16.mxu1 %v18840_v18  ;;  %v2677_v18 = vld [vmem:[#allocation3 + $0xdd0] sm:$0xff]  ;;  %v18804_v61 = vpack.c.bf16 %v2676_v14, %v2675_v13  ;;  %v2724_v13 = vld [vmem:[#allocation3 + $0xf48] sm:$0xff] }
 0x3af   : > { %18843 = vmatpush3.bf16.msra.mxu1 %v18842_v19  ;;  %v2678_v19 = vld [vmem:[#allocation3 + $0xdd8] sm:$0xff] }
 0x3b0   : > { %18845 = vmatprep.subr.bf16.mxu1 %v18844_v24  ;;  %v2661_v24 = vld [vmem:[#allocation3 + $0xd50] sm:$0xff] }
 0x3b3   : > { %18847 = vmatpush3.bf16.msra.mxu1 %v18846_v21  ;;  %v2662_v21 = vld [vmem:[#allocation3 + $0xd58] sm:$0xff] }
 0x3b4   : > { %18849 = vmatprep.subr.bf16.mxu1 %v18848_v31  ;;  %v2664_v31 = vld [vmem:[#allocation3 + $0xd68] sm:$0xff] }
 0x3b5   : > { %v18814_v34 = vpack.c.bf16 %v2664_v31, %v2663_v30  ;;  %v3129_v30 = vld [vmem:[#allocation3 + $0x1060] sm:$0xff]  ;;  %v3130_v31 = vld [vmem:[#allocation3 + $0x1068] sm:$0xff] }
 0x3b7   : > { %18851 = vmatpush3.bf16.msra.mxu1 %v18850_v32  ;;  %v2681_v32 = vld [vmem:[#allocation3 + $0xdf0] sm:$0xff] }
 0x3b8   : > { %18853 = vmatprep.subr.bf16.mxu1 %v18852_v38  ;;  %v18816_v35 = vpack.c.bf16 %v2682_v33, %v2681_v32  ;;  %v2666_v38 = vld [vmem:[#allocation3 + $0xd78] sm:$0xff]  ;;  %v18909_v32 = vpack.c.bf16 %v3130_v31, %v3129_v30  ;;  %v3147_v33 = vld [vmem:[#allocation3 + $0x10f0] sm:$0xff] }
 0x3b9   : > { %v18818_v42 = vpack.c.bf16 %v2666_v38, %v2665_v37  ;;  %v3131_v37 = vld [vmem:[#allocation3 + $0x1070] sm:$0xff]  ;;  %v3132_v38 = vld [vmem:[#allocation3 + $0x1078] sm:$0xff] }
 0x3ba   : > { %v3095_v31 = vld [vmem:[#allocation3 + $0xf50] sm:$0xff] }
 0x3bb   : > { %18855 = vmatpush3.bf16.msra.mxu1 %v18854_v39  ;;  %v2683_v39 = vld [vmem:[#allocation3 + $0xe00] sm:$0xff] }
 0x3bc   : > { %18857 = vmatprep.subr.bf16.mxu1 %v18856_v46  ;;  %v18820_v43 = vpack.c.bf16 %v2684_v41, %v2683_v39  ;;  %v2668_v46 = vld [vmem:[#allocation3 + $0xd88] sm:$0xff]  ;;  %v18913_v39 = vpack.c.bf16 %v3132_v38, %v3131_v37  ;;  %v3149_v41 = vld [vmem:[#allocation3 + $0x1100] sm:$0xff] }
 0x3bd   : > { %v18822_v50 = vpack.c.bf16 %v2668_v46, %v2667_v45  ;;  %v3133_v45 = vld [vmem:[#allocation3 + $0x1080] sm:$0xff]  ;;  %v3134_v46 = vld [vmem:[#allocation3 + $0x1088] sm:$0xff] }
 0x3be   : > { %v16324_v38 = vld [vmem:[%s23100_s26 + $0x48] sm:$0xff] }
 0x3bf   : > { %18859 = vmatpush3.bf16.msra.mxu1 %v18858_v47  ;;  %v2685_v47 = vld [vmem:[#allocation3 + $0xe10] sm:$0xff] }
 0x3c0   : > { %18861 = vmatprep.subr.bf16.mxu1 %v18860_v54  ;;  %v18824_v51 = vpack.c.bf16 %v2686_v49, %v2685_v47  ;;  %v2670_v54 = vld [vmem:[#allocation3 + $0xd98] sm:$0xff]  ;;  %v18917_v47 = vpack.c.bf16 %v3134_v46, %v3133_v45  ;;  %v3151_v49 = vld [vmem:[#allocation3 + $0x1110] sm:$0xff] }
 0x3c1   : > { %v18826_v63 = vpack.c.bf16 %v2670_v54, %v2669_v53  ;;  %v3135_v53 = vld [vmem:[#allocation3 + $0x1090] sm:$0xff]  ;;  %v3136_v54 = vld [vmem:[#allocation3 + $0x1098] sm:$0xff] }
 0x3c3   : > { %18863 = vmatpush3.bf16.msra.mxu1 %v18862_v55  ;;  %v2687_v55 = vld [vmem:[#allocation3 + $0xe20] sm:$0xff] }
 0x3c4   : > { %18865 = vmatprep.subr.bf16.mxu1 %v18864_v2  ;;  %v18828_v0 = vpack.c.bf16 %v2688_v60, %v2687_v55  ;;  %v2672_v2 = vld [vmem:[#allocation3 + $0xda8] sm:$0xff]  ;;  %v18921_v55 = vpack.c.bf16 %v3136_v54, %v3135_v53  ;;  %v3153_v60 = vld [vmem:[#allocation3 + $0x1120] sm:$0xff] }
 0x3c7   : > { %18867 = vmatpush3.bf16.msra.mxu1 %v18866_v3  ;;  %v2689_v3 = vld [vmem:[#allocation3 + $0xe30] sm:$0xff] }
 0x3ca   : > { %2930 = vmatmul.mubr.f32.vlgmr.msra.gmra.mrb[16].mxu1 %v21684_v36 }
 0x3cb   : > { %3327 = vmatprep.mubr.f32.mxu1 %v21660_v27 }
 0x45a   : > { %v17012_v4 = vpop.f32.mrb[16].mxu0 }
 0x45b   : > { %v17013_v5 = vpop.f32.mrb[17].mxu0 }
 0x45c   : > { %v17014_v8 = vadd.f32 %v17013_v5, %v17012_v4  ;;  %v2690_v4 = vld [vmem:[#allocation3 + $0xe38] sm:$0xff]  ;;  %v18830_v5 = vpack.c.bf16 %v2672_v2, %v2671_v1  ;;  %v3137_v1 = vld [vmem:[#allocation3 + $0x10a0] sm:$0xff]  ;;  %v3138_v2 = vld [vmem:[#allocation3 + $0x10a8] sm:$0xff] }
 0x45e   : > { %v2394_v9 = vadd.f32 %v21765_v6, %v17014_v8  ;;  %v18808_v6 = vpack.c.bf16 %v2678_v19, %v2677_v18  ;;  %v18832_v8 = vpack.c.bf16 %v2690_v4, %v2689_v3  ;;  %v18925_v3 = vpack.c.bf16 %v3138_v2, %v3137_v1  ;;  %v3155_v4 = vld [vmem:[#allocation3 + $0x1130] sm:$0xff] }
 0x47a   : > { %v17082_v10 = vpop.f32.mrb[18].mxu0 }
 0x47b   : > { %v17083_v11 = vpop.f32.mrb[19].mxu0 }
 0x47c   : > { %v17084_v12 = vadd.f32 %v17083_v11, %v17082_v10  ;;  %v2674_v10 = vld [vmem:[#allocation3 + $0xdb8] sm:$0xff] }
 0x47e   : > { %v2464_v15 = vadd.f32 %v17084_v12, %v2394_v9  ;;  %v2673_v9 = vld [vmem:[#allocation3 + $0xdb0] sm:$0xff]  ;;  %v2723_v12 = vld [vmem:[#allocation3 + $0xf40] sm:$0xff] }
 0x47f   : > { %v18834_v11 = vpack.c.bf16 %v2674_v10, %v2673_v9  ;;  %v18869_v14 = vpack.c.bf16 %v2724_v13, %v2723_v12  ;;  %v3139_v9 = vld [vmem:[#allocation3 + $0x10b0] sm:$0xff]  ;;  %v3140_v10 = vld [vmem:[#allocation3 + $0x10b8] sm:$0xff]  ;;  %v3157_v12 = vld [vmem:[#allocation3 + $0x1140] sm:$0xff] }
 0x480   : > { %v2534_v20 = vadd.f32 %v21767_v58, %v2464_v15  ;;  %v18810_v58 = vpack.c.bf16 %v2662_v21, %v2661_v24  ;;  %v17123_v15 = vpop.f32.mrb[14].mxu1  ;;  %v3127_v24 = vld [vmem:[#allocation3 + $0x1050] sm:$0xff]  ;;  %v3128_v21 = vld [vmem:[#allocation3 + $0x1058] sm:$0xff]  ;;  %v3158_v13 = vld [vmem:[#allocation3 + $0x1148] sm:$0xff] }
 0x481   : > { %v17124_v16 = vpop.f32.mrb[15].mxu1  ;;  %v18905_v25 = vpack.c.bf16 %v3128_v21, %v3127_v24 }
 0x482   : > { %17895 = vmatprep.subr.msk.mxu0 %vm1527_vm3, %v2534_v20  ;;  %v21792_v17 = vadd.f32 %v17124_v16, %v17123_v15  ;;  %v3141_v15 = vld [vmem:[#allocation3 + $0x10c0] sm:$0xff]  ;;  %v3142_v16 = vld [vmem:[#allocation3 + $0x10c8] sm:$0xff] }
 0x483   : > { %17896 = vmatpush3.msk.msra.mxu0 %vm1527_vm3, %v2534_v20 }
 0x484   : > { %18805 = vmatprep.subr.bf16.mxu0 %v18804_v61  ;;  %17898 = vmatmul.mubr.msk.f32.vlgmr.msra.gmra.mrb[10].mxu0 %vm1520_vm2, %v16318_v22  ;;  %v3143_v61 = vld [vmem:[#allocation3 + $0x10d0] sm:$0xff]  ;;  %v3144_v22 = vld [vmem:[#allocation3 + $0x10d8] sm:$0xff] }
 0x485   : > { %18807 = vmatpush3.bf16.msra.mxu0 %v18806_v23  ;;  %2859 = vmatprep.mubr.f32.mxu0 %v21660_v27  ;;  %v16323_v23 = vld [vmem:[%s23100_s26 + $0x40] sm:$0xff] }
 0x486   : > { %18809 = vmatprep.subr.bf16.mxu0 %v18808_v6  ;;  %v18903_v6 = vpack.c.bf16 %v3144_v22, %v3143_v61  ;;  %v3192_v61 = vld [vmem:[#allocation3 + $0x1258] sm:$0xff] }
 0x488   : > { %18904 = vmatprep.subr.bf16.mxu1 %v18903_v6 }
 0x489   : > { %18811 = vmatpush3.bf16.msra.mxu0 %v18810_v58  ;;  %18906 = vmatpush3.bf16.msra.mxu1 %v18905_v25  ;;  %v3146_v58 = vld [vmem:[#allocation3 + $0x10e8] sm:$0xff] }
 0x48a   : > { %18813 = vmatprep.subr.bf16.mxu0 %v18812_v29  ;;  %v18907_v29 = vpack.c.bf16 %v3146_v58, %v3145_v28  ;;  %v3111_v58 = vld [vmem:[#allocation3 + $0xfd0] sm:$0xff] }
 0x48c   : > { %18908 = vmatprep.subr.bf16.mxu1 %v18907_v29  ;;  %v3112_v29 = vld [vmem:[#allocation3 + $0xfd8] sm:$0xff] }
 0x48d   : > { %18815 = vmatpush3.bf16.msra.mxu0 %v18814_v34  ;;  %18910 = vmatpush3.bf16.msra.mxu1 %v18909_v32  ;;  %v3148_v34 = vld [vmem:[#allocation3 + $0x10f8] sm:$0xff]  ;;  %v18871_v37 = vpack.c.bf16 %v3112_v29, %v3111_v58 }
 0x48e   : > { %18817 = vmatprep.subr.bf16.mxu0 %v18816_v35  ;;  %v18911_v35 = vpack.c.bf16 %v3148_v34, %v3147_v33  ;;  %v3096_v32 = vld [vmem:[#allocation3 + $0xf58] sm:$0xff]  ;;  %v3113_v33 = vld [vmem:[#allocation3 + $0xfe0] sm:$0xff]  ;;  %v3114_v34 = vld [vmem:[#allocation3 + $0xfe8] sm:$0xff] }
 0x490   : > { %18912 = vmatprep.subr.bf16.mxu1 %v18911_v35 }
 0x491   : > { %18819 = vmatpush3.bf16.msra.mxu0 %v18818_v42  ;;  %18914 = vmatpush3.bf16.msra.mxu1 %v18913_v39  ;;  %v3150_v42 = vld [vmem:[#allocation3 + $0x1108] sm:$0xff]  ;;  %v18873_v39 = vpack.c.bf16 %v3096_v32, %v3095_v31  ;;  %v3160_v31 = vld [vmem:[#allocation3 + $0x1158] sm:$0xff]  ;;  %v3177_v32 = vld [vmem:[#allocation3 + $0x11e0] sm:$0xff] }
 0x492   : > { %18821 = vmatprep.subr.bf16.mxu0 %v18820_v43  ;;  %v18915_v43 = vpack.c.bf16 %v3150_v42, %v3149_v41  ;;  %v3097_v41 = vld [vmem:[#allocation3 + $0xf60] sm:$0xff]  ;;  %v3098_v42 = vld [vmem:[#allocation3 + $0xf68] sm:$0xff] }
 0x493   : > { %v18877_v45 = vpack.c.bf16 %v3098_v42, %v3097_v41 }
 0x494   : > { %18916 = vmatprep.subr.bf16.mxu1 %v18915_v43  ;;  %v3115_v43 = vld [vmem:[#allocation3 + $0xff0] sm:$0xff] }
 0x495   : > { %18823 = vmatpush3.bf16.msra.mxu0 %v18822_v50  ;;  %18918 = vmatpush3.bf16.msra.mxu1 %v18917_v47  ;;  %v3152_v50 = vld [vmem:[#allocation3 + $0x1118] sm:$0xff]  ;;  %v3099_v47 = vld [vmem:[#allocation3 + $0xf70] sm:$0xff] }
 0x496   : > { %18825 = vmatprep.subr.bf16.mxu0 %v18824_v51  ;;  %v18919_v51 = vpack.c.bf16 %v3152_v50, %v3151_v49  ;;  %v3100_v49 = vld [vmem:[#allocation3 + $0xf78] sm:$0xff]  ;;  %v3117_v50 = vld [vmem:[#allocation3 + $0x1000] sm:$0xff] }
 0x497   : > { %v18881_v53 = vpack.c.bf16 %v3100_v49, %v3099_v47 }
 0x498   : > { %18920 = vmatprep.subr.bf16.mxu1 %v18919_v51  ;;  %v3118_v51 = vld [vmem:[#allocation3 + $0x1008] sm:$0xff] }
 0x499   : > { %18827 = vmatpush3.bf16.msra.mxu0 %v18826_v63  ;;  %18922 = vmatpush3.bf16.msra.mxu1 %v18921_v55  ;;  %v3154_v63 = vld [vmem:[#allocation3 + $0x1128] sm:$0xff]  ;;  %v18883_v54 = vpack.c.bf16 %v3118_v51, %v3117_v50  ;;  %v3101_v55 = vld [vmem:[#allocation3 + $0xf80] sm:$0xff] }
 0x49a   : > { %18829 = vmatprep.subr.bf16.mxu0 %v18828_v0  ;;  %v18923_v0 = vpack.c.bf16 %v3154_v63, %v3153_v60  ;;  %v3102_v60 = vld [vmem:[#allocation3 + $0xf88] sm:$0xff]  ;;  %v3119_v63 = vld [vmem:[#allocation3 + $0x1010] sm:$0xff]  ;;  %v3165_v50 = vld [vmem:[#allocation3 + $0x1180] sm:$0xff] }
 0x49b   : > { %v18885_v1 = vpack.c.bf16 %v3102_v60, %v3101_v55  ;;  %v3166_v51 = vld [vmem:[#allocation3 + $0x1188] sm:$0xff] }
 0x49c   : > { %18924 = vmatprep.subr.bf16.mxu1 %v18923_v0  ;;  %v3120_v0 = vld [vmem:[#allocation3 + $0x1018] sm:$0xff]  ;;  %v18949_v55 = vpack.c.bf16 %v3166_v51, %v3165_v50  ;;  %v3587_v51 = vld [vmem:[#allocation3 + $0x1320] sm:$0xff] }
 0x49d   : > { %18831 = vmatpush3.bf16.msra.mxu0 %v18830_v5  ;;  %v17193_v18 = vpop.f32.mrb[16].mxu1  ;;  %18926 = vmatpush3.bf16.msra.mxu1 %v18925_v3  ;;  %v3156_v5 = vld [vmem:[#allocation3 + $0x1138] sm:$0xff]  ;;  %v18887_v2 = vpack.c.bf16 %v3120_v0, %v3119_v63  ;;  %v3103_v3 = vld [vmem:[#allocation3 + $0xf90] sm:$0xff] }
 0x49e   : > { %18833 = vmatprep.subr.bf16.mxu0 %v18832_v8  ;;  %v17194_v19 = vpop.f32.mrb[17].mxu1  ;;  %v18927_v8 = vpack.c.bf16 %v3156_v5, %v3155_v4  ;;  %v3104_v4 = vld [vmem:[#allocation3 + $0xf98] sm:$0xff]  ;;  %v3121_v5 = vld [vmem:[#allocation3 + $0x1020] sm:$0xff]  ;;  %v3167_v63 = vld [vmem:[#allocation3 + $0x1190] sm:$0xff] }
 0x49f   : > { %v21794_v20 = vadd.f32 %v17194_v19, %v17193_v18  ;;  %v18933_v18 = vpack.c.bf16 %v3142_v16, %v3141_v15  ;;  %v3191_v19 = vld [vmem:[#allocation3 + $0x1250] sm:$0xff]  ;;  %v3168_v0 = vld [vmem:[#allocation3 + $0x1198] sm:$0xff] }
 0x4a0   : > { %18928 = vmatprep.subr.bf16.mxu1 %v18927_v8  ;;  %v18968_v22 = vpack.c.bf16 %v3192_v61, %v3191_v19  ;;  %v3122_v8 = vld [vmem:[#allocation3 + $0x1028] sm:$0xff]  ;;  %v3108_v19 = vld [vmem:[#allocation3 + $0xfb8] sm:$0xff]  ;;  %v3125_v61 = vld [vmem:[#allocation3 + $0x1040] sm:$0xff] }
 0x4a1   : > { %18835 = vmatpush3.bf16.msra.mxu0 %v18834_v11  ;;  %v18929_v11 = vpack.c.bf16 %v3140_v10, %v3139_v9  ;;  %v18889_v9 = vpack.c.bf16 %v3104_v4, %v3103_v3  ;;  %v18891_v10 = vpack.c.bf16 %v3122_v8, %v3121_v5  ;;  %v18953_v3 = vpack.c.bf16 %v3168_v0, %v3167_v63  ;;  %v3169_v5 = vld [vmem:[#allocation3 + $0x11a0] sm:$0xff]  ;;  %v3170_v8 = vld [vmem:[#allocation3 + $0x11a8] sm:$0xff]  ;;  %v3570_v50 = vld [vmem:[#allocation3 + $0x1298] sm:$0xff] }
 0x4a2   : > { %18868 = vmatprep.subr.bf16.mxu0 %v23051_v44  ;;  %v3572_v63 = vld [vmem:[#allocation3 + $0x12a8] sm:$0xff]  ;;  %v3589_v0 = vld [vmem:[#allocation3 + $0x1330] sm:$0xff] }
 0x4a3   : > { %18930 = vmatpush3.bf16.msra.mxu1 %v18929_v11  ;;  %v3105_v11 = vld [vmem:[#allocation3 + $0xfa0] sm:$0xff] }
 0x4a4   : > { %2860 = vmatmul.mubr.f32.vlgmr.msra.gmra.mrb[20].mxu0 %v21673_v59 }
 0x4a5   : > { %18870 = vmatpush3.bf16.msra.mxu0 %v18869_v14  ;;  %17904 = vmatprep.mubr.msk.f32.mxu0 %vm21257_vm0, %v23053_v57  ;;  %v18931_v14 = vpack.c.bf16 %v3158_v13, %v3157_v12  ;;  %v3106_v12 = vld [vmem:[#allocation3 + $0xfa8] sm:$0xff]  ;;  %v3123_v13 = vld [vmem:[#allocation3 + $0x1030] sm:$0xff] }
 0x4a6   : > { %v18893_v15 = vpack.c.bf16 %v3106_v12, %v3105_v11  ;;  %v18957_v11 = vpack.c.bf16 %v3170_v8, %v3169_v5  ;;  %v3574_v5 = vld [vmem:[#allocation3 + $0x12b8] sm:$0xff] }
 0x4a7   : > { %18932 = vmatprep.subr.bf16.mxu1 %v18931_v14  ;;  %v3124_v14 = vld [vmem:[#allocation3 + $0x1038] sm:$0xff] }
 0x4a8   : > { %17905 = vmatmul.mubr.msk.f32.vlgmr.msra.gmra.mrb[22].mxu0 %vm853_vm1, %v21690_v52  ;;  %18934 = vmatpush3.bf16.msra.mxu1 %v18933_v18  ;;  %v18895_v16 = vpack.c.bf16 %v3124_v14, %v3123_v13  ;;  %v3107_v18 = vld [vmem:[#allocation3 + $0xfb0] sm:$0xff]  ;;  %v3172_v14 = vld [vmem:[#allocation3 + $0x11b8] sm:$0xff] }
 0x4a9   : > { %17909 = vmatprep.mubr.msk.f32.mxu0 %vm1520_vm2, %v16323_v23  ;;  %18967 = vmatprep.subr.bf16.mxu1 %v23051_v44  ;;  %v3171_v13 = vld [vmem:[#allocation3 + $0x11b0] sm:$0xff] }
 0x4ab   : > { %3328 = vmatmul.mubr.f32.vlgmr.msra.gmra.mrb[18].mxu1 %v21673_v59 }
 0x4ac   : > { %17916 = vmatprep.mubr.msk.f32.mxu1 %vm21257_vm0, %v23053_v57  ;;  %18969 = vmatpush3.bf16.msra.mxu1 %v18968_v22  ;;  %v3126_v22 = vld [vmem:[#allocation3 + $0x1048] sm:$0xff] }
 0x4af   : > { %17917 = vmatmul.mubr.msk.f32.vlgmr.msra.gmra.mrb[20].mxu1 %vm853_vm1, %v21690_v52 }
 0x4b0   : > { %3725 = vmatprep.mubr.f32.mxu1 %v21657_v26 }
 0x577   : > { %v17158_v23 = vpop.f32.mrb[20].mxu0 }
 0x578   : > { %v17159_v6 = vpop.f32.mrb[21].mxu0 }
 0x579   : > { %v17160_v24 = vadd.f32 %v17159_v6, %v17158_v23  ;;  %v18897_v23 = vpack.c.bf16 %v3108_v19, %v3107_v18  ;;  %v18899_v6 = vpack.c.bf16 %v3126_v22, %v3125_v61  ;;  %v18961_v18 = vpack.c.bf16 %v3172_v14, %v3171_v13  ;;  %v3173_v61 = vld [vmem:[#allocation3 + $0x11c0] sm:$0xff]  ;;  %v3174_v22 = vld [vmem:[#allocation3 + $0x11c8] sm:$0xff] }
 0x57a   : > { %v3576_v13 = vld [vmem:[#allocation3 + $0x12c8] sm:$0xff] }
 0x57b   : > { %v2862_v21 = vadd.f32 %v17160_v24, %v21792_v17  ;;  %v3001_v25 = vpop.f32.mrb[22].mxu0  ;;  %v18875_v17 = vpack.c.bf16 %v3114_v34, %v3113_v33  ;;  %v3109_v24 = vld [vmem:[#allocation3 + $0xfc0] sm:$0xff]  ;;  %v3178_v33 = vld [vmem:[#allocation3 + $0x11e8] sm:$0xff] }
 0x57c   : > { %v17906_v28 = vpop.f32.mrb[23].mxu0 }
 0x57d   : > { %v2932_v30 = vadd.f32 %v21794_v20, %v2862_v21  ;;  %v3116_v20 = vld [vmem:[#allocation3 + $0xff8] sm:$0xff]  ;;  %v3110_v21 = vld [vmem:[#allocation3 + $0xfc8] sm:$0xff] }
 0x57e   : > { %v18879_v46 = vpack.c.bf16 %v3116_v20, %v3115_v43  ;;  %v3176_v28 = vld [vmem:[#allocation3 + $0x11d8] sm:$0xff]  ;;  %v18901_v58 = vpack.c.bf16 %v3110_v21, %v3109_v24  ;;  %v3163_v43 = vld [vmem:[#allocation3 + $0x1170] sm:$0xff] }
 0x57f   : > { %v3002_v35 = vadd.f32 %v3001_v25, %v2932_v30  ;;  %v3175_v25 = vld [vmem:[#allocation3 + $0x11d0] sm:$0xff]  ;;  %v3164_v20 = vld [vmem:[#allocation3 + $0x1178] sm:$0xff] }
 0x580   : > { %v18935_v29 = vpack.c.bf16 %v3176_v28, %v3175_v25  ;;  %v3159_v30 = vld [vmem:[#allocation3 + $0x1150] sm:$0xff]  ;;  %v18945_v47 = vpack.c.bf16 %v3164_v20, %v3163_v43  ;;  %v3579_v25 = vld [vmem:[#allocation3 + $0x12e0] sm:$0xff]  ;;  %v3580_v28 = vld [vmem:[#allocation3 + $0x12e8] sm:$0xff] }
 0x581   : > { %17907 = vmatprep.subr.msk.mxu0 %vm1527_vm3, %v3002_v35  ;;  %v18937_v34 = vpack.c.bf16 %v3160_v31, %v3159_v30  ;;  %v3564_v30 = vld [vmem:[#allocation3 + $0x1268] sm:$0xff]  ;;  %v3581_v31 = vld [vmem:[#allocation3 + $0x12f0] sm:$0xff] }
 0x582   : > { %17908 = vmatpush3.msk.msra.mxu0 %vm1527_vm3, %v3002_v35  ;;  %v18939_v35 = vpack.c.bf16 %v3178_v33, %v3177_v32  ;;  %v3582_v32 = vld [vmem:[#allocation3 + $0x12f8] sm:$0xff]  ;;  %v3568_v43 = vld [vmem:[#allocation3 + $0x1288] sm:$0xff]  ;;  %v3585_v20 = vld [vmem:[#allocation3 + $0x1310] sm:$0xff] }
 0x583   : > { %18872 = vmatprep.subr.bf16.mxu0 %v18871_v37  ;;  %17910 = vmatmul.mubr.msk.f32.vlgmr.msra.gmra.mrb[10].mxu0 %vm1520_vm2, %v16324_v38  ;;  %v3161_v37 = vld [vmem:[#allocation3 + $0x1160] sm:$0xff]  ;;  %v3162_v38 = vld [vmem:[#allocation3 + $0x1168] sm:$0xff] }
 0x584   : > { %18874 = vmatpush3.bf16.msra.mxu0 %v18873_v39  ;;  %3257 = vmatprep.mubr.f32.mxu0 %v21657_v26  ;;  %v3179_v39 = vld [vmem:[#allocation3 + $0x11f0] sm:$0xff]  ;;  %v18941_v41 = vpack.c.bf16 %v3162_v38, %v3161_v37  ;;  %v3566_v37 = vld [vmem:[#allocation3 + $0x1278] sm:$0xff]  ;;  %v3583_v38 = vld [vmem:[#allocation3 + $0x1300] sm:$0xff] }
 0x585   : > { %18876 = vmatprep.subr.bf16.mxu0 %v18875_v17  ;;  %v3180_v17 = vld [vmem:[#allocation3 + $0x11f8] sm:$0xff] }
 0x586   : > { %v18943_v42 = vpack.c.bf16 %v3180_v17, %v3179_v39  ;;  %v3584_v39 = vld [vmem:[#allocation3 + $0x1308] sm:$0xff] }
 0x588   : > { %18878 = vmatpush3.bf16.msra.mxu0 %v18877_v45  ;;  %v3181_v45 = vld [vmem:[#allocation3 + $0x1200] sm:$0xff] }
 0x589   : > { %18880 = vmatprep.subr.bf16.mxu0 %v18879_v46  ;;  %v3182_v46 = vld [vmem:[#allocation3 + $0x1208] sm:$0xff] }
 0x58a   : > { %v18947_v49 = vpack.c.bf16 %v3182_v46, %v3181_v45  ;;  %v3586_v45 = vld [vmem:[#allocation3 + $0x1318] sm:$0xff] }
 0x58c   : > { %18882 = vmatpush3.bf16.msra.mxu0 %v18881_v53  ;;  %v3183_v53 = vld [vmem:[#allocation3 + $0x1210] sm:$0xff] }
 0x58d   : > { %18884 = vmatprep.subr.bf16.mxu0 %v18883_v54  ;;  %v3184_v54 = vld [vmem:[#allocation3 + $0x1218] sm:$0xff] }
 0x58e   : > { %v18951_v60 = vpack.c.bf16 %v3184_v54, %v3183_v53  ;;  %v3588_v53 = vld [vmem:[#allocation3 + $0x1328] sm:$0xff] }
 0x590   : > { %18886 = vmatpush3.bf16.msra.mxu0 %v18885_v1  ;;  %v3185_v1 = vld [vmem:[#allocation3 + $0x1220] sm:$0xff] }
 0x591   : > { %18888 = vmatprep.subr.bf16.mxu0 %v18887_v2  ;;  %v3186_v2 = vld [vmem:[#allocation3 + $0x1228] sm:$0xff] }
 0x592   : > { %v18955_v4 = vpack.c.bf16 %v3186_v2, %v3185_v1  ;;  %v3590_v1 = vld [vmem:[#allocation3 + $0x1338] sm:$0xff] }
 0x594   : > { %18890 = vmatpush3.bf16.msra.mxu0 %v18889_v9  ;;  %v3187_v9 = vld [vmem:[#allocation3 + $0x1230] sm:$0xff] }
 0x595   : > { %18892 = vmatprep.subr.bf16.mxu0 %v18891_v10  ;;  %v3188_v10 = vld [vmem:[#allocation3 + $0x1238] sm:$0xff] }
 0x596   : > { %v18959_v12 = vpack.c.bf16 %v3188_v10, %v3187_v9  ;;  %v3591_v9 = vld [vmem:[#allocation3 + $0x1340] sm:$0xff]  ;;  %v3592_v10 = vld [vmem:[#allocation3 + $0x1348] sm:$0xff] }
 0x598   : > { %18894 = vmatpush3.bf16.msra.mxu0 %v18893_v15  ;;  %v3189_v15 = vld [vmem:[#allocation3 + $0x1240] sm:$0xff] }
 0x599   : > { %18896 = vmatprep.subr.bf16.mxu0 %v18895_v16  ;;  %v3190_v16 = vld [vmem:[#allocation3 + $0x1248] sm:$0xff] }
 0x59a   : > { %v18963_v19 = vpack.c.bf16 %v3190_v16, %v3189_v15  ;;  %v3593_v16 = vld [vmem:[#allocation3 + $0x1350] sm:$0xff] }
 0x59c   : > { %18898 = vmatpush3.bf16.msra.mxu0 %v18897_v23  ;;  %v18965_v23 = vpack.c.bf16 %v3174_v22, %v3173_v61  ;;  %v3577_v22 = vld [vmem:[#allocation3 + $0x12d0] sm:$0xff] }
 0x59d   : > { %18900 = vmatprep.subr.bf16.mxu0 %v18899_v6  ;;  %v17269_v6 = vpop.f32.mrb[18].mxu1 }
 0x59e   : > { %v17270_v24 = vpop.f32.mrb[19].mxu1 }
 0x59f   : > { %v21819_v21 = vadd.f32 %v17270_v24, %v17269_v6  ;;  %v21821_v15 = vpop.f32.mrb[20].mxu1  ;;  %v3643_v24 = vld [vmem:[#allocation3 + $0x14e0] sm:$0xff] }
 0x5a0   : > { %18902 = vmatpush3.bf16.msra.mxu0 %v18901_v58  ;;  %v3563_v58 = vld [vmem:[#allocation3 + $0x1260] sm:$0xff] }
 0x5a1   : > { %18936 = vmatprep.subr.bf16.mxu0 %v18935_v29  ;;  %v18970_v29 = vpack.c.bf16 %v3580_v28, %v3579_v25  ;;  %v18972_v33 = vpack.c.bf16 %v3564_v30, %v3563_v58  ;;  %v16329_v25 = vld [vmem:[%s23100_s26 + $0x50] sm:$0xff]  ;;  %v3627_v58 = vld [vmem:[#allocation3 + $0x1460] sm:$0xff] }
 0x5a2   : > { %v3644_v28 = vld [vmem:[#allocation3 + $0x14e8] sm:$0xff] }
 0x5a3   : > { %3258 = vmatmul.mubr.f32.vlgmr.msra.gmra.mrb[24].mxu0 %v21670_v56  ;;  %18971 = vmatprep.subr.bf16.mxu1 %v18970_v29  ;;  %v19034_v29 = vpack.c.bf16 %v3644_v28, %v3643_v24  ;;  %v3628_v30 = vld [vmem:[#allocation3 + $0x1468] sm:$0xff] }
 0x5a4   : > { %18938 = vmatpush3.bf16.msra.mxu0 %v18937_v34  ;;  %3397 = vmatprep.mubr.f32.mxu0 %v21676_v7  ;;  %v18974_v34 = vpack.c.bf16 %v3582_v32, %v3581_v31  ;;  %v19036_v31 = vpack.c.bf16 %v3628_v30, %v3627_v58  ;;  %v3645_v32 = vld [vmem:[#allocation3 + $0x14f0] sm:$0xff] }
 0x5a5   : > { %18940 = vmatprep.subr.bf16.mxu0 %v18939_v35  ;;  %v3565_v35 = vld [vmem:[#allocation3 + $0x1270] sm:$0xff]  ;;  %18973 = vmatpush3.bf16.msra.mxu1 %v18972_v33  ;;  %v3646_v33 = vld [vmem:[#allocation3 + $0x14f8] sm:$0xff] }
 0x5a6   : > { %v18976_v17 = vpack.c.bf16 %v3566_v37, %v3565_v35  ;;  %18975 = vmatprep.subr.bf16.mxu1 %v18974_v34  ;;  %v3629_v34 = vld [vmem:[#allocation3 + $0x1470] sm:$0xff]  ;;  %v3630_v35 = vld [vmem:[#allocation3 + $0x1478] sm:$0xff]  ;;  %v19038_v37 = vpack.c.bf16 %v3646_v33, %v3645_v32  ;;  %v3612_v32 = vld [vmem:[#allocation3 + $0x13e8] sm:$0xff] }
 0x5a8   : > { %18942 = vmatpush3.bf16.msra.mxu0 %v18941_v41  ;;  %v18978_v41 = vpack.c.bf16 %v3584_v39, %v3583_v38  ;;  %v19040_v38 = vpack.c.bf16 %v3630_v35, %v3629_v34  ;;  %v3647_v39 = vld [vmem:[#allocation3 + $0x1500] sm:$0xff]  ;;  %v3596_v35 = vld [vmem:[#allocation3 + $0x1368] sm:$0xff] }
 0x5a9   : > { %18944 = vmatprep.subr.bf16.mxu0 %v18943_v42  ;;  %v3567_v42 = vld [vmem:[#allocation3 + $0x1280] sm:$0xff]  ;;  %18977 = vmatpush3.bf16.msra.mxu1 %v18976_v17  ;;  %v3648_v17 = vld [vmem:[#allocation3 + $0x1508] sm:$0xff] }
 0x5aa   : > { %v18980_v46 = vpack.c.bf16 %v3568_v43, %v3567_v42  ;;  %18979 = vmatprep.subr.bf16.mxu1 %v18978_v41  ;;  %v3631_v41 = vld [vmem:[#allocation3 + $0x1480] sm:$0xff]  ;;  %v3632_v42 = vld [vmem:[#allocation3 + $0x1488] sm:$0xff]  ;;  %v19042_v43 = vpack.c.bf16 %v3648_v17, %v3647_v39 }
 0x5ab   : > { %v3595_v34 = vld [vmem:[#allocation3 + $0x1360] sm:$0xff] }
 0x5ac   : > { %18946 = vmatpush3.bf16.msra.mxu0 %v18945_v47  ;;  %v18982_v47 = vpack.c.bf16 %v3586_v45, %v3585_v20  ;;  %v19044_v20 = vpack.c.bf16 %v3632_v42, %v3631_v41  ;;  %v3649_v45 = vld [vmem:[#allocation3 + $0x1510] sm:$0xff]  ;;  %v19004_v42 = vpack.c.bf16 %v3596_v35, %v3595_v34 }
 0x5ad   : > { %18948 = vmatprep.subr.bf16.mxu0 %v18947_v49  ;;  %v3569_v49 = vld [vmem:[#allocation3 + $0x1290] sm:$0xff]  ;;  %18981 = vmatpush3.bf16.msra.mxu1 %v18980_v46  ;;  %v3650_v46 = vld [vmem:[#allocation3 + $0x1518] sm:$0xff] }
 0x5ae   : > { %v18984_v54 = vpack.c.bf16 %v3570_v50, %v3569_v49  ;;  %18983 = vmatprep.subr.bf16.mxu1 %v18982_v47  ;;  %v3633_v47 = vld [vmem:[#allocation3 + $0x1490] sm:$0xff]  ;;  %v3634_v49 = vld [vmem:[#allocation3 + $0x1498] sm:$0xff]  ;;  %v19046_v50 = vpack.c.bf16 %v3650_v46, %v3649_v45  ;;  %v3615_v45 = vld [vmem:[#allocation3 + $0x1400] sm:$0xff] }
 0x5af   : > { %v16330_v41 = vld [vmem:[%s23100_s26 + $0x58] sm:$0xff]  ;;  %v3616_v46 = vld [vmem:[#allocation3 + $0x1408] sm:$0xff] }
 0x5b0   : > { %18950 = vmatpush3.bf16.msra.mxu0 %v18949_v55  ;;  %v18986_v55 = vpack.c.bf16 %v3588_v53, %v3587_v51  ;;  %v19048_v51 = vpack.c.bf16 %v3634_v49, %v3633_v47  ;;  %v3651_v53 = vld [vmem:[#allocation3 + $0x1520] sm:$0xff]  ;;  %v19010_v47 = vpack.c.bf16 %v3616_v46, %v3615_v45 }
 0x5b1   : > { %18952 = vmatprep.subr.bf16.mxu0 %v18951_v60  ;;  %v3571_v60 = vld [vmem:[#allocation3 + $0x12a0] sm:$0xff]  ;;  %18985 = vmatpush3.bf16.msra.mxu1 %v18984_v54  ;;  %v3652_v54 = vld [vmem:[#allocation3 + $0x1528] sm:$0xff] }
 0x5b2   : > { %v18988_v2 = vpack.c.bf16 %v3572_v63, %v3571_v60  ;;  %18987 = vmatprep.subr.bf16.mxu1 %v18986_v55  ;;  %v3635_v55 = vld [vmem:[#allocation3 + $0x14a0] sm:$0xff]  ;;  %v3636_v60 = vld [vmem:[#allocation3 + $0x14a8] sm:$0xff]  ;;  %v19050_v63 = vpack.c.bf16 %v3652_v54, %v3651_v53  ;;  %v3618_v53 = vld [vmem:[#allocation3 + $0x1418] sm:$0xff] }
 0x5b3   : > { %v3599_v49 = vld [vmem:[#allocation3 + $0x1380] sm:$0xff] }
 0x5b4   : > { %18954 = vmatpush3.bf16.msra.mxu0 %v18953_v3  ;;  %v18990_v3 = vpack.c.bf16 %v3590_v1, %v3589_v0  ;;  %v19052_v0 = vpack.c.bf16 %v3636_v60, %v3635_v55  ;;  %v3653_v1 = vld [vmem:[#allocation3 + $0x1530] sm:$0xff]  ;;  %v4081_v46 = vld [vmem:[#allocation3 + $0x1700] sm:$0xff] }
 0x5b5   : > { %18956 = vmatprep.subr.bf16.mxu0 %v18955_v4  ;;  %18989 = vmatpush3.bf16.msra.mxu1 %v18988_v2  ;;  %v3573_v4 = vld [vmem:[#allocation3 + $0x12b0] sm:$0xff]  ;;  %v3654_v2 = vld [vmem:[#allocation3 + $0x1538] sm:$0xff] }
 0x5b6   : > { %18991 = vmatprep.subr.bf16.mxu1 %v18990_v3  ;;  %v18992_v8 = vpack.c.bf16 %v3574_v5, %v3573_v4  ;;  %v3637_v3 = vld [vmem:[#allocation3 + $0x14b0] sm:$0xff]  ;;  %v3638_v4 = vld [vmem:[#allocation3 + $0x14b8] sm:$0xff]  ;;  %v19054_v5 = vpack.c.bf16 %v3654_v2, %v3653_v1  ;;  %v3620_v1 = vld [vmem:[#allocation3 + $0x1428] sm:$0xff] }
 0x5b7   : > { %v3601_v60 = vld [vmem:[#allocation3 + $0x1390] sm:$0xff] }
 0x5b8   : > { %18958 = vmatpush3.bf16.msra.mxu0 %v18957_v11  ;;  %v18994_v11 = vpack.c.bf16 %v3592_v10, %v3591_v9  ;;  %v3655_v9 = vld [vmem:[#allocation3 + $0x1540] sm:$0xff]  ;;  %v3656_v10 = vld [vmem:[#allocation3 + $0x1548] sm:$0xff] }
 0x5b9   : > { %18960 = vmatprep.subr.bf16.mxu0 %v18959_v12  ;;  %18993 = vmatpush3.bf16.msra.mxu1 %v18992_v8  ;;  %v3575_v12 = vld [vmem:[#allocation3 + $0x12c0] sm:$0xff]  ;;  %v19056_v8 = vpack.c.bf16 %v3638_v4, %v3637_v3 }
 0x5ba   : > { %v18996_v14 = vpack.c.bf16 %v3576_v13, %v3575_v12  ;;  %18995 = vmatprep.subr.bf16.mxu1 %v18994_v11  ;;  %v3639_v11 = vld [vmem:[#allocation3 + $0x14c0] sm:$0xff]  ;;  %v3640_v12 = vld [vmem:[#allocation3 + $0x14c8] sm:$0xff]  ;;  %v19058_v13 = vpack.c.bf16 %v3656_v10, %v3655_v9  ;;  %v3622_v9 = vld [vmem:[#allocation3 + $0x1438] sm:$0xff] }
 0x5bb   : > { %v3603_v4 = vld [vmem:[#allocation3 + $0x13a0] sm:$0xff] }
 0x5bc   : > { %18962 = vmatpush3.bf16.msra.mxu0 %v18961_v18  ;;  %v3594_v18 = vld [vmem:[#allocation3 + $0x1358] sm:$0xff] }
 0x5bd   : > { %18964 = vmatprep.subr.bf16.mxu0 %v18963_v19  ;;  %18997 = vmatpush3.bf16.msra.mxu1 %v18996_v14  ;;  %v17918_v19 = vpop.f32.mrb[21].mxu1  ;;  %v18998_v61 = vpack.c.bf16 %v3594_v18, %v3593_v16  ;;  %v19060_v14 = vpack.c.bf16 %v3640_v12, %v3639_v11  ;;  %v3657_v16 = vld [vmem:[#allocation3 + $0x1550] sm:$0xff]  ;;  %v3658_v18 = vld [vmem:[#allocation3 + $0x1558] sm:$0xff] }
 0x5be   : > { %v3641_v19 = vld [vmem:[#allocation3 + $0x14d0] sm:$0xff] }
 0x5bf   : > { %18999 = vmatprep.subr.bf16.mxu1 %v18998_v61  ;;  %v3642_v61 = vld [vmem:[#allocation3 + $0x14d8] sm:$0xff]  ;;  %v3605_v12 = vld [vmem:[#allocation3 + $0x13b0] sm:$0xff] }
 0x5c0   : > { %18966 = vmatpush3.bf16.msra.mxu0 %v18965_v23  ;;  %v3578_v23 = vld [vmem:[#allocation3 + $0x12d8] sm:$0xff] }
 0x5c1   : > { %v19000_v6 = vpack.c.bf16 %v3578_v23, %v3577_v22  ;;  %v19062_v22 = vpack.c.bf16 %v3658_v18, %v3657_v16  ;;  %v19064_v23 = vpack.c.bf16 %v3642_v61, %v3641_v19  ;;  %v3624_v16 = vld [vmem:[#allocation3 + $0x1448] sm:$0xff]  ;;  %v3607_v61 = vld [vmem:[#allocation3 + $0x13c0] sm:$0xff] }
 0x5c3   : > { %3398 = vmatmul.mubr.f32.vlgmr.msra.gmra.mrb[26].mxu0 %v21684_v36  ;;  %19001 = vmatpush3.bf16.msra.mxu1 %v19000_v6 }
 0x5c4   : > { %17921 = vmatprep.mubr.msk.f32.mxu0 %vm1520_vm2, %v16329_v25  ;;  %19035 = vmatprep.subr.bf16.mxu1 %v19034_v29 }
 0x5c6   : > { %3726 = vmatmul.mubr.f32.vlgmr.msra.gmra.mrb[22].mxu1 %v21670_v56 }
 0x5c7   : > { %3865 = vmatprep.mubr.f32.mxu1 %v21676_v7  ;;  %19037 = vmatpush3.bf16.msra.mxu1 %v19036_v31  ;;  %v3611_v31 = vld [vmem:[#allocation3 + $0x13e0] sm:$0xff] }
 0x5c8   : > { %19039 = vmatprep.subr.bf16.mxu1 %v19038_v37  ;;  %v3613_v37 = vld [vmem:[#allocation3 + $0x13f0] sm:$0xff]  ;;  %v19002_v17 = vpack.c.bf16 %v3612_v32, %v3611_v31  ;;  %v3660_v31 = vld [vmem:[#allocation3 + $0x1568] sm:$0xff] }
 0x5cb   : > { %19041 = vmatpush3.bf16.msra.mxu1 %v19040_v38  ;;  %v3614_v38 = vld [vmem:[#allocation3 + $0x13f8] sm:$0xff] }
 0x5cc   : > { %19043 = vmatprep.subr.bf16.mxu1 %v19042_v43  ;;  %v3597_v43 = vld [vmem:[#allocation3 + $0x1370] sm:$0xff] }
 0x5cf   : > { %19045 = vmatpush3.bf16.msra.mxu1 %v19044_v20  ;;  %v3598_v20 = vld [vmem:[#allocation3 + $0x1378] sm:$0xff] }
 0x5d0   : > { %19047 = vmatprep.subr.bf16.mxu1 %v19046_v50  ;;  %v3600_v50 = vld [vmem:[#allocation3 + $0x1388] sm:$0xff] }
 0x5d1   : > { %v19012_v54 = vpack.c.bf16 %v3600_v50, %v3599_v49  ;;  %v4065_v49 = vld [vmem:[#allocation3 + $0x1680] sm:$0xff]  ;;  %v4066_v50 = vld [vmem:[#allocation3 + $0x1688] sm:$0xff] }
 0x5d3   : > { %19049 = vmatpush3.bf16.msra.mxu1 %v19048_v51  ;;  %v3617_v51 = vld [vmem:[#allocation3 + $0x1410] sm:$0xff] }
 0x5d4   : > { %19051 = vmatprep.subr.bf16.mxu1 %v19050_v63  ;;  %v19014_v55 = vpack.c.bf16 %v3618_v53, %v3617_v51  ;;  %v3602_v63 = vld [vmem:[#allocation3 + $0x1398] sm:$0xff]  ;;  %v19107_v51 = vpack.c.bf16 %v4066_v50, %v4065_v49  ;;  %v4083_v53 = vld [vmem:[#allocation3 + $0x1710] sm:$0xff] }
 0x5d5   : > { %v19016_v2 = vpack.c.bf16 %v3602_v63, %v3601_v60  ;;  %v4067_v60 = vld [vmem:[#allocation3 + $0x1690] sm:$0xff]  ;;  %v4068_v63 = vld [vmem:[#allocation3 + $0x1698] sm:$0xff] }
 0x5d6   : > { %v4031_v50 = vld [vmem:[#allocation3 + $0x1570] sm:$0xff] }
 0x5d7   : > { %19053 = vmatpush3.bf16.msra.mxu1 %v19052_v0  ;;  %v3619_v0 = vld [vmem:[#allocation3 + $0x1420] sm:$0xff] }
 0x5d8   : > { %19055 = vmatprep.subr.bf16.mxu1 %v19054_v5  ;;  %v19018_v3 = vpack.c.bf16 %v3620_v1, %v3619_v0  ;;  %v3604_v5 = vld [vmem:[#allocation3 + $0x13a8] sm:$0xff]  ;;  %v19111_v0 = vpack.c.bf16 %v4068_v63, %v4067_v60  ;;  %v4085_v1 = vld [vmem:[#allocation3 + $0x1720] sm:$0xff] }
 0x5d9   : > { %v19020_v10 = vpack.c.bf16 %v3604_v5, %v3603_v4  ;;  %v4069_v4 = vld [vmem:[#allocation3 + $0x16a0] sm:$0xff]  ;;  %v4070_v5 = vld [vmem:[#allocation3 + $0x16a8] sm:$0xff] }
 0x5da   : > { %v16336_v63 = vld [vmem:[%s23100_s26 + $0x68] sm:$0xff] }
 0x5db   : > { %19057 = vmatpush3.bf16.msra.mxu1 %v19056_v8  ;;  %v3621_v8 = vld [vmem:[#allocation3 + $0x1430] sm:$0xff] }
 0x5dc   : > { %19059 = vmatprep.subr.bf16.mxu1 %v19058_v13  ;;  %v19022_v11 = vpack.c.bf16 %v3622_v9, %v3621_v8  ;;  %v3606_v13 = vld [vmem:[#allocation3 + $0x13b8] sm:$0xff]  ;;  %v19115_v8 = vpack.c.bf16 %v4070_v5, %v4069_v4  ;;  %v4087_v9 = vld [vmem:[#allocation3 + $0x1730] sm:$0xff] }
 0x5dd   : > { %v19024_v18 = vpack.c.bf16 %v3606_v13, %v3605_v12  ;;  %v4071_v12 = vld [vmem:[#allocation3 + $0x16b0] sm:$0xff]  ;;  %v4072_v13 = vld [vmem:[#allocation3 + $0x16b8] sm:$0xff] }
 0x5df   : > { %19061 = vmatpush3.bf16.msra.mxu1 %v19060_v14  ;;  %v3623_v14 = vld [vmem:[#allocation3 + $0x1440] sm:$0xff] }
 0x5e0   : > { %19063 = vmatprep.subr.bf16.mxu1 %v19062_v22  ;;  %v19026_v19 = vpack.c.bf16 %v3624_v16, %v3623_v14  ;;  %v3608_v22 = vld [vmem:[#allocation3 + $0x13c8] sm:$0xff]  ;;  %v19119_v14 = vpack.c.bf16 %v4072_v13, %v4071_v12  ;;  %v4089_v16 = vld [vmem:[#allocation3 + $0x1740] sm:$0xff] }
 0x5e3   : > { %19065 = vmatpush3.bf16.msra.mxu1 %v19064_v23  ;;  %v3625_v23 = vld [vmem:[#allocation3 + $0x1450] sm:$0xff] }
 0x5e6   : > { %3866 = vmatmul.mubr.f32.vlgmr.msra.gmra.mrb[24].mxu1 %v21684_v36 }
 0x5e7   : > { %4263 = vmatprep.mubr.f32.mxu1 %v21660_v27 }
 0x676   : > { %v17234_v6 = vpop.f32.mrb[24].mxu0 }
 0x677   : > { %v17235_v24 = vpop.f32.mrb[25].mxu0 }
 0x678   : > { %v17236_v25 = vadd.f32 %v17235_v24, %v17234_v6  ;;  %v3626_v6 = vld [vmem:[#allocation3 + $0x1458] sm:$0xff]  ;;  %v19028_v24 = vpack.c.bf16 %v3608_v22, %v3607_v61  ;;  %v4073_v61 = vld [vmem:[#allocation3 + $0x16c0] sm:$0xff]  ;;  %v4074_v22 = vld [vmem:[#allocation3 + $0x16c8] sm:$0xff] }
 0x67a   : > { %v3330_v28 = vadd.f32 %v21819_v21, %v17236_v25  ;;  %v19006_v21 = vpack.c.bf16 %v3614_v38, %v3613_v37  ;;  %v19030_v25 = vpack.c.bf16 %v3626_v6, %v3625_v23  ;;  %v19123_v23 = vpack.c.bf16 %v4074_v22, %v4073_v61  ;;  %v4091_v6 = vld [vmem:[#allocation3 + $0x1750] sm:$0xff] }
 0x696   : > { %v17304_v58 = vpop.f32.mrb[26].mxu0 }
 0x697   : > { %v17305_v29 = vpop.f32.mrb[27].mxu0 }
 0x698   : > { %v17306_v30 = vadd.f32 %v17305_v29, %v17304_v58  ;;  %v3610_v58 = vld [vmem:[#allocation3 + $0x13d8] sm:$0xff] }
 0x69a   : > { %v3400_v33 = vadd.f32 %v17306_v30, %v3330_v28  ;;  %v3609_v28 = vld [vmem:[#allocation3 + $0x13d0] sm:$0xff]  ;;  %v3659_v30 = vld [vmem:[#allocation3 + $0x1560] sm:$0xff] }
 0x69b   : > { %v19032_v29 = vpack.c.bf16 %v3610_v58, %v3609_v28  ;;  %v19067_v32 = vpack.c.bf16 %v3660_v31, %v3659_v30  ;;  %v4075_v28 = vld [vmem:[#allocation3 + $0x16d0] sm:$0xff]  ;;  %v4076_v58 = vld [vmem:[#allocation3 + $0x16d8] sm:$0xff]  ;;  %v4093_v30 = vld [vmem:[#allocation3 + $0x1760] sm:$0xff] }
 0x69c   : > { %v3470_v39 = vadd.f32 %v21821_v15, %v3400_v33  ;;  %v19008_v15 = vpack.c.bf16 %v3598_v20, %v3597_v43  ;;  %v17345_v33 = vpop.f32.mrb[22].mxu1  ;;  %v4063_v43 = vld [vmem:[#allocation3 + $0x1670] sm:$0xff]  ;;  %v4064_v20 = vld [vmem:[#allocation3 + $0x1678] sm:$0xff]  ;;  %v4094_v31 = vld [vmem:[#allocation3 + $0x1768] sm:$0xff] }
 0x69d   : > { %v17346_v34 = vpop.f32.mrb[23].mxu1  ;;  %v19103_v45 = vpack.c.bf16 %v4064_v20, %v4063_v43 }
 0x69e   : > { %17919 = vmatprep.subr.msk.mxu0 %vm1527_vm3, %v3470_v39  ;;  %v21846_v35 = vadd.f32 %v17346_v34, %v17345_v33  ;;  %v4077_v33 = vld [vmem:[#allocation3 + $0x16e0] sm:$0xff]  ;;  %v4078_v34 = vld [vmem:[#allocation3 + $0x16e8] sm:$0xff] }
 0x69f   : > { %17920 = vmatpush3.msk.msra.mxu0 %vm1527_vm3, %v3470_v39 }
 0x6a0   : > { %19003 = vmatprep.subr.bf16.mxu0 %v19002_v17  ;;  %17922 = vmatmul.mubr.msk.f32.vlgmr.msra.gmra.mrb[10].mxu0 %vm1520_vm2, %v16330_v41  ;;  %v4079_v17 = vld [vmem:[#allocation3 + $0x16f0] sm:$0xff]  ;;  %v4080_v41 = vld [vmem:[#allocation3 + $0x16f8] sm:$0xff] }
 0x6a1   : > { %19005 = vmatpush3.bf16.msra.mxu0 %v19004_v42  ;;  %3795 = vmatprep.mubr.f32.mxu0 %v21660_v27  ;;  %v16335_v42 = vld [vmem:[%s23100_s26 + $0x60] sm:$0xff] }
 0x6a2   : > { %19007 = vmatprep.subr.bf16.mxu0 %v19006_v21  ;;  %v19101_v21 = vpack.c.bf16 %v4080_v41, %v4079_v17  ;;  %v4128_v17 = vld [vmem:[#allocation3 + $0x1878] sm:$0xff] }
 0x6a4   : > { %19102 = vmatprep.subr.bf16.mxu1 %v19101_v21 }
 0x6a5   : > { %19009 = vmatpush3.bf16.msra.mxu0 %v19008_v15  ;;  %19104 = vmatpush3.bf16.msra.mxu1 %v19103_v45  ;;  %v4082_v15 = vld [vmem:[#allocation3 + $0x1708] sm:$0xff] }
 0x6a6   : > { %19011 = vmatprep.subr.bf16.mxu0 %v19010_v47  ;;  %v19105_v47 = vpack.c.bf16 %v4082_v15, %v4081_v46  ;;  %v4047_v15 = vld [vmem:[#allocation3 + $0x15f0] sm:$0xff] }
 0x6a8   : > { %19106 = vmatprep.subr.bf16.mxu1 %v19105_v47  ;;  %v4048_v47 = vld [vmem:[#allocation3 + $0x15f8] sm:$0xff] }
 0x6a9   : > { %19013 = vmatpush3.bf16.msra.mxu0 %v19012_v54  ;;  %19108 = vmatpush3.bf16.msra.mxu1 %v19107_v51  ;;  %v4084_v54 = vld [vmem:[#allocation3 + $0x1718] sm:$0xff]  ;;  %v19069_v60 = vpack.c.bf16 %v4048_v47, %v4047_v15  ;;  %v4095_v47 = vld [vmem:[#allocation3 + $0x1770] sm:$0xff] }
 0x6aa   : > { %19015 = vmatprep.subr.bf16.mxu0 %v19014_v55  ;;  %v19109_v55 = vpack.c.bf16 %v4084_v54, %v4083_v53  ;;  %v4032_v51 = vld [vmem:[#allocation3 + $0x1578] sm:$0xff]  ;;  %v4049_v53 = vld [vmem:[#allocation3 + $0x1600] sm:$0xff]  ;;  %v4050_v54 = vld [vmem:[#allocation3 + $0x1608] sm:$0xff] }
 0x6ac   : > { %19110 = vmatprep.subr.bf16.mxu1 %v19109_v55 }
 0x6ad   : > { %19017 = vmatpush3.bf16.msra.mxu0 %v19016_v2  ;;  %19112 = vmatpush3.bf16.msra.mxu1 %v19111_v0  ;;  %v4086_v2 = vld [vmem:[#allocation3 + $0x1728] sm:$0xff]  ;;  %v19071_v0 = vpack.c.bf16 %v4032_v51, %v4031_v50  ;;  %v4113_v50 = vld [vmem:[#allocation3 + $0x1800] sm:$0xff] }
 0x6ae   : > { %19019 = vmatprep.subr.bf16.mxu0 %v19018_v3  ;;  %v19113_v3 = vpack.c.bf16 %v4086_v2, %v4085_v1  ;;  %v4033_v1 = vld [vmem:[#allocation3 + $0x1580] sm:$0xff]  ;;  %v4034_v2 = vld [vmem:[#allocation3 + $0x1588] sm:$0xff] }
 0x6af   : > { %v19075_v4 = vpack.c.bf16 %v4034_v2, %v4033_v1  ;;  %v4114_v51 = vld [vmem:[#allocation3 + $0x1808] sm:$0xff]  ;;  %v4099_v2 = vld [vmem:[#allocation3 + $0x1790] sm:$0xff] }
 0x6b0   : > { %19114 = vmatprep.subr.bf16.mxu1 %v19113_v3  ;;  %v4051_v3 = vld [vmem:[#allocation3 + $0x1610] sm:$0xff] }
 0x6b1   : > { %19021 = vmatpush3.bf16.msra.mxu0 %v19020_v10  ;;  %19116 = vmatpush3.bf16.msra.mxu1 %v19115_v8  ;;  %v4088_v10 = vld [vmem:[#allocation3 + $0x1738] sm:$0xff]  ;;  %v4035_v8 = vld [vmem:[#allocation3 + $0x1590] sm:$0xff] }
 0x6b2   : > { %19023 = vmatprep.subr.bf16.mxu0 %v19022_v11  ;;  %v19117_v11 = vpack.c.bf16 %v4088_v10, %v4087_v9  ;;  %v4036_v9 = vld [vmem:[#allocation3 + $0x1598] sm:$0xff]  ;;  %v4053_v10 = vld [vmem:[#allocation3 + $0x1620] sm:$0xff] }
 0x6b3   : > { %v19079_v12 = vpack.c.bf16 %v4036_v9, %v4035_v8  ;;  %v4101_v9 = vld [vmem:[#allocation3 + $0x17a0] sm:$0xff] }
 0x6b4   : > { %19118 = vmatprep.subr.bf16.mxu1 %v19117_v11  ;;  %v4054_v11 = vld [vmem:[#allocation3 + $0x1628] sm:$0xff] }
 0x6b5   : > { %19025 = vmatpush3.bf16.msra.mxu0 %v19024_v18  ;;  %19120 = vmatpush3.bf16.msra.mxu1 %v19119_v14  ;;  %v4090_v18 = vld [vmem:[#allocation3 + $0x1748] sm:$0xff]  ;;  %v19081_v13 = vpack.c.bf16 %v4054_v11, %v4053_v10  ;;  %v4037_v14 = vld [vmem:[#allocation3 + $0x15a0] sm:$0xff]  ;;  %v4119_v11 = vld [vmem:[#allocation3 + $0x1830] sm:$0xff] }
 0x6b6   : > { %19027 = vmatprep.subr.bf16.mxu0 %v19026_v19  ;;  %v19121_v19 = vpack.c.bf16 %v4090_v18, %v4089_v16  ;;  %v4038_v16 = vld [vmem:[#allocation3 + $0x15a8] sm:$0xff]  ;;  %v4055_v18 = vld [vmem:[#allocation3 + $0x1630] sm:$0xff] }
 0x6b7   : > { %v19083_v61 = vpack.c.bf16 %v4038_v16, %v4037_v14  ;;  %v4102_v10 = vld [vmem:[#allocation3 + $0x17a8] sm:$0xff]  ;;  %v4103_v16 = vld [vmem:[#allocation3 + $0x17b0] sm:$0xff] }
 0x6b8   : > { %19122 = vmatprep.subr.bf16.mxu1 %v19121_v19  ;;  %v4056_v19 = vld [vmem:[#allocation3 + $0x1638] sm:$0xff] }
 0x6b9   : > { %19029 = vmatpush3.bf16.msra.mxu0 %v19028_v24  ;;  %v17415_v37 = vpop.f32.mrb[24].mxu1  ;;  %19124 = vmatpush3.bf16.msra.mxu1 %v19123_v23  ;;  %v4092_v24 = vld [vmem:[#allocation3 + $0x1758] sm:$0xff]  ;;  %v19085_v22 = vpack.c.bf16 %v4056_v19, %v4055_v18  ;;  %v4039_v23 = vld [vmem:[#allocation3 + $0x15b0] sm:$0xff]  ;;  %v4121_v19 = vld [vmem:[#allocation3 + $0x1840] sm:$0xff] }
 0x6ba   : > { %19031 = vmatprep.subr.bf16.mxu0 %v19030_v25  ;;  %v17416_v38 = vpop.f32.mrb[25].mxu1  ;;  %v19125_v25 = vpack.c.bf16 %v4092_v24, %v4091_v6  ;;  %v4057_v6 = vld [vmem:[#allocation3 + $0x1640] sm:$0xff]  ;;  %v4058_v24 = vld [vmem:[#allocation3 + $0x1648] sm:$0xff]  ;;  %v4104_v18 = vld [vmem:[#allocation3 + $0x17b8] sm:$0xff] }
 0x6bb   : > { %v21848_v39 = vadd.f32 %v17416_v38, %v17415_v37  ;;  %v19131_v37 = vpack.c.bf16 %v4078_v34, %v4077_v33  ;;  %v4127_v38 = vld [vmem:[#allocation3 + $0x1870] sm:$0xff] }
 0x6bc   : > { %19126 = vmatprep.subr.bf16.mxu1 %v19125_v25  ;;  %v19166_v41 = vpack.c.bf16 %v4128_v17, %v4127_v38  ;;  %v4043_v34 = vld [vmem:[#allocation3 + $0x15d0] sm:$0xff]  ;;  %v4061_v38 = vld [vmem:[#allocation3 + $0x1660] sm:$0xff]  ;;  %v4062_v17 = vld [vmem:[#allocation3 + $0x1668] sm:$0xff] }
 0x6bd   : > { %19033 = vmatpush3.bf16.msra.mxu0 %v19032_v29  ;;  %v19127_v29 = vpack.c.bf16 %v4076_v58, %v4075_v28  ;;  %v19089_v28 = vpack.c.bf16 %v4058_v24, %v4057_v6  ;;  %v4041_v58 = vld [vmem:[#allocation3 + $0x15c0] sm:$0xff]  ;;  %v4106_v6 = vld [vmem:[#allocation3 + $0x17c8] sm:$0xff]  ;;  %v4123_v24 = vld [vmem:[#allocation3 + $0x1850] sm:$0xff] }
 0x6be   : > { %19066 = vmatprep.subr.bf16.mxu0 %v23051_v44 }
 0x6bf   : > { %19128 = vmatpush3.bf16.msra.mxu1 %v19127_v29  ;;  %v4042_v29 = vld [vmem:[#allocation3 + $0x15c8] sm:$0xff] }
 0x6c0   : > { %3796 = vmatmul.mubr.f32.vlgmr.msra.gmra.mrb[28].mxu0 %v21673_v59 }
 0x6c1   : > { %19068 = vmatpush3.bf16.msra.mxu0 %v19067_v32  ;;  %17928 = vmatprep.mubr.msk.f32.mxu0 %vm21257_vm0, %v23053_v57  ;;  %v19129_v32 = vpack.c.bf16 %v4094_v31, %v4093_v30  ;;  %v4059_v30 = vld [vmem:[#allocation3 + $0x1650] sm:$0xff]  ;;  %v4060_v31 = vld [vmem:[#allocation3 + $0x1658] sm:$0xff] }
 0x6c2   : > { %v19093_v33 = vpack.c.bf16 %v4060_v31, %v4059_v30  ;;  %v4108_v30 = vld [vmem:[#allocation3 + $0x17d8] sm:$0xff]  ;;  %v4125_v31 = vld [vmem:[#allocation3 + $0x1860] sm:$0xff] }
 0x6c3   : > { %19130 = vmatprep.subr.bf16.mxu1 %v19129_v32  ;;  %v19091_v32 = vpack.c.bf16 %v4042_v29, %v4041_v58  ;;  %v4107_v29 = vld [vmem:[#allocation3 + $0x17d0] sm:$0xff] }
 0x6c4   : > { %17929 = vmatmul.mubr.msk.f32.vlgmr.msra.gmra.mrb[30].mxu0 %vm853_vm1, %v21690_v52  ;;  %19132 = vmatpush3.bf16.msra.mxu1 %v19131_v37  ;;  %v4044_v37 = vld [vmem:[#allocation3 + $0x15d8] sm:$0xff] }
 0x6c5   : > { %17933 = vmatprep.mubr.msk.f32.mxu0 %vm1520_vm2, %v16335_v42  ;;  %19165 = vmatprep.subr.bf16.mxu1 %v23051_v44 }
 0x6c7   : > { %4264 = vmatmul.mubr.f32.vlgmr.msra.gmra.mrb[26].mxu1 %v21673_v59 }
 0x6c8   : > { %17940 = vmatprep.mubr.msk.f32.mxu1 %vm21257_vm0, %v23053_v57  ;;  %19167 = vmatpush3.bf16.msra.mxu1 %v19166_v41  ;;  %v19095_v41 = vpack.c.bf16 %v4044_v37, %v4043_v34  ;;  %v4109_v37 = vld [vmem:[#allocation3 + $0x17e0] sm:$0xff] }
 0x6cb   : > { %17941 = vmatmul.mubr.msk.f32.vlgmr.msra.gmra.mrb[28].mxu1 %vm853_vm1, %v21690_v52 }
 0x6cc   : > { %4661 = vmatprep.mubr.f32.mxu1 %v21657_v26 }
 0x793   : > { %v17380_v42 = vpop.f32.mrb[28].mxu0 }
 0x794   : > { %v17381_v21 = vpop.f32.mrb[29].mxu0 }
 0x795   : > { %v17382_v43 = vadd.f32 %v17381_v21, %v17380_v42  ;;  %v19097_v42 = vpack.c.bf16 %v4062_v17, %v4061_v38  ;;  %v4045_v21 = vld [vmem:[#allocation3 + $0x15e0] sm:$0xff]  ;;  %v4110_v38 = vld [vmem:[#allocation3 + $0x17e8] sm:$0xff] }
 0x796   : > { %v19163_v17 = vpack.c.bf16 %v4110_v38, %v4109_v37  ;;  %v4513_v37 = vld [vmem:[#allocation3 + $0x18f0] sm:$0xff]  ;;  %v4514_v38 = vld [vmem:[#allocation3 + $0x18f8] sm:$0xff] }
 0x797   : > { %v3798_v20 = vadd.f32 %v17382_v43, %v21846_v35  ;;  %v3937_v45 = vpop.f32.mrb[30].mxu0  ;;  %v19073_v35 = vpack.c.bf16 %v4050_v54, %v4049_v53  ;;  %v4046_v43 = vld [vmem:[#allocation3 + $0x15e8] sm:$0xff]  ;;  %v19137_v54 = vpack.c.bf16 %v4114_v51, %v4113_v50 }
 0x798   : > { %v17930_v46 = vpop.f32.mrb[31].mxu0 }
 0x799   : > { %v3868_v49 = vadd.f32 %v21848_v39, %v3798_v20  ;;  %v4052_v39 = vld [vmem:[#allocation3 + $0x1618] sm:$0xff]  ;;  %v4111_v20 = vld [vmem:[#allocation3 + $0x17f0] sm:$0xff]  ;;  %v19099_v46 = vpack.c.bf16 %v4046_v43, %v4045_v21  ;;  %v4515_v43 = vld [vmem:[#allocation3 + $0x1900] sm:$0xff] }
 0x79a   : > { %v19077_v5 = vpack.c.bf16 %v4052_v39, %v4051_v3  ;;  %v4100_v3 = vld [vmem:[#allocation3 + $0x1798] sm:$0xff]  ;;  %v4117_v39 = vld [vmem:[#allocation3 + $0x1820] sm:$0xff] }
 0x79b   : > { %v3938_v55 = vadd.f32 %v3937_v45, %v3868_v49  ;;  %v4112_v45 = vld [vmem:[#allocation3 + $0x17f8] sm:$0xff] }
 0x79c   : > { %v19133_v15 = vpack.c.bf16 %v4112_v45, %v4111_v20  ;;  %v4096_v49 = vld [vmem:[#allocation3 + $0x1778] sm:$0xff]  ;;  %v4516_v20 = vld [vmem:[#allocation3 + $0x1908] sm:$0xff]  ;;  %v4499_v45 = vld [vmem:[#allocation3 + $0x1880] sm:$0xff] }
 0x79d   : > { %17931 = vmatprep.subr.msk.mxu0 %vm1527_vm3, %v3938_v55  ;;  %v19135_v53 = vpack.c.bf16 %v4096_v49, %v4095_v47  ;;  %v4517_v47 = vld [vmem:[#allocation3 + $0x1910] sm:$0xff]  ;;  %v4518_v49 = vld [vmem:[#allocation3 + $0x1918] sm:$0xff] }
 0x79e   : > { %17932 = vmatpush3.msk.msra.mxu0 %vm1527_vm3, %v3938_v55  ;;  %v4097_v55 = vld [vmem:[#allocation3 + $0x1780] sm:$0xff]  ;;  %v19172_v51 = vpack.c.bf16 %v4518_v49, %v4517_v47  ;;  %v4581_v47 = vld [vmem:[#allocation3 + $0x1b10] sm:$0xff]  ;;  %v4582_v49 = vld [vmem:[#allocation3 + $0x1b18] sm:$0xff] }
 0x79f   : > { %19070 = vmatprep.subr.bf16.mxu0 %v19069_v60  ;;  %17934 = vmatmul.mubr.msk.f32.vlgmr.msra.gmra.mrb[10].mxu0 %vm1520_vm2, %v16336_v63  ;;  %v4098_v60 = vld [vmem:[#allocation3 + $0x1788] sm:$0xff]  ;;  %v4115_v63 = vld [vmem:[#allocation3 + $0x1810] sm:$0xff] }
 0x7a0   : > { %19072 = vmatpush3.bf16.msra.mxu0 %v19071_v0  ;;  %4193 = vmatprep.mubr.f32.mxu0 %v21657_v26  ;;  %v4040_v26 = vld [vmem:[#allocation3 + $0x15b8] sm:$0xff] }
 0x7a1   : > { %19074 = vmatprep.subr.bf16.mxu0 %v19073_v35  ;;  %v19087_v25 = vpack.c.bf16 %v4040_v26, %v4039_v23  ;;  %v4116_v0 = vld [vmem:[#allocation3 + $0x1818] sm:$0xff]  ;;  %v19139_v35 = vpack.c.bf16 %v4098_v60, %v4097_v55  ;;  %v4105_v26 = vld [vmem:[#allocation3 + $0x17c0] sm:$0xff]  ;;  %v4520_v60 = vld [vmem:[#allocation3 + $0x1928] sm:$0xff] }
 0x7a2   : > { %v19141_v1 = vpack.c.bf16 %v4116_v0, %v4115_v63  ;;  %v4519_v55 = vld [vmem:[#allocation3 + $0x1920] sm:$0xff] }
 0x7a3   : > { %v19176_v0 = vpack.c.bf16 %v4520_v60, %v4519_v55  ;;  %v4583_v55 = vld [vmem:[#allocation3 + $0x1b20] sm:$0xff]  ;;  %v4584_v60 = vld [vmem:[#allocation3 + $0x1b28] sm:$0xff] }
 0x7a4   : > { %19076 = vmatpush3.bf16.msra.mxu0 %v19075_v4  ;;  %v4118_v4 = vld [vmem:[#allocation3 + $0x1828] sm:$0xff] }
 0x7a5   : > { %19078 = vmatprep.subr.bf16.mxu0 %v19077_v5  ;;  %v19143_v5 = vpack.c.bf16 %v4100_v3, %v4099_v2  ;;  %v19145_v8 = vpack.c.bf16 %v4118_v4, %v4117_v39  ;;  %v4521_v2 = vld [vmem:[#allocation3 + $0x1930] sm:$0xff]  ;;  %v4522_v3 = vld [vmem:[#allocation3 + $0x1938] sm:$0xff] }
 0x7a6   : > { %v19180_v4 = vpack.c.bf16 %v4522_v3, %v4521_v2  ;;  %v4586_v2 = vld [vmem:[#allocation3 + $0x1b38] sm:$0xff]  ;;  %v4569_v3 = vld [vmem:[#allocation3 + $0x1ab0] sm:$0xff] }
 0x7a8   : > { %19080 = vmatpush3.bf16.msra.mxu0 %v19079_v12  ;;  %v4120_v12 = vld [vmem:[#allocation3 + $0x1838] sm:$0xff] }
 0x7a9   : > { %19082 = vmatprep.subr.bf16.mxu0 %v19081_v13  ;;  %v19147_v13 = vpack.c.bf16 %v4102_v10, %v4101_v9  ;;  %v19149_v14 = vpack.c.bf16 %v4120_v12, %v4119_v11  ;;  %v4523_v9 = vld [vmem:[#allocation3 + $0x1940] sm:$0xff]  ;;  %v4524_v10 = vld [vmem:[#allocation3 + $0x1948] sm:$0xff] }
 0x7aa   : > { %v19184_v12 = vpack.c.bf16 %v4524_v10, %v4523_v9  ;;  %v4571_v9 = vld [vmem:[#allocation3 + $0x1ac0] sm:$0xff]  ;;  %v4572_v10 = vld [vmem:[#allocation3 + $0x1ac8] sm:$0xff] }
 0x7ac   : > { %19084 = vmatpush3.bf16.msra.mxu0 %v19083_v61  ;;  %v4122_v61 = vld [vmem:[#allocation3 + $0x1848] sm:$0xff] }
 0x7ad   : > { %19086 = vmatprep.subr.bf16.mxu0 %v19085_v22  ;;  %v19151_v22 = vpack.c.bf16 %v4104_v18, %v4103_v16  ;;  %v19153_v23 = vpack.c.bf16 %v4122_v61, %v4121_v19  ;;  %v4525_v16 = vld [vmem:[#allocation3 + $0x1950] sm:$0xff]  ;;  %v4526_v18 = vld [vmem:[#allocation3 + $0x1958] sm:$0xff] }
 0x7ae   : > { %v19188_v61 = vpack.c.bf16 %v4526_v18, %v4525_v16  ;;  %v4573_v16 = vld [vmem:[#allocation3 + $0x1ad0] sm:$0xff]  ;;  %v4574_v18 = vld [vmem:[#allocation3 + $0x1ad8] sm:$0xff] }
 0x7b0   : > { %19088 = vmatpush3.bf16.msra.mxu0 %v19087_v25  ;;  %v4124_v25 = vld [vmem:[#allocation3 + $0x1858] sm:$0xff] }
 0x7b1   : > { %19090 = vmatprep.subr.bf16.mxu0 %v19089_v28  ;;  %v19155_v28 = vpack.c.bf16 %v4106_v6, %v4105_v26  ;;  %v19157_v58 = vpack.c.bf16 %v4124_v25, %v4123_v24  ;;  %v4527_v6 = vld [vmem:[#allocation3 + $0x1960] sm:$0xff]  ;;  %v4528_v24 = vld [vmem:[#allocation3 + $0x1968] sm:$0xff] }
 0x7b2   : > { %v19192_v25 = vpack.c.bf16 %v4528_v24, %v4527_v6  ;;  %v4576_v6 = vld [vmem:[#allocation3 + $0x1ae8] sm:$0xff] }
 0x7b4   : > { %19092 = vmatpush3.bf16.msra.mxu0 %v19091_v32  ;;  %v4126_v32 = vld [vmem:[#allocation3 + $0x1868] sm:$0xff] }
 0x7b5   : > { %19094 = vmatprep.subr.bf16.mxu0 %v19093_v33  ;;  %v19159_v33 = vpack.c.bf16 %v4108_v30, %v4107_v29  ;;  %v19161_v34 = vpack.c.bf16 %v4126_v32, %v4125_v31  ;;  %v4529_v31 = vld [vmem:[#allocation3 + $0x1970] sm:$0xff]  ;;  %v4530_v32 = vld [vmem:[#allocation3 + $0x1978] sm:$0xff] }
 0x7b8   : > { %19096 = vmatpush3.bf16.msra.mxu0 %v19095_v41  ;;  %v17491_v41 = vpop.f32.mrb[26].mxu1 }
 0x7b9   : > { %19098 = vmatprep.subr.bf16.mxu0 %v19097_v42  ;;  %v17492_v42 = vpop.f32.mrb[27].mxu1 }
 0x7ba   : > { %v21873_v21 = vadd.f32 %v17492_v42, %v17491_v41  ;;  %v21875_v30 = vpop.f32.mrb[28].mxu1  ;;  %v4579_v41 = vld [vmem:[#allocation3 + $0x1b00] sm:$0xff]  ;;  %v16341_v42 = vld [vmem:[%s23100_s26 + $0x70] sm:$0xff] }
 0x7bc   : > { %19100 = vmatpush3.bf16.msra.mxu0 %v19099_v46  ;;  %v19168_v46 = vpack.c.bf16 %v4516_v20, %v4515_v43  ;;  %v4580_v43 = vld [vmem:[#allocation3 + $0x1b08] sm:$0xff]  ;;  %v4563_v20 = vld [vmem:[#allocation3 + $0x1a80] sm:$0xff] }
 0x7bd   : > { %19134 = vmatprep.subr.bf16.mxu0 %v19133_v15  ;;  %v4500_v15 = vld [vmem:[#allocation3 + $0x1888] sm:$0xff] }
 0x7be   : > { %v19170_v50 = vpack.c.bf16 %v4500_v15, %v4499_v45  ;;  %19169 = vmatprep.subr.bf16.mxu1 %v19168_v46  ;;  %v19232_v45 = vpack.c.bf16 %v4580_v43, %v4579_v41  ;;  %v4564_v46 = vld [vmem:[#allocation3 + $0x1a88] sm:$0xff] }
 0x7bf   : > { %4194 = vmatmul.mubr.f32.vlgmr.msra.gmra.mrb[32].mxu0 %v21670_v56  ;;  %v19234_v15 = vpack.c.bf16 %v4564_v46, %v4563_v20  ;;  %v4547_v20 = vld [vmem:[#allocation3 + $0x1a00] sm:$0xff] }
 0x7c0   : > { %19136 = vmatpush3.bf16.msra.mxu0 %v19135_v53  ;;  %4333 = vmatprep.mubr.f32.mxu0 %v21676_v7  ;;  %v4501_v53 = vld [vmem:[#allocation3 + $0x1890] sm:$0xff] }
 0x7c1   : > { %19138 = vmatprep.subr.bf16.mxu0 %v19137_v54  ;;  %v4502_v54 = vld [vmem:[#allocation3 + $0x1898] sm:$0xff]  ;;  %19171 = vmatpush3.bf16.msra.mxu1 %v19170_v50  ;;  %v4565_v50 = vld [vmem:[#allocation3 + $0x1a90] sm:$0xff] }
 0x7c2   : > { %v19174_v63 = vpack.c.bf16 %v4502_v54, %v4501_v53  ;;  %19173 = vmatprep.subr.bf16.mxu1 %v19172_v51  ;;  %v4566_v51 = vld [vmem:[#allocation3 + $0x1a98] sm:$0xff]  ;;  %v19236_v53 = vpack.c.bf16 %v4582_v49, %v4581_v47  ;;  %v4532_v47 = vld [vmem:[#allocation3 + $0x1988] sm:$0xff]  ;;  %v4549_v49 = vld [vmem:[#allocation3 + $0x1a10] sm:$0xff] }
 0x7c3   : > { %v19238_v54 = vpack.c.bf16 %v4566_v51, %v4565_v50  ;;  %v4550_v50 = vld [vmem:[#allocation3 + $0x1a18] sm:$0xff] }
 0x7c4   : > { %19140 = vmatpush3.bf16.msra.mxu0 %v19139_v35  ;;  %v4503_v35 = vld [vmem:[#allocation3 + $0x18a0] sm:$0xff] }
 0x7c5   : > { %19142 = vmatprep.subr.bf16.mxu0 %v19141_v1  ;;  %v4504_v1 = vld [vmem:[#allocation3 + $0x18a8] sm:$0xff]  ;;  %19175 = vmatpush3.bf16.msra.mxu1 %v19174_v63  ;;  %v4567_v63 = vld [vmem:[#allocation3 + $0x1aa0] sm:$0xff] }
 0x7c6   : > { %v19178_v39 = vpack.c.bf16 %v4504_v1, %v4503_v35  ;;  %19177 = vmatprep.subr.bf16.mxu1 %v19176_v0  ;;  %v4568_v0 = vld [vmem:[#allocation3 + $0x1aa8] sm:$0xff]  ;;  %v19240_v35 = vpack.c.bf16 %v4584_v60, %v4583_v55  ;;  %v4533_v55 = vld [vmem:[#allocation3 + $0x1990] sm:$0xff]  ;;  %v4534_v60 = vld [vmem:[#allocation3 + $0x1998] sm:$0xff] }
 0x7c7   : > { %v19242_v1 = vpack.c.bf16 %v4568_v0, %v4567_v63  ;;  %v4551_v63 = vld [vmem:[#allocation3 + $0x1a20] sm:$0xff]  ;;  %v4552_v0 = vld [vmem:[#allocation3 + $0x1a28] sm:$0xff] }
 0x7c8   : > { %19144 = vmatpush3.bf16.msra.mxu0 %v19143_v5  ;;  %v4505_v5 = vld [vmem:[#allocation3 + $0x18b0] sm:$0xff] }
 0x7c9   : > { %19146 = vmatprep.subr.bf16.mxu0 %v19145_v8  ;;  %v4506_v8 = vld [vmem:[#allocation3 + $0x18b8] sm:$0xff]  ;;  %19179 = vmatpush3.bf16.msra.mxu1 %v19178_v39 }
 0x7ca   : > { %v19182_v11 = vpack.c.bf16 %v4506_v8, %v4505_v5  ;;  %19181 = vmatprep.subr.bf16.mxu1 %v19180_v4  ;;  %v4587_v5 = vld [vmem:[#allocation3 + $0x1b40] sm:$0xff]  ;;  %v4588_v8 = vld [vmem:[#allocation3 + $0x1b48] sm:$0xff] }
 0x7cc   : > { %19148 = vmatpush3.bf16.msra.mxu0 %v19147_v13  ;;  %v4507_v13 = vld [vmem:[#allocation3 + $0x18c0] sm:$0xff] }
 0x7cd   : > { %19150 = vmatprep.subr.bf16.mxu0 %v19149_v14  ;;  %v4508_v14 = vld [vmem:[#allocation3 + $0x18c8] sm:$0xff]  ;;  %19183 = vmatpush3.bf16.msra.mxu1 %v19182_v11  ;;  %v19248_v11 = vpack.c.bf16 %v4588_v8, %v4587_v5  ;;  %v4538_v5 = vld [vmem:[#allocation3 + $0x19b8] sm:$0xff]  ;;  %v4555_v8 = vld [vmem:[#allocation3 + $0x1a40] sm:$0xff] }
 0x7ce   : > { %v19186_v19 = vpack.c.bf16 %v4508_v14, %v4507_v13  ;;  %19185 = vmatprep.subr.bf16.mxu1 %v19184_v12  ;;  %v19250_v12 = vpack.c.bf16 %v4572_v10, %v4571_v9  ;;  %v4589_v13 = vld [vmem:[#allocation3 + $0x1b50] sm:$0xff]  ;;  %v4590_v14 = vld [vmem:[#allocation3 + $0x1b58] sm:$0xff]  ;;  %v4556_v9 = vld [vmem:[#allocation3 + $0x1a48] sm:$0xff] }
 0x7d0   : > { %19152 = vmatpush3.bf16.msra.mxu0 %v19151_v22  ;;  %v4509_v22 = vld [vmem:[#allocation3 + $0x18d0] sm:$0xff] }
 0x7d1   : > { %19154 = vmatprep.subr.bf16.mxu0 %v19153_v23  ;;  %19187 = vmatpush3.bf16.msra.mxu1 %v19186_v19  ;;  %v4510_v23 = vld [vmem:[#allocation3 + $0x18d8] sm:$0xff]  ;;  %v19252_v19 = vpack.c.bf16 %v4590_v14, %v4589_v13  ;;  %v4557_v13 = vld [vmem:[#allocation3 + $0x1a50] sm:$0xff] }
 0x7d2   : > { %19189 = vmatprep.subr.bf16.mxu1 %v19188_v61  ;;  %v19190_v26 = vpack.c.bf16 %v4510_v23, %v4509_v22  ;;  %v19254_v61 = vpack.c.bf16 %v4574_v18, %v4573_v16  ;;  %v4591_v22 = vld [vmem:[#allocation3 + $0x1b60] sm:$0xff]  ;;  %v4592_v23 = vld [vmem:[#allocation3 + $0x1b68] sm:$0xff]  ;;  %v4558_v14 = vld [vmem:[#allocation3 + $0x1a58] sm:$0xff] }
 0x7d3   : > { %v19256_v24 = vpack.c.bf16 %v4592_v23, %v4591_v22  ;;  %v19220_v18 = vpack.c.bf16 %v4558_v14, %v4557_v13  ;;  %v4559_v22 = vld [vmem:[#allocation3 + $0x1a60] sm:$0xff]  ;;  %v4560_v23 = vld [vmem:[#allocation3 + $0x1a68] sm:$0xff]  ;;  %v5085_v13 = vld [vmem:[#allocation5 + $0x80] sm:$0xff] }
 0x7d4   : > { %19156 = vmatpush3.bf16.msra.mxu0 %v19155_v28  ;;  %v4511_v28 = vld [vmem:[#allocation3 + $0x18e0] sm:$0xff] }
 0x7d5   : > { %19158 = vmatprep.subr.bf16.mxu0 %v19157_v58  ;;  %19191 = vmatpush3.bf16.msra.mxu1 %v19190_v26  ;;  %v4512_v58 = vld [vmem:[#allocation3 + $0x18e8] sm:$0xff]  ;;  %v4575_v26 = vld [vmem:[#allocation3 + $0x1ae0] sm:$0xff] }
 0x7d6   : > { %v19194_v29 = vpack.c.bf16 %v4512_v58, %v4511_v28  ;;  %19193 = vmatprep.subr.bf16.mxu1 %v19192_v25  ;;  %v19258_v25 = vpack.c.bf16 %v4576_v6, %v4575_v26  ;;  %v4593_v28 = vld [vmem:[#allocation3 + $0x1b70] sm:$0xff]  ;;  %v4594_v58 = vld [vmem:[#allocation3 + $0x1b78] sm:$0xff]  ;;  %v19224_v6 = vpack.c.bf16 %v4560_v23, %v4559_v22  ;;  %v5087_v22 = vld [vmem:[#allocation5 + $0x90] sm:$0xff] }
 0x7d8   : > { %19160 = vmatpush3.bf16.msra.mxu0 %v19159_v33  ;;  %v17942_v33 = vpop.f32.mrb[29].mxu1 }
 0x7d9   : > { %19162 = vmatprep.subr.bf16.mxu0 %v19161_v34  ;;  %19195 = vmatpush3.bf16.msra.mxu1 %v19194_v29  ;;  %v19196_v34 = vpack.c.bf16 %v4530_v32, %v4529_v31  ;;  %v4577_v29 = vld [vmem:[#allocation3 + $0x1af0] sm:$0xff]  ;;  %v4578_v31 = vld [vmem:[#allocation3 + $0x1af8] sm:$0xff]  ;;  %v19260_v32 = vpack.c.bf16 %v4594_v58, %v4593_v28 }
 0x7da   : > { %v19262_v33 = vpack.c.bf16 %v4578_v31, %v4577_v29  ;;  %v4561_v28 = vld [vmem:[#allocation3 + $0x1a70] sm:$0xff]  ;;  %v4562_v58 = vld [vmem:[#allocation3 + $0x1a78] sm:$0xff] }
 0x7db   : > { %19197 = vmatprep.subr.bf16.mxu1 %v19196_v34  ;;  %v19228_v31 = vpack.c.bf16 %v4562_v58, %v4561_v28  ;;  %v5091_v28 = vld [vmem:[#allocation5 + $0xb0] sm:$0xff] }
 0x7dc   : > { %19164 = vmatpush3.bf16.msra.mxu0 %v19163_v17  ;;  %v19198_v17 = vpack.c.bf16 %v4514_v38, %v4513_v37 }
 0x7de   : > { %19199 = vmatpush3.bf16.msra.mxu1 %v19198_v17 }
 0x7df   : > { %4334 = vmatmul.mubr.f32.vlgmr.msra.gmra.mrb[34].mxu0 %v21684_v36  ;;  %19233 = vmatprep.subr.bf16.mxu1 %v19232_v45  ;;  %v4548_v45 = vld [vmem:[#allocation3 + $0x1a08] sm:$0xff] }
 0x7e0   : > { %17945 = vmatprep.mubr.msk.f32.mxu0 %vm1520_vm2, %v16341_v42 }
 0x7e1   : > { %4662 = vmatmul.mubr.f32.vlgmr.msra.gmra.mrb[30].mxu1 %v21670_v56  ;;  %v4585_v56 = vld [vmem:[#allocation3 + $0x1b30] sm:$0xff] }
 0x7e2   : > { %4801 = vmatprep.mubr.f32.mxu1 %v21676_v7  ;;  %19235 = vmatpush3.bf16.msra.mxu1 %v19234_v15  ;;  %v4570_v7 = vld [vmem:[#allocation3 + $0x1ab8] sm:$0xff]  ;;  %v19244_v39 = vpack.c.bf16 %v4586_v2, %v4585_v56  ;;  %v4531_v15 = vld [vmem:[#allocation3 + $0x1980] sm:$0xff]  ;;  %v4536_v56 = vld [vmem:[#allocation3 + $0x19a8] sm:$0xff] }
 0x7e3   : > { %19237 = vmatprep.subr.bf16.mxu1 %v19236_v53  ;;  %v19246_v4 = vpack.c.bf16 %v4570_v7, %v4569_v3  ;;  %v19200_v53 = vpack.c.bf16 %v4548_v45, %v4547_v20  ;;  %v4553_v2 = vld [vmem:[#allocation3 + $0x1a30] sm:$0xff]  ;;  %v4554_v3 = vld [vmem:[#allocation3 + $0x1a38] sm:$0xff] }
 0x7e6   : > { %19239 = vmatpush3.bf16.msra.mxu1 %v19238_v54  ;;  %v19202_v54 = vpack.c.bf16 %v4532_v47, %v4531_v15  ;;  %v16347_v15 = vld [vmem:[%s23100_s26 + $0x80] sm:$0xff]  ;;  %v21259_v47 = vmov 0  }
 0x7e7   : > { %19241 = vmatprep.subr.bf16.mxu1 %v19240_v35  ;;  %v19208_v35 = vpack.c.bf16 %v4552_v0, %v4551_v63  ;;  %20909 = vset.pattern.permute.xlu0 %v21259_v47  ;;  %v8564_v63 = vld [vmem:[%s23030_s10 + $0x8] sm:$0xff] }
 0x7e8   : > { %20910 = vset.pattern.permute.xlu1 %v21259_v47  ;;  %v4988_v0 = vld [vmem:[#allocation5 + $0x30] sm:$0xff] }
 0x7ea   : > { %19243 = vmatpush3.bf16.msra.mxu1 %v19242_v1  ;;  %v4535_v1 = vld [vmem:[#allocation3 + $0x19a0] sm:$0xff] }
 0x7eb   : > { %19245 = vmatprep.subr.bf16.mxu1 %v19244_v39  ;;  %v19210_v7 = vpack.c.bf16 %v4536_v56, %v4535_v1  ;;  %v19212_v39 = vpack.c.bf16 %v4554_v3, %v4553_v2  ;;  %v16039_v1 = vld [vmem:[#allocation2] sm:$0x1]  ;;  %v4990_v56 = vld [vmem:[#allocation5 + $0x40] sm:$0xff] }
 0x7ec   : > { %v4991_v2 = vld [vmem:[#allocation5 + $0x48] sm:$0xff] }
 0x7ed   : > { %v19283_v3 = vpack.c.bf16 %v4991_v2, %v4990_v56 }
 0x7ee   : > { %19247 = vmatpush3.bf16.msra.mxu1 %v19246_v4  ;;  %v4537_v4 = vld [vmem:[#allocation3 + $0x19b0] sm:$0xff] }
 0x7ef   : > { %19249 = vmatprep.subr.bf16.mxu1 %v19248_v11  ;;  %v19214_v10 = vpack.c.bf16 %v4538_v5, %v4537_v4  ;;  %v19216_v11 = vpack.c.bf16 %v4556_v9, %v4555_v8 }
 0x7f2   : > { %19251 = vmatpush3.bf16.msra.mxu1 %v19250_v12  ;;  %v4539_v12 = vld [vmem:[#allocation3 + $0x19c0] sm:$0xff] }
 0x7f3   : > { %19253 = vmatprep.subr.bf16.mxu1 %v19252_v19  ;;  %v4541_v19 = vld [vmem:[#allocation3 + $0x19d0] sm:$0xff] }
 0x7f6   : > { %19255 = vmatpush3.bf16.msra.mxu1 %v19254_v61  ;;  %v4542_v61 = vld [vmem:[#allocation3 + $0x19d8] sm:$0xff] }
 0x7f7   : > { %19257 = vmatprep.subr.bf16.mxu1 %v19256_v24  ;;  %v19222_v26 = vpack.c.bf16 %v4542_v61, %v4541_v19  ;;  %v4543_v24 = vld [vmem:[#allocation3 + $0x19e0] sm:$0xff]  ;;  %v5086_v61 = vld [vmem:[#allocation5 + $0x88] sm:$0xff] }
 0x7f8   : > { %v19299_v23 = vpack.c.bf16 %v5087_v22, %v5086_v61 }
 0x7fa   : > { %19259 = vmatpush3.bf16.msra.mxu1 %v19258_v25  ;;  %v4544_v25 = vld [vmem:[#allocation3 + $0x19e8] sm:$0xff] }
 0x7fb   : > { %19261 = vmatprep.subr.bf16.mxu1 %v19260_v32  ;;  %v19226_v29 = vpack.c.bf16 %v4544_v25, %v4543_v24  ;;  %v4545_v32 = vld [vmem:[#allocation3 + $0x19f0] sm:$0xff]  ;;  %v5090_v25 = vld [vmem:[#allocation5 + $0xa8] sm:$0xff] }
 0x7fc   : > { %v19307_v58 = vpack.c.bf16 %v5091_v28, %v5090_v25  ;;  %v5365_v28 = vld [vmem:[#allocation8 + $0x10] sm:$0xff] }
 0x7fe   : > { %19263 = vmatpush3.bf16.msra.mxu1 %v19262_v33  ;;  %v4546_v33 = vld [vmem:[#allocation3 + $0x19f8] sm:$0xff] }
 0x801   : > { %4802 = vmatmul.mubr.f32.vlgmr.msra.gmra.mrb[32].mxu1 %v21684_v36  ;;  %v16342_v36 = vld [vmem:[%s23100_s26 + $0x78] sm:$0xff] }
 0x892   : > { %v17456_v34 = vpop.f32.mrb[32].mxu0 }
 0x893   : > { %v17457_v37 = vpop.f32.mrb[33].mxu0 }
 0x894   : > { %v17458_v38 = vadd.f32 %v17457_v37, %v17456_v34  ;;  %v19230_v34 = vpack.c.bf16 %v4546_v33, %v4545_v32  ;;  %v4595_v37 = vld [vmem:[#allocation3 + $0x1b80] sm:$0xff]  ;;  %v5092_v32 = vld [vmem:[#allocation5 + $0xb8] sm:$0xff] }
 0x896   : > { %v4266_v17 = vadd.f32 %v21873_v21, %v17458_v38  ;;  %v19204_v21 = vpack.c.bf16 %v4550_v50, %v4549_v49  ;;  %v4596_v38 = vld [vmem:[#allocation3 + $0x1b88] sm:$0xff]  ;;  %v4982_v49 = vld [vmem:[#allocation5] sm:$0xff] }
 0x8b2   : > { %v17526_v41 = vpop.f32.mrb[34].mxu0 }
 0x8b3   : > { %v17527_v42 = vpop.f32.mrb[35].mxu0 }
 0x8b4   : > { %v17528_v43 = vadd.f32 %v17527_v42, %v17526_v41  ;;  %v17567_v41 = vpop.f32.mrb[30].mxu1 }
 0x8b5   : > { %v17568_v42 = vpop.f32.mrb[31].mxu1 }
 0x8b6   : > { %v4336_v46 = vadd.f32 %v17528_v43, %v4266_v17  ;;  %v19265_v17 = vpack.c.bf16 %v4596_v38, %v4595_v37  ;;  %v17569_v43 = vadd.f32 %v17568_v42, %v17567_v41  ;;  %v4994_v38 = vld [vmem:[#allocation5 + $0x60] sm:$0xf]  ;;  %v5176_v41 = vld [vmem:[#allocation5 + $0xd0] sm:$0xff]  ;;  %v5177_v42 = vld [vmem:[#allocation5 + $0xd8] sm:$0xff] }
 0x8b8   : > { %v4406_v51 = vadd.f32 %v21875_v30, %v4336_v46  ;;  %v19206_v30 = vpack.c.bf16 %v4534_v60, %v4533_v55  ;;  %v4987_v55 = vld [vmem:[#allocation5 + $0x28] sm:$0xff] }
 0x8ba   : > { %17943 = vmatprep.subr.msk.mxu0 %vm1527_vm3, %v4406_v51 }
 0x8bb   : > { %17944 = vmatpush3.msk.msra.mxu0 %vm1527_vm3, %v4406_v51  ;;  %v4984_v51 = vld [vmem:[#allocation5 + $0x10] sm:$0xff] }
 0x8bc   : > { %19201 = vmatprep.subr.bf16.mxu0 %v19200_v53  ;;  %17946 = vmatmul.mubr.msk.f32.vlgmr.msra.gmra.mrb[10].mxu0 %vm1520_vm2, %v16342_v36  ;;  %v4967_v53 = vld [vmem:[%s23101_s24 + $0x8] sm:$0xff] }
 0x8bd   : > { %19203 = vmatpush3.bf16.msra.mxu0 %v19202_v54  ;;  %4731 = vmatprep.mubr.f32.mxu0 %v21660_v27  ;;  %v4540_v27 = vld [vmem:[#allocation3 + $0x19c8] sm:$0xff] }
 0x8be   : > { %19205 = vmatprep.subr.bf16.mxu0 %v19204_v21  ;;  %v19218_v16 = vpack.c.bf16 %v4540_v27, %v4539_v12  ;;  %v4985_v36 = vld [vmem:[#allocation5 + $0x18] sm:$0xff]  ;;  %v4986_v21 = vld [vmem:[#allocation5 + $0x20] sm:$0xff] }
 0x8bf   : > { %v19271_v54 = vpack.c.bf16 %v4985_v36, %v4984_v51  ;;  %v19275_v60 = vpack.c.bf16 %v4987_v55, %v4986_v21  ;;  %v5084_v27 = vld [vmem:[#allocation5 + $0x78] sm:$0xff]  ;;  %v5178_v51 = vld [vmem:[#allocation5 + $0xe0] sm:$0xff]  ;;  %v5272_v36 = vld [vmem:[#allocation5 + $0x148] sm:$0xff] }
 0x8c0   : > { %v19295_v19 = vpack.c.bf16 %v5085_v13, %v5084_v27 }
 0x8c1   : > { %19207 = vmatpush3.bf16.msra.mxu0 %v19206_v30  ;;  %v4989_v30 = vld [vmem:[#allocation5 + $0x38] sm:$0xff] }
 0x8c2   : > { %19209 = vmatprep.subr.bf16.mxu0 %v19208_v35  ;;  %v19279_v35 = vpack.c.bf16 %v4989_v30, %v4988_v0  ;;  %v5181_v30 = vld [vmem:[#allocation5 + $0xf8] sm:$0xff] }
 0x8c5   : > { %19211 = vmatpush3.bf16.msra.mxu0 %v19210_v7 }
 0x8c6   : > { %19213 = vmatprep.subr.bf16.mxu0 %v19212_v39 }
 0x8c9   : > { %19215 = vmatpush3.bf16.msra.mxu0 %v19214_v10  ;;  %v5082_v10 = vld [vmem:[#allocation5 + $0x68] sm:$0xff] }
 0x8ca   : > { %19217 = vmatprep.subr.bf16.mxu0 %v19216_v11  ;;  %v5083_v11 = vld [vmem:[#allocation5 + $0x70] sm:$0xff] }
 0x8cd   : > { %19219 = vmatpush3.bf16.msra.mxu0 %v19218_v16  ;;  %v19291_v16 = vpack.c.bf16 %v5083_v11, %v5082_v10  ;;  %v5185_v10 = vld [vmem:[#allocation5 + $0x118] sm:$0xff] }
 0x8ce   : > { %19221 = vmatprep.subr.bf16.mxu0 %v19220_v18  ;;  %v16348_v18 = vld [vmem:[%s23100_s26 + $0x88] sm:$0xff] }
 0x8cf   : > { %v5278_v11 = vld [vmem:[#allocation5 + $0x178] sm:$0xff] }
 0x8d1   : > { %19223 = vmatpush3.bf16.msra.mxu0 %v19222_v26  ;;  %v5088_v26 = vld [vmem:[#allocation5 + $0x98] sm:$0xff] }
 0x8d2   : > { %19225 = vmatprep.subr.bf16.mxu0 %v19224_v6  ;;  %v5089_v6 = vld [vmem:[#allocation5 + $0xa0] sm:$0xff] }
 0x8d3   : > { %v19303_v24 = vpack.c.bf16 %v5089_v6, %v5088_v26  ;;  %v5282_v26 = vld [vmem:[#allocation5 + $0x198] sm:$0xf]  ;;  %v5363_v6 = vld [vmem:[#allocation8] sm:$0xff] }
 0x8d4   : > { %v17637_v20 = vpop.f32.mrb[32].mxu1 }
 0x8d5   : > { %19227 = vmatpush3.bf16.msra.mxu0 %v19226_v29  ;;  %v17638_v45 = vpop.f32.mrb[33].mxu1  ;;  %v4992_v29 = vld [vmem:[#allocation5 + $0x50] sm:$0xff] }
 0x8d6   : > { %19229 = vmatprep.subr.bf16.mxu0 %v19228_v31  ;;  %v17639_v46 = vadd.f32 %v17638_v45, %v17637_v20  ;;  %v4993_v31 = vld [vmem:[#allocation5 + $0x58] sm:$0xff]  ;;  %v5271_v20 = vld [vmem:[#allocation5 + $0x140] sm:$0xff]  ;;  %v19315_v45 = vpack.c.bf16 %v5177_v42, %v5176_v41 }
 0x8d7   : > { %v19287_v33 = vpack.c.bf16 %v4993_v31, %v4992_v29  ;;  %v12861_v31 = vld [vmem:[#allocation17 + $0xb0] sm:$0xff] }
 0x8d9   : > { %19231 = vmatpush3.bf16.msra.mxu0 %v19230_v34  ;;  %v5093_v34 = vld [vmem:[#allocation5 + $0xc0] sm:$0xff] }
 0x8da   : > { %19264 = vmatprep.subr.bf16.mxu0 %v23051_v44  ;;  %v19311_v37 = vpack.c.bf16 %v5093_v34, %v5092_v32  ;;  %v5454_v32 = vld [vmem:[#allocation8 + $0x20] sm:$0xff] }
 0x8dc   : > { %4732 = vmatmul.mubr.f32.vlgmr.msra.gmra.mrb[36].mxu0 %v21673_v59  ;;  %v4966_v59 = vld [vmem:[%s23101_s24] sm:$0xff] }
 0x8dd   : > { %19266 = vmatpush3.bf16.msra.mxu0 %v19265_v17  ;;  %17952 = vmatprep.mubr.msk.f32.mxu0 %vm21257_vm0, %v23053_v57  ;;  %v5094_v17 = vld [vmem:[#allocation5 + $0xc8] sm:$0xf] }
 0x8de   : > { %4970 = vperm.xlu0 %20909, %v4966_v59  }
 0x8e0   : > { %17953 = vmatmul.mubr.msk.f32.vlgmr.msra.gmra.mrb[38].mxu0 %vm853_vm1, %v21690_v52  ;;  %v4983_v52 = vld [vmem:[#allocation5 + $0x8] sm:$0xff] }
 0x8e1   : > { %17957 = vmatprep.mubr.msk.f32.mxu0 %vm1520_vm2, %v16347_v15  ;;  %v19267_v50 = vpack.c.bf16 %v4983_v52, %v4982_v49 }
 0x8e2   : > { %4975 = vperm.xlu0 %20909, %v4967_v53   ;;  %v5179_v53 = vld [vmem:[#allocation5 + $0xe8] sm:$0xff] }
 0x8e3   : > { %19268 = vmatprep.subr.bf16.mxu1 %v19267_v50 }
 0x8e4   : > { %19270 = vmatpush3.bf16.msra.mxu1 %v19267_v50 }
 0x8e5   : > { %19272 = vmatprep.subr.bf16.mxu1 %v19271_v54 }
 0x8e6   : > { %8572 = vperm.xlu0 %20909, %v8564_v63   ;;  %v19319_v63 = vpack.c.bf16 %v5179_v53, %v5178_v51 }
 0x8e8   : > { %19274 = vmatpush3.bf16.msra.mxu1 %v19271_v54  ;;  %v5273_v54 = vld [vmem:[#allocation5 + $0x150] sm:$0xff] }
 0x8e9   : > { %19276 = vmatprep.subr.bf16.mxu1 %v19275_v60  ;;  %v19343_v0 = vpack.c.bf16 %v5273_v54, %v5272_v36  ;;  %v5685_v36 = vld [vmem:[#allocation8 + $0x40] sm:$0xff]  ;;  %v5686_v54 = vld [vmem:[#allocation8 + $0x48] sm:$0xff] }
 0x8ea   : > { %16042 = vperm.xlu0 %20909, %v16039_v1   ;;  %v5275_v1 = vld [vmem:[#allocation5 + $0x160] sm:$0xff] }
 0x8ec   : > { %19278 = vmatpush3.bf16.msra.mxu1 %v19275_v60  ;;  %v5180_v60 = vld [vmem:[#allocation5 + $0xf0] sm:$0xff] }
 0x8ed   : > { %19280 = vmatprep.subr.bf16.mxu1 %v19279_v35  ;;  %v19323_v56 = vpack.c.bf16 %v5181_v30, %v5180_v60  ;;  %v5688_v60 = vld [vmem:[#allocation8 + $0x58] sm:$0x1] }
 0x8f0   : > { %19282 = vmatpush3.bf16.msra.mxu1 %v19279_v35  ;;  %v5274_v35 = vld [vmem:[#allocation5 + $0x158] sm:$0xff] }
 0x8f1   : > { %19284 = vmatprep.subr.bf16.mxu1 %v19283_v3  ;;  %v19347_v2 = vpack.c.bf16 %v5275_v1, %v5274_v35 }
 0x8f4   : > { %19286 = vmatpush3.bf16.msra.mxu1 %v19283_v3  ;;  %v5182_v3 = vld [vmem:[#allocation5 + $0x100] sm:$0xff] }
 0x8f5   : > { %19288 = vmatprep.subr.bf16.mxu1 %v19287_v33 }
 0x8f8   : > { %19290 = vmatpush3.bf16.msra.mxu1 %v19287_v33  ;;  %v5455_v33 = vld [vmem:[#allocation8 + $0x28] sm:$0xff] }
 0x8f9   : > { %17984 = vmatprep.subr.msk.mxu1 %vm5002_vm4, %v4994_v38  ;;  %v19373_v34 = vpack.c.bf16 %v5455_v33, %v5454_v32  ;;  %v6005_v32 = vld [vmem:[#allocation8 + $0x90] sm:$0xff]  ;;  %v6006_v33 = vld [vmem:[#allocation8 + $0x98] sm:$0x1] }
 0x8fc   : > { %17985 = vmatpush3.msk.msra.mxu1 %vm5002_vm4, %v4994_v38 }
 0x8fd   : > { %19316 = vmatprep.subr.bf16.mxu1 %v19315_v45 }
 0x95d   : > { %v4971_v15 = vpop.permute.xlu0 %4970 }
 0x961   : > { %v4976_v59 = vpop.permute.xlu0 %4975 }
 0x9af   : > { %v17602_v7 = vpop.f32.mrb[36].mxu0 }
 0x9b0   : > { %v17603_v39 = vpop.f32.mrb[37].mxu0 }
 0x9b1   : > { %v17604_v4 = vadd.f32 %v17603_v39, %v17602_v7  ;;  %v5183_v7 = vld [vmem:[#allocation5 + $0x108] sm:$0xff] }
 0x9b2   : > { %v5276_v39 = vld [vmem:[#allocation5 + $0x168] sm:$0xff] }
 0x9b3   : > { %v4734_v5 = vadd.f32 %v17604_v4, %v17569_v43  ;;  %v4873_v8 = vpop.f32.mrb[38].mxu0  ;;  %v5270_v43 = vld [vmem:[#allocation5 + $0x138] sm:$0xff]  ;;  %v5277_v4 = vld [vmem:[#allocation5 + $0x170] sm:$0xff] }
 0x9b4   : > { %v17954_v9 = vpop.f32.mrb[39].mxu0 }
 0x9b5   : > { %v4804_v12 = vadd.f32 %v17639_v46, %v4734_v5  ;;  %v19339_v46 = vpack.c.bf16 %v5271_v20, %v5270_v43  ;;  %v19327_v5 = vpack.c.bf16 %v5183_v7, %v5182_v3  ;;  %v5184_v9 = vld [vmem:[#allocation5 + $0x110] sm:$0xff]  ;;  %v5537_v3 = vld [vmem:[#allocation7 + $0x8] sm:$0xff] }
 0x9b6   : > { %v19331_v27 = vpack.c.bf16 %v5185_v10, %v5184_v9  ;;  %v5844_v7 = vld [vmem:[#allocation8 + $0x60] sm:$0xff] }
 0x9b7   : > { %v4874_v14 = vadd.f32 %v4873_v8, %v4804_v12  ;;  %v19351_v8 = vpack.c.bf16 %v5277_v4, %v5276_v39  ;;  %v5279_v12 = vld [vmem:[#allocation5 + $0x180] sm:$0xff]  ;;  %v5845_v39 = vld [vmem:[#allocation8 + $0x68] sm:$0xff] }
 0x9b8   : > { %v19355_v13 = vpack.c.bf16 %v5279_v12, %v5278_v11  ;;  %v19402_v9 = vpack.c.bf16 %v5845_v39, %v5844_v7  ;;  %v5846_v11 = vld [vmem:[#allocation8 + $0x70] sm:$0xff]  ;;  %v5847_v12 = vld [vmem:[#allocation8 + $0x78] sm:$0x1] }
 0x9b9   : > { %17955 = vmatprep.subr.msk.mxu0 %vm1527_vm3, %v4874_v14 }
 0x9ba   : > { %17956 = vmatpush3.msk.msra.mxu0 %vm1527_vm3, %v4874_v14  ;;  %v5186_v14 = vld [vmem:[#allocation5 + $0x120] sm:$0xff] }
 0x9bb   : > { %17958 = vmatmul.mubr.msk.f32.vlgmr.msra.gmra.mrb[10].mxu0 %vm1520_vm2, %v16348_v18  ;;  %19292 = vmatprep.subr.bf16.mxu0 %v19291_v16  ;;  %v5280_v18 = vld [vmem:[#allocation5 + $0x188] sm:$0xff] }
 0x9bc   : > { %19294 = vmatpush3.bf16.msra.mxu0 %v19291_v16  ;;  %v5187_v16 = vld [vmem:[#allocation5 + $0x128] sm:$0xff] }
 0x9bd   : > { %19296 = vmatprep.subr.bf16.mxu0 %v19295_v19  ;;  %v19335_v61 = vpack.c.bf16 %v5187_v16, %v5186_v14 }
 0x9c0   : > { %19298 = vmatpush3.bf16.msra.mxu0 %v19295_v19  ;;  %v5281_v19 = vld [vmem:[#allocation5 + $0x190] sm:$0xff] }
 0x9c1   : > { %19300 = vmatprep.subr.bf16.mxu0 %v19299_v23  ;;  %v19359_v22 = vpack.c.bf16 %v5281_v19, %v5280_v18 }
 0x9c4   : > { %19302 = vmatpush3.bf16.msra.mxu0 %v19299_v23  ;;  %v5188_v23 = vld [vmem:[#allocation5 + $0x130] sm:$0xf] }
 0x9c5   : > { %19304 = vmatprep.subr.bf16.mxu0 %v19303_v24 }
 0x9c8   : > { %19306 = vmatpush3.bf16.msra.mxu0 %v19303_v24  ;;  %v5364_v24 = vld [vmem:[#allocation8 + $0x8] sm:$0xff] }
 0x9c9   : > { %19308 = vmatprep.subr.bf16.mxu0 %v19307_v58  ;;  %v19363_v25 = vpack.c.bf16 %v5364_v24, %v5363_v6  ;;  %v6003_v6 = vld [vmem:[#allocation8 + $0x80] sm:$0xff]  ;;  %v6004_v24 = vld [vmem:[#allocation8 + $0x88] sm:$0xff] }
 0x9cc   : > { %19310 = vmatpush3.bf16.msra.mxu0 %v19307_v58  ;;  %v5366_v58 = vld [vmem:[#allocation8 + $0x18] sm:$0x1] }
 0x9cd   : > { %19312 = vmatprep.subr.bf16.mxu0 %v19311_v37  ;;  %v19367_v29 = vpack.c.bf16 %v5366_v58, %v5365_v28  ;;  %v19415_v58 = vpack.c.bf16 %v6004_v24, %v6003_v6 }
 0x9d0   : > { %19314 = vmatpush3.bf16.msra.mxu0 %v19311_v37 }
 0x9d1   : > { %18013 = vmatprep.subr.msk.mxu0 %vm5002_vm4, %v5094_v17 }
 0x9d4   : > { %18014 = vmatpush3.msk.msra.mxu0 %vm5002_vm4, %v5094_v17 }
 0x9d5   : > { %19340 = vmatprep.subr.bf16.mxu0 %v19339_v46 }
 0xa8e   : > { %v17959_v47 = vpop.f32.mrb[10].mxu0 }
 0xa8f   : > { %v4979_v49 = vadd.f32 %v17959_v47, %v4976_v59  ;;  %v4955_v52 = vpop.f32.mrb[11].mxu0 }
 0xa90   : > { %v4978_v50 = vadd.f32 %v4971_v15, %v4955_v52  ;;  %v5457_v52 = vld [vmem:[#allocation8 + $0x38] sm:$0x1] }
 0xa91   : > { %v4981_v55 = vmax.f32 %v4979_v49, 0.0  ;;  %v5456_v49 = vld [vmem:[#allocation8 + $0x30] sm:$0xff] }
 0xa92   : > { %v4980_v21 = vmax.f32 %v4978_v50, 0.0  ;;  %v19377_v53 = vpack.c.bf16 %v5457_v52, %v5456_v49  ;;  %v6086_v49 = vld [vmem:[#allocation7 + $0x20] sm:$0xff] }
 0xa94   : > { %17986 = vmatprep.mubr.msk.f32.mxu1 %vm4995_vm5, %v4980_v21  ;;  %18015 = vmatprep.mubr.msk.f32.mxu0 %vm4995_vm5, %v4980_v21 }
 0xa95   : > { %17987 = vmatmul.mubr.msk.f32.vlgmr.msra.gmra.mrb[34].mxu1 %vm4995_vm5, %v4981_v55  ;;  %18016 = vmatmul.mubr.msk.f32.vlgmr.msra.gmra.mrb[40].mxu0 %vm4995_vm5, %v4981_v55 }
 0xa96   : > { %19318 = vmatpush3.bf16.msra.mxu1 %v19315_v45  ;;  %19342 = vmatpush3.bf16.msra.mxu0 %v19339_v46 }
 0xa97   : > { %18044 = vmatprep.mubr.msk.f32.mxu1 %vm4995_vm5, %v4980_v21  ;;  %18073 = vmatprep.mubr.msk.f32.mxu0 %vm4995_vm5, %v4980_v21  ;;  %v19389_v21 = vpack.c.bf16 %v5686_v54, %v5685_v36 }
 0xa98   : > { %19320 = vmatprep.subr.bf16.mxu1 %v19319_v63  ;;  %19344 = vmatprep.subr.bf16.mxu0 %v19343_v0 }
 0xa9a   : > { %19322 = vmatpush3.bf16.msra.mxu1 %v19319_v63  ;;  %19346 = vmatpush3.bf16.msra.mxu0 %v19343_v0 }
 0xa9b   : > { %19324 = vmatprep.subr.bf16.mxu1 %v19323_v56  ;;  %19348 = vmatprep.subr.bf16.mxu0 %v19347_v2 }
 0xa9e   : > { %19326 = vmatpush3.bf16.msra.mxu1 %v19323_v56  ;;  %19350 = vmatpush3.bf16.msra.mxu0 %v19347_v2 }
 0xa9f   : > { %19328 = vmatprep.subr.bf16.mxu1 %v19327_v5  ;;  %19352 = vmatprep.subr.bf16.mxu0 %v19351_v8 }
 0xaa2   : > { %19330 = vmatpush3.bf16.msra.mxu1 %v19327_v5  ;;  %19354 = vmatpush3.bf16.msra.mxu0 %v19351_v8  ;;  %v5452_v5 = vld [vmem:[#allocation7] sm:$0xff] }
 0xaa3   : > { %19332 = vmatprep.subr.bf16.mxu1 %v19331_v27  ;;  %19356 = vmatprep.subr.bf16.mxu0 %v19355_v13 }
 0xaa6   : > { %19334 = vmatpush3.bf16.msra.mxu1 %v19331_v27  ;;  %19358 = vmatpush3.bf16.msra.mxu0 %v19355_v13  ;;  %v5768_v27 = vld [vmem:[#allocation7 + $0x10] sm:$0xff]  ;;  %v19406_v13 = vpack.c.bf16 %v5847_v12, %v5846_v11  ;;  %v6482_v12 = vld [vmem:[#allocation8 + $0xf0] sm:$0xff] }
 0xaa7   : > { %19336 = vmatprep.subr.bf16.mxu1 %v19335_v61  ;;  %19360 = vmatprep.subr.bf16.mxu0 %v19359_v22 }
 0xaaa   : > { %19338 = vmatpush3.bf16.msra.mxu1 %v19335_v61  ;;  %19362 = vmatpush3.bf16.msra.mxu0 %v19359_v22 }
 0xaab   : > { %18042 = vmatprep.subr.msk.mxu1 %vm5002_vm4, %v5188_v23  ;;  %18071 = vmatprep.subr.msk.mxu0 %vm5002_vm4, %v5282_v26 }
 0xaae   : > { %18043 = vmatpush3.msk.msra.mxu1 %vm5002_vm4, %v5188_v23  ;;  %18072 = vmatpush3.msk.msra.mxu0 %vm5002_vm4, %v5282_v26 }
 0xaaf   : > { %18045 = vmatmul.mubr.msk.f32.vlgmr.msra.gmra.mrb[36].mxu1 %vm4995_vm5, %v4981_v55  ;;  %18074 = vmatmul.mubr.msk.f32.vlgmr.msra.gmra.mrb[42].mxu0 %vm4995_vm5, %v4981_v55  ;;  %v5687_v55 = vld [vmem:[#allocation8 + $0x50] sm:$0xff] }
 0xab0   : > { %19383 = vmatprep.subr.bf16.mxu1 %v23051_v44  ;;  %18102 = vmatprep.mubr.msk.f32.mxu1 %vm21257_vm0, %v23053_v57  ;;  %v19393_v63 = vpack.c.bf16 %v5688_v60, %v5687_v55  ;;  %v6322_v55 = vld [vmem:[#allocation8 + $0xc8] sm:$0xff] }
 0xab1   : > { %19364 = vmatprep.subr.bf16.mxu0 %v19363_v25 }
 0xab2   : > { %19366 = vmatpush3.bf16.msra.mxu0 %v19363_v25 }
 0xab3   : > { %19369 = vmatprep.subr.msk.bf16.mxu0 %vm21938_vm7, %v19367_v29 }
 0xab6   : > { %19372 = vmatpush3.bf16.msk.msra.mxu0 %vm21938_vm7, %v19367_v29 }
 0xab7   : > { %19374 = vmatprep.subr.bf16.mxu0 %v19373_v34 }
 0xb68   : > { %v17988_v37 = vpop.f32.mrb[34].mxu1  ;;  %v18017_v38 = vpop.f32.mrb[40].mxu0 }
 0xb69   : > { %v5174_v17 = vmax.f32 %v17988_v37, %v18017_v38  ;;  %v5072_v41 = vpop.f32.mrb[35].mxu1  ;;  %v5164_v42 = vpop.f32.mrb[41].mxu0  ;;  %v19419_v37 = vpack.c.bf16 %v6006_v33, %v6005_v32  ;;  %v6797_v32 = vld [vmem:[%s23026_s6] sm:$0xff] }
 0xb6a   : > { %v5173_v43 = vmax.f32 %v5072_v41, %v5164_v42  ;;  %v6162_v42 = vld [vmem:[#allocation8 + $0xa0] sm:$0xff]  ;;  %6800 = vperm.xlu1 %20910, %v6797_v32  }
 0xb6b   : > { %v12829_v33 = vld [vmem:[%s23033_s13] sm:$0xff] }
 0xb82   : > { %v18046_v20 = vpop.f32.mrb[36].mxu1  ;;  %v18075_v45 = vpop.f32.mrb[42].mxu0 }
 0xb83   : > { %v5268_v46 = vmax.f32 %v5174_v17, %v18046_v20  ;;  %v5258_v15 = vpop.f32.mrb[37].mxu1  ;;  %v5352_v59 = vpop.f32.mrb[43].mxu0 }
 0xb84   : > { %v5267_v47 = vmax.f32 %v5173_v43, %v5258_v15  ;;  %v6163_v43 = vld [vmem:[#allocation8 + $0xa8] sm:$0xff] }
 0xb85   : > { %v21946_v50 = vmax.f32 %v5268_v46, %v18075_v45  ;;  %v19428_v46 = vpack.c.bf16 %v6163_v43, %v6162_v42  ;;  %v6722_v42 = vld [vmem:[#allocation7 + $0x40] sm:$0xff]  ;;  %v6805_v43 = vld [vmem:[#allocation10] sm:$0xff] }
 0xb86   : > { %v21948_v51 = vmax.f32 %v5267_v47, %v5352_v59  ;;  %v6164_v59 = vld [vmem:[#allocation8 + $0xb0] sm:$0xff]  ;;  %v6165_v47 = vld [vmem:[#allocation8 + $0xb8] sm:$0x1] }
 0xb87   : > { %v19432_v52 = vpack.c.bf16 %v6165_v47, %v6164_v59 }
 0xb88   : > { %18084 = vmatprep.mubr.msk.f32.mxu0 %vm5367_vm8, %v21948_v51 }
 0xb89   : > { %18085 = vmatmul.mubr.msk.f32.vlgmr.msra.gmra.mrb[44].mxu0 %vm5367_vm8, %v21946_v50 }
 0xb8a   : > { %19376 = vmatpush3.bf16.msra.mxu0 %v19373_v34  ;;  %18095 = vmatprep.mubr.msk.f32.mxu0 %vm5367_vm8, %v21948_v51  ;;  %v5927_v34 = vld [vmem:[#allocation7 + $0x18] sm:$0xff] }
 0xb8b   : > { %19379 = vmatprep.subr.msk.bf16.mxu0 %vm21938_vm7, %v19377_v53 }
 0xb8e   : > { %19382 = vmatpush3.bf16.msk.msra.mxu0 %vm21938_vm7, %v19377_v53 }
 0xb8f   : > { %19390 = vmatprep.subr.bf16.mxu0 %v19389_v21 }
 0xb91   : > { %18096 = vmatmul.mubr.msk.f32.vlgmr.msra.gmra.mrb[46].mxu0 %vm5367_vm8, %v21946_v50 }
 0xb92   : > { %19392 = vmatpush3.bf16.msra.mxu0 %v19389_v21  ;;  %18120 = vmatprep.mubr.msk.f32.mxu0 %vm5367_vm8, %v21948_v51  ;;  %v6321_v21 = vld [vmem:[#allocation8 + $0xc0] sm:$0xff] }
 0xb93   : > { %19395 = vmatprep.subr.msk.bf16.mxu0 %vm21938_vm7, %v19393_v63 }
 0xb96   : > { %19398 = vmatpush3.bf16.msk.msra.mxu0 %vm21938_vm7, %v19393_v63 }
 0xb97   : > { %19412 = vmatprep.subr.bf16.mxu0 %v23051_v44 }
 0xb99   : > { %18121 = vmatmul.mubr.msk.f32.vlgmr.msra.gmra.mrb[48].mxu0 %vm5367_vm8, %v21946_v50 }
 0xb9a   : > { %18145 = vmatprep.mubr.msk.f32.mxu0 %vm21257_vm0, %v23053_v57 }
 0xc5c   : > { %v18086_v0 = vpop.f32.mrb[44].mxu0 }
 0xc5d   : > { %v5443_v30 = vpop.f32.mrb[45].mxu0 }
 0xc5e   : > { %v19387_v35 = vpack.c.bf16 %v18086_v0, %v5443_v30  ;;  %v19441_v0 = vpack.c.bf16 %v6322_v55, %v6321_v21  ;;  %v7040_v21 = vld [vmem:[#allocation10 + $0x38] sm:$0x1]  ;;  %v6801_v55 = vpop.permute.xlu1 %6800 }
 0xc64   : > { %v18097_v1 = vpop.f32.mrb[46].mxu0 }
 0xc65   : > { %v5527_v56 = vpop.f32.mrb[47].mxu0 }
 0xc66   : > { %v19384_v2 = vpack.c.bf16 %v18097_v1, %v5527_v56  ;;  %v6324_v1 = vld [vmem:[#allocation8 + $0xd8] sm:$0x1]  ;;  %v6245_v56 = vld [vmem:[#allocation7 + $0x28] sm:$0xff] }
 0xc68   : > { %19385 = vmatpush3.bf16.msra.mxu1 %v19384_v2 }
 0xc69   : > { %19386 = vmatprep.subr.bf16.mxu1 %v23051_v44 }
 0xc6b   : > { %18103 = vmatmul.mubr.msk.f32.vlgmr.msra.gmra.mrb[38].mxu1 %vm853_vm1, %v5537_v3 }
 0xc6c   : > { %19388 = vmatpush3.bf16.msra.mxu1 %v19387_v35  ;;  %v18122_v4 = vpop.f32.mrb[48].mxu0  ;;  %18109 = vmatprep.mubr.msk.f32.mxu1 %vm21257_vm0, %v23053_v57  ;;  %v6323_v35 = vld [vmem:[#allocation8 + $0xd0] sm:$0xff] }
 0xc6d   : > { %v5758_v8 = vpop.f32.mrb[49].mxu0  ;;  %19399 = vmatprep.subr.bf16.mxu1 %v23051_v44  ;;  %v19445_v2 = vpack.c.bf16 %v6324_v1, %v6323_v35  ;;  %v7115_v35 = vld [vmem:[#allocation11] sm:$0xf]  ;;  %v7196_v1 = vld [vmem:[#allocation11 + $0x4] sm:$0xf] }
 0xc6e   : > { %v19400_v10 = vpack.c.bf16 %v18122_v4, %v5758_v8  ;;  %v6480_v4 = vld [vmem:[#allocation8 + $0xe0] sm:$0xff] }
 0xc6f   : > { %18110 = vmatmul.mubr.msk.f32.vlgmr.msra.gmra.mrb[40].mxu1 %vm853_vm1, %v5452_v5  ;;  %v6481_v5 = vld [vmem:[#allocation8 + $0xe8] sm:$0xff] }
 0xc70   : > { %19401 = vmatpush3.bf16.msra.mxu1 %v19400_v10  ;;  %18127 = vmatprep.mubr.msk.f32.mxu1 %vm21257_vm0, %v23053_v57  ;;  %v19454_v10 = vpack.c.bf16 %v6481_v5, %v6480_v4 }
 0xc71   : > { %19403 = vmatprep.subr.bf16.mxu1 %v19402_v9 }
 0xc73   : > { %18128 = vmatmul.mubr.msk.f32.vlgmr.msra.gmra.mrb[42].mxu1 %vm853_vm1, %v5768_v27  ;;  %v6483_v27 = vld [vmem:[#allocation8 + $0xf8] sm:$0x1] }
 0xc74   : > { %19405 = vmatpush3.bf16.msra.mxu1 %v19402_v9  ;;  %18138 = vmatprep.mubr.msk.f32.mxu1 %vm5367_vm8, %v21948_v51 }
 0xc75   : > { %19408 = vmatprep.subr.msk.bf16.mxu1 %vm21938_vm7, %v19406_v13 }
 0xc78   : > { %19411 = vmatpush3.bf16.msk.msra.mxu1 %vm21938_vm7, %v19406_v13  ;;  %v6404_v13 = vld [vmem:[#allocation7 + $0x30] sm:$0xff] }
 0xc79   : > { %19425 = vmatprep.subr.bf16.mxu1 %v23051_v44 }
 0xc7b   : > { %18139 = vmatmul.mubr.msk.f32.vlgmr.msra.gmra.mrb[44].mxu1 %vm5367_vm8, %v21946_v50 }
 0xc7c   : > { %18163 = vmatprep.mubr.msk.f32.mxu1 %vm21257_vm0, %v23053_v57 }
 0xd3e   : > { %v5607_v14 = vpop.f32.mrb[38].mxu1 }
 0xd3f   : > { %v18104_v16 = vpop.f32.mrb[39].mxu1 }
 0xd42   : > { %v5680_v18 = vpop.f32.mrb[40].mxu1 }
 0xd43   : > { %v5681_v19 = vadd.f32 %v5680_v18, %v5607_v14  ;;  %v18111_v61 = vpop.f32.mrb[41].mxu1  ;;  %v19458_v14 = vpack.c.bf16 %v6483_v27, %v6482_v12  ;;  %v7437_v12 = vld [vmem:[#allocation11 + $0x8] sm:$0xf]  ;;  %v7598_v27 = vld [vmem:[#allocation11 + $0xc] sm:$0xf] }
 0xd44   : > { %v6639_v61 = vld [vmem:[#allocation8 + $0x100] sm:$0xff] }
 0xd46   : > { %v5838_v22 = vpop.f32.mrb[42].mxu1 }
 0xd47   : > { %v5842_v23 = vadd.f32 %v5838_v22, %v5681_v19  ;;  %v18129_v26 = vpop.f32.mrb[43].mxu1  ;;  %v6640_v22 = vld [vmem:[#allocation8 + $0x108] sm:$0xff] }
 0xd48   : > { %v19467_v6 = vpack.c.bf16 %v6640_v22, %v6639_v61  ;;  %v16412_v61 = vld [vmem:[%s23104_s7 + $0x10] sm:$0xff] }
 0xd49   : > { %v8580_v22 = vld [vmem:[#allocation14 + $0x8] sm:$0xff] }
 0xd4e   : > { %v18140_v25 = vpop.f32.mrb[44].mxu1 }
 0xd4f   : > { %v5917_v28 = vpop.f32.mrb[45].mxu1 }
 0xd50   : > { %v19413_v29 = vpack.c.bf16 %v18140_v25, %v5917_v28  ;;  %v6641_v25 = vld [vmem:[#allocation8 + $0x110] sm:$0xff]  ;;  %v6642_v28 = vld [vmem:[#allocation8 + $0x118] sm:$0x1] }
 0xd52   : > { %19414 = vmatpush3.bf16.msra.mxu0 %v19413_v29  ;;  %v19471_v29 = vpack.c.bf16 %v6642_v28, %v6641_v25 }
 0xd53   : > { %19416 = vmatprep.subr.bf16.mxu0 %v19415_v58 }
 0xd55   : > { %18146 = vmatmul.mubr.msk.f32.vlgmr.msra.gmra.mrb[50].mxu0 %vm853_vm1, %v5927_v34 }
 0xd56   : > { %19418 = vmatpush3.bf16.msra.mxu0 %v19415_v58  ;;  %18156 = vmatprep.mubr.msk.f32.mxu0 %vm5367_vm8, %v21948_v51  ;;  %v6563_v58 = vld [vmem:[#allocation7 + $0x38] sm:$0xff] }
 0xd57   : > { %19421 = vmatprep.subr.msk.bf16.mxu0 %vm21938_vm7, %v19419_v37 }
 0xd5a   : > { %19424 = vmatpush3.bf16.msk.msra.mxu0 %vm21938_vm7, %v19419_v37 }
 0xd5b   : > { %19438 = vmatprep.subr.bf16.mxu0 %v23051_v44 }
 0xd5d   : > { %18157 = vmatmul.mubr.msk.f32.vlgmr.msra.gmra.mrb[52].mxu0 %vm5367_vm8, %v21946_v50 }
 0xd5e   : > { %18181 = vmatprep.mubr.msk.f32.mxu0 %vm21257_vm0, %v23053_v57 }
 0xe28   : > { %v5997_v38 = vpop.f32.mrb[50].mxu0 }
 0xe29   : > { %v6001_v17 = vadd.f32 %v5997_v38, %v5842_v23  ;;  %v18147_v41 = vpop.f32.mrb[51].mxu0 }
 0xe30   : > { %v18158_v20 = vpop.f32.mrb[52].mxu0 }
 0xe31   : > { %v6076_v45 = vpop.f32.mrb[53].mxu0 }
 0xe32   : > { %v19426_v15 = vpack.c.bf16 %v18158_v20, %v6076_v45  ;;  %v6806_v20 = vld [vmem:[#allocation10 + $0x8] sm:$0x1]  ;;  %v6885_v45 = vld [vmem:[#allocation10 + $0x10] sm:$0xff] }
 0xe34   : > { %19427 = vmatpush3.bf16.msra.mxu1 %v19426_v15  ;;  %v6886_v15 = vld [vmem:[#allocation10 + $0x18] sm:$0x1] }
 0xe35   : > { %19429 = vmatprep.subr.bf16.mxu1 %v19428_v46  ;;  %v19485_v59 = vpack.c.bf16 %v6886_v15, %v6885_v45  ;;  %v16421_v45 = vld [vmem:[%s23104_s7 + $0x28] sm:$0xff]  ;;  %v16426_v15 = vld [vmem:[%s23104_s7 + $0x30] sm:$0xff] }
 0xe37   : > { %18164 = vmatmul.mubr.msk.f32.vlgmr.msra.gmra.mrb[46].mxu1 %vm853_vm1, %v6086_v49  ;;  %v6962_v49 = vld [vmem:[#allocation10 + $0x20] sm:$0xff] }
 0xe38   : > { %19431 = vmatpush3.bf16.msra.mxu1 %v19428_v46  ;;  %18174 = vmatprep.mubr.msk.f32.mxu1 %vm5367_vm8, %v21948_v51  ;;  %v19481_v46 = vpack.c.bf16 %v6806_v20, %v6805_v43 }
 0xe39   : > { %19434 = vmatprep.subr.msk.bf16.mxu1 %vm21938_vm7, %v19432_v52 }
 0xe3c   : > { %19437 = vmatpush3.bf16.msk.msra.mxu1 %vm21938_vm7, %v19432_v52 }
 0xe3d   : > { %19451 = vmatprep.subr.bf16.mxu1 %v23051_v44 }
 0xe3f   : > { %18175 = vmatmul.mubr.msk.f32.vlgmr.msra.gmra.mrb[48].mxu1 %vm5367_vm8, %v21946_v50 }
 0xe40   : > { %18199 = vmatprep.mubr.msk.f32.mxu1 %vm21257_vm0, %v23053_v57 }
 0xf0a   : > { %v6156_v53 = vpop.f32.mrb[46].mxu1 }
 0xf0b   : > { %v6160_v36 = vadd.f32 %v6156_v53, %v6001_v17  ;;  %v18165_v54 = vpop.f32.mrb[47].mxu1 }
 0xf0c   : > { %v7039_v54 = vld [vmem:[#allocation10 + $0x30] sm:$0xff] }
 0xf12   : > { %v18176_v60 = vpop.f32.mrb[48].mxu1 }
 0xf13   : > { %v6235_v63 = vpop.f32.mrb[49].mxu1 }
 0xf14   : > { %v19439_v30 = vpack.c.bf16 %v18176_v60, %v6235_v63 }
 0xf16   : > { %19440 = vmatpush3.bf16.msra.mxu0 %v19439_v30 }
 0xf17   : > { %19442 = vmatprep.subr.bf16.mxu0 %v19441_v0 }
 0xf19   : > { %18182 = vmatmul.mubr.msk.f32.vlgmr.msra.gmra.mrb[54].mxu0 %vm853_vm1, %v6245_v56 }
 0xf1a   : > { %19444 = vmatpush3.bf16.msra.mxu0 %v19441_v0  ;;  %18192 = vmatprep.mubr.msk.f32.mxu0 %vm5367_vm8, %v21948_v51  ;;  %v19493_v0 = vpack.c.bf16 %v7040_v21, %v7039_v54 }
 0xf1b   : > { %19447 = vmatprep.subr.msk.bf16.mxu0 %vm21938_vm7, %v19445_v2 }
 0xf1e   : > { %19450 = vmatpush3.bf16.msk.msra.mxu0 %vm21938_vm7, %v19445_v2 }
 0xf1f   : > { %19464 = vmatprep.subr.bf16.mxu0 %v23051_v44 }
 0xf21   : > { %18193 = vmatmul.mubr.msk.f32.vlgmr.msra.gmra.mrb[56].mxu0 %vm5367_vm8, %v21946_v50 }
 0xf22   : > { %18217 = vmatprep.mubr.msk.f32.mxu0 %vm21257_vm0, %v23053_v57 }
 0xfec   : > { %v6315_v3 = vpop.f32.mrb[54].mxu0 }
 0xfed   : > { %v6319_v7 = vadd.f32 %v6315_v3, %v6160_v36  ;;  %v18183_v39 = vpop.f32.mrb[55].mxu0  ;;  %v6963_v36 = vld [vmem:[#allocation10 + $0x28] sm:$0x1] }
 0xfee   : > { %v19489_v63 = vpack.c.bf16 %v6963_v36, %v6962_v49  ;;  %v16432_v36 = vld [vmem:[%s23104_s7 + $0x40] sm:$0xff] }
 0xff4   : > { %v18194_v8 = vpop.f32.mrb[56].mxu0 }
 0xff5   : > { %v6394_v9 = vpop.f32.mrb[57].mxu0 }
 0xff6   : > { %v19452_v11 = vpack.c.bf16 %v18194_v8, %v6394_v9 }
 0xff8   : > { %19453 = vmatpush3.bf16.msra.mxu1 %v19452_v11 }
 0xff9   : > { %19455 = vmatprep.subr.bf16.mxu1 %v19454_v10 }
 0xffb   : > { %18200 = vmatmul.mubr.msk.f32.vlgmr.msra.gmra.mrb[50].mxu1 %vm853_vm1, %v6404_v13  ;;  %v7759_v13 = vld [vmem:[#allocation11 + $0x10] sm:$0xf] }
 0xffc   : > { %19457 = vmatpush3.bf16.msra.mxu1 %v19454_v10  ;;  %18210 = vmatprep.mubr.msk.f32.mxu1 %vm5367_vm8, %v21948_v51 }
 0xffd   : > { %19460 = vmatprep.subr.msk.bf16.mxu1 %vm21938_vm7, %v19458_v14 }
0x1000   : > { %19463 = vmatpush3.bf16.msk.msra.mxu1 %vm21938_vm7, %v19458_v14  ;;  %v7920_v14 = vld [vmem:[#allocation11 + $0x14] sm:$0xf] }
0x1001   : > { %19477 = vmatprep.subr.bf16.mxu1 %v23051_v44 }
0x1003   : > { %18211 = vmatmul.mubr.msk.f32.vlgmr.msra.gmra.mrb[52].mxu1 %vm5367_vm8, %v21946_v50 }
0x1004   : > { %18235 = vmatprep.mubr.msk.f32.mxu1 %vm21257_vm0, %v23053_v57 }
0x10ce   : > { %v6474_v16 = vpop.f32.mrb[50].mxu1 }
0x10cf   : > { %v6478_v18 = vadd.f32 %v6474_v16, %v6319_v7  ;;  %v18201_v19 = vpop.f32.mrb[51].mxu1  ;;  %v8081_v16 = vld [vmem:[#allocation11 + $0x18] sm:$0xf] }
0x10d0   : > { %v8403_v19 = vld [vmem:[#allocation11 + $0x20] sm:$0xf] }
0x10d6   : > { %v18212_v23 = vpop.f32.mrb[52].mxu1 }
0x10d7   : > { %v6553_v26 = vpop.f32.mrb[53].mxu1 }
0x10d8   : > { %v19465_v24 = vpack.c.bf16 %v18212_v23, %v6553_v26  ;;  %v8582_v23 = vld [vmem:[#allocation14 + $0x18] sm:$0xff] }
0x10d9   : > { %v19496_v26 = vpack.c.bf16 %v8582_v23, %v8580_v22  ;;  %v8921_v23 = vld [vmem:[#allocation14 + $0x88] sm:$0xff] }
0x10da   : > { %19466 = vmatpush3.bf16.msra.mxu0 %v19465_v24  ;;  %v8581_v24 = vld [vmem:[#allocation14 + $0x10] sm:$0xff] }
0x10db   : > { %19468 = vmatprep.subr.bf16.mxu0 %v19467_v6 }
0x10dd   : > { %18218 = vmatmul.mubr.msk.f32.vlgmr.msra.gmra.mrb[58].mxu0 %vm853_vm1, %v6563_v58 }
0x10de   : > { %19470 = vmatpush3.bf16.msra.mxu0 %v19467_v6  ;;  %18228 = vmatprep.mubr.msk.f32.mxu0 %vm5367_vm8, %v21948_v51  ;;  %v8563_v51 = vld [vmem:[%s23030_s10] sm:$0xff] }
0x10df   : > { %19473 = vmatprep.subr.msk.bf16.mxu0 %vm21938_vm7, %v19471_v29  ;;  %8567 = vperm.xlu1 %20910, %v8563_v51   ;;  %v8579_v6 = vld [vmem:[#allocation14] sm:$0xff] }
0x10e0   : > { %v19498_v25 = vpack.c.bf16 %v8581_v24, %v8579_v6 }
0x10e2   : > { %19476 = vmatpush3.bf16.msk.msra.mxu0 %vm21938_vm7, %v19471_v29  ;;  %v16413_v29 = vld [vmem:[%s23104_s7 + $0x18] sm:$0xff] }
0x10e3   : > { %19484 = vmatprep.subr.bf16.mxu0 %v23051_v44  ;;  %12832 = vperm.xlu1 %20910, %v12829_v33   ;;  %v7193_v33 = vld [vmem:[%s23104_s7] sm:$0xff] }
0x10e5   : > { %18229 = vmatmul.mubr.msk.f32.vlgmr.msra.gmra.mrb[60].mxu0 %vm5367_vm8, %v21946_v50 }
0x10e6   : > { %18249 = vmatprep.mubr.msk.f32.mxu0 %vm21257_vm0, %v23053_v57  ;;  %19487 = vmatpush3.bf16.msk.msra.mxu0 %vm21938_vm7, %v19485_v59 }
0x10e7   : > { %19492 = vmatprep.subr.bf16.mxu0 %v23051_v44 }
0x11b0   : > { %v6633_v34 = vpop.f32.mrb[58].mxu0 }
0x11b1   : > { %v6637_v50 = vadd.f32 %v6633_v34, %v6478_v18  ;;  %v18219_v37 = vpop.f32.mrb[59].mxu0  ;;  %v8242_v18 = vld [vmem:[#allocation11 + $0x1c] sm:$0xf] }
0x11b8   : > { %v18230_v38 = vpop.f32.mrb[60].mxu0 }
0x11b9   : > { %v6712_v17 = vpop.f32.mrb[61].mxu0 }
0x11ba   : > { %v19478_v41 = vpack.c.bf16 %v18230_v38, %v6712_v17  ;;  %v7194_v38 = vld [vmem:[%s23104_s7 + $0x8] sm:$0xff] }
0x11bc   : > { %19479 = vmatpush3.bf16.msra.mxu1 %v19478_v41  ;;  %v16420_v41 = vld [vmem:[%s23104_s7 + $0x20] sm:$0xff] }
0x11bd   : > { %19480 = vmatprep.subr.bf16.mxu1 %v23051_v44 }
0x11bf   : > { %18236 = vmatmul.mubr.msk.f32.vlgmr.msra.gmra.mrb[54].mxu1 %vm853_vm1, %v6722_v42 }
0x11c0   : > { %18242 = vmatprep.mubr.msk.f32.mxu1 %vm21257_vm0, %v23053_v57  ;;  %19483 = vmatpush3.bf16.msk.msra.mxu1 %vm21938_vm7, %v19481_v46 }
0x11c1   : > { %19488 = vmatprep.subr.bf16.mxu1 %v23051_v44 }
0x1292   : > { %v6792_v47 = vpop.f32.mrb[54].mxu1 }
0x1293   : > { %v6796_v52 = vadd.f32 %v6792_v47, %v6637_v50  ;;  %v18237_v53 = vpop.f32.mrb[55].mxu1 }
0x1295   : > { %v6803_v60 = vadd.f32 %v6801_v55, %v6796_v52  ;;  %v16427_v52 = vld [vmem:[%s23104_s7 + $0x38] sm:$0xff]  ;;  %v16433_v55 = vld [vmem:[%s23104_s7 + $0x48] sm:$0xff] }
0x1297   : > { %v6804_v30 = vmax.f32 %v6803_v60, 0.0  ;;  %v16438_v60 = vld [vmem:[%s23104_s7 + $0x50] sm:$0xff] }
0x1299   : > { %18243 = vmatmul.mubr.msk.f32.vlgmr.msra.gmra.mrb[56].mxu1 %vm6807_vm9, %v6804_v30  ;;  %18250 = vmatmul.mubr.msk.f32.vlgmr.msra.gmra.mrb[62].mxu0 %vm6807_vm9, %v6804_v30 }
0x129a   : > { %19491 = vmatpush3.bf16.msk.msra.mxu1 %vm21938_vm7, %v19489_v63  ;;  %19495 = vmatpush3.bf16.msk.msra.mxu0 %vm21938_vm7, %v19493_v0  ;;  %v16439_v63 = vld [vmem:[%s23104_s7 + $0x58] sm:$0xff]  ;;  %v16444_v0 = vld [vmem:[%s23104_s7 + $0x60] sm:$0xff] }
0x129b   : > { %18256 = vmatprep.mubr.msk.f32.mxu1 %vm21257_vm0, %v23053_v57  ;;  %18263 = vmatprep.mubr.msk.f32.mxu0 %vm21257_vm0, %v23053_v57 }
0x129c   : > { %18266 = vmatprep.subr.mxu1 %v23053_v57  ;;  %18271 = vmatprep.subr.mxu0 %v23053_v57 }
0x129d   : > { %18257 = vmatmul.mubr.msk.f32.vlgmr.msra.gmra.mrb[58].mxu1 %vm6807_vm9, %v6804_v30  ;;  %18264 = vmatmul.mubr.msk.f32.vlgmr.msra.gmra.mrb[64].mxu0 %vm6807_vm9, %v6804_v30  ;;  %v16445_v30 = vld [vmem:[%s23104_s7 + $0x68] sm:$0xff] }
0x129e   : > { %18268 = vmatprep.mubr.msk.f32.mxu1 %vm21257_vm0, %v23053_v57  ;;  %18273 = vmatprep.mubr.msk.f32.mxu0 %vm21257_vm0, %v23053_v57 }
0x129f   : > { %18267 = vmatpush3.msk.msra.mxu1 %vm5002_vm4, %v7115_v35  ;;  %18272 = vmatpush3.msk.msra.mxu0 %vm5002_vm4, %v7196_v1  ;;  %v16450_v35 = vld [vmem:[%s23104_s7 + $0x70] sm:$0xff] }
0x12a0   : > { %18286 = vmatprep.subr.mxu0 %v23053_v57  ;;  %v8679_v1 = vld [vmem:[#allocation14 + $0x48] sm:$0xff] }
0x136c   : > { %v6880_v56 = vpop.f32.mrb[56].mxu1  ;;  %v6956_v2 = vpop.f32.mrb[62].mxu0 }
0x136d   : > { %v6960_v3 = vmax.f32 %v6880_v56, %v6956_v2  ;;  %v18244_v7 = vpop.f32.mrb[57].mxu1  ;;  %v18251_v39 = vpop.f32.mrb[63].mxu0  ;;  %v8681_v56 = vld [vmem:[#allocation14 + $0x58] sm:$0xff] }
0x136e   : > { %v16451_v2 = vld [vmem:[%s23104_s7 + $0x78] sm:$0xff]  ;;  %v19506_v7 = vpack.c.bf16 %v8681_v56, %v8679_v1  ;;  %v8678_v39 = vld [vmem:[#allocation14 + $0x40] sm:$0xff]  ;;  %v9435_v1 = vld [vmem:[#allocation14 + $0x168] sm:$0xff] }
0x136f   : > { %v9437_v56 = vld [vmem:[#allocation14 + $0x178] sm:$0x1] }
0x1370   : > { %v7033_v4 = vpop.f32.mrb[58].mxu1  ;;  %v7110_v5 = vpop.f32.mrb[64].mxu0 }
0x1371   : > { %v7037_v8 = vmax.f32 %v6960_v3, %v7033_v4  ;;  %v18258_v9 = vpop.f32.mrb[59].mxu1  ;;  %v18265_v10 = vpop.f32.mrb[65].mxu0  ;;  %v16456_v3 = vld [vmem:[%s23104_s7 + $0x80] sm:$0xff]  ;;  %v8680_v4 = vld [vmem:[#allocation14 + $0x50] sm:$0xff] }
0x1372   : > { %v8584_v9 = vld [vmem:[#allocation14 + $0x28] sm:$0xff]  ;;  %v8586_v10 = vld [vmem:[#allocation14 + $0x38] sm:$0x1] }
0x1373   : > { %v7114_v11 = vmax.f32 %v7037_v8, %v7110_v5  ;;  %v16457_v5 = vld [vmem:[%s23104_s7 + $0x88] sm:$0xff]  ;;  %v19508_v8 = vpack.c.bf16 %v8680_v4, %v8678_v39  ;;  %v9436_v39 = vld [vmem:[#allocation14 + $0x170] sm:$0x1] }
0x1374   : > { %v9601_v4 = vld [vmem:[#allocation14 + $0x188] sm:$0xff] }
0x1375   : > { %18269 = vmatmul.mubr.msk.f32.vlgmr.msra.gmra.mrb[60].mxu1 %vm7116_vm10, %v7114_v11  ;;  %18274 = vmatmul.mubr.msk.f32.vlgmr.msra.gmra.mrb[66].mxu0 %vm7116_vm10, %v7114_v11 }
0x1376   : > { %18287 = vmatpush3.msk.msra.mxu0 %vm5002_vm4, %v7437_v12  ;;  %18288 = vmatprep.mubr.msk.f32.mxu0 %vm21257_vm0, %v23053_v57  ;;  %v19500_v12 = vpack.c.bf16 %v8586_v10, %v8584_v9  ;;  %v9600_v10 = vld [vmem:[#allocation14 + $0x180] sm:$0xff] }
0x1377   : > { %18296 = vmatprep.subr.mxu0 %v23053_v57  ;;  %18278 = vmatprep.mubr.msk.f32.mxu1 %vm7273_vm11, %v16412_v61  ;;  %v8684_v61 = vld [vmem:[#allocation14 + $0x70] sm:$0x1] }
0x1379   : > { %18289 = vmatmul.mubr.msk.f32.vlgmr.msra.gmra.mrb[68].mxu0 %vm7116_vm10, %v7114_v11 }
0x137a   : > { %18297 = vmatpush3.msk.msra.mxu0 %vm5002_vm4, %v7598_v27  ;;  %18298 = vmatprep.mubr.msk.f32.mxu0 %vm21257_vm0, %v23053_v57  ;;  %v8685_v27 = vld [vmem:[#allocation14 + $0x78] sm:$0x1] }
0x137b   : > { %18306 = vmatprep.subr.mxu0 %v23053_v57 }
0x137d   : > { %18299 = vmatmul.mubr.msk.f32.vlgmr.msra.gmra.mrb[70].mxu0 %vm7116_vm10, %v7114_v11 }
0x137e   : > { %18307 = vmatpush3.msk.msra.mxu0 %vm5002_vm4, %v7759_v13  ;;  %18308 = vmatprep.mubr.msk.f32.mxu0 %vm21257_vm0, %v23053_v57  ;;  %v8583_v13 = vld [vmem:[#allocation14 + $0x20] sm:$0xff] }
0x137f   : > { %18316 = vmatprep.subr.mxu0 %v23053_v57 }
0x1381   : > { %18309 = vmatmul.mubr.msk.f32.vlgmr.msra.gmra.mrb[72].mxu0 %vm7116_vm10, %v7114_v11 }
0x1382   : > { %18317 = vmatpush3.msk.msra.mxu0 %vm5002_vm4, %v7920_v14  ;;  %18318 = vmatprep.mubr.msk.f32.mxu0 %vm21257_vm0, %v23053_v57  ;;  %v8585_v14 = vld [vmem:[#allocation14 + $0x30] sm:$0x1] }
0x1383   : > { %18326 = vmatprep.subr.mxu0 %v23053_v57 }
0x1385   : > { %18319 = vmatmul.mubr.msk.f32.vlgmr.msra.gmra.mrb[74].mxu0 %vm7116_vm10, %v7114_v11 }
0x1386   : > { %18327 = vmatpush3.msk.msra.mxu0 %vm5002_vm4, %v8081_v16  ;;  %18328 = vmatprep.mubr.msk.f32.mxu0 %vm21257_vm0, %v23053_v57 }
0x1387   : > { %18336 = vmatprep.subr.mxu0 %v23053_v57 }
0x1389   : > { %18329 = vmatmul.mubr.msk.f32.vlgmr.msra.gmra.mrb[76].mxu0 %vm7116_vm10, %v7114_v11 }
0x138a   : > { %18337 = vmatpush3.msk.msra.mxu0 %vm5002_vm4, %v8242_v18  ;;  %18338 = vmatprep.mubr.msk.f32.mxu0 %vm21257_vm0, %v23053_v57  ;;  %v19503_v18 = vpack.c.bf16 %v8585_v14, %v8583_v13 }
0x138b   : > { %18346 = vmatprep.subr.mxu0 %v23053_v57 }
0x138d   : > { %18339 = vmatmul.mubr.msk.f32.vlgmr.msra.gmra.mrb[78].mxu0 %vm7116_vm10, %v7114_v11 }
0x138e   : > { %18347 = vmatpush3.msk.msra.mxu0 %vm5002_vm4, %v8403_v19  ;;  %18348 = vmatprep.mubr.msk.f32.mxu0 %vm21257_vm0, %v23053_v57  ;;  %v8682_v19 = vld [vmem:[#allocation14 + $0x60] sm:$0xff] }
0x138f   : > { %19497 = vmatprep.subr.bf16.mxu0 %v19496_v26  ;;  %v19513_v22 = vpack.c.bf16 %v8684_v61, %v8682_v19  ;;  %v8923_v26 = vld [vmem:[#allocation14 + $0x98] sm:$0xff]  ;;  %v9771_v19 = vld [vmem:[#allocation14 + $0x1c8] sm:$0xff] }
0x1390   : > { %v19524_v6 = vpack.c.bf16 %v8923_v26, %v8921_v23  ;;  %v9773_v61 = vld [vmem:[#allocation14 + $0x1d8] sm:$0xff]  ;;  %v9770_v26 = vld [vmem:[#allocation14 + $0x1c0] sm:$0xff] }
0x1391   : > { %18349 = vmatmul.mubr.msk.f32.vlgmr.msra.gmra.mrb[80].mxu0 %vm7116_vm10, %v7114_v11  ;;  %v8683_v11 = vld [vmem:[#allocation14 + $0x68] sm:$0xff]  ;;  %v19594_v23 = vpack.c.bf16 %v9773_v61, %v9771_v19 }
0x1392   : > { %8663 = vmatprep.mubr.f32.mxu0 %v23053_v57  ;;  %19499 = vmatpush1.bf16.msra.mxu0 %v19498_v25  ;;  %v19510_v16 = vpack.c.bf16 %v8685_v27, %v8683_v11  ;;  %v8920_v25 = vld [vmem:[#allocation14 + $0x80] sm:$0xff]  ;;  %v9602_v11 = vld [vmem:[#allocation14 + $0x190] sm:$0xff]  ;;  %v9607_v27 = vld [vmem:[#allocation14 + $0x1b8] sm:$0x1] }
0x1393   : > { %19502 = vmatprep.subr.msk.bf16.mxu0 %vm21938_vm7, %v19500_v12  ;;  %v9605_v12 = vld [vmem:[#allocation14 + $0x1a8] sm:$0xff]  ;;  %v19582_v13 = vpack.c.bf16 %v9602_v11, %v9600_v10  ;;  %v10623_v11 = vld [vmem:[#allocation14 + $0x318] sm:$0xff] }
0x1394   : > { %v19584_v14 = vpack.c.bf16 %v9607_v27, %v9605_v12  ;;  %v10621_v10 = vld [vmem:[#allocation14 + $0x308] sm:$0xff] }
0x1395   : > { %v19664_v27 = vpack.c.bf16 %v10623_v11, %v10621_v10 }
0x1396   : > { %19505 = vmatpush1.bf16.msk.msra.mxu0 %vm21938_vm7, %v19503_v18  ;;  %v9606_v18 = vld [vmem:[#allocation14 + $0x1b0] sm:$0x1] }
0x1448   : > { %v7189_v28 = vpop.f32.mrb[60].mxu1  ;;  %v7266_v58 = vpop.f32.mrb[66].mxu0 }
0x1449   : > { %v18270_v32 = vpop.f32.mrb[61].mxu1  ;;  %v18275_v51 = vpop.f32.mrb[67].mxu0  ;;  %18276 = vmatprep.subr.mxu1 %v7266_v58 }
0x144a   : > { %18277 = vmatpush3.msra.mxu1 %v7266_v58  ;;  %v8568_v58 = vpop.permute.xlu1 %8567  ;;  %v8925_v32 = vld [vmem:[#allocation14 + $0xa8] sm:$0xff]  ;;  %v8927_v51 = vld [vmem:[#allocation14 + $0xb8] sm:$0x1] }
0x144b   : > { %18279 = vmatmul.mubr.msk.f32.vlgmr.msra.gmra.mrb[62].mxu1 %vm7273_vm11, %v16413_v29  ;;  %18281 = vmatprep.subr.mxu1 %v7189_v28 }
0x144c   : > { %18282 = vmatpush3.msra.mxu1 %v7189_v28  ;;  %v7507_v34 = vpop.f32.mrb[68].mxu0  ;;  %18283 = vmatprep.mubr.msk.f32.mxu1 %vm7273_vm11, %v7193_v33  ;;  %v8922_v28 = vld [vmem:[#allocation14 + $0x90] sm:$0xff] }
0x144d   : > { %v18290_v50 = vpop.f32.mrb[69].mxu0  ;;  %18291 = vmatprep.subr.mxu1 %v7507_v34 }
0x144e   : > { %v19526_v50 = vpack.c.bf16 %v8922_v28, %v8920_v25  ;;  %v9777_v25 = vld [vmem:[#allocation14 + $0x1f8] sm:$0x1] }
0x1450   : > { %v7668_v37 = vpop.f32.mrb[70].mxu0 }
0x1451   : > { %v18300_v17 = vpop.f32.mrb[71].mxu0 }
0x1452   : > { %v19528_v17 = vpack.c.bf16 %v8927_v51, %v8925_v32  ;;  %v9776_v32 = vld [vmem:[#allocation14 + $0x1f0] sm:$0x1]  ;;  %v9941_v51 = vld [vmem:[#allocation14 + $0x208] sm:$0xff] }
0x1453   : > { %18284 = vmatmul.mubr.msk.f32.vlgmr.msra.gmra.mrb[62].mxu1 %vm7273_vm11, %v7194_v38 }
0x1454   : > { %18292 = vmatpush3.msra.mxu1 %v7507_v34  ;;  %v7829_v42 = vpop.f32.mrb[72].mxu0  ;;  %18293 = vmatprep.mubr.msk.f32.mxu1 %vm7273_vm11, %v16420_v41  ;;  %v8573_v34 = vpop.permute.xlu0 %8572  ;;  %v8924_v41 = vld [vmem:[#allocation14 + $0xa0] sm:$0xff] }
0x1455   : > { %18301 = vmatprep.subr.mxu1 %v7668_v37  ;;  %v18310_v43 = vpop.f32.mrb[73].mxu0 }
0x1456   : > { %v9091_v43 = vld [vmem:[#allocation14 + $0xc8] sm:$0xff] }
0x1458   : > { %v7990_v20 = vpop.f32.mrb[74].mxu0 }
0x1459   : > { %v18320_v46 = vpop.f32.mrb[75].mxu0 }
0x145b   : > { %18294 = vmatmul.mubr.msk.f32.vlgmr.msra.gmra.mrb[62].mxu1 %vm7273_vm11, %v16421_v45 }
0x145c   : > { %18302 = vmatpush3.msra.mxu1 %v7668_v37  ;;  %v8151_v59 = vpop.f32.mrb[76].mxu0  ;;  %18303 = vmatprep.mubr.msk.f32.mxu1 %vm7273_vm11, %v16426_v15 }
0x145d   : > { %18311 = vmatprep.subr.mxu1 %v7829_v42  ;;  %v18330_v47 = vpop.f32.mrb[77].mxu0 }
0x145e   : > { %v9092_v47 = vld [vmem:[#allocation14 + $0xd0] sm:$0xff] }
0x1460   : > { %v8312_v49 = vpop.f32.mrb[78].mxu0 }
0x1461   : > { %v18340_v53 = vpop.f32.mrb[79].mxu0 }
0x1463   : > { %18304 = vmatmul.mubr.msk.f32.vlgmr.msra.gmra.mrb[62].mxu1 %vm7273_vm11, %v16427_v52  ;;  %v9097_v52 = vld [vmem:[#allocation14 + $0xf8] sm:$0x1] }
0x1464   : > { %18312 = vmatpush3.msra.mxu1 %v7829_v42  ;;  %v8473_v54 = vpop.f32.mrb[80].mxu0  ;;  %18313 = vmatprep.mubr.msk.f32.mxu1 %vm7273_vm11, %v16432_v36  ;;  %v8926_v42 = vld [vmem:[#allocation14 + $0xb0] sm:$0x1] }
0x1465   : > { %18321 = vmatprep.subr.mxu1 %v7990_v20  ;;  %v18350_v21 = vpop.f32.mrb[81].mxu0  ;;  %v19531_v45 = vpack.c.bf16 %v8926_v42, %v8924_v41  ;;  %v9945_v41 = vld [vmem:[#allocation14 + $0x228] sm:$0xff]  ;;  %v9947_v42 = vld [vmem:[#allocation14 + $0x238] sm:$0x1] }
0x1466   : > { %v9096_v21 = vld [vmem:[#allocation14 + $0xf0] sm:$0x1] }
0x146b   : > { %18314 = vmatmul.mubr.msk.f32.vlgmr.msra.gmra.mrb[62].mxu1 %vm7273_vm11, %v16433_v55  ;;  %v9431_v55 = vld [vmem:[#allocation14 + $0x148] sm:$0xff] }
0x146c   : > { %18322 = vmatpush3.msra.mxu1 %v7990_v20  ;;  %18323 = vmatprep.mubr.msk.f32.mxu1 %vm7273_vm11, %v16438_v60  ;;  %v9093_v20 = vld [vmem:[#allocation14 + $0xd8] sm:$0xff] }
0x146d   : > { %18331 = vmatprep.subr.mxu1 %v8151_v59  ;;  %v19538_v15 = vpack.c.bf16 %v9093_v20, %v9091_v43  ;;  %v9433_v60 = vld [vmem:[#allocation14 + $0x158] sm:$0xff]  ;;  %v19612_v20 = vpack.c.bf16 %v9947_v42, %v9945_v41 }
0x1473   : > { %18324 = vmatmul.mubr.msk.f32.vlgmr.msra.gmra.mrb[62].mxu1 %vm7273_vm11, %v16439_v63 }
0x1474   : > { %18332 = vmatpush3.msra.mxu1 %v8151_v59  ;;  %18333 = vmatprep.mubr.msk.f32.mxu1 %vm7273_vm11, %v16444_v0  ;;  %v9090_v59 = vld [vmem:[#allocation14 + $0xc0] sm:$0xff]  ;;  %v19566_v0 = vpack.c.bf16 %v9433_v60, %v9431_v55 }
0x1475   : > { %18341 = vmatprep.subr.mxu1 %v8312_v49  ;;  %v19540_v53 = vpack.c.bf16 %v9092_v47, %v9090_v59  ;;  %v10281_v59 = vld [vmem:[#allocation14 + $0x288] sm:$0xff]  ;;  %v10283_v47 = vld [vmem:[#allocation14 + $0x298] sm:$0xff] }
0x147b   : > { %18334 = vmatmul.mubr.msk.f32.vlgmr.msra.gmra.mrb[62].mxu1 %vm7273_vm11, %v16445_v30  ;;  %v9430_v30 = vld [vmem:[#allocation14 + $0x140] sm:$0xff] }
0x147c   : > { %18342 = vmatpush3.msra.mxu1 %v8312_v49  ;;  %18343 = vmatprep.mubr.msk.f32.mxu1 %vm7273_vm11, %v16450_v35  ;;  %v9095_v49 = vld [vmem:[#allocation14 + $0xe8] sm:$0xff]  ;;  %v9432_v35 = vld [vmem:[#allocation14 + $0x150] sm:$0xff] }
0x147d   : > { %18351 = vmatprep.subr.mxu1 %v8473_v54  ;;  %v19542_v36 = vpack.c.bf16 %v9097_v52, %v9095_v49  ;;  %v19636_v52 = vpack.c.bf16 %v10283_v47, %v10281_v59 }
0x1483   : > { %18344 = vmatmul.mubr.msk.f32.vlgmr.msra.gmra.mrb[62].mxu1 %vm7273_vm11, %v16451_v2  ;;  %v19568_v2 = vpack.c.bf16 %v9432_v35, %v9430_v30  ;;  %v10451_v30 = vld [vmem:[#allocation14 + $0x2c8] sm:$0xff]  ;;  %v10453_v35 = vld [vmem:[#allocation14 + $0x2d8] sm:$0xff] }
0x1484   : > { %18352 = vmatpush3.msra.mxu1 %v8473_v54  ;;  %18353 = vmatprep.mubr.msk.f32.mxu1 %vm7273_vm11, %v16456_v3  ;;  %v9094_v54 = vld [vmem:[#allocation14 + $0xe0] sm:$0xff]  ;;  %v19570_v3 = vpack.c.bf16 %v9437_v56, %v9435_v1  ;;  %v19650_v56 = vpack.c.bf16 %v10453_v35, %v10451_v30 }
0x1485   : > { %19507 = vmatprep.subr.bf16.mxu1 %v19506_v7  ;;  %v19545_v63 = vpack.c.bf16 %v9096_v21, %v9094_v54  ;;  %v9434_v7 = vld [vmem:[#allocation14 + $0x160] sm:$0xff]  ;;  %v10285_v54 = vld [vmem:[#allocation14 + $0x2a8] sm:$0xff]  ;;  %v10287_v21 = vld [vmem:[#allocation14 + $0x2b8] sm:$0x1] }
0x1486   : > { %v19640_v60 = vpack.c.bf16 %v10287_v21, %v10285_v54 }
0x148b   : > { %18354 = vmatmul.mubr.msk.f32.vlgmr.msra.gmra.mrb[62].mxu1 %vm7273_vm11, %v16457_v5  ;;  %v9603_v5 = vld [vmem:[#allocation14 + $0x198] sm:$0xff] }
0x148c   : > { %19509 = vmatpush1.bf16.msra.mxu1 %v19508_v8  ;;  %8756 = vmatprep.mubr.f32.mxu1 %v23053_v57  ;;  %v19573_v8 = vpack.c.bf16 %v9436_v39, %v9434_v7  ;;  %v19580_v9 = vpack.c.bf16 %v9603_v5, %v9601_v4  ;;  %v10455_v7 = vld [vmem:[#allocation14 + $0x2e8] sm:$0xff]  ;;  %v10457_v39 = vld [vmem:[#allocation14 + $0x2f8] sm:$0x1] }
0x148d   : > { %19512 = vmatprep.subr.msk.bf16.mxu1 %vm21938_vm7, %v19510_v16  ;;  %v9604_v16 = vld [vmem:[#allocation14 + $0x1a0] sm:$0xff]  ;;  %v19654_v5 = vpack.c.bf16 %v10457_v39, %v10455_v7 }
0x1490   : > { %19515 = vmatpush1.bf16.msk.msra.mxu1 %vm21938_vm7, %v19513_v22  ;;  %v19587_v22 = vpack.c.bf16 %v9606_v18, %v9604_v16  ;;  %v10625_v16 = vld [vmem:[#allocation14 + $0x328] sm:$0xff]  ;;  %v10627_v18 = vld [vmem:[#allocation14 + $0x338] sm:$0x1] }
0x1491   : > { %19525 = vmatprep.subr.bf16.mxu1 %v19524_v6  ;;  %v9772_v6 = vld [vmem:[#allocation14 + $0x1d0] sm:$0xff]  ;;  %v19668_v61 = vpack.c.bf16 %v10627_v18, %v10625_v16 }
0x1492   : > { %v19596_v28 = vpack.c.bf16 %v9772_v6, %v9770_v26  ;;  %v10791_v26 = vld [vmem:[#allocation14 + $0x348] sm:$0xff]  ;;  %v10793_v6 = vld [vmem:[#allocation14 + $0x358] sm:$0xff] }
0x155e   : > { %v18355_v24 = vpop.f32.mrb[62].mxu1 }
0x155f   : > { %v8552_v29 = vpop.f32.mrb[63].mxu1  ;;  %v8576_v37 = vadd.f32 %v18355_v24, %v8573_v34  ;;  %v9775_v24 = vld [vmem:[#allocation14 + $0x1e8] sm:$0xff] }
0x1560   : > { %v8575_v33 = vadd.f32 %v8568_v58, %v8552_v29  ;;  %v19598_v58 = vpack.c.bf16 %v9777_v25, %v9775_v24  ;;  %v9774_v29 = vld [vmem:[#allocation14 + $0x1e0] sm:$0xff]  ;;  %v19678_v25 = vpack.c.bf16 %v10793_v6, %v10791_v26 }
0x1561   : > { %v22214_v46 = vmax.f32 %v8576_v37, 0.0  ;;  %v19601_v34 = vpack.c.bf16 %v9776_v32, %v9774_v29  ;;  %v9940_v37 = vld [vmem:[#allocation14 + $0x200] sm:$0xff]  ;;  %v10795_v29 = vld [vmem:[#allocation14 + $0x368] sm:$0xff]  ;;  %v10797_v32 = vld [vmem:[#allocation14 + $0x378] sm:$0x1] }
0x1562   : > { %v22207_v38 = vmax.f32 %v8575_v33, 0.0  ;;  %v9943_v33 = vld [vmem:[#allocation14 + $0x218] sm:$0xff] }
0x1564   : > { %16462 = vmatmul.mubr.msk.f32.vlgmr.msra.gmra.mrb[82].mxu0 %vm5367_vm8, %v22207_v38  ;;  %16466 = vmatmul.mubr.msk.f32.vlgmr.msra.gmra.mrb[64].mxu1 %vm5367_vm8, %v22207_v38 }
0x1565   : > { %19527 = vmatpush1.bf16.msra.mxu1 %v19526_v50  ;;  %8669 = vmatprep.mubr.f32.mxu0 %v23053_v57  ;;  %v19608_v50 = vpack.c.bf16 %v9943_v33, %v9941_v51  ;;  %v19682_v33 = vpack.c.bf16 %v10797_v32, %v10795_v29 }
0x1566   : > { %8762 = vmatprep.mubr.f32.mxu1 %v23053_v57  ;;  %19530 = vmatprep.subr.msk.bf16.mxu1 %vm21938_vm7, %v19528_v17  ;;  %v9942_v17 = vld [vmem:[#allocation14 + $0x210] sm:$0xff] }
0x1567   : > { %v19610_v43 = vpack.c.bf16 %v9942_v17, %v9940_v37  ;;  %v11131_v37 = vld [vmem:[#allocation14 + $0x3c8] sm:$0xff]  ;;  %v11133_v17 = vld [vmem:[#allocation14 + $0x3d8] sm:$0xff] }
0x1568   : > { %16463 = vmatmul.mubr.msk.f32.gmra.mrb[84].mxu0 %vm5367_vm8, %v22214_v46  ;;  %16467 = vmatmul.mubr.msk.f32.gmra.mrb[66].mxu1 %vm5367_vm8, %v22214_v46  ;;  %v19706_v42 = vpack.c.bf16 %v11133_v17, %v11131_v37 }
0x1569   : > { %19533 = vmatpush1.bf16.msk.msra.mxu1 %vm21938_vm7, %v19531_v45  ;;  %8998 = vmatprep.mubr.f32.mxu1 %v23053_v57  ;;  %v9944_v45 = vld [vmem:[#allocation14 + $0x220] sm:$0xff] }
0x156a   : > { %19539 = vmatprep.subr.bf16.mxu1 %v19538_v15  ;;  %8838 = vmatprep.mubr.f32.mxu0 %v23053_v57  ;;  %v9946_v15 = vld [vmem:[#allocation14 + $0x230] sm:$0x1] }
0x156b   : > { %v19615_v49 = vpack.c.bf16 %v9946_v15, %v9944_v45  ;;  %v11135_v45 = vld [vmem:[#allocation14 + $0x3e8] sm:$0xff]  ;;  %v11137_v15 = vld [vmem:[#allocation14 + $0x3f8] sm:$0x1] }
0x156c   : > { %16472 = vmatmul.mubr.msk.f32.vlgmr.msra.gmra.mrb[68].mxu1 %vm5367_vm8, %v22207_v38  ;;  %v19710_v47 = vpack.c.bf16 %v11137_v15, %v11135_v45 }
0x156d   : > { %19541 = vmatpush1.bf16.msra.mxu1 %v19540_v53  ;;  %9004 = vmatprep.mubr.f32.mxu1 %v23053_v57  ;;  %v10280_v53 = vld [vmem:[#allocation14 + $0x280] sm:$0xff] }
0x156e   : > { %19544 = vmatprep.subr.msk.bf16.mxu1 %vm21938_vm7, %v19542_v36  ;;  %v10282_v36 = vld [vmem:[#allocation14 + $0x290] sm:$0xff] }
0x156f   : > { %v19638_v55 = vpack.c.bf16 %v10282_v36, %v10280_v53  ;;  %v11301_v53 = vld [vmem:[#allocation14 + $0x408] sm:$0xff]  ;;  %v11303_v36 = vld [vmem:[#allocation14 + $0x418] sm:$0xff] }
0x1570   : > { %16473 = vmatmul.mubr.msk.f32.gmra.mrb[70].mxu1 %vm5367_vm8, %v22214_v46  ;;  %v19720_v21 = vpack.c.bf16 %v11303_v36, %v11301_v53 }
0x1571   : > { %19547 = vmatpush1.bf16.msk.msra.mxu1 %vm21938_vm7, %v19545_v63  ;;  %9168 = vmatprep.mubr.f32.mxu1 %v23053_v57  ;;  %v10284_v63 = vld [vmem:[#allocation14 + $0x2a0] sm:$0xff] }
0x1572   : > { %19567 = vmatprep.subr.bf16.mxu1 %v19566_v0  ;;  %v10286_v0 = vld [vmem:[#allocation14 + $0x2b0] sm:$0x1] }
0x1573   : > { %v19643_v1 = vpack.c.bf16 %v10286_v0, %v10284_v63  ;;  %v11305_v63 = vld [vmem:[#allocation14 + $0x428] sm:$0xff]  ;;  %v11307_v0 = vld [vmem:[#allocation14 + $0x438] sm:$0x1] }
0x1574   : > { %16477 = vmatmul.mubr.msk.f32.vlgmr.msra.gmra.mrb[72].mxu1 %vm5367_vm8, %v22207_v38  ;;  %v19724_v35 = vpack.c.bf16 %v11307_v0, %v11305_v63 }
0x1575   : > { %19569 = vmatpush1.bf16.msra.mxu1 %v19568_v2  ;;  %9174 = vmatprep.mubr.f32.mxu1 %v23053_v57  ;;  %v10450_v2 = vld [vmem:[#allocation14 + $0x2c0] sm:$0xff] }
0x1576   : > { %19572 = vmatprep.subr.msk.bf16.mxu1 %vm21938_vm7, %v19570_v3  ;;  %v10452_v3 = vld [vmem:[#allocation14 + $0x2d0] sm:$0xff] }
0x1577   : > { %v19652_v4 = vpack.c.bf16 %v10452_v3, %v10450_v2  ;;  %v11471_v2 = vld [vmem:[#allocation14 + $0x448] sm:$0xff]  ;;  %v11473_v3 = vld [vmem:[#allocation14 + $0x458] sm:$0xff] }
0x1578   : > { %16478 = vmatmul.mubr.msk.f32.gmra.mrb[74].mxu1 %vm5367_vm8, %v22214_v46  ;;  %v19734_v39 = vpack.c.bf16 %v11473_v3, %v11471_v2 }
0x1579   : > { %19575 = vmatpush1.bf16.msk.msra.mxu1 %vm21938_vm7, %v19573_v8  ;;  %9508 = vmatprep.mubr.f32.mxu1 %v23053_v57  ;;  %v10454_v8 = vld [vmem:[#allocation14 + $0x2e0] sm:$0xff] }
0x157a   : > { %19581 = vmatprep.subr.bf16.mxu1 %v19580_v9  ;;  %v10456_v9 = vld [vmem:[#allocation14 + $0x2f0] sm:$0x1] }
0x157b   : > { %v19657_v12 = vpack.c.bf16 %v10456_v9, %v10454_v8  ;;  %v11475_v8 = vld [vmem:[#allocation14 + $0x468] sm:$0xff]  ;;  %v11477_v9 = vld [vmem:[#allocation14 + $0x478] sm:$0x1] }
0x157c   : > { %16487 = vmatmul.mubr.msk.f32.vlgmr.msra.gmra.mrb[76].mxu1 %vm5367_vm8, %v22207_v38  ;;  %v19738_v11 = vpack.c.bf16 %v11477_v9, %v11475_v8 }
0x157d   : > { %19583 = vmatpush1.bf16.msra.mxu1 %v19582_v13  ;;  %9514 = vmatprep.mubr.f32.mxu1 %v23053_v57  ;;  %v10620_v13 = vld [vmem:[#allocation14 + $0x300] sm:$0xff] }
0x157e   : > { %19586 = vmatprep.subr.msk.bf16.mxu1 %vm21938_vm7, %v19584_v14  ;;  %v10622_v14 = vld [vmem:[#allocation14 + $0x310] sm:$0xff] }
0x157f   : > { %v19666_v19 = vpack.c.bf16 %v10622_v14, %v10620_v13  ;;  %v11641_v13 = vld [vmem:[#allocation14 + $0x488] sm:$0xff]  ;;  %v11643_v14 = vld [vmem:[#allocation14 + $0x498] sm:$0xff] }
0x1580   : > { %16488 = vmatmul.mubr.msk.f32.gmra.mrb[78].mxu1 %vm5367_vm8, %v22214_v46  ;;  %v19748_v18 = vpack.c.bf16 %v11643_v14, %v11641_v13 }
0x1581   : > { %19589 = vmatpush1.bf16.msk.msra.mxu1 %vm21938_vm7, %v19587_v22  ;;  %9678 = vmatprep.mubr.f32.mxu1 %v23053_v57  ;;  %v10624_v22 = vld [vmem:[#allocation14 + $0x320] sm:$0xff] }
0x1582   : > { %19595 = vmatprep.subr.bf16.mxu1 %v19594_v23  ;;  %v10626_v23 = vld [vmem:[#allocation14 + $0x330] sm:$0x1] }
0x1583   : > { %v19671_v24 = vpack.c.bf16 %v10626_v23, %v10624_v22  ;;  %v11645_v22 = vld [vmem:[#allocation14 + $0x4a8] sm:$0xff]  ;;  %v11647_v23 = vld [vmem:[#allocation14 + $0x4b8] sm:$0x1] }
0x1584   : > { %16492 = vmatmul.mubr.msk.f32.vlgmr.msra.gmra.mrb[80].mxu1 %vm5367_vm8, %v22207_v38  ;;  %v19752_v6 = vpack.c.bf16 %v11647_v23, %v11645_v22 }
0x1585   : > { %19597 = vmatpush1.bf16.msra.mxu1 %v19596_v28  ;;  %9684 = vmatprep.mubr.f32.mxu1 %v23053_v57  ;;  %v10790_v28 = vld [vmem:[#allocation14 + $0x340] sm:$0xff] }
0x1586   : > { %19600 = vmatprep.subr.msk.bf16.mxu1 %vm21938_vm7, %v19598_v58  ;;  %v10792_v58 = vld [vmem:[#allocation14 + $0x350] sm:$0xff] }
0x1587   : > { %v19680_v51 = vpack.c.bf16 %v10792_v58, %v10790_v28  ;;  %v11981_v28 = vld [vmem:[#allocation14 + $0x508] sm:$0xff]  ;;  %v11983_v58 = vld [vmem:[#allocation14 + $0x518] sm:$0xff] }
0x1588   : > { %16493 = vmatmul.mubr.msk.f32.gmra.mrb[82].mxu1 %vm5367_vm8, %v22214_v46  ;;  %v19776_v32 = vpack.c.bf16 %v11983_v58, %v11981_v28 }
0x1589   : > { %19603 = vmatpush1.bf16.msk.msra.mxu1 %vm21938_vm7, %v19601_v34  ;;  %9848 = vmatprep.mubr.f32.mxu1 %v23053_v57  ;;  %v10794_v34 = vld [vmem:[#allocation14 + $0x360] sm:$0xff] }
0x158a   : > { %19609 = vmatprep.subr.bf16.mxu1 %v19608_v50  ;;  %v10796_v50 = vld [vmem:[#allocation14 + $0x370] sm:$0x1] }
0x158b   : > { %v19685_v41 = vpack.c.bf16 %v10796_v50, %v10794_v34  ;;  %v11985_v34 = vld [vmem:[#allocation14 + $0x528] sm:$0xff]  ;;  %v11987_v50 = vld [vmem:[#allocation14 + $0x538] sm:$0x1] }
0x158c   : > { %16497 = vmatmul.mubr.msk.f32.vlgmr.msra.gmra.mrb[84].mxu1 %vm5367_vm8, %v22207_v38  ;;  %v19780_v17 = vpack.c.bf16 %v11987_v50, %v11985_v34  ;;  %v8770_v50 = vld [vmem:[#allocation13 + $0x8] sm:$0xff] }
0x158d   : > { %19611 = vmatpush1.bf16.msra.mxu1 %v19610_v43  ;;  %9854 = vmatprep.mubr.f32.mxu1 %v23053_v57  ;;  %v11130_v43 = vld [vmem:[#allocation14 + $0x3c0] sm:$0xff] }
0x158e   : > { %19614 = vmatprep.subr.msk.bf16.mxu1 %vm21938_vm7, %v19612_v20  ;;  %v11132_v20 = vld [vmem:[#allocation14 + $0x3d0] sm:$0xff] }
0x158f   : > { %v19708_v59 = vpack.c.bf16 %v11132_v20, %v11130_v43  ;;  %v12151_v43 = vld [vmem:[#allocation14 + $0x548] sm:$0xff]  ;;  %v12153_v20 = vld [vmem:[#allocation14 + $0x558] sm:$0xff] }
0x1590   : > { %16498 = vmatmul.mubr.msk.f32.gmra.mrb[86].mxu1 %vm5367_vm8, %v22214_v46  ;;  %v19790_v15 = vpack.c.bf16 %v12153_v20, %v12151_v43 }
0x1591   : > { %19617 = vmatpush1.bf16.msk.msra.mxu1 %vm21938_vm7, %v19615_v49  ;;  %10018 = vmatprep.mubr.f32.mxu1 %v23053_v57  ;;  %v11134_v49 = vld [vmem:[#allocation14 + $0x3e0] sm:$0xff] }
0x1592   : > { %19637 = vmatprep.subr.bf16.mxu1 %v19636_v52  ;;  %v11136_v52 = vld [vmem:[#allocation14 + $0x3f0] sm:$0x1] }
0x1593   : > { %v19713_v54 = vpack.c.bf16 %v11136_v52, %v11134_v49  ;;  %v12155_v49 = vld [vmem:[#allocation14 + $0x568] sm:$0xff]  ;;  %v12157_v52 = vld [vmem:[#allocation14 + $0x578] sm:$0x1] }
0x1594   : > { %16502 = vmatmul.mubr.msk.f32.vlgmr.msra.gmra.mrb[88].mxu1 %vm5367_vm8, %v22207_v38  ;;  %v19794_v36 = vpack.c.bf16 %v12157_v52, %v12155_v49  ;;  %v9261_v52 = vld [vmem:[#allocation14 + $0x108] sm:$0xff] }
0x1595   : > { %19639 = vmatpush1.bf16.msra.mxu1 %v19638_v55  ;;  %10024 = vmatprep.mubr.f32.mxu1 %v23053_v57  ;;  %v11300_v55 = vld [vmem:[#allocation14 + $0x400] sm:$0xff] }
0x1596   : > { %19642 = vmatprep.subr.msk.bf16.mxu1 %vm21938_vm7, %v19640_v60  ;;  %v11302_v60 = vld [vmem:[#allocation14 + $0x410] sm:$0xff] }
0x1597   : > { %v19722_v30 = vpack.c.bf16 %v11302_v60, %v11300_v55  ;;  %v12321_v55 = vld [vmem:[#allocation14 + $0x588] sm:$0xff]  ;;  %v12323_v60 = vld [vmem:[#allocation14 + $0x598] sm:$0xff] }
0x1598   : > { %16503 = vmatmul.mubr.msk.f32.gmra.mrb[90].mxu1 %vm5367_vm8, %v22214_v46  ;;  %v19804_v0 = vpack.c.bf16 %v12323_v60, %v12321_v55 }
0x1599   : > { %19645 = vmatpush1.bf16.msk.msra.mxu1 %vm21938_vm7, %v19643_v1  ;;  %10358 = vmatprep.mubr.f32.mxu1 %v23053_v57  ;;  %v11304_v1 = vld [vmem:[#allocation14 + $0x420] sm:$0xff] }
0x159a   : > { %19651 = vmatprep.subr.bf16.mxu1 %v19650_v56  ;;  %v11306_v56 = vld [vmem:[#allocation14 + $0x430] sm:$0x1] }
0x159b   : > { %v19727_v7 = vpack.c.bf16 %v11306_v56, %v11304_v1  ;;  %v12325_v1 = vld [vmem:[#allocation14 + $0x5a8] sm:$0xff]  ;;  %v12327_v56 = vld [vmem:[#allocation14 + $0x5b8] sm:$0x1] }
0x159c   : > { %16512 = vmatmul.mubr.msk.f32.vlgmr.msra.gmra.mrb[92].mxu1 %vm5367_vm8, %v22207_v38  ;;  %v19808_v3 = vpack.c.bf16 %v12327_v56, %v12325_v1  ;;  %v9262_v1 = vld [vmem:[#allocation14 + $0x110] sm:$0xff]  ;;  %v9265_v56 = vld [vmem:[#allocation14 + $0x128] sm:$0xff] }
0x159d   : > { %19653 = vmatpush1.bf16.msra.mxu1 %v19652_v4  ;;  %10364 = vmatprep.mubr.f32.mxu1 %v23053_v57  ;;  %v11470_v4 = vld [vmem:[#allocation14 + $0x440] sm:$0xff] }
0x159e   : > { %19656 = vmatprep.subr.msk.bf16.mxu1 %vm21938_vm7, %v19654_v5  ;;  %v11472_v5 = vld [vmem:[#allocation14 + $0x450] sm:$0xff] }
0x159f   : > { %v19736_v10 = vpack.c.bf16 %v11472_v5, %v11470_v4  ;;  %v12491_v4 = vld [vmem:[#allocation14 + $0x5c8] sm:$0xff]  ;;  %v12493_v5 = vld [vmem:[#allocation14 + $0x5d8] sm:$0xff] }
0x15a0   : > { %16513 = vmatmul.mubr.msk.f32.gmra.mrb[94].mxu1 %vm5367_vm8, %v22214_v46  ;;  %v19818_v9 = vpack.c.bf16 %v12493_v5, %v12491_v4 }
0x15a1   : > { %19659 = vmatpush1.bf16.msk.msra.mxu1 %vm21938_vm7, %v19657_v12  ;;  %10528 = vmatprep.mubr.f32.mxu1 %v23053_v57  ;;  %v11474_v12 = vld [vmem:[#allocation14 + $0x460] sm:$0xff] }
0x15a2   : > { %19665 = vmatprep.subr.bf16.mxu1 %v19664_v27  ;;  %v11476_v27 = vld [vmem:[#allocation14 + $0x470] sm:$0x1] }
0x15a3   : > { %v19741_v16 = vpack.c.bf16 %v11476_v27, %v11474_v12  ;;  %v12495_v12 = vld [vmem:[#allocation14 + $0x5e8] sm:$0xff]  ;;  %v12497_v27 = vld [vmem:[#allocation14 + $0x5f8] sm:$0x1] }
0x15a4   : > { %16517 = vmatmul.mubr.msk.f32.vlgmr.msra.gmra.mrb[96].mxu1 %vm5367_vm8, %v22207_v38  ;;  %v19822_v14 = vpack.c.bf16 %v12497_v27, %v12495_v12 }
0x15a5   : > { %19667 = vmatpush1.bf16.msra.mxu1 %v19666_v19  ;;  %10534 = vmatprep.mubr.f32.mxu1 %v23053_v57  ;;  %v11640_v19 = vld [vmem:[#allocation14 + $0x480] sm:$0xff] }
0x15a6   : > { %19670 = vmatprep.subr.msk.bf16.mxu1 %vm21938_vm7, %v19668_v61  ;;  %v11642_v61 = vld [vmem:[#allocation14 + $0x490] sm:$0xff] }
0x15a7   : > { %v19750_v26 = vpack.c.bf16 %v11642_v61, %v11640_v19 }
0x15a8   : > { %16518 = vmatmul.mubr.msk.f32.gmra.mrb[98].mxu1 %vm5367_vm8, %v22214_v46 }
0x15a9   : > { %19673 = vmatpush1.bf16.msk.msra.mxu1 %vm21938_vm7, %v19671_v24  ;;  %10698 = vmatprep.mubr.f32.mxu1 %v23053_v57  ;;  %v11644_v24 = vld [vmem:[#allocation14 + $0x4a0] sm:$0xff] }
0x15aa   : > { %19679 = vmatprep.subr.bf16.mxu1 %v19678_v25  ;;  %v11646_v25 = vld [vmem:[#allocation14 + $0x4b0] sm:$0x1] }
0x15ab   : > { %v19755_v29 = vpack.c.bf16 %v11646_v25, %v11644_v24 }
0x15ac   : > { %16522 = vmatmul.mubr.msk.f32.vlgmr.msra.gmra.mrb[100].mxu1 %vm5367_vm8, %v22207_v38 }
0x15ad   : > { %19681 = vmatpush1.bf16.msra.mxu1 %v19680_v51  ;;  %10704 = vmatprep.mubr.f32.mxu1 %v23053_v57  ;;  %v11980_v51 = vld [vmem:[#allocation14 + $0x500] sm:$0xff] }
0x15ae   : > { %19684 = vmatprep.subr.msk.bf16.mxu1 %vm21938_vm7, %v19682_v33  ;;  %v11982_v33 = vld [vmem:[#allocation14 + $0x510] sm:$0xff] }
0x15af   : > { %v19778_v37 = vpack.c.bf16 %v11982_v33, %v11980_v51 }
0x15b0   : > { %16523 = vmatmul.mubr.msk.f32.gmra.mrb[102].mxu1 %vm5367_vm8, %v22214_v46 }
0x15b1   : > { %19687 = vmatpush1.bf16.msk.msra.mxu1 %vm21938_vm7, %v19685_v41  ;;  %10868 = vmatprep.mubr.f32.mxu1 %v23053_v57  ;;  %v11984_v41 = vld [vmem:[#allocation14 + $0x520] sm:$0xff] }
0x15b2   : > { %19707 = vmatprep.subr.bf16.mxu1 %v19706_v42  ;;  %v11986_v42 = vld [vmem:[#allocation14 + $0x530] sm:$0x1] }
0x15b3   : > { %v19783_v45 = vpack.c.bf16 %v11986_v42, %v11984_v41 }
0x15b4   : > { %16527 = vmatmul.mubr.msk.f32.vlgmr.msra.gmra.mrb[104].mxu1 %vm5367_vm8, %v22207_v38 }
0x15b5   : > { %19709 = vmatpush1.bf16.msra.mxu1 %v19708_v59  ;;  %10874 = vmatprep.mubr.f32.mxu1 %v23053_v57  ;;  %v12150_v59 = vld [vmem:[#allocation14 + $0x540] sm:$0xff] }
0x15b6   : > { %19712 = vmatprep.subr.msk.bf16.mxu1 %vm21938_vm7, %v19710_v47  ;;  %v12152_v47 = vld [vmem:[#allocation14 + $0x550] sm:$0xff] }
0x15b7   : > { %v19792_v53 = vpack.c.bf16 %v12152_v47, %v12150_v59 }
0x15b8   : > { %16528 = vmatmul.mubr.msk.f32.gmra.mrb[106].mxu1 %vm5367_vm8, %v22214_v46 }
0x15b9   : > { %19715 = vmatpush1.bf16.msk.msra.mxu1 %vm21938_vm7, %v19713_v54  ;;  %11208 = vmatprep.mubr.f32.mxu1 %v23053_v57  ;;  %v12154_v54 = vld [vmem:[#allocation14 + $0x560] sm:$0xff] }
0x15ba   : > { %19721 = vmatprep.subr.bf16.mxu1 %v19720_v21  ;;  %v12156_v21 = vld [vmem:[#allocation14 + $0x570] sm:$0x1] }
0x15bb   : > { %v19797_v63 = vpack.c.bf16 %v12156_v21, %v12154_v54  ;;  %v9012_v21 = vld [vmem:[#allocation13 + $0x10] sm:$0xff] }
0x15bc   : > { %16537 = vmatmul.mubr.msk.f32.vlgmr.msra.gmra.mrb[108].mxu1 %vm5367_vm8, %v22207_v38 }
0x15bd   : > { %19723 = vmatpush1.bf16.msra.mxu1 %v19722_v30  ;;  %11214 = vmatprep.mubr.f32.mxu1 %v23053_v57  ;;  %v12320_v30 = vld [vmem:[#allocation14 + $0x580] sm:$0xff] }
0x15be   : > { %19726 = vmatprep.subr.msk.bf16.mxu1 %vm21938_vm7, %v19724_v35  ;;  %v12322_v35 = vld [vmem:[#allocation14 + $0x590] sm:$0xff] }
0x15bf   : > { %v19806_v2 = vpack.c.bf16 %v12322_v35, %v12320_v30  ;;  %v9260_v35 = vld [vmem:[#allocation14 + $0x100] sm:$0xff] }
0x15c0   : > { %16538 = vmatmul.mubr.msk.f32.gmra.mrb[110].mxu1 %vm5367_vm8, %v22214_v46  ;;  %v19554_v4 = vpack.c.bf16 %v9262_v1, %v9260_v35 }
0x15c1   : > { %19729 = vmatpush1.bf16.msk.msra.mxu1 %vm21938_vm7, %v19727_v7  ;;  %11378 = vmatprep.mubr.f32.mxu1 %v23053_v57  ;;  %v12324_v7 = vld [vmem:[#allocation14 + $0x5a0] sm:$0xff] }
0x15c2   : > { %19735 = vmatprep.subr.bf16.mxu1 %v19734_v39  ;;  %v12326_v39 = vld [vmem:[#allocation14 + $0x5b0] sm:$0x1] }
0x15c3   : > { %v19811_v8 = vpack.c.bf16 %v12326_v39, %v12324_v7  ;;  %v9182_v39 = vld [vmem:[#allocation13 + $0x18] sm:$0xff] }
0x15c4   : > { %16542 = vmatmul.mubr.msk.f32.vlgmr.msra.gmra.mrb[112].mxu1 %vm5367_vm8, %v22207_v38 }
0x15c5   : > { %19737 = vmatpush1.bf16.msra.mxu1 %v19736_v10  ;;  %11384 = vmatprep.mubr.f32.mxu1 %v23053_v57  ;;  %v12490_v10 = vld [vmem:[#allocation14 + $0x5c0] sm:$0xff] }
0x15c6   : > { %19740 = vmatprep.subr.msk.bf16.mxu1 %vm21938_vm7, %v19738_v11  ;;  %v12492_v11 = vld [vmem:[#allocation14 + $0x5d0] sm:$0xff] }
0x15c7   : > { %v19820_v13 = vpack.c.bf16 %v12492_v11, %v12490_v10 }
0x15c8   : > { %16543 = vmatmul.mubr.msk.f32.gmra.mrb[114].mxu1 %vm5367_vm8, %v22214_v46 }
0x15c9   : > { %19743 = vmatpush1.bf16.msk.msra.mxu1 %vm21938_vm7, %v19741_v16  ;;  %11548 = vmatprep.mubr.f32.mxu1 %v23053_v57  ;;  %v12494_v16 = vld [vmem:[#allocation14 + $0x5e0] sm:$0xff] }
0x15ca   : > { %19749 = vmatprep.subr.bf16.mxu1 %v19748_v18  ;;  %v12496_v18 = vld [vmem:[#allocation14 + $0x5f0] sm:$0x1] }
0x15cb   : > { %v19825_v19 = vpack.c.bf16 %v12496_v18, %v12494_v16 }
0x15cc   : > { %16547 = vmatmul.mubr.msk.f32.vlgmr.msra.gmra.mrb[116].mxu1 %vm5367_vm8, %v22207_v38 }
0x15cd   : > { %19751 = vmatpush1.bf16.msra.mxu1 %v19750_v26  ;;  %11554 = vmatprep.mubr.f32.mxu1 %v23053_v57 }
0x15ce   : > { %19754 = vmatprep.subr.msk.bf16.mxu1 %vm21938_vm7, %v19752_v6 }
0x15d0   : > { %16548 = vmatmul.mubr.msk.f32.gmra.mrb[118].mxu1 %vm5367_vm8, %v22214_v46 }
0x15d1   : > { %19757 = vmatpush1.bf16.msk.msra.mxu1 %vm21938_vm7, %v19755_v29  ;;  %11718 = vmatprep.mubr.f32.mxu1 %v23053_v57 }
0x15d2   : > { %19777 = vmatprep.subr.bf16.mxu1 %v19776_v32 }
0x15d4   : > { %16552 = vmatmul.mubr.msk.f32.vlgmr.msra.gmra.mrb[120].mxu1 %vm5367_vm8, %v22207_v38 }
0x15d5   : > { %19779 = vmatpush1.bf16.msra.mxu1 %v19778_v37  ;;  %11724 = vmatprep.mubr.f32.mxu1 %v23053_v57 }
0x15d6   : > { %19782 = vmatprep.subr.msk.bf16.mxu1 %vm21938_vm7, %v19780_v17 }
0x15d8   : > { %16553 = vmatmul.mubr.msk.f32.gmra.mrb[122].mxu1 %vm5367_vm8, %v22214_v46 }
0x15d9   : > { %19785 = vmatpush1.bf16.msk.msra.mxu1 %vm21938_vm7, %v19783_v45  ;;  %12058 = vmatprep.mubr.f32.mxu1 %v23053_v57  ;;  %v8676_v45 = vld [vmem:[#allocation13] sm:$0xff] }
0x15da   : > { %19791 = vmatprep.subr.bf16.mxu1 %v19790_v15 }
0x15dc   : > { %16562 = vmatmul.mubr.msk.f32.vlgmr.msra.gmra.mrb[124].mxu1 %vm5367_vm8, %v22207_v38 }
0x15dd   : > { %19793 = vmatpush1.bf16.msra.mxu1 %v19792_v53  ;;  %12064 = vmatprep.mubr.f32.mxu1 %v23053_v57  ;;  %v9263_v53 = vld [vmem:[#allocation14 + $0x118] sm:$0xff] }
0x15de   : > { %19796 = vmatprep.subr.msk.bf16.mxu1 %vm21938_vm7, %v19794_v36  ;;  %v19552_v55 = vpack.c.bf16 %v9263_v53, %v9261_v52 }
0x15e0   : > { %16563 = vmatmul.mubr.msk.f32.gmra.mrb[126].mxu1 %vm5367_vm8, %v22214_v46 }
0x15e1   : > { %19799 = vmatpush1.bf16.msk.msra.mxu1 %vm21938_vm7, %v19797_v63  ;;  %12228 = vmatprep.mubr.f32.mxu1 %v23053_v57 }
0x15e2   : > { %19805 = vmatprep.subr.bf16.mxu1 %v19804_v0 }
0x15e4   : > { %16567 = vmatmul.mubr.msk.f32.vlgmr.msra.gmra.mrb[128].mxu1 %vm5367_vm8, %v22207_v38 }
0x15e5   : > { %19807 = vmatpush1.bf16.msra.mxu1 %v19806_v2  ;;  %12234 = vmatprep.mubr.f32.mxu1 %v23053_v57  ;;  %v9267_v2 = vld [vmem:[#allocation14 + $0x138] sm:$0x1] }
0x15e6   : > { %19810 = vmatprep.subr.msk.bf16.mxu1 %vm21938_vm7, %v19808_v3  ;;  %v19556_v5 = vpack.c.bf16 %v9267_v2, %v9265_v56 }
0x15e8   : > { %16568 = vmatmul.mubr.msk.f32.gmra.mrb[130].mxu1 %vm5367_vm8, %v22214_v46 }
0x15e9   : > { %19813 = vmatpush1.bf16.msk.msra.mxu1 %vm21938_vm7, %v19811_v8  ;;  %12398 = vmatprep.mubr.f32.mxu1 %v23053_v57  ;;  %v9264_v8 = vld [vmem:[#allocation14 + $0x120] sm:$0xff] }
0x15ea   : > { %19819 = vmatprep.subr.bf16.mxu1 %v19818_v9  ;;  %v9266_v9 = vld [vmem:[#allocation14 + $0x130] sm:$0x1] }
0x15eb   : > { %v19559_v27 = vpack.c.bf16 %v9266_v9, %v9264_v8 }
0x15ec   : > { %16572 = vmatmul.mubr.msk.f32.vlgmr.msra.gmra.mrb[132].mxu1 %vm5367_vm8, %v22207_v38 }
0x15ed   : > { %19821 = vmatpush1.bf16.msra.mxu1 %v19820_v13  ;;  %12404 = vmatprep.mubr.f32.mxu1 %v23053_v57 }
0x15ee   : > { %19824 = vmatprep.subr.msk.bf16.mxu1 %vm21938_vm7, %v19822_v14 }
0x15f0   : > { %16573 = vmatmul.mubr.msk.f32.gmra.mrb[134].mxu1 %vm5367_vm8, %v22214_v46 }
0x15f1   : > { %19827 = vmatpush1.bf16.msk.msra.mxu1 %vm21938_vm7, %v19825_v19  ;;  %12568 = vmatprep.mubr.f32.mxu1 %v23053_v57 }
0x15f4   : > { %16577 = vmatmul.mubr.msk.f32.vlgmr.msra.gmra.mrb[136].mxu1 %vm5367_vm8, %v22207_v38 }
0x15f5   : > { %12574 = vmatprep.mubr.f32.mxu1 %v23053_v57 }
0x15f8   : > { %16578 = vmatmul.mubr.msk.f32.gmra.mrb[138].mxu1 %vm5367_vm8, %v22214_v46 }
0x1637   : > { %v8665_v61 = vpop.f32.mrb[82].mxu0  ;;  %v8758_v22 = vpop.f32.mrb[64].mxu1 }
0x1638   : > { %v8667_v23 = vpop.f32.mrb[83].mxu0  ;;  %v8760_v26 = vpop.f32.mrb[65].mxu1 }
0x163b   : > { %v8671_v6 = vpop.f32.mrb[84].mxu0  ;;  %v8764_v24 = vpop.f32.mrb[66].mxu1 }
0x163c   : > { %v19522_v25 = vpack.c.bf16 %v8671_v6, %v8665_v61  ;;  %v19518_v28 = vpack.c.bf16 %v8764_v24, %v8758_v22  ;;  %v8673_v58 = vpop.f32.mrb[85].mxu0  ;;  %v8766_v29 = vpop.f32.mrb[67].mxu1 }
0x163d   : > { %v19520_v32 = vpack.c.bf16 %v8673_v58, %v8667_v23  ;;  %v19516_v51 = vpack.c.bf16 %v8766_v29, %v8760_v26 }
0x163f   : > { %19517 = vmatprep.subr.bf16.mxu0 %v19516_v51  ;;  %v9000_v33 = vpop.f32.mrb[68].mxu1 }
0x1640   : > { %19519 = vmatpush1.bf16.msra.mxu0 %v19518_v28  ;;  %v9002_v34 = vpop.f32.mrb[69].mxu1 }
0x1641   : > { %19521 = vmatprep.subr.bf16.mxu0 %v19520_v32 }
0x1643   : > { %16468 = vmatmul.mubr.msk.f32.vlgmr.msra.gmra.mrb[86].mxu0 %vm853_vm1, %v8770_v50  ;;  %v9006_v37 = vpop.f32.mrb[70].mxu1 }
0x1644   : > { %v19536_v17 = vpack.c.bf16 %v9006_v37, %v9000_v33  ;;  %19523 = vmatpush1.bf16.msra.mxu0 %v19522_v25  ;;  %v9008_v41 = vpop.f32.mrb[71].mxu1  ;;  %8912 = vmatprep.mubr.f32.mxu0 %v23053_v57 }
0x1645   : > { %v19534_v42 = vpack.c.bf16 %v9008_v41, %v9002_v34 }
0x1647   : > { %19535 = vmatprep.subr.bf16.mxu0 %v19534_v42  ;;  %v9170_v43 = vpop.f32.mrb[72].mxu1 }
0x1648   : > { %v9172_v20 = vpop.f32.mrb[73].mxu1 }
0x164b   : > { %16469 = vmatmul.mubr.msk.f32.vlgmr.msra.gmra.mrb[86].mxu0 %vm853_vm1, %v8676_v45  ;;  %v9176_v15 = vpop.f32.mrb[74].mxu1 }
0x164c   : > { %19537 = vmatpush1.bf16.msra.mxu0 %v19536_v17  ;;  %v19550_v59 = vpack.c.bf16 %v9176_v15, %v9170_v43  ;;  %v9178_v47 = vpop.f32.mrb[75].mxu1  ;;  %9080 = vmatprep.mubr.f32.mxu0 %v23053_v57 }
0x164d   : > { %v19548_v49 = vpack.c.bf16 %v9178_v47, %v9172_v20 }
0x164f   : > { %19549 = vmatprep.subr.bf16.mxu0 %v19548_v49  ;;  %v22406_v36 = vpop.f32.mrb[76].mxu1 }
0x1650   : > { %v22408_v54 = vpop.f32.mrb[77].mxu1 }
0x1653   : > { %16474 = vmatmul.mubr.msk.f32.vlgmr.msra.gmra.mrb[86].mxu0 %vm853_vm1, %v9012_v21  ;;  %v22411_v60 = vpop.f32.mrb[78].mxu1 }
0x1654   : > { %19551 = vmatpush1.bf16.msra.mxu0 %v19550_v59  ;;  %v22415_v0 = vpop.f32.mrb[79].mxu1  ;;  %9250 = vmatprep.mubr.f32.mxu0 %v23053_v57  ;;  %v23119_v30 = vpack.c.bf16 %v22411_v60, %v22406_v36  ;;  %v9692_v36 = vld [vmem:[#allocation13 + $0x30] sm:$0xff] }
0x1655   : > { %19553 = vmatprep.subr.bf16.mxu0 %v19552_v55 }
0x1657   : > { %v22420_v3 = vpop.f32.mrb[80].mxu1 }
0x1658   : > { %v22422_v7 = vpop.f32.mrb[81].mxu1 }
0x165b   : > { %16479 = vmatmul.mubr.msk.f32.vlgmr.msra.gmra.mrb[86].mxu0 %vm853_vm1, %v9182_v39  ;;  %v22425_v10 = vpop.f32.mrb[82].mxu1 }
0x165c   : > { %19555 = vmatpush1.bf16.msra.mxu0 %v19554_v4  ;;  %v22429_v12 = vpop.f32.mrb[83].mxu1  ;;  %9338 = vmatprep.mubr.f32.mxu0 %v23053_v57 }
0x165d   : > { %19558 = vmatprep.subr.msk.bf16.mxu0 %vm21938_vm7, %v19556_v5 }
0x165f   : > { %v22436_v14 = vpop.f32.mrb[84].mxu1 }
0x1660   : > { %19561 = vmatpush1.bf16.msk.msra.mxu0 %vm21938_vm7, %v19559_v27  ;;  %v22440_v16 = vpop.f32.mrb[85].mxu1 }
0x1663   : > { %16482 = vmatmul.mubr.msk.f32.vlgmr.msra.gmra.mrb[88].mxu0 %vm5367_vm8, %v22207_v38  ;;  %v22444_v18 = vpop.f32.mrb[86].mxu1 }
0x1664   : > { %v22448_v61 = vpop.f32.mrb[87].mxu1  ;;  %9344 = vmatprep.mubr.f32.mxu0 %v23053_v57 }
0x1667   : > { %16483 = vmatmul.mubr.msk.f32.gmra.mrb[90].mxu0 %vm5367_vm8, %v22214_v46  ;;  %v22455_v23 = vpop.f32.mrb[88].mxu1 }
0x1668   : > { %v22457_v26 = vpop.f32.mrb[89].mxu1  ;;  %9420 = vmatprep.mubr.f32.mxu0 %v23053_v57 }
0x166b   : > { %v22460_v6 = vpop.f32.mrb[90].mxu1 }
0x166c   : > { %v22464_v25 = vpop.f32.mrb[91].mxu1 }
0x166d   : > { %v23125_v60 = vpack.c.bf16 %v22464_v25, %v22457_v26  ;;  %v10114_v25 = vld [vmem:[#allocation14 + $0x260] sm:$0xff] }
0x166f   : > { %v22468_v58 = vpop.f32.mrb[92].mxu1 }
0x1670   : > { %v22470_v29 = vpop.f32.mrb[93].mxu1 }
0x1673   : > { %v22472_v32 = vpop.f32.mrb[94].mxu1 }
0x1674   : > { %v22476_v33 = vpop.f32.mrb[95].mxu1 }
0x1677   : > { %v22480_v50 = vpop.f32.mrb[96].mxu1 }
0x1678   : > { %v22482_v37 = vpop.f32.mrb[97].mxu1 }
0x167b   : > { %v22484_v17 = vpop.f32.mrb[98].mxu1 }
0x167c   : > { %v22488_v42 = vpop.f32.mrb[99].mxu1 }
0x167f   : > { %v22492_v20 = vpop.f32.mrb[100].mxu1 }
0x1680   : > { %v22494_v45 = vpop.f32.mrb[101].mxu1 }
0x1683   : > { %v22496_v15 = vpop.f32.mrb[102].mxu1 }
0x1684   : > { %v22500_v47 = vpop.f32.mrb[103].mxu1 }
0x1687   : > { %v22504_v52 = vpop.f32.mrb[104].mxu1 }
0x1688   : > { %v22506_v53 = vpop.f32.mrb[105].mxu1 }
0x168b   : > { %v22508_v21 = vpop.f32.mrb[106].mxu1 }
0x168c   : > { %v22512_v35 = vpop.f32.mrb[107].mxu1 }
0x168f   : > { %v22516_v56 = vpop.f32.mrb[108].mxu1 }
0x1690   : > { %v22518_v2 = vpop.f32.mrb[109].mxu1 }
0x1693   : > { %v22520_v39 = vpop.f32.mrb[110].mxu1 }
0x1694   : > { %v22524_v5 = vpop.f32.mrb[111].mxu1 }
0x1697   : > { %v22528_v9 = vpop.f32.mrb[112].mxu1 }
0x1698   : > { %v22530_v27 = vpop.f32.mrb[113].mxu1 }
0x169b   : > { %v22532_v48 = vpop.f32.mrb[114].mxu1 }
0x169c   : > { %v22536_v44 = vpop.f32.mrb[115].mxu1 }
0x169f   : > { %v22540_v4 = vpop.f32.mrb[116].mxu1 }
0x16a0   : > { %v22542_v1 = vpop.f32.mrb[117].mxu1 }
0x16a3   : > { %v22544_v59 = vpop.f32.mrb[118].mxu1 }
0x16a4   : > { %v22548_v49 = vpop.f32.mrb[119].mxu1 }
0x16a7   : > { %v22552_v40 = vpop.f32.mrb[120].mxu1 }
0x16a8   : > { %23105 = vst [vmem:[#allocation27_spill] sm:$0xff] %v22552_v40  ;;  %v22554_v43 = vpop.f32.mrb[121].mxu1 }
0x16ab   : > { %v22556_v51 = vpop.f32.mrb[122].mxu1 }
0x16ac   : > { %v22560_v34 = vpop.f32.mrb[123].mxu1 }
0x16af   : > { %v22564_v8 = vpop.f32.mrb[124].mxu1 }
0x16b0   : > { %23106 = vst [vmem:[#allocation28_spill] sm:$0xff] %v22564_v8  ;;  %v22566_v28 = vpop.f32.mrb[125].mxu1 }
0x16b1   : > { %23107 = vst [vmem:[#allocation29_spill] sm:$0xff] %v22566_v28 }
0x16b3   : > { %v22568_v19 = vpop.f32.mrb[126].mxu1 }
0x16b4   : > { %23108 = vst [vmem:[#allocation30_spill] sm:$0xff] %v22568_v19  ;;  %v22572_v22 = vpop.f32.mrb[127].mxu1 }
0x16b5   : > { %23109 = vst [vmem:[#allocation31_spill] sm:$0xff] %v22572_v22 }
0x16b7   : > { %v22576_v55 = vpop.f32.mrb[128].mxu1 }
0x16b8   : > { %23110 = vst [vmem:[#allocation32_spill] sm:$0xff] %v22576_v55  ;;  %v22578_v13 = vpop.f32.mrb[129].mxu1 }
0x16b9   : > { %23111 = vst [vmem:[#allocation33_spill] sm:$0xff] %v22578_v13 }
0x16bb   : > { %v22580_v57 = vpop.f32.mrb[130].mxu1 }
0x16bc   : > { %23112 = vst [vmem:[#allocation34_spill] sm:$0xff] %v22580_v57  ;;  %v22584_v63 = vpop.f32.mrb[131].mxu1 }
0x16bd   : > { %23113 = vst [vmem:[#allocation35_spill] sm:$0xff] %v22584_v63  ;;  %v23120_v63 = vmov 0.0  }
0x16bf   : > { %v22588_v41 = vpop.f32.mrb[132].mxu1 }
0x16c0   : > { %23114 = vst [vmem:[#allocation36_spill] sm:$0xff] %v22588_v41  ;;  %v22590_v62 = vpop.f32.mrb[133].mxu1 }
0x16c1   : > { %23115 = vst [vmem:[#allocation37_spill] sm:$0xff] %v22590_v62  ;;  %v9352_v62 = vld [vmem:[#allocation13 + $0x20] sm:$0xff] }
0x16c3   : > { %v22592_v8 = vpop.f32.mrb[134].mxu1 }
0x16c4   : > { %23116 = vst [vmem:[#allocation38_spill] sm:$0xff] %v22592_v8  ;;  %v22596_v19 = vpop.f32.mrb[135].mxu1 }
0x16c5   : > { %23117 = vst [vmem:[#allocation39_spill] sm:$0xff] %v22596_v19  ;;  %v23118_v19 = vpack.c.bf16 %v22415_v0, %v22408_v54  ;;  %v23124_v54 = vpack.c.bf16 %v22444_v18, %v22436_v14  ;;  %v10111_v0 = vld [vmem:[#allocation14 + $0x248] sm:$0xff]  ;;  %v10112_v14 = vld [vmem:[#allocation14 + $0x250] sm:$0xff]  ;;  %v10117_v18 = vld [vmem:[#allocation14 + $0x278] sm:$0x1] }
0x16c7   : > { %v22600_v24 = vpop.f32.mrb[136].mxu1 }
0x16c8   : > { %v22602_v55 = vpop.f32.mrb[137].mxu1 }
0x16cb   : > { %v22604_v57 = vpop.f32.mrb[138].mxu1 }
0x16cc   : > { %v22608_v13 = vpop.f32.mrb[139].mxu1 }
0x1736   : > { %v9340_v11 = vpop.f32.mrb[88].mxu0 }
0x1737   : > { %v9342_v41 = vpop.f32.mrb[89].mxu0 }
0x173a   : > { %v9346_v8 = vpop.f32.mrb[90].mxu0 }
0x173b   : > { %v19564_v22 = vpack.c.bf16 %v9346_v8, %v9340_v11  ;;  %v9348_v40 = vpop.f32.mrb[91].mxu0  ;;  %v23121_v11 = vpack.c.bf16 %v22429_v12, %v22422_v7  ;;  %v10110_v12 = vld [vmem:[#allocation14 + $0x240] sm:$0xff] }
0x173c   : > { %v19562_v28 = vpack.c.bf16 %v9348_v40, %v9342_v41  ;;  %v9522_v40 = vld [vmem:[#allocation13 + $0x28] sm:$0xff] }
0x173e   : > { %19563 = vmatprep.subr.bf16.mxu0 %v19562_v28  ;;  %v10116_v28 = vld [vmem:[#allocation14 + $0x270] sm:$0x1] }
0x173f   : > { %19565 = vmatpush1.bf16.msra.mxu0 %v19564_v22  ;;  %v23122_v22 = vpack.c.bf16 %v22425_v10, %v22420_v3  ;;  %v9862_v3 = vld [vmem:[#allocation13 + $0x38] sm:$0xff]  ;;  %v23126_v10 = vpack.c.bf16 %v22460_v6, %v22455_v23  ;;  %v19629_v41 = vpack.c.bf16 %v10116_v28, %v10114_v25  ;;  %v23135_v25 = vpack.c.bf16 %v22524_v5, %v22518_v2  ;;  %v11813_v5 = vld [vmem:[#allocation14 + $0x4d8] sm:$0xff] }
0x1740   : > { %19577 = vmatprep.subr.bf16.mxu0 %v23118_v19  ;;  %v10032_v19 = vld [vmem:[#allocation13 + $0x40] sm:$0xff]  ;;  %v23136_v28 = vpack.c.bf16 %v22520_v39, %v22516_v56  ;;  %v23139_v2 = vpack.c.bf16 %v22548_v49, %v22542_v1  ;;  %v23141_v39 = vpack.c.bf16 %v22560_v34, %v22554_v43  ;;  %v23142_v49 = vld [vmem:[#allocation27_spill] sm:$0xff] }
0x1741   : > { %v11392_v56 = vld [vmem:[#allocation13 + $0x80] sm:$0xff]  ;;  %v23143_v1 = vpack.c.bf16 %v22556_v51, %v23142_v49 }
0x1742   : > { %16484 = vmatmul.mubr.msk.f32.vlgmr.msra.gmra.mrb[86].mxu0 %vm853_vm1, %v9352_v62  ;;  %v23123_v62 = vpack.c.bf16 %v22448_v61, %v22440_v16  ;;  %v10115_v16 = vld [vmem:[#allocation14 + $0x268] sm:$0xff]  ;;  %v19624_v61 = vpack.c.bf16 %v10112_v14, %v10110_v12  ;;  %v10966_v12 = vld [vmem:[#allocation14 + $0x3b0] sm:$0x1] }
0x1743   : > { %19579 = vmatpush1.bf16.msra.mxu0 %v23119_v30  ;;  %9590 = vmatprep.mubr.f32.mxu0 %v23120_v63  ;;  %v10113_v30 = vld [vmem:[#allocation14 + $0x258] sm:$0xff]  ;;  %v19626_v26 = vpack.c.bf16 %v10117_v18, %v10115_v16 }
0x1744   : > { %19591 = vmatprep.subr.bf16.mxu0 %v23121_v11  ;;  %v19622_v7 = vpack.c.bf16 %v10113_v30, %v10111_v0  ;;  %v10372_v0 = vld [vmem:[#allocation13 + $0x50] sm:$0xff]  ;;  %v23130_v30 = vpack.c.bf16 %v22484_v17, %v22480_v50  ;;  %v10712_v17 = vld [vmem:[#allocation13 + $0x60] sm:$0xff] }
0x1745   : > { %v10961_v50 = vld [vmem:[#allocation14 + $0x388] sm:$0xff] }
0x174a   : > { %16489 = vmatmul.mubr.msk.f32.vlgmr.msra.gmra.mrb[86].mxu0 %vm853_vm1, %v9522_v40 }
0x174b   : > { %19593 = vmatpush1.bf16.msra.mxu0 %v23122_v22  ;;  %9760 = vmatprep.mubr.f32.mxu0 %v23120_v63 }
0x174c   : > { %19605 = vmatprep.subr.bf16.mxu0 %v23123_v62  ;;  %v10202_v62 = vld [vmem:[#allocation13 + $0x48] sm:$0xff] }
0x1752   : > { %16494 = vmatmul.mubr.msk.f32.vlgmr.msra.gmra.mrb[86].mxu0 %vm853_vm1, %v9692_v36  ;;  %v23127_v36 = vpack.c.bf16 %v22476_v33, %v22470_v29  ;;  %v23131_v29 = vpack.c.bf16 %v22500_v47, %v22494_v45  ;;  %v23133_v33 = vpack.c.bf16 %v22512_v35, %v22506_v53  ;;  %v23134_v45 = vpack.c.bf16 %v22508_v21, %v22504_v52  ;;  %v10965_v47 = vld [vmem:[#allocation14 + $0x3a8] sm:$0xff] }
0x1753   : > { %19607 = vmatpush1.bf16.msra.mxu0 %v23124_v54  ;;  %9930 = vmatprep.mubr.f32.mxu0 %v23120_v63  ;;  %v23128_v54 = vpack.c.bf16 %v22472_v32, %v22468_v58  ;;  %v10542_v58 = vld [vmem:[#allocation13 + $0x58] sm:$0xff]  ;;  %v23132_v32 = vpack.c.bf16 %v22496_v15, %v22492_v20  ;;  %v10960_v20 = vld [vmem:[#allocation14 + $0x380] sm:$0xff] }
0x1754   : > { %19619 = vmatprep.subr.bf16.mxu0 %v23125_v60  ;;  %v23129_v60 = vpack.c.bf16 %v22488_v42, %v22482_v37  ;;  %v10963_v37 = vld [vmem:[#allocation14 + $0x398] sm:$0xff]  ;;  %v10962_v15 = vld [vmem:[#allocation14 + $0x390] sm:$0xff] }
0x1755   : > { %v19692_v42 = vpack.c.bf16 %v10963_v37, %v10961_v50  ;;  %v19694_v53 = vpack.c.bf16 %v10962_v15, %v10960_v20  ;;  %v23147_v37 = vld [vmem:[#allocation30_spill] sm:$0xff]  ;;  %v23151_v20 = vld [vmem:[#allocation33_spill] sm:$0xff] }
0x175a   : > { %16499 = vmatmul.mubr.msk.f32.vlgmr.msra.gmra.mrb[86].mxu0 %vm853_vm1, %v9862_v3  ;;  %v10967_v3 = vld [vmem:[#allocation14 + $0x3b8] sm:$0x1] }
0x175b   : > { %19621 = vmatpush1.bf16.msra.mxu0 %v23126_v10  ;;  %10100 = vmatprep.mubr.f32.mxu0 %v23120_v63  ;;  %v19696_v35 = vpack.c.bf16 %v10967_v3, %v10965_v47  ;;  %v10964_v10 = vld [vmem:[#allocation14 + $0x3a0] sm:$0xff]  ;;  %v12072_v47 = vld [vmem:[#allocation13 + $0xa0] sm:$0xff] }
0x175c   : > { %19623 = vmatprep.subr.bf16.mxu0 %v19622_v7  ;;  %v10882_v7 = vld [vmem:[#allocation13 + $0x68] sm:$0xff]  ;;  %v19699_v14 = vpack.c.bf16 %v10966_v12, %v10964_v10 }
0x175d   : > { %v23153_v3 = vld [vmem:[#allocation34_spill] sm:$0xff]  ;;  %v23157_v10 = vld [vmem:[#allocation37_spill] sm:$0xff] }
0x1762   : > { %16504 = vmatmul.mubr.msk.f32.vlgmr.msra.gmra.mrb[86].mxu0 %vm853_vm1, %v10032_v19 }
0x1763   : > { %19625 = vmatpush1.bf16.msra.mxu0 %v19624_v61  ;;  %10188 = vmatprep.mubr.f32.mxu0 %v23120_v63 }
0x1764   : > { %19628 = vmatprep.subr.msk.bf16.mxu0 %vm21938_vm7, %v19626_v26  ;;  %v11052_v26 = vld [vmem:[#allocation13 + $0x70] sm:$0xff] }
0x1767   : > { %19631 = vmatpush1.bf16.msk.msra.mxu0 %vm21938_vm7, %v19629_v41  ;;  %v23137_v41 = vpack.c.bf16 %v22536_v44, %v22530_v27  ;;  %v23140_v44 = vpack.c.bf16 %v22544_v59, %v22540_v4  ;;  %v11810_v59 = vld [vmem:[#allocation14 + $0x4c0] sm:$0xff]  ;;  %v11812_v4 = vld [vmem:[#allocation14 + $0x4d0] sm:$0xff] }
0x1768   : > { %v19764_v34 = vpack.c.bf16 %v11812_v4, %v11810_v59  ;;  %v12853_v4 = vld [vmem:[#allocation17 + $0x70] sm:$0xff] }
0x176a   : > { %16507 = vmatmul.mubr.msk.f32.vlgmr.msra.gmra.mrb[92].mxu0 %vm5367_vm8, %v22207_v38 }
0x176b   : > { %10194 = vmatprep.mubr.f32.mxu0 %v23120_v63 }
0x176e   : > { %16508 = vmatmul.mubr.msk.f32.gmra.mrb[94].mxu0 %vm5367_vm8, %v22214_v46 }
0x176f   : > { %10270 = vmatprep.mubr.f32.mxu0 %v23120_v63 }
0x183d   : > { %v10190_v23 = vpop.f32.mrb[92].mxu0 }
0x183e   : > { %v10192_v6 = vpop.f32.mrb[93].mxu0 }
0x1841   : > { %v10196_v8 = vpop.f32.mrb[94].mxu0 }
0x1842   : > { %v19634_v11 = vpack.c.bf16 %v10196_v8, %v10190_v23  ;;  %v10198_v40 = vpop.f32.mrb[95].mxu0  ;;  %v11222_v23 = vld [vmem:[#allocation13 + $0x78] sm:$0xff]  ;;  %v11815_v8 = vld [vmem:[#allocation14 + $0x4e8] sm:$0xff] }
0x1843   : > { %v19632_v22 = vpack.c.bf16 %v10198_v40, %v10192_v6  ;;  %v23138_v6 = vpack.c.bf16 %v22532_v48, %v22528_v9  ;;  %v11811_v48 = vld [vmem:[#allocation14 + $0x4c8] sm:$0xff]  ;;  %v11562_v9 = vld [vmem:[#allocation13 + $0x88] sm:$0xff] }
0x1844   : > { %v19762_v27 = vpack.c.bf16 %v11813_v5, %v11811_v48  ;;  %v11732_v40 = vld [vmem:[#allocation13 + $0x90] sm:$0xff] }
0x1845   : > { %19633 = vmatprep.subr.bf16.mxu0 %v19632_v22  ;;  %v11814_v22 = vld [vmem:[#allocation14 + $0x4e0] sm:$0xff] }
0x1846   : > { %19635 = vmatpush1.bf16.msra.mxu0 %v19634_v11  ;;  %v11817_v11 = vld [vmem:[#allocation14 + $0x4f8] sm:$0x1] }
0x1847   : > { %19647 = vmatprep.subr.bf16.mxu0 %v23127_v36  ;;  %v19766_v43 = vpack.c.bf16 %v11817_v11, %v11815_v8  ;;  %v12868_v11 = vld [vmem:[#allocation17 + $0xe8] sm:$0xff] }
0x1849   : > { %16509 = vmatmul.mubr.msk.f32.vlgmr.msra.gmra.mrb[86].mxu0 %vm853_vm1, %v10202_v62  ;;  %v11816_v62 = vld [vmem:[#allocation14 + $0x4f0] sm:$0x1] }
0x184a   : > { %19649 = vmatpush1.bf16.msra.mxu0 %v23128_v54  ;;  %10440 = vmatprep.mubr.f32.mxu0 %v23120_v63  ;;  %v19769_v36 = vpack.c.bf16 %v11816_v62, %v11814_v22  ;;  %v12882_v62 = vld [vmem:[#allocation17 + $0x158] sm:$0xff] }
0x184b   : > { %19661 = vmatprep.subr.bf16.mxu0 %v23129_v60 }
0x1851   : > { %16514 = vmatmul.mubr.msk.f32.vlgmr.msra.gmra.mrb[86].mxu0 %vm853_vm1, %v10372_v0 }
0x1852   : > { %19663 = vmatpush1.bf16.msra.mxu0 %v23130_v30  ;;  %10610 = vmatprep.mubr.f32.mxu0 %v23120_v63 }
0x1853   : > { %19675 = vmatprep.subr.bf16.mxu0 %v23131_v29 }
0x1859   : > { %16519 = vmatmul.mubr.msk.f32.vlgmr.msra.gmra.mrb[86].mxu0 %vm853_vm1, %v10542_v58  ;;  %v11902_v58 = vld [vmem:[#allocation13 + $0x98] sm:$0xff] }
0x185a   : > { %19677 = vmatpush1.bf16.msra.mxu0 %v23132_v32  ;;  %10780 = vmatprep.mubr.f32.mxu0 %v23120_v63  ;;  %v23144_v32 = vld [vmem:[#allocation31_spill] sm:$0xff] }
0x185b   : > { %19689 = vmatprep.subr.bf16.mxu0 %v23133_v33  ;;  %v23145_v33 = vld [vmem:[#allocation29_spill] sm:$0xff] }
0x185c   : > { %v23146_v50 = vpack.c.bf16 %v23144_v32, %v23145_v33  ;;  %v12895_v32 = vld [vmem:[#allocation17 + $0x1c0] sm:$0xff]  ;;  %v12902_v33 = vld [vmem:[#allocation17 + $0x1f8] sm:$0xff] }
0x1861   : > { %16524 = vmatmul.mubr.msk.f32.vlgmr.msra.gmra.mrb[86].mxu0 %vm853_vm1, %v10712_v17  ;;  %v23148_v17 = vld [vmem:[#allocation28_spill] sm:$0xff] }
0x1862   : > { %19691 = vmatpush1.bf16.msra.mxu0 %v23134_v45  ;;  %10950 = vmatprep.mubr.f32.mxu0 %v23120_v63  ;;  %v23150_v45 = vld [vmem:[#allocation35_spill] sm:$0xff] }
0x1863   : > { %19693 = vmatprep.subr.bf16.mxu0 %v19692_v42  ;;  %v23149_v42 = vpack.c.bf16 %v23147_v37, %v23148_v17  ;;  %v23152_v15 = vpack.c.bf16 %v23150_v45, %v23151_v20  ;;  %v12910_v37 = vld [vmem:[#allocation17 + $0x238] sm:$0xff]  ;;  %v12917_v17 = vld [vmem:[#allocation17 + $0x270] sm:$0xff]  ;;  %v12916_v20 = vld [vmem:[#allocation17 + $0x268] sm:$0xff] }
0x1864   : > { %v12909_v45 = vld [vmem:[#allocation17 + $0x230] sm:$0xff] }
0x1869   : > { %16529 = vmatmul.mubr.msk.f32.vlgmr.msra.gmra.mrb[86].mxu0 %vm853_vm1, %v10882_v7  ;;  %v23154_v7 = vld [vmem:[#allocation32_spill] sm:$0xff] }
0x186a   : > { %19695 = vmatpush1.bf16.msra.mxu0 %v19694_v53  ;;  %11038 = vmatprep.mubr.f32.mxu0 %v23120_v63  ;;  %v23155_v53 = vpack.c.bf16 %v23153_v3, %v23154_v7  ;;  %v12931_v3 = vld [vmem:[#allocation17 + $0x2e0] sm:$0xff] }
0x186b   : > { %19698 = vmatprep.subr.msk.bf16.mxu0 %vm21938_vm7, %v19696_v35  ;;  %v23156_v35 = vld [vmem:[#allocation39_spill] sm:$0xff] }
0x186c   : > { %v23158_v12 = vpack.c.bf16 %v23156_v35, %v23157_v10  ;;  %v12930_v35 = vld [vmem:[#allocation17 + $0x2d8] sm:$0xff] }
0x186e   : > { %19701 = vmatpush1.bf16.msk.msra.mxu0 %vm21938_vm7, %v19699_v14  ;;  %v12242_v14 = vld [vmem:[#allocation13 + $0xa8] sm:$0xff] }
0x1871   : > { %16532 = vmatmul.mubr.msk.f32.vlgmr.msra.gmra.mrb[96].mxu0 %vm5367_vm8, %v22207_v38 }
0x1872   : > { %11044 = vmatprep.mubr.f32.mxu0 %v23120_v63 }
0x1875   : > { %16533 = vmatmul.mubr.msk.f32.gmra.mrb[98].mxu0 %vm5367_vm8, %v22214_v46 }
0x1876   : > { %11120 = vmatprep.mubr.f32.mxu0 %v23120_v63 }
0x1944   : > { %v11040_v52 = vpop.f32.mrb[96].mxu0 }
0x1945   : > { %v11042_v21 = vpop.f32.mrb[97].mxu0 }
0x1948   : > { %v11046_v16 = vpop.f32.mrb[98].mxu0 }
0x1949   : > { %v19704_v18 = vpack.c.bf16 %v11046_v16, %v11040_v52  ;;  %v11048_v19 = vpop.f32.mrb[99].mxu0  ;;  %v23159_v52 = vld [vmem:[#allocation38_spill] sm:$0xff] }
0x194a   : > { %v19702_v61 = vpack.c.bf16 %v11048_v19, %v11042_v21  ;;  %v23160_v21 = vld [vmem:[#allocation36_spill] sm:$0xff]  ;;  %v12661_v19 = vld [vmem:[#allocation14 + $0x608] sm:$0xff] }
0x194b   : > { %v23161_v16 = vpack.c.bf16 %v23159_v52, %v23160_v21  ;;  %v12937_v21 = vld [vmem:[#allocation17 + $0x310] sm:$0xff] }
0x194c   : > { %19703 = vmatprep.subr.bf16.mxu0 %v19702_v61  ;;  %v12663_v61 = vld [vmem:[#allocation14 + $0x618] sm:$0xff] }
0x194d   : > { %19705 = vmatpush1.bf16.msra.mxu0 %v19704_v18  ;;  %v23162_v18 = vpack.c.bf16 %v22608_v13, %v22602_v55 }
0x194e   : > { %19717 = vmatprep.subr.bf16.mxu0 %v23135_v25  ;;  %v19832_v25 = vpack.c.bf16 %v12663_v61, %v12661_v19  ;;  %v12952_v19 = vld [vmem:[#allocation17 + $0x388] sm:$0xff]  ;;  %v12959_v61 = vld [vmem:[#allocation17 + $0x3c0] sm:$0xff] }
0x1950   : > { %16534 = vmatmul.mubr.msk.f32.vlgmr.msra.gmra.mrb[86].mxu0 %vm853_vm1, %v11052_v26  ;;  %v12412_v26 = vld [vmem:[#allocation13 + $0xb0] sm:$0xff] }
0x1951   : > { %19719 = vmatpush1.bf16.msra.mxu0 %v23136_v28  ;;  %11290 = vmatprep.mubr.f32.mxu0 %v23120_v63  ;;  %v23163_v28 = vpack.c.bf16 %v22604_v57, %v22600_v24  ;;  %v12840_v57 = vld [vmem:[#allocation17 + $0x8] sm:$0xff]  ;;  %v12847_v24 = vld [vmem:[#allocation17 + $0x40] sm:$0xff] }
0x1952   : > { %19731 = vmatprep.subr.bf16.mxu0 %v23137_v41  ;;  %v12660_v41 = vld [vmem:[#allocation14 + $0x600] sm:$0xff]  ;;  %v19846_v5 = vpack.c.bf16 %v12847_v24, %v12840_v57 }
0x1953   : > { %v12979_v57 = vld [vmem:[#allocation17 + $0x460] sm:$0xff]  ;;  %v12986_v24 = vld [vmem:[#allocation17 + $0x498] sm:$0xff] }
0x1954   : > { %19847 = vmatprep.subr.bf16.mxu1 %v19846_v5  ;;  %v19888_v5 = vpack.c.bf16 %v12986_v24, %v12979_v57  ;;  %v12940_v57 = vld [vmem:[#allocation17 + $0x328] sm:$0xff]  ;;  %v12947_v24 = vld [vmem:[#allocation17 + $0x360] sm:$0xff] }
0x1958   : > { %16539 = vmatmul.mubr.msk.f32.vlgmr.msra.gmra.mrb[86].mxu0 %vm853_vm1, %v11222_v23  ;;  %v12662_v23 = vld [vmem:[#allocation14 + $0x610] sm:$0xff] }
0x1959   : > { %19733 = vmatpush1.bf16.msra.mxu0 %v23138_v6  ;;  %11460 = vmatprep.mubr.f32.mxu0 %v23120_v63  ;;  %v12665_v6 = vld [vmem:[#allocation14 + $0x628] sm:$0xff]  ;;  %v19834_v13 = vpack.c.bf16 %v12662_v23, %v12660_v41  ;;  %v12966_v23 = vld [vmem:[#allocation17 + $0x3f8] sm:$0xff] }
0x195a   : > { %19745 = vmatprep.subr.bf16.mxu0 %v23139_v2  ;;  %v12667_v2 = vld [vmem:[#allocation14 + $0x638] sm:$0x1] }
0x195b   : > { %v19836_v55 = vpack.c.bf16 %v12667_v2, %v12665_v6  ;;  %v12973_v6 = vld [vmem:[#allocation17 + $0x430] sm:$0xff] }
0x195c   : > { %v19882_v2 = vpack.c.bf16 %v12973_v6, %v12966_v23  ;;  %v12911_v6 = vld [vmem:[#allocation17 + $0x240] sm:$0xff] }
0x1960   : > { %16544 = vmatmul.mubr.msk.f32.vlgmr.msra.gmra.mrb[86].mxu0 %vm853_vm1, %v11392_v56  ;;  %v12582_v56 = vld [vmem:[#allocation13 + $0xb8] sm:$0xff] }
0x1961   : > { %19747 = vmatpush1.bf16.msra.mxu0 %v23140_v44  ;;  %11630 = vmatprep.mubr.f32.mxu0 %v23120_v63  ;;  %v12664_v44 = vld [vmem:[#allocation14 + $0x620] sm:$0xff] }
0x1962   : > { %19759 = vmatprep.subr.bf16.mxu0 %v23141_v39  ;;  %v12666_v39 = vld [vmem:[#allocation14 + $0x630] sm:$0x1] }
0x1963   : > { %v19839_v48 = vpack.c.bf16 %v12666_v39, %v12664_v44  ;;  %v12980_v44 = vld [vmem:[#allocation17 + $0x468] sm:$0xff]  ;;  %v12987_v39 = vld [vmem:[#allocation17 + $0x4a0] sm:$0xff] }
0x1968   : > { %16549 = vmatmul.mubr.msk.f32.vlgmr.msra.gmra.mrb[86].mxu0 %vm853_vm1, %v11562_v9  ;;  %v12839_v9 = vld [vmem:[#allocation17] sm:$0xff] }
0x1969   : > { %19761 = vmatpush1.bf16.msra.mxu0 %v23143_v1  ;;  %11800 = vmatprep.mubr.f32.mxu0 %v23120_v63  ;;  %v12854_v1 = vld [vmem:[#allocation17 + $0x78] sm:$0xff] }
0x196a   : > { %19763 = vmatprep.subr.bf16.mxu0 %v19762_v27  ;;  %v12846_v27 = vld [vmem:[#allocation17 + $0x38] sm:$0xff]  ;;  %v19850_v59 = vpack.c.bf16 %v12861_v31, %v12854_v1  ;;  %v12993_v1 = vld [vmem:[#allocation17 + $0x4d0] sm:$0xff]  ;;  %v13000_v31 = vld [vmem:[#allocation17 + $0x508] sm:$0xff] }
0x196b   : > { %v19848_v49 = vpack.c.bf16 %v12846_v27, %v12839_v9  ;;  %v12994_v9 = vld [vmem:[#allocation17 + $0x4d8] sm:$0xff]  ;;  %v13001_v27 = vld [vmem:[#allocation17 + $0x510] sm:$0xff] }
0x196d   : > { %19849 = vmatpush1.bf16.msra.mxu1 %v19848_v49  ;;  %v19890_v49 = vpack.c.bf16 %v13001_v27, %v12994_v9  ;;  %v19930_v9 = vpack.c.bf16 %v12947_v24, %v12940_v57  ;;  %v12939_v27 = vld [vmem:[#allocation17 + $0x320] sm:$0xff]  ;;  %v12845_v57 = vld [vmem:[#allocation17 + $0x30] sm:$0xff]  ;;  %v12852_v24 = vld [vmem:[#allocation17 + $0x68] sm:$0xff] }
0x196e   : > { %19851 = vmatprep.subr.bf16.mxu1 %v19850_v59  ;;  %v19892_v59 = vpack.c.bf16 %v13000_v31, %v12993_v1  ;;  %v12954_v1 = vld [vmem:[#allocation17 + $0x398] sm:$0xff]  ;;  %v12961_v31 = vld [vmem:[#allocation17 + $0x3d0] sm:$0xff] }
0x1970   : > { %16554 = vmatmul.mubr.msk.f32.vlgmr.msra.gmra.mrb[86].mxu0 %vm853_vm1, %v11732_v40  ;;  %v12875_v40 = vld [vmem:[#allocation17 + $0x120] sm:$0xff] }
0x1971   : > { %19765 = vmatpush1.bf16.msra.mxu0 %v19764_v34  ;;  %11888 = vmatprep.mubr.f32.mxu0 %v23120_v63  ;;  %v12867_v34 = vld [vmem:[#allocation17 + $0xe0] sm:$0xff] }
0x1972   : > { %19768 = vmatprep.subr.msk.bf16.mxu0 %vm21938_vm7, %v19766_v43  ;;  %v12874_v43 = vld [vmem:[#allocation17 + $0x118] sm:$0xff] }
0x1973   : > { %v19856_v22 = vpack.c.bf16 %v12874_v43, %v12867_v34 }
0x1975   : > { %19771 = vmatpush1.bf16.msk.msra.mxu0 %vm21938_vm7, %v19769_v36  ;;  %v12889_v36 = vld [vmem:[#allocation17 + $0x190] sm:$0xff] }
0x1978   : > { %16557 = vmatmul.mubr.msk.f32.vlgmr.msra.gmra.mrb[100].mxu0 %vm5367_vm8, %v22207_v38 }
0x1979   : > { %11894 = vmatprep.mubr.f32.mxu0 %v23120_v63 }
0x197c   : > { %16558 = vmatmul.mubr.msk.f32.gmra.mrb[102].mxu0 %vm5367_vm8, %v22214_v46 }
0x197d   : > { %11970 = vmatprep.mubr.f32.mxu0 %v23120_v63 }
0x1a4b   : > { %v11890_v51 = vpop.f32.mrb[100].mxu0 }
0x1a4c   : > { %v11892_v54 = vpop.f32.mrb[101].mxu0 }
0x1a4f   : > { %v11896_v60 = vpop.f32.mrb[102].mxu0 }
0x1a50   : > { %v19774_v0 = vpack.c.bf16 %v11896_v60, %v11890_v51  ;;  %v11898_v30 = vpop.f32.mrb[103].mxu0  ;;  %v19858_v51 = vpack.c.bf16 %v12889_v36, %v12882_v62  ;;  %v12888_v60 = vld [vmem:[#allocation17 + $0x188] sm:$0xff]  ;;  %v12849_v62 = vld [vmem:[#allocation17 + $0x50] sm:$0xff] }
0x1a51   : > { %v19772_v29 = vpack.c.bf16 %v11898_v30, %v11892_v54  ;;  %v12881_v54 = vld [vmem:[#allocation17 + $0x150] sm:$0xff]  ;;  %v12896_v30 = vld [vmem:[#allocation17 + $0x1c8] sm:$0xff] }
0x1a53   : > { %19773 = vmatprep.subr.bf16.mxu0 %v19772_v29  ;;  %v12903_v29 = vld [vmem:[#allocation17 + $0x200] sm:$0xff] }
0x1a54   : > { %19775 = vmatpush1.bf16.msra.mxu0 %v19774_v0  ;;  %v19860_v0 = vpack.c.bf16 %v12888_v60, %v12881_v54 }
0x1a55   : > { %19787 = vmatprep.subr.bf16.mxu0 %v23146_v50  ;;  %v19864_v50 = vpack.c.bf16 %v12902_v33, %v12895_v32  ;;  %v12863_v32 = vld [vmem:[#allocation17 + $0xc0] sm:$0xff]  ;;  %v12752_v33 = vld [vmem:[#allocation13 + $0xc0] sm:$0xff] }
0x1a57   : > { %16559 = vmatmul.mubr.msk.f32.vlgmr.msra.gmra.mrb[86].mxu0 %vm853_vm1, %v11902_v58  ;;  %v19862_v58 = vpack.c.bf16 %v12903_v29, %v12896_v30  ;;  %v12841_v30 = vld [vmem:[#allocation17 + $0x10] sm:$0xff]  ;;  %v12848_v29 = vld [vmem:[#allocation17 + $0x48] sm:$0xff] }
0x1a58   : > { %19789 = vmatpush1.bf16.msra.mxu0 %v23149_v42  ;;  %12140 = vmatprep.mubr.f32.mxu0 %v23120_v63  ;;  %v19866_v42 = vpack.c.bf16 %v12917_v17, %v12910_v37  ;;  %v12855_v17 = vld [vmem:[#allocation17 + $0x80] sm:$0xff] }
0x1a59   : > { %19801 = vmatprep.subr.bf16.mxu0 %v23152_v15  ;;  %v19868_v15 = vpack.c.bf16 %v12916_v20, %v12909_v45  ;;  %v12870_v45 = vld [vmem:[#allocation17 + $0xf8] sm:$0xff]  ;;  %v12877_v20 = vld [vmem:[#allocation17 + $0x130] sm:$0xff] }
0x1a5f   : > { %16564 = vmatmul.mubr.msk.f32.vlgmr.msra.gmra.mrb[86].mxu0 %vm853_vm1, %v12072_v47  ;;  %v12924_v47 = vld [vmem:[#allocation17 + $0x2a8] sm:$0xff] }
0x1a60   : > { %19803 = vmatpush1.bf16.msra.mxu0 %v23155_v53  ;;  %12310 = vmatprep.mubr.f32.mxu0 %v23120_v63  ;;  %v19870_v7 = vpack.c.bf16 %v12931_v3, %v12924_v47  ;;  %v12923_v53 = vld [vmem:[#allocation17 + $0x2a0] sm:$0xff]  ;;  %v19910_v47 = vpack.c.bf16 %v12877_v20, %v12870_v45  ;;  %v12869_v3 = vld [vmem:[#allocation17 + $0xf0] sm:$0xff] }
0x1a61   : > { %19815 = vmatprep.subr.bf16.mxu0 %v23158_v12  ;;  %v19872_v10 = vpack.c.bf16 %v12930_v35, %v12923_v53  ;;  %v12938_v12 = vld [vmem:[#allocation17 + $0x318] sm:$0xff]  ;;  %v12884_v53 = vld [vmem:[#allocation17 + $0x168] sm:$0xff]  ;;  %v12891_v35 = vld [vmem:[#allocation17 + $0x1a0] sm:$0xff] }
0x1a62   : > { %v13009_v20 = vld [vmem:[#allocation17 + $0x550] sm:$0xff] }
0x1a67   : > { %16569 = vmatmul.mubr.msk.f32.vlgmr.msra.gmra.mrb[86].mxu0 %vm853_vm1, %v12242_v14  ;;  %v12945_v14 = vld [vmem:[#allocation17 + $0x350] sm:$0xff] }
0x1a68   : > { %19817 = vmatpush1.bf16.msra.mxu0 %v23161_v16  ;;  %12480 = vmatprep.mubr.f32.mxu0 %v23120_v63  ;;  %v19874_v52 = vpack.c.bf16 %v12945_v14, %v12938_v12  ;;  %v12944_v16 = vld [vmem:[#allocation17 + $0x348] sm:$0xff]  ;;  %v19914_v12 = vpack.c.bf16 %v12891_v35, %v12884_v53  ;;  %v12883_v14 = vld [vmem:[#allocation17 + $0x160] sm:$0xff] }
0x1a69   : > { %19829 = vmatprep.subr.bf16.mxu0 %v23162_v18  ;;  %v19876_v18 = vpack.c.bf16 %v12944_v16, %v12937_v21  ;;  %v12898_v21 = vld [vmem:[#allocation17 + $0x1d8] sm:$0xff]  ;;  %v12905_v16 = vld [vmem:[#allocation17 + $0x210] sm:$0xff]  ;;  %v13024_v53 = vld [vmem:[#allocation17 + $0x5c8] sm:$0xff] }
0x1a6f   : > { %16574 = vmatmul.mubr.msk.f32.vlgmr.msra.gmra.mrb[86].mxu0 %vm853_vm1, %v12412_v26  ;;  %v19878_v26 = vpack.c.bf16 %v12959_v61, %v12952_v19  ;;  %v19918_v19 = vpack.c.bf16 %v12905_v16, %v12898_v21  ;;  %v12897_v61 = vld [vmem:[#allocation17 + $0x1d0] sm:$0xff]  ;;  %v13023_v16 = vld [vmem:[#allocation17 + $0x5c0] sm:$0xff] }
0x1a70   : > { %19831 = vmatpush1.bf16.msra.mxu0 %v23163_v28  ;;  %12650 = vmatprep.mubr.f32.mxu0 %v23120_v63  ;;  %v12958_v28 = vld [vmem:[#allocation17 + $0x3b8] sm:$0xff] }
0x1a71   : > { %19833 = vmatprep.subr.bf16.mxu0 %v19832_v25  ;;  %v12951_v25 = vld [vmem:[#allocation17 + $0x380] sm:$0xff] }
0x1a72   : > { %v19880_v41 = vpack.c.bf16 %v12958_v28, %v12951_v25  ;;  %v12912_v25 = vld [vmem:[#allocation17 + $0x248] sm:$0xff]  ;;  %v12919_v28 = vld [vmem:[#allocation17 + $0x280] sm:$0xff] }
0x1a73   : > { %v19922_v23 = vpack.c.bf16 %v12919_v28, %v12912_v25  ;;  %v12844_v25 = vld [vmem:[#allocation17 + $0x28] sm:$0xff]  ;;  %v13035_v28 = vld [vmem:[#allocation17 + $0x620] sm:$0x1] }
0x1a77   : > { %16579 = vmatmul.mubr.msk.f32.vlgmr.msra.gmra.mrb[86].mxu0 %vm853_vm1, %v12582_v56  ;;  %v12965_v56 = vld [vmem:[#allocation17 + $0x3f0] sm:$0xff] }
0x1a78   : > { %19835 = vmatpush1.bf16.msra.mxu0 %v19834_v13  ;;  %12738 = vmatprep.mubr.f32.mxu0 %v23120_v63  ;;  %v12972_v13 = vld [vmem:[#allocation17 + $0x428] sm:$0xff] }
0x1a79   : > { %19838 = vmatprep.subr.msk.bf16.mxu0 %vm21938_vm7, %v19836_v55  ;;  %v19884_v55 = vpack.c.bf16 %v12972_v13, %v12965_v56  ;;  %v12926_v56 = vld [vmem:[#allocation17 + $0x2b8] sm:$0xff]  ;;  %v12933_v13 = vld [vmem:[#allocation17 + $0x2f0] sm:$0xff] }
0x1a7c   : > { %19841 = vmatpush1.bf16.msk.msra.mxu0 %vm21938_vm7, %v19839_v48  ;;  %v19886_v48 = vpack.c.bf16 %v12987_v39, %v12980_v44  ;;  %v19926_v44 = vpack.c.bf16 %v12933_v13, %v12926_v56  ;;  %v12925_v39 = vld [vmem:[#allocation17 + $0x2b0] sm:$0xff]  ;;  %v12833_v56 = vpop.permute.xlu1 %12832 }
0x1a7f   : > { %16582 = vmatmul.mubr.msk.f32.vlgmr.msra.gmra.mrb[104].mxu0 %vm5367_vm8, %v22207_v38  ;;  %v12860_v38 = vld [vmem:[#allocation17 + $0xa8] sm:$0xff] }
0x1a80   : > { %12744 = vmatprep.mubr.f32.mxu0 %v23120_v63  ;;  %v19852_v8 = vpack.c.bf16 %v12860_v38, %v12853_v4  ;;  %v13008_v4 = vld [vmem:[#allocation17 + $0x548] sm:$0xff]  ;;  %v13015_v38 = vld [vmem:[#allocation17 + $0x580] sm:$0xff] }
0x1a82   : > { %19853 = vmatpush1.bf16.msra.mxu1 %v19852_v8  ;;  %v19894_v8 = vpack.c.bf16 %v13015_v38, %v13008_v4  ;;  %v19934_v4 = vpack.c.bf16 %v12961_v31, %v12954_v1  ;;  %v12953_v38 = vld [vmem:[#allocation17 + $0x390] sm:$0xff]  ;;  %v20015_v31 = vpack.c.bf16 %v12852_v24, %v12845_v57 }
0x1a83   : > { %16583 = vmatmul.mubr.msk.f32.gmra.mrb[106].mxu0 %vm5367_vm8, %v22214_v46  ;;  %v19854_v46 = vpack.c.bf16 %v12875_v40, %v12868_v11  ;;  %v13007_v11 = vld [vmem:[#allocation17 + $0x540] sm:$0xff]  ;;  %v13014_v40 = vld [vmem:[#allocation17 + $0x578] sm:$0xff]  ;;  %v12941_v24 = vld [vmem:[#allocation17 + $0x330] sm:$0xff] }
0x1a84   : > { %12820 = vmatprep.mubr.f32.mxu0 %v23120_v63 }
0x1a85   : > { %19855 = vmatprep.subr.bf16.mxu1 %v19854_v46  ;;  %v19896_v46 = vpack.c.bf16 %v13014_v40, %v13007_v11  ;;  %v12968_v11 = vld [vmem:[#allocation17 + $0x408] sm:$0xff]  ;;  %v12975_v40 = vld [vmem:[#allocation17 + $0x440] sm:$0xff] }
0x1a86   : > { %19857 = vmatpush1.bf16.msra.mxu1 %v19856_v22  ;;  %v12842_v22 = vld [vmem:[#allocation17 + $0x18] sm:$0xff] }
0x1a87   : > { %19859 = vmatprep.subr.bf16.mxu1 %v19858_v51 }
0x1a8a   : > { %19861 = vmatpush1.bf16.msra.mxu1 %v19860_v0  ;;  %v19902_v0 = vpack.c.bf16 %v12849_v62, %v12842_v22  ;;  %v12974_v22 = vld [vmem:[#allocation17 + $0x438] sm:$0xff] }
0x1a8b   : > { %19863 = vmatprep.subr.bf16.mxu1 %v19862_v58  ;;  %v12856_v58 = vld [vmem:[#allocation17 + $0x88] sm:$0xff]  ;;  %v12982_v62 = vld [vmem:[#allocation17 + $0x478] sm:$0xff] }
0x1a8c   : > { %v19906_v37 = vpack.c.bf16 %v12863_v32, %v12856_v58 }
0x1a8e   : > { %19865 = vmatpush1.bf16.msra.mxu1 %v19864_v50  ;;  %v19904_v50 = vpack.c.bf16 %v12848_v29, %v12841_v30  ;;  %v12996_v30 = vld [vmem:[#allocation17 + $0x4e8] sm:$0xff]  ;;  %v13003_v29 = vld [vmem:[#allocation17 + $0x520] sm:$0xff] }
0x1a8f   : > { %19867 = vmatprep.subr.bf16.mxu1 %v19866_v42  ;;  %v12862_v42 = vld [vmem:[#allocation17 + $0xb8] sm:$0xff]  ;;  %v19946_v32 = vpack.c.bf16 %v13003_v29, %v12996_v30  ;;  %v12893_v30 = vld [vmem:[#allocation17 + $0x1b0] sm:$0xff] }
0x1a92   : > { %19869 = vmatpush1.bf16.msra.mxu1 %v19868_v15  ;;  %v19908_v15 = vpack.c.bf16 %v12862_v42, %v12855_v17  ;;  %v13017_v17 = vld [vmem:[#allocation17 + $0x590] sm:$0xff] }
0x1a93   : > { %19871 = vmatprep.subr.bf16.mxu1 %v19870_v7  ;;  %v12876_v7 = vld [vmem:[#allocation17 + $0x128] sm:$0xff] }
0x1a96   : > { %19873 = vmatpush1.bf16.msra.mxu1 %v19872_v10  ;;  %v19912_v10 = vpack.c.bf16 %v12876_v7, %v12869_v3  ;;  %v13022_v3 = vld [vmem:[#allocation17 + $0x5b8] sm:$0xff]  ;;  %v13029_v7 = vld [vmem:[#allocation17 + $0x5f0] sm:$0xff] }
0x1a97   : > { %19875 = vmatprep.subr.bf16.mxu1 %v19874_v52  ;;  %v12890_v52 = vld [vmem:[#allocation17 + $0x198] sm:$0xff]  ;;  %v19898_v35 = vpack.c.bf16 %v13029_v7, %v13022_v3 }
0x1a98   : > { %v12906_v7 = vld [vmem:[#allocation17 + $0x218] sm:$0xff] }
0x1a9a   : > { %19877 = vmatpush1.bf16.msra.mxu1 %v19876_v18  ;;  %v19916_v18 = vpack.c.bf16 %v12890_v52, %v12883_v14  ;;  %v13028_v14 = vld [vmem:[#allocation17 + $0x5e8] sm:$0xff] }
0x1a9b   : > { %19879 = vmatprep.subr.bf16.mxu1 %v19878_v26  ;;  %v12904_v26 = vld [vmem:[#allocation17 + $0x208] sm:$0xff] }
0x1a9e   : > { %19881 = vmatpush1.bf16.msra.mxu1 %v19880_v41  ;;  %v19920_v41 = vpack.c.bf16 %v12904_v26, %v12897_v61  ;;  %v13036_v61 = vld [vmem:[#allocation17 + $0x628] sm:$0x1]  ;;  %v13038_v26 = vld [vmem:[#allocation17 + $0x638] sm:$0x1] }
0x1a9f   : > { %19883 = vmatprep.subr.bf16.mxu1 %v19882_v2  ;;  %v12918_v2 = vld [vmem:[#allocation17 + $0x278] sm:$0xff] }
0x1aa2   : > { %19885 = vmatpush1.bf16.msra.mxu1 %v19884_v55  ;;  %v19924_v55 = vpack.c.bf16 %v12918_v2, %v12911_v6  ;;  %v23164_v2 = vmov 0.0|0.0  }
0x1aa3   : > { %19887 = vmatprep.subr.bf16.mxu1 %v19886_v48  ;;  %v12932_v48 = vld [vmem:[#allocation17 + $0x2e8] sm:$0xff] }
0x1aa6   : > { %19889 = vmatpush1.bf16.msra.mxu1 %v19888_v5  ;;  %v19928_v5 = vpack.c.bf16 %v12932_v48, %v12925_v39  ;;  %v12850_v48 = vld [vmem:[#allocation17 + $0x58] sm:$0xff] }
0x1aa7   : > { %19891 = vmatprep.subr.bf16.mxu1 %v19890_v49  ;;  %v12946_v49 = vld [vmem:[#allocation17 + $0x358] sm:$0xff] }
0x1aaa   : > { %19893 = vmatpush1.bf16.msra.mxu1 %v19892_v59  ;;  %v19932_v59 = vpack.c.bf16 %v12946_v49, %v12939_v27  ;;  %v12865_v27 = vld [vmem:[#allocation17 + $0xd0] sm:$0xff] }
0x1aab   : > { %19895 = vmatprep.subr.bf16.mxu1 %v19894_v8  ;;  %v12960_v8 = vld [vmem:[#allocation17 + $0x3c8] sm:$0xff] }
0x1aae   : > { %19897 = vmatpush1.bf16.msra.mxu1 %v19896_v46  ;;  %v19936_v46 = vpack.c.bf16 %v12960_v8, %v12953_v38  ;;  %v12864_v38 = vld [vmem:[#allocation17 + $0xc8] sm:$0xff]  ;;  %v12859_v8 = vld [vmem:[#allocation17 + $0xa0] sm:$0xff] }
0x1aaf   : > { %19899 = vmatprep.subr.bf16.mxu1 %v19898_v35  ;;  %v12908_v35 = vld [vmem:[#allocation17 + $0x228] sm:$0xff] }
0x1b52   : > { %v12740_v34 = vpop.f32.mrb[104].mxu0 }
0x1b53   : > { %v12742_v43 = vpop.f32.mrb[105].mxu0 }
0x1b56   : > { %v12746_v36 = vpop.f32.mrb[106].mxu0 }
0x1b57   : > { %v19844_v51 = vpack.c.bf16 %v12746_v36, %v12740_v34  ;;  %v12748_v54 = vpop.f32.mrb[107].mxu0  ;;  %v19938_v34 = vpack.c.bf16 %v12975_v40, %v12968_v11  ;;  %v12989_v36 = vld [vmem:[#allocation17 + $0x4b0] sm:$0xff]  ;;  %v12866_v11 = vld [vmem:[#allocation17 + $0xd8] sm:$0xff] }
0x1b58   : > { %v19842_v60 = vpack.c.bf16 %v12748_v54, %v12742_v43  ;;  %v12967_v43 = vld [vmem:[#allocation17 + $0x400] sm:$0xff]  ;;  %v19942_v54 = vpack.c.bf16 %v12989_v36, %v12982_v62 }
0x1b59   : > { %v12871_v62 = vld [vmem:[#allocation17 + $0x100] sm:$0xff] }
0x1b5a   : > { %19843 = vmatprep.subr.bf16.mxu0 %v19842_v60  ;;  %v12981_v60 = vld [vmem:[#allocation17 + $0x470] sm:$0xff] }
0x1b5b   : > { %19845 = vmatpush1.bf16.msra.mxu0 %v19844_v51  ;;  %v19940_v51 = vpack.c.bf16 %v12974_v22, %v12967_v43  ;;  %v20018_v22 = vpack.c.bf16 %v12866_v11, %v12859_v8  ;;  %v12955_v11 = vld [vmem:[#allocation17 + $0x3a0] sm:$0xff] }
0x1b5c   : > { %19903 = vmatprep.subr.bf16.mxu0 %v19902_v0  ;;  %v12988_v0 = vld [vmem:[#allocation17 + $0x4a8] sm:$0xff] }
0x1b5d   : > { %v19944_v58 = vpack.c.bf16 %v12988_v0, %v12981_v60  ;;  %v12880_v60 = vld [vmem:[#allocation17 + $0x148] sm:$0xff]  ;;  %v12886_v0 = vld [vmem:[#allocation17 + $0x178] sm:$0xff] }
0x1b5e   : > { %16584 = vmatmul.mubr.msk.f32.vlgmr.msra.gmra.mrb[86].mxu0 %vm853_vm1, %v12752_v33  ;;  %v12995_v33 = vld [vmem:[#allocation17 + $0x4e0] sm:$0xff] }
0x1b5f   : > { %19905 = vmatpush1.bf16.msra.mxu0 %v19904_v50  ;;  %v13002_v50 = vld [vmem:[#allocation17 + $0x518] sm:$0xff] }
0x1b60   : > { %19907 = vmatprep.subr.bf16.mxu0 %v19906_v37  ;;  %v13010_v37 = vld [vmem:[#allocation17 + $0x558] sm:$0xff]  ;;  %v19948_v42 = vpack.c.bf16 %v13002_v50, %v12995_v33  ;;  %v19970_v33 = vpack.c.bf16 %v12893_v30, %v12886_v0  ;;  %v12892_v50 = vld [vmem:[#allocation17 + $0x1a8] sm:$0xff]  ;;  %v12971_v30 = vld [vmem:[#allocation17 + $0x420] sm:$0xff] }
0x1b61   : > { %v19950_v45 = vpack.c.bf16 %v13017_v17, %v13010_v37  ;;  %v12887_v37 = vld [vmem:[#allocation17 + $0x180] sm:$0xff]  ;;  %v12894_v17 = vld [vmem:[#allocation17 + $0x1b8] sm:$0xff]  ;;  %v12976_v0 = vld [vmem:[#allocation17 + $0x448] sm:$0xff] }
0x1b63   : > { %19909 = vmatpush1.bf16.msra.mxu0 %v19908_v15  ;;  %v13016_v15 = vld [vmem:[#allocation17 + $0x588] sm:$0xff] }
0x1b64   : > { %19911 = vmatprep.subr.bf16.mxu0 %v19910_v47  ;;  %v19952_v47 = vpack.c.bf16 %v13016_v15, %v13009_v20  ;;  %v20024_v15 = vpack.c.bf16 %v12894_v17, %v12887_v37  ;;  %v12983_v37 = vld [vmem:[#allocation17 + $0x480] sm:$0xff] }
0x1b67   : > { %19913 = vmatpush1.bf16.msra.mxu0 %v19912_v10  ;;  %v13031_v10 = vld [vmem:[#allocation17 + $0x600] sm:$0xff] }
0x1b68   : > { %19915 = vmatprep.subr.bf16.mxu0 %v19914_v12  ;;  %v13021_v12 = vld [vmem:[#allocation17 + $0x5b0] sm:$0xff]  ;;  %v19954_v52 = vpack.c.bf16 %v13031_v10, %v13024_v53  ;;  %v12914_v10 = vld [vmem:[#allocation17 + $0x258] sm:$0xff] }
0x1b69   : > { %v19900_v21 = vpack.c.bf16 %v13028_v14, %v13021_v12  ;;  %v12901_v53 = vld [vmem:[#allocation17 + $0x1f0] sm:$0xff] }
0x1b6a   : > { %v12921_v12 = vld [vmem:[#allocation17 + $0x290] sm:$0xff] }
0x1b6b   : > { %19917 = vmatpush1.bf16.msra.mxu0 %v19916_v18  ;;  %v13030_v18 = vld [vmem:[#allocation17 + $0x5f8] sm:$0xff]  ;;  %19901 = vmatpush1.bf16.msra.mxu1 %v19900_v21  ;;  %v12913_v21 = vld [vmem:[#allocation17 + $0x250] sm:$0xff] }
0x1b6c   : > { %19919 = vmatprep.subr.bf16.mxu0 %v19918_v19  ;;  %v19956_v19 = vpack.c.bf16 %v13030_v18, %v13023_v16  ;;  %16585 = vmatprep.subr.msk.mxu1 %vm1527_vm3, %v13036_v61  ;;  %v19978_v16 = vpack.c.bf16 %v12921_v12, %v12914_v10  ;;  %v12920_v18 = vld [vmem:[#allocation17 + $0x288] sm:$0xff]  ;;  %v12922_v61 = vld [vmem:[#allocation17 + $0x298] sm:$0xff]  ;;  %v12999_v12 = vld [vmem:[#allocation17 + $0x500] sm:$0xff] }
0x1b6d   : > { %v13004_v10 = vld [vmem:[#allocation17 + $0x528] sm:$0xff] }
0x1b6f   : > { %19921 = vmatpush1.bf16.msra.mxu0 %v19920_v41  ;;  %v13037_v41 = vld [vmem:[#allocation17 + $0x630] sm:$0x1]  ;;  %16586 = vmatpush1.msk.msra.mxu1 %vm1527_vm3, %v13035_v28  ;;  %v19980_v28 = vpack.c.bf16 %v12920_v18, %v12913_v21  ;;  %v13019_v21 = vld [vmem:[#allocation17 + $0x5a0] sm:$0xff] }
0x1b70   : > { %19923 = vmatprep.subr.bf16.mxu0 %v19922_v23  ;;  %v12851_v23 = vld [vmem:[#allocation17 + $0x60] sm:$0xff] }
0x1b71   : > { %v19958_v6 = vpack.c.bf16 %v12851_v23, %v12844_v25  ;;  %v12935_v25 = vld [vmem:[#allocation17 + $0x300] sm:$0xff] }
0x1b72   : > { %v12927_v23 = vld [vmem:[#allocation17 + $0x2c0] sm:$0xff] }
0x1b73   : > { %19925 = vmatpush1.bf16.msra.mxu0 %v19924_v55  ;;  %19959 = vmatprep.subr.bf16.mxu1 %v19958_v6  ;;  %v12843_v55 = vld [vmem:[#allocation17 + $0x20] sm:$0xff] }
0x1b74   : > { %19927 = vmatprep.subr.bf16.mxu0 %v19926_v44  ;;  %v19960_v1 = vpack.c.bf16 %v12850_v48, %v12843_v55  ;;  %v12936_v55 = vld [vmem:[#allocation17 + $0x308] sm:$0xff] }
0x1b77   : > { %19929 = vmatpush1.bf16.msra.mxu0 %v19928_v5 }
0x1b78   : > { %19931 = vmatprep.subr.bf16.mxu0 %v19930_v9  ;;  %v12858_v9 = vld [vmem:[#allocation17 + $0x98] sm:$0xff] }
0x1b79   : > { %v19962_v40 = vpack.c.bf16 %v12865_v27, %v12858_v9  ;;  %v12948_v9 = vld [vmem:[#allocation17 + $0x368] sm:$0xff]  ;;  %v12943_v27 = vld [vmem:[#allocation17 + $0x340] sm:$0xff] }
0x1b7b   : > { %19933 = vmatpush1.bf16.msra.mxu0 %v19932_v59  ;;  %v12857_v59 = vld [vmem:[#allocation17 + $0x90] sm:$0xff] }
0x1b7c   : > { %19935 = vmatprep.subr.bf16.mxu0 %v19934_v4  ;;  %v19964_v43 = vpack.c.bf16 %v12864_v38, %v12857_v59  ;;  %v12963_v59 = vld [vmem:[#allocation17 + $0x3e0] sm:$0xff]  ;;  %v19988_v38 = vpack.c.bf16 %v12948_v9, %v12941_v24 }
0x1b7d   : > { %v13353_v9 = vld [vmem:[#allocation17 + $0x660] sm:$0xff] }
0x1b7f   : > { %19937 = vmatpush1.bf16.msra.mxu0 %v19936_v46  ;;  %v12872_v46 = vld [vmem:[#allocation17 + $0x108] sm:$0xff] }
0x1b80   : > { %19939 = vmatprep.subr.bf16.mxu0 %v19938_v34  ;;  %v12879_v34 = vld [vmem:[#allocation17 + $0x140] sm:$0xff] }
0x1b81   : > { %v19966_v36 = vpack.c.bf16 %v12879_v34, %v12872_v46  ;;  %v12962_v46 = vld [vmem:[#allocation17 + $0x3d8] sm:$0xff]  ;;  %v12957_v34 = vld [vmem:[#allocation17 + $0x3b0] sm:$0xff] }
0x1b83   : > { %19941 = vmatpush1.bf16.msra.mxu0 %v19940_v51  ;;  %v12878_v51 = vld [vmem:[#allocation17 + $0x138] sm:$0xff] }
0x1b84   : > { %19943 = vmatprep.subr.bf16.mxu0 %v19942_v54  ;;  %v12873_v54 = vld [vmem:[#allocation17 + $0x110] sm:$0xff]  ;;  %v19968_v29 = vpack.c.bf16 %v12878_v51, %v12871_v62 }
0x1b85   : > { %v12977_v62 = vld [vmem:[#allocation17 + $0x450] sm:$0xff] }
0x1b87   : > { %19945 = vmatpush1.bf16.msra.mxu0 %v19944_v58  ;;  %v20021_v58 = vpack.c.bf16 %v12880_v60, %v12873_v54  ;;  %v12969_v54 = vld [vmem:[#allocation17 + $0x410] sm:$0xff] }
0x1b88   : > { %19947 = vmatprep.subr.bf16.mxu0 %v19946_v32  ;;  %v12885_v32 = vld [vmem:[#allocation17 + $0x170] sm:$0xff] }
0x1b89   : > { %v19972_v20 = vpack.c.bf16 %v12892_v50, %v12885_v32  ;;  %v12991_v32 = vld [vmem:[#allocation17 + $0x4c0] sm:$0xff] }
0x1b8b   : > { %19949 = vmatpush1.bf16.msra.mxu0 %v19948_v42  ;;  %v12900_v42 = vld [vmem:[#allocation17 + $0x1e8] sm:$0xff] }
0x1b8c   : > { %19951 = vmatprep.subr.bf16.mxu0 %v19950_v45  ;;  %v12907_v45 = vld [vmem:[#allocation17 + $0x220] sm:$0xff] }
0x1b8d   : > { %v19974_v3 = vpack.c.bf16 %v12907_v45, %v12900_v42  ;;  %v12990_v42 = vld [vmem:[#allocation17 + $0x4b8] sm:$0xff]  ;;  %v12985_v45 = vld [vmem:[#allocation17 + $0x490] sm:$0xff] }
0x1b8f   : > { %19953 = vmatpush1.bf16.msra.mxu0 %v19952_v47  ;;  %v12899_v47 = vld [vmem:[#allocation17 + $0x1e0] sm:$0xff] }
0x1b90   : > { %19955 = vmatprep.subr.bf16.mxu0 %v19954_v52  ;;  %v19976_v14 = vpack.c.bf16 %v12906_v7, %v12899_v47  ;;  %v20027_v52 = vpack.c.bf16 %v12908_v35, %v12901_v53  ;;  %v13005_v47 = vld [vmem:[#allocation17 + $0x530] sm:$0xff] }
0x1b91   : > { %v12997_v53 = vld [vmem:[#allocation17 + $0x4f0] sm:$0xff] }
0x1b93   : > { %19957 = vmatpush1.bf16.msra.mxu0 %v19956_v19  ;;  %v12915_v19 = vld [vmem:[#allocation17 + $0x260] sm:$0xff] }
0x1b94   : > { %16588 = vmatprep.subr.msk.mxu0 %vm1527_vm3, %v13038_v26  ;;  %v12928_v26 = vld [vmem:[#allocation17 + $0x2c8] sm:$0xff] }
0x1b95   : > { %v19982_v6 = vpack.c.bf16 %v12935_v25, %v12928_v26  ;;  %v13018_v26 = vld [vmem:[#allocation17 + $0x598] sm:$0xff]  ;;  %v13013_v25 = vld [vmem:[#allocation17 + $0x570] sm:$0xff] }
0x1b97   : > { %16589 = vmatpush1.msk.msra.mxu0 %vm1527_vm3, %v13037_v41  ;;  %v20030_v41 = vpack.c.bf16 %v12922_v61, %v12915_v19  ;;  %v13011_v19 = vld [vmem:[#allocation17 + $0x560] sm:$0xff] }
0x1b98   : > { %20014 = vmatprep.subr.bf16.mxu0 %v23164_v2 }
0x1c31   : > { %v12822_v13 = vpop.f32.mrb[86].mxu0 }
0x1c32   : > { %v12835_v44 = vadd.f32 %v12833_v56, %v12822_v13  ;;  %v12824_v39 = vpop.f32.mrb[87].mxu0  ;;  %v12929_v13 = vld [vmem:[#allocation17 + $0x2d0] sm:$0xff] }
0x1c33   : > { %v12836_v5 = vadd.f32 %v12833_v56, %v12824_v39  ;;  %v12934_v56 = vld [vmem:[#allocation17 + $0x2f8] sm:$0xff]  ;;  %v12949_v39 = vld [vmem:[#allocation17 + $0x370] sm:$0xff]  ;;  %v20033_v57 = vpack.c.bf16 %v12936_v55, %v12929_v13 }
0x1c34   : > { %v22796_v4 = vmax.f32 %v12835_v44, 0.0  ;;  %v12942_v44 = vld [vmem:[#allocation17 + $0x338] sm:$0xff]  ;;  %v19984_v48 = vpack.c.bf16 %v12934_v56, %v12927_v23  ;;  %v13033_v23 = vld [vmem:[#allocation17 + $0x610] sm:$0xff] }
0x1c35   : > { %v22794_v49 = vmax.f32 %v12836_v5, 0.0  ;;  %v19986_v5 = vpack.c.bf16 %v12949_v39, %v12942_v44  ;;  %v13025_v13 = vld [vmem:[#allocation17 + $0x5d0] sm:$0xff]  ;;  %v13032_v44 = vld [vmem:[#allocation17 + $0x608] sm:$0xff]  ;;  %v13027_v39 = vld [vmem:[#allocation17 + $0x5e0] sm:$0xff] }
0x1c37   : > { %16587 = vmatprep.mubr.msk.f32.mxu1 %vm13042_vm12, %v22794_v49  ;;  %16590 = vmatprep.mubr.msk.f32.mxu0 %vm13042_vm12, %v22794_v49 }
0x1c38   : > { %13132 = vmatmul.mubr.f32.vlgmr.msra.gmra.mrb[140].mxu1 %v22796_v4  ;;  %13203 = vmatmul.mubr.f32.vlgmr.msra.gmra.mrb[108].mxu0 %v22796_v4 }
0x1c39   : > { %19961 = vmatpush1.bf16.msra.mxu1 %v19960_v1  ;;  %20016 = vmatpush1.bf16.msra.mxu0 %v20015_v31  ;;  %v12950_v1 = vld [vmem:[#allocation17 + $0x378] sm:$0xff]  ;;  %v12956_v31 = vld [vmem:[#allocation17 + $0x3a8] sm:$0xff] }
0x1c3a   : > { %16593 = vmatprep.mubr.msk.f32.mxu1 %vm13042_vm12, %v22794_v49  ;;  %16595 = vmatprep.mubr.msk.f32.mxu0 %vm13042_vm12, %v22794_v49  ;;  %v20036_v8 = vpack.c.bf16 %v12950_v1, %v12943_v27  ;;  %v13039_v27 = vld [vmem:[#allocation17 + $0x640] sm:$0x1]  ;;  %v13360_v1 = vld [vmem:[#allocation17 + $0x698] sm:$0xff] }
0x1c3b   : > { %19963 = vmatprep.subr.bf16.mxu1 %v19962_v40  ;;  %20017 = vmatprep.subr.bf16.mxu0 %v23164_v2  ;;  %v19990_v40 = vpack.c.bf16 %v12963_v59, %v12956_v31  ;;  %v13355_v31 = vld [vmem:[#allocation17 + $0x670] sm:$0xff]  ;;  %v13362_v59 = vld [vmem:[#allocation17 + $0x6a8] sm:$0xff] }
0x1c3d   : > { %19965 = vmatpush1.bf16.msra.mxu1 %v19964_v43  ;;  %20019 = vmatpush1.bf16.msra.mxu0 %v20018_v22  ;;  %v12964_v43 = vld [vmem:[#allocation17 + $0x3e8] sm:$0xff]  ;;  %v12970_v22 = vld [vmem:[#allocation17 + $0x418] sm:$0xff] }
0x1c3e   : > { %19967 = vmatprep.subr.bf16.mxu1 %v19966_v36  ;;  %20020 = vmatprep.subr.bf16.mxu0 %v23164_v2  ;;  %v19992_v36 = vpack.c.bf16 %v12962_v46, %v12955_v11  ;;  %v20039_v51 = vpack.c.bf16 %v12964_v43, %v12957_v34  ;;  %v19994_v60 = vpack.c.bf16 %v12977_v62, %v12970_v22  ;;  %v13359_v11 = vld [vmem:[#allocation17 + $0x690] sm:$0xff]  ;;  %v13361_v46 = vld [vmem:[#allocation17 + $0x6a0] sm:$0xff]  ;;  %v13374_v62 = vld [vmem:[#allocation17 + $0x708] sm:$0xff] }
0x1c3f   : > { %v13367_v34 = vld [vmem:[#allocation17 + $0x6d0] sm:$0xff]  ;;  %v20056_v43 = vpack.c.bf16 %v13360_v1, %v13353_v9  ;;  %v20112_v22 = vpack.c.bf16 %v13362_v59, %v13355_v31  ;;  %v13425_v1 = vld [vmem:[#allocation17 + $0x8a0] sm:$0xff]  ;;  %v13432_v31 = vld [vmem:[#allocation17 + $0x8d8] sm:$0xff] }
0x1c40   : > { %v13423_v9 = vld [vmem:[#allocation17 + $0x890] sm:$0xff] }
0x1c41   : > { %19969 = vmatpush1.bf16.msra.mxu1 %v19968_v29  ;;  %20022 = vmatpush1.bf16.msra.mxu0 %v20021_v58  ;;  %v12978_v29 = vld [vmem:[#allocation17 + $0x458] sm:$0xff]  ;;  %v12984_v58 = vld [vmem:[#allocation17 + $0x488] sm:$0xff] }
0x1c42   : > { %19971 = vmatprep.subr.bf16.mxu1 %v19970_v33  ;;  %20023 = vmatprep.subr.bf16.mxu0 %v23164_v2  ;;  %v19996_v33 = vpack.c.bf16 %v12976_v0, %v12969_v54  ;;  %v20042_v50 = vpack.c.bf16 %v12978_v29, %v12971_v30  ;;  %v19998_v17 = vpack.c.bf16 %v12991_v32, %v12984_v58  ;;  %v13366_v0 = vld [vmem:[#allocation17 + $0x6c8] sm:$0xff]  ;;  %v13373_v30 = vld [vmem:[#allocation17 + $0x700] sm:$0xff]  ;;  %v13368_v29 = vld [vmem:[#allocation17 + $0x6d8] sm:$0xff] }
0x1c43   : > { %v20060_v58 = vpack.c.bf16 %v13374_v62, %v13367_v34  ;;  %v20132_v34 = vpack.c.bf16 %v13432_v31, %v13425_v1  ;;  %v13444_v62 = vld [vmem:[#allocation17 + $0x938] sm:$0xff]  ;;  %v13495_v1 = vld [vmem:[#allocation17 + $0xad0] sm:$0xff]  ;;  %v13502_v31 = vld [vmem:[#allocation17 + $0xb08] sm:$0xff] }
0x1c45   : > { %19973 = vmatpush1.bf16.msra.mxu1 %v19972_v20  ;;  %20025 = vmatpush1.bf16.msra.mxu0 %v20024_v15  ;;  %v12992_v20 = vld [vmem:[#allocation17 + $0x4c8] sm:$0xff]  ;;  %v12998_v15 = vld [vmem:[#allocation17 + $0x4f8] sm:$0xff] }
0x1c46   : > { %19975 = vmatprep.subr.bf16.mxu1 %v19974_v3  ;;  %20026 = vmatprep.subr.bf16.mxu0 %v23164_v2  ;;  %v20000_v3 = vpack.c.bf16 %v12990_v42, %v12983_v37  ;;  %v20045_v7 = vpack.c.bf16 %v12992_v20, %v12985_v45  ;;  %v20002_v35 = vpack.c.bf16 %v13005_v47, %v12998_v15  ;;  %v13388_v37 = vld [vmem:[#allocation17 + $0x778] sm:$0xff]  ;;  %v13390_v42 = vld [vmem:[#allocation17 + $0x788] sm:$0xff] }
0x1c47   : > { %v20062_v45 = vpack.c.bf16 %v13373_v30, %v13366_v0  ;;  %v13380_v47 = vld [vmem:[#allocation17 + $0x738] sm:$0xff] }
0x1c48   : > { %v13436_v30 = vld [vmem:[#allocation17 + $0x8f8] sm:$0xff] }
0x1c49   : > { %19977 = vmatpush1.bf16.msra.mxu1 %v19976_v14  ;;  %20028 = vmatpush1.bf16.msra.mxu0 %v20027_v52  ;;  %v13006_v14 = vld [vmem:[#allocation17 + $0x538] sm:$0xff]  ;;  %v13012_v52 = vld [vmem:[#allocation17 + $0x568] sm:$0xff] }
0x1c4a   : > { %19979 = vmatprep.subr.bf16.mxu1 %v19978_v16  ;;  %20029 = vmatprep.subr.bf16.mxu0 %v23164_v2  ;;  %v20004_v16 = vpack.c.bf16 %v13004_v10, %v12997_v53  ;;  %v20048_v18 = vpack.c.bf16 %v13006_v14, %v12999_v12  ;;  %v20006_v61 = vpack.c.bf16 %v13019_v21, %v13012_v52  ;;  %v13395_v10 = vld [vmem:[#allocation17 + $0x7b0] sm:$0xff]  ;;  %v13402_v12 = vld [vmem:[#allocation17 + $0x7e8] sm:$0xff]  ;;  %v13397_v14 = vld [vmem:[#allocation17 + $0x7c0] sm:$0xff] }
0x1c4b   : > { %v13404_v52 = vld [vmem:[#allocation17 + $0x7f8] sm:$0xff] }
0x1c4d   : > { %19981 = vmatpush1.bf16.msra.mxu1 %v19980_v28  ;;  %20031 = vmatpush1.bf16.msra.mxu0 %v20030_v41  ;;  %v13020_v28 = vld [vmem:[#allocation17 + $0x5a8] sm:$0xff]  ;;  %v13026_v41 = vld [vmem:[#allocation17 + $0x5d8] sm:$0xff] }
0x1c4e   : > { %19983 = vmatprep.subr.bf16.mxu1 %v19982_v6  ;;  %20032 = vmatprep.subr.bf16.mxu0 %v23164_v2  ;;  %v20008_v6 = vpack.c.bf16 %v13018_v26, %v13011_v19  ;;  %v20051_v56 = vpack.c.bf16 %v13020_v28, %v13013_v25  ;;  %v20010_v55 = vpack.c.bf16 %v13033_v23, %v13026_v41  ;;  %v13394_v19 = vld [vmem:[#allocation17 + $0x7a8] sm:$0xff]  ;;  %v13396_v26 = vld [vmem:[#allocation17 + $0x7b8] sm:$0xff]  ;;  %v13403_v28 = vld [vmem:[#allocation17 + $0x7f0] sm:$0xff] }
0x1c4f   : > { %v20124_v25 = vpack.c.bf16 %v13404_v52, %v13397_v14  ;;  %v13409_v41 = vld [vmem:[#allocation17 + $0x820] sm:$0xff]  ;;  %v13416_v23 = vld [vmem:[#allocation17 + $0x858] sm:$0xff]  ;;  %v13467_v14 = vld [vmem:[#allocation17 + $0x9f0] sm:$0xff] }
0x1c50   : > { %v13474_v52 = vld [vmem:[#allocation17 + $0xa28] sm:$0xff] }
0x1c51   : > { %19985 = vmatpush1.bf16.msra.mxu1 %v19984_v48  ;;  %20034 = vmatpush1.bf16.msra.mxu0 %v20033_v57  ;;  %v13034_v48 = vld [vmem:[#allocation17 + $0x618] sm:$0xff]  ;;  %v20012_v57 = vpack.c.bf16 %v13032_v44, %v13025_v13  ;;  %v20072_v44 = vpack.c.bf16 %v13416_v23, %v13409_v41  ;;  %v13479_v41 = vld [vmem:[#allocation17 + $0xa50] sm:$0xff]  ;;  %v13486_v23 = vld [vmem:[#allocation17 + $0xa88] sm:$0xff] }
0x1c52   : > { %19987 = vmatprep.subr.bf16.mxu1 %v19986_v5  ;;  %20035 = vmatprep.subr.bf16.mxu0 %v23164_v2  ;;  %v20054_v24 = vpack.c.bf16 %v13034_v48, %v13027_v39  ;;  %v13040_v5 = vld [vmem:[#allocation17 + $0x648] sm:$0x1]  ;;  %v13408_v39 = vld [vmem:[#allocation17 + $0x818] sm:$0xff]  ;;  %v13415_v48 = vld [vmem:[#allocation17 + $0x850] sm:$0xff] }
0x1c53   : > { %v20074_v59 = vpack.c.bf16 %v13415_v48, %v13408_v39  ;;  %v13478_v39 = vld [vmem:[#allocation17 + $0xa48] sm:$0xff]  ;;  %v13485_v48 = vld [vmem:[#allocation17 + $0xa80] sm:$0xff] }
0x1c55   : > { %19989 = vmatpush1.bf16.msra.mxu1 %v19988_v38  ;;  %20037 = vmatpush1.bf16.msra.mxu0 %v20036_v8  ;;  %v13041_v38 = vld [vmem:[#allocation17 + $0x650] sm:$0x1]  ;;  %v13352_v8 = vld [vmem:[#allocation17 + $0x658] sm:$0xff] }
0x1c56   : > { %19991 = vmatprep.subr.bf16.mxu1 %v19990_v40  ;;  %20038 = vmatprep.subr.bf16.mxu0 %v23164_v2  ;;  %v13354_v40 = vld [vmem:[#allocation17 + $0x668] sm:$0xff]  ;;  %v20058_v54 = vpack.c.bf16 %v13359_v11, %v13352_v8 }
0x1c57   : > { %v13422_v11 = vld [vmem:[#allocation17 + $0x888] sm:$0xff] }
0x1c59   : > { %19993 = vmatpush1.bf16.msra.mxu1 %v19992_v36  ;;  %20040 = vmatpush1.bf16.msra.mxu0 %v20039_v51  ;;  %v13369_v36 = vld [vmem:[#allocation17 + $0x6e0] sm:$0xff]  ;;  %v13376_v51 = vld [vmem:[#allocation17 + $0x718] sm:$0xff] }
0x1c5a   : > { %19995 = vmatprep.subr.bf16.mxu1 %v19994_v60  ;;  %20041 = vmatprep.subr.bf16.mxu0 %v23164_v2  ;;  %v20114_v60 = vpack.c.bf16 %v13361_v46, %v13354_v40  ;;  %v20116_v32 = vpack.c.bf16 %v13376_v51, %v13369_v36  ;;  %v13429_v40 = vld [vmem:[#allocation17 + $0x8c0] sm:$0xff]  ;;  %v13424_v46 = vld [vmem:[#allocation17 + $0x898] sm:$0xff]  ;;  %v13439_v36 = vld [vmem:[#allocation17 + $0x910] sm:$0xff] }
0x1c5b   : > { %v13446_v51 = vld [vmem:[#allocation17 + $0x948] sm:$0xff] }
0x1c5d   : > { %19997 = vmatpush1.bf16.msra.mxu1 %v19996_v33  ;;  %20043 = vmatpush1.bf16.msra.mxu0 %v20042_v50  ;;  %v13375_v33 = vld [vmem:[#allocation17 + $0x710] sm:$0xff]  ;;  %v13381_v50 = vld [vmem:[#allocation17 + $0x740] sm:$0xff] }
0x1c5e   : > { %19999 = vmatprep.subr.bf16.mxu1 %v19998_v17  ;;  %20044 = vmatprep.subr.bf16.mxu0 %v23164_v2  ;;  %v13383_v17 = vld [vmem:[#allocation17 + $0x750] sm:$0xff]  ;;  %v20118_v20 = vpack.c.bf16 %v13375_v33, %v13368_v29  ;;  %v20064_v15 = vpack.c.bf16 %v13388_v37, %v13381_v50  ;;  %v13445_v33 = vld [vmem:[#allocation17 + $0x940] sm:$0xff]  ;;  %v13458_v37 = vld [vmem:[#allocation17 + $0x9a8] sm:$0xff] }
0x1c5f   : > { %v20120_v53 = vpack.c.bf16 %v13390_v42, %v13383_v17  ;;  %v13443_v29 = vld [vmem:[#allocation17 + $0x930] sm:$0xff]  ;;  %v13453_v17 = vld [vmem:[#allocation17 + $0x980] sm:$0xff]  ;;  %v13460_v42 = vld [vmem:[#allocation17 + $0x9b8] sm:$0xff] }
0x1c60   : > { %v13451_v50 = vld [vmem:[#allocation17 + $0x970] sm:$0xff] }
0x1c61   : > { %20001 = vmatpush1.bf16.msra.mxu1 %v20000_v3  ;;  %20046 = vmatpush1.bf16.msra.mxu0 %v20045_v7  ;;  %v13387_v3 = vld [vmem:[#allocation17 + $0x770] sm:$0xff]  ;;  %v13382_v7 = vld [vmem:[#allocation17 + $0x748] sm:$0xff] }
0x1c62   : > { %20003 = vmatprep.subr.bf16.mxu1 %v20002_v35  ;;  %20047 = vmatprep.subr.bf16.mxu0 %v23164_v2  ;;  %v13389_v35 = vld [vmem:[#allocation17 + $0x780] sm:$0xff]  ;;  %v20066_v21 = vpack.c.bf16 %v13387_v3, %v13380_v47  ;;  %v13450_v47 = vld [vmem:[#allocation17 + $0x968] sm:$0xff] }
0x1c63   : > { %v13457_v3 = vld [vmem:[#allocation17 + $0x9a0] sm:$0xff] }
0x1c65   : > { %20005 = vmatpush1.bf16.msra.mxu1 %v20004_v16  ;;  %20049 = vmatpush1.bf16.msra.mxu0 %v20048_v18  ;;  %v20122_v16 = vpack.c.bf16 %v13389_v35, %v13382_v7  ;;  %v20068_v18 = vpack.c.bf16 %v13402_v12, %v13395_v10  ;;  %v13452_v7 = vld [vmem:[#allocation17 + $0x978] sm:$0xff]  ;;  %v13459_v35 = vld [vmem:[#allocation17 + $0x9b0] sm:$0xff]  ;;  %v13465_v10 = vld [vmem:[#allocation17 + $0x9e0] sm:$0xff] }
0x1c66   : > { %20007 = vmatprep.subr.bf16.mxu1 %v20006_v61  ;;  %20050 = vmatprep.subr.bf16.mxu0 %v23164_v2  ;;  %v13401_v61 = vld [vmem:[#allocation17 + $0x7e0] sm:$0xff]  ;;  %v13472_v12 = vld [vmem:[#allocation17 + $0xa18] sm:$0xff] }
0x1c67   : > { %v20070_v13 = vpack.c.bf16 %v13401_v61, %v13394_v19  ;;  %v13464_v19 = vld [vmem:[#allocation17 + $0x9d8] sm:$0xff]  ;;  %v13471_v61 = vld [vmem:[#allocation17 + $0xa10] sm:$0xff] }
0x1c69   : > { %20009 = vmatpush1.bf16.msra.mxu1 %v20008_v6  ;;  %20052 = vmatpush1.bf16.msra.mxu0 %v20051_v56  ;;  %v13411_v6 = vld [vmem:[#allocation17 + $0x830] sm:$0xff]  ;;  %v13418_v56 = vld [vmem:[#allocation17 + $0x868] sm:$0xff] }
0x1c6a   : > { %20011 = vmatprep.subr.bf16.mxu1 %v20010_v55  ;;  %20053 = vmatprep.subr.bf16.mxu0 %v23164_v2  ;;  %v20126_v55 = vpack.c.bf16 %v13403_v28, %v13396_v26  ;;  %v13466_v26 = vld [vmem:[#allocation17 + $0x9e8] sm:$0xff]  ;;  %v13473_v28 = vld [vmem:[#allocation17 + $0xa20] sm:$0xff] }
0x1c6d   : > { %20013 = vmatpush1.bf16.msra.mxu1 %v20012_v57  ;;  %20055 = vmatpush1.bf16.msra.mxu0 %v20054_v24  ;;  %v13410_v57 = vld [vmem:[#allocation17 + $0x828] sm:$0xff]  ;;  %v20128_v24 = vpack.c.bf16 %v13418_v56, %v13411_v6  ;;  %v13481_v6 = vld [vmem:[#allocation17 + $0xa60] sm:$0xff]  ;;  %v13488_v56 = vld [vmem:[#allocation17 + $0xa98] sm:$0xff] }
0x1c6e   : > { %16591 = vmatprep.subr.msk.mxu1 %vm1527_vm3, %v13040_v5  ;;  %13336 = vmatprep.subr.mxu0 %v23120_v63  ;;  %v13417_v5 = vld [vmem:[#allocation17 + $0x860] sm:$0xff] }
0x1c71   : > { %16592 = vmatpush1.msk.msra.mxu1 %vm1527_vm3, %v13039_v27  ;;  %16594 = vmatpush1.msk.msra.mxu0 %vm1527_vm3, %v13041_v38  ;;  %v13430_v27 = vld [vmem:[#allocation17 + $0x8c8] sm:$0xff]  ;;  %v20130_v38 = vpack.c.bf16 %v13417_v5, %v13410_v57  ;;  %v13480_v57 = vld [vmem:[#allocation17 + $0xa58] sm:$0xff]  ;;  %v13487_v5 = vld [vmem:[#allocation17 + $0xa90] sm:$0xff] }
0x1c72   : > { %13274 = vmatmul.mubr.f32.vlgmr.msra.gmra.mrb[142].mxu1 %v22796_v4  ;;  %13345 = vmatmul.mubr.f32.vlgmr.msra.gmra.mrb[110].mxu0 %v22796_v4  ;;  %v20076_v8 = vpack.c.bf16 %v13430_v27, %v13423_v9  ;;  %v13493_v9 = vld [vmem:[#allocation17 + $0xac0] sm:$0xff]  ;;  %v13500_v27 = vld [vmem:[#allocation17 + $0xaf8] sm:$0xff] }
0x1c73   : > { %20057 = vmatprep.subr.bf16.mxu1 %v20056_v43  ;;  %20113 = vmatprep.subr.bf16.mxu0 %v20112_v22  ;;  %v13431_v43 = vld [vmem:[#allocation17 + $0x8d0] sm:$0xff]  ;;  %v13437_v22 = vld [vmem:[#allocation17 + $0x900] sm:$0xff] }
0x1c74   : > { %20059 = vmatpush1.bf16.msra.mxu1 %v20058_v54  ;;  %16598 = vmatprep.mubr.msk.f32.mxu1 %vm13042_vm12, %v22794_v49  ;;  %v20078_v54 = vpack.c.bf16 %v13429_v40, %v13422_v11  ;;  %v20080_v0 = vpack.c.bf16 %v13444_v62, %v13437_v22  ;;  %v13492_v11 = vld [vmem:[#allocation17 + $0xab8] sm:$0xff]  ;;  %v13499_v40 = vld [vmem:[#allocation17 + $0xaf0] sm:$0xff]  ;;  %v13514_v62 = vld [vmem:[#allocation17 + $0xb68] sm:$0xff] }
0x1c75   : > { %20115 = vmatpush1.bf16.msra.mxu0 %v20114_v60  ;;  %16601 = vmatprep.mubr.msk.f32.mxu0 %vm13042_vm12, %v22794_v49  ;;  %v20134_v60 = vpack.c.bf16 %v13431_v43, %v13424_v46  ;;  %v13494_v46 = vld [vmem:[#allocation17 + $0xac8] sm:$0xff]  ;;  %v13501_v43 = vld [vmem:[#allocation17 + $0xb00] sm:$0xff]  ;;  %v13507_v22 = vld [vmem:[#allocation17 + $0xb30] sm:$0xff] }
0x1c76   : > { %20061 = vmatprep.subr.bf16.mxu1 %v20060_v58  ;;  %20117 = vmatprep.subr.bf16.mxu0 %v20116_v32  ;;  %v13438_v58 = vld [vmem:[#allocation17 + $0x908] sm:$0xff]  ;;  %v20136_v32 = vpack.c.bf16 %v13446_v51, %v13439_v36  ;;  %v13509_v36 = vld [vmem:[#allocation17 + $0xb40] sm:$0xff]  ;;  %v13516_v51 = vld [vmem:[#allocation17 + $0xb78] sm:$0xff] }
0x1c78   : > { %20063 = vmatpush1.bf16.msra.mxu1 %v20062_v45  ;;  %v20082_v45 = vpack.c.bf16 %v13443_v29, %v13436_v30  ;;  %v13506_v30 = vld [vmem:[#allocation17 + $0xb28] sm:$0xff]  ;;  %v13513_v29 = vld [vmem:[#allocation17 + $0xb60] sm:$0xff] }
0x1c79   : > { %20119 = vmatpush1.bf16.msra.mxu0 %v20118_v20  ;;  %20065 = vmatprep.subr.bf16.mxu1 %v20064_v15  ;;  %v20138_v20 = vpack.c.bf16 %v13445_v33, %v13438_v58  ;;  %v20084_v15 = vpack.c.bf16 %v13458_v37, %v13451_v50  ;;  %v13508_v58 = vld [vmem:[#allocation17 + $0xb38] sm:$0xff]  ;;  %v13515_v33 = vld [vmem:[#allocation17 + $0xb70] sm:$0xff]  ;;  %v13521_v50 = vld [vmem:[#allocation17 + $0xba0] sm:$0xff] }
0x1c7a   : > { %20121 = vmatprep.subr.bf16.mxu0 %v20120_v53  ;;  %v20140_v53 = vpack.c.bf16 %v13460_v42, %v13453_v17  ;;  %v13528_v37 = vld [vmem:[#allocation17 + $0xbd8] sm:$0xff]  ;;  %v13523_v17 = vld [vmem:[#allocation17 + $0xbb0] sm:$0xff]  ;;  %v13530_v42 = vld [vmem:[#allocation17 + $0xbe8] sm:$0xff] }
0x1c7c   : > { %20067 = vmatpush1.bf16.msra.mxu1 %v20066_v21  ;;  %v20086_v21 = vpack.c.bf16 %v13457_v3, %v13450_v47  ;;  %v13520_v47 = vld [vmem:[#allocation17 + $0xb98] sm:$0xff]  ;;  %v13527_v3 = vld [vmem:[#allocation17 + $0xbd0] sm:$0xff] }
0x1c7d   : > { %20123 = vmatpush1.bf16.msra.mxu0 %v20122_v16  ;;  %20069 = vmatprep.subr.bf16.mxu1 %v20068_v18  ;;  %v20142_v16 = vpack.c.bf16 %v13459_v35, %v13452_v7  ;;  %v20088_v18 = vpack.c.bf16 %v13472_v12, %v13465_v10  ;;  %v13522_v7 = vld [vmem:[#allocation17 + $0xba8] sm:$0xff]  ;;  %v13529_v35 = vld [vmem:[#allocation17 + $0xbe0] sm:$0xff]  ;;  %v13535_v10 = vld [vmem:[#allocation17 + $0xc10] sm:$0xff] }
0x1c7e   : > { %20125 = vmatprep.subr.bf16.mxu0 %v20124_v25  ;;  %v20144_v25 = vpack.c.bf16 %v13474_v52, %v13467_v14  ;;  %v13542_v12 = vld [vmem:[#allocation17 + $0xc48] sm:$0xff]  ;;  %v13537_v14 = vld [vmem:[#allocation17 + $0xc20] sm:$0xff]  ;;  %v13544_v52 = vld [vmem:[#allocation17 + $0xc58] sm:$0xff] }
0x1c80   : > { %20071 = vmatpush1.bf16.msra.mxu1 %v20070_v13  ;;  %v20090_v13 = vpack.c.bf16 %v13471_v61, %v13464_v19  ;;  %v13534_v19 = vld [vmem:[#allocation17 + $0xc08] sm:$0xff]  ;;  %v13541_v61 = vld [vmem:[#allocation17 + $0xc40] sm:$0xff] }
0x1c81   : > { %20127 = vmatpush1.bf16.msra.mxu0 %v20126_v55  ;;  %20073 = vmatprep.subr.bf16.mxu1 %v20072_v44  ;;  %v20146_v55 = vpack.c.bf16 %v13473_v28, %v13466_v26  ;;  %v20092_v44 = vpack.c.bf16 %v13486_v23, %v13479_v41  ;;  %v20164_v26 = vpack.c.bf16 %v13544_v52, %v13537_v14  ;;  %v13543_v28 = vld [vmem:[#allocation17 + $0xc50] sm:$0xff]  ;;  %v13434_v14 = vld [vmem:[#allocation17 + $0x8e8] sm:$0xff] }
0x1c82   : > { %20129 = vmatprep.subr.bf16.mxu0 %v20128_v24  ;;  %v20148_v24 = vpack.c.bf16 %v13488_v56, %v13481_v6  ;;  %v20110_v41 = vpack.c.bf16 %v13541_v61, %v13534_v19  ;;  %v13549_v6 = vld [vmem:[#allocation17 + $0xc80] sm:$0x1]  ;;  %v13551_v56 = vld [vmem:[#allocation17 + $0xc90] sm:$0x1]  ;;  %v13428_v61 = vld [vmem:[#allocation17 + $0x8b8] sm:$0xff] }
0x1c83   : > { %v13433_v19 = vld [vmem:[#allocation17 + $0x8e0] sm:$0xff] }
0x1c84   : > { %20075 = vmatpush1.bf16.msra.mxu1 %v20074_v59  ;;  %v20094_v59 = vpack.c.bf16 %v13485_v48, %v13478_v39  ;;  %v13363_v39 = vld [vmem:[#allocation17 + $0x6b0] sm:$0xff]  ;;  %v13548_v48 = vld [vmem:[#allocation17 + $0xc78] sm:$0x1] }
0x1c85   : > { %20131 = vmatpush1.bf16.msra.mxu0 %v20130_v38  ;;  %20077 = vmatprep.subr.bf16.mxu1 %v20076_v8  ;;  %v20150_v38 = vpack.c.bf16 %v13487_v5, %v13480_v57  ;;  %v20096_v8 = vpack.c.bf16 %v13500_v27, %v13493_v9  ;;  %v13358_v57 = vld [vmem:[#allocation17 + $0x688] sm:$0xff]  ;;  %v13371_v27 = vld [vmem:[#allocation17 + $0x6f0] sm:$0xff] }
0x1c86   : > { %20133 = vmatprep.subr.bf16.mxu0 %v20132_v34  ;;  %v20152_v34 = vpack.c.bf16 %v13502_v31, %v13495_v1  ;;  %v13550_v5 = vld [vmem:[#allocation17 + $0xc88] sm:$0x1] }
0x1c87   : > { %v13378_v1 = vld [vmem:[#allocation17 + $0x728] sm:$0xff] }
0x1c88   : > { %20079 = vmatpush1.bf16.msra.mxu1 %v20078_v54  ;;  %v20098_v54 = vpack.c.bf16 %v13499_v40, %v13492_v11  ;;  %v13372_v11 = vld [vmem:[#allocation17 + $0x6f8] sm:$0xff]  ;;  %v20172_v40 = vpack.c.bf16 %v13378_v1, %v13371_v27  ;;  %v13461_v27 = vld [vmem:[#allocation17 + $0x9c0] sm:$0xff] }
0x1c89   : > { %20135 = vmatpush1.bf16.msra.mxu0 %v20134_v60  ;;  %20081 = vmatprep.subr.bf16.mxu1 %v20080_v0  ;;  %v20154_v60 = vpack.c.bf16 %v13501_v43, %v13494_v46  ;;  %v20100_v0 = vpack.c.bf16 %v13514_v62, %v13507_v22  ;;  %v13379_v46 = vld [vmem:[#allocation17 + $0x730] sm:$0xff]  ;;  %v13392_v43 = vld [vmem:[#allocation17 + $0x798] sm:$0xff] }
0x1c8a   : > { %20137 = vmatprep.subr.bf16.mxu0 %v20136_v32  ;;  %v20156_v32 = vpack.c.bf16 %v13516_v51, %v13509_v36  ;;  %v20228_v62 = vpack.c.bf16 %v13379_v46, %v13372_v11  ;;  %v13384_v51 = vld [vmem:[#allocation17 + $0x758] sm:$0xff] }
0x1c8b   : > { %v13456_v1 = vld [vmem:[#allocation17 + $0x998] sm:$0xff] }
0x1c8c   : > { %20083 = vmatpush1.bf16.msra.mxu1 %v20082_v45  ;;  %v20102_v45 = vpack.c.bf16 %v13513_v29, %v13506_v30  ;;  %v13399_v30 = vld [vmem:[#allocation17 + $0x7d0] sm:$0xff]  ;;  %v13406_v29 = vld [vmem:[#allocation17 + $0x808] sm:$0xff]  ;;  %v13468_v46 = vld [vmem:[#allocation17 + $0x9f8] sm:$0xff] }
0x1c8d   : > { %20139 = vmatpush1.bf16.msra.mxu0 %v20138_v20  ;;  %20085 = vmatprep.subr.bf16.mxu1 %v20084_v15  ;;  %v20158_v20 = vpack.c.bf16 %v13515_v33, %v13508_v58  ;;  %v20104_v15 = vpack.c.bf16 %v13528_v37, %v13521_v50  ;;  %v20180_v33 = vpack.c.bf16 %v13406_v29, %v13399_v30  ;;  %v13398_v50 = vld [vmem:[#allocation17 + $0x7c8] sm:$0xff]  ;;  %v13405_v37 = vld [vmem:[#allocation17 + $0x800] sm:$0xff]  ;;  %v13484_v29 = vld [vmem:[#allocation17 + $0xa78] sm:$0xff] }
0x1c8e   : > { %20141 = vmatprep.subr.bf16.mxu0 %v20140_v53  ;;  %v20160_v53 = vpack.c.bf16 %v13530_v42, %v13523_v17  ;;  %v13400_v17 = vld [vmem:[#allocation17 + $0x7d8] sm:$0xff]  ;;  %v13407_v42 = vld [vmem:[#allocation17 + $0x810] sm:$0xff]  ;;  %v13489_v30 = vld [vmem:[#allocation17 + $0xaa0] sm:$0xff] }
0x1c90   : > { %20087 = vmatpush1.bf16.msra.mxu1 %v20086_v21  ;;  %v20106_v21 = vpack.c.bf16 %v13527_v3, %v13520_v47  ;;  %v20234_v47 = vpack.c.bf16 %v13407_v42, %v13400_v17  ;;  %v13496_v42 = vld [vmem:[#allocation17 + $0xad8] sm:$0xff] }
0x1c91   : > { %20143 = vmatpush1.bf16.msra.mxu0 %v20142_v16  ;;  %20089 = vmatprep.subr.bf16.mxu1 %v20088_v18  ;;  %v20162_v16 = vpack.c.bf16 %v13529_v35, %v13522_v7  ;;  %v20108_v18 = vpack.c.bf16 %v13542_v12, %v13535_v10  ;;  %v13412_v7 = vld [vmem:[#allocation17 + $0x838] sm:$0xff]  ;;  %v13414_v35 = vld [vmem:[#allocation17 + $0x848] sm:$0xff]  ;;  %v13421_v10 = vld [vmem:[#allocation17 + $0x880] sm:$0xff] }
0x1c92   : > { %20145 = vmatprep.subr.bf16.mxu0 %v20144_v25  ;;  %v13536_v25 = vld [vmem:[#allocation17 + $0xc18] sm:$0xff]  ;;  %v13427_v12 = vld [vmem:[#allocation17 + $0x8b0] sm:$0xff] }
0x1c93   : > { %v20166_v23 = vpack.c.bf16 %v13543_v28, %v13536_v25  ;;  %v13441_v25 = vld [vmem:[#allocation17 + $0x920] sm:$0xff]  ;;  %v13448_v28 = vld [vmem:[#allocation17 + $0x958] sm:$0xff] }
0x1c94   : > { %20091 = vmatpush1.bf16.msra.mxu1 %v20090_v13  ;;  %v13357_v13 = vld [vmem:[#allocation17 + $0x680] sm:$0xff] }
0x1c95   : > { %20147 = vmatpush1.bf16.msra.mxu0 %v20146_v55  ;;  %20093 = vmatprep.subr.bf16.mxu1 %v20092_v44  ;;  %v13364_v55 = vld [vmem:[#allocation17 + $0x6b8] sm:$0xff] }
0x1c96   : > { %20149 = vmatprep.subr.bf16.mxu0 %v20148_v24  ;;  %v13356_v44 = vld [vmem:[#allocation17 + $0x678] sm:$0xff]  ;;  %v13365_v24 = vld [vmem:[#allocation17 + $0x6c0] sm:$0xff]  ;;  %v20168_v9 = vpack.c.bf16 %v13364_v55, %v13357_v13  ;;  %v13447_v13 = vld [vmem:[#allocation17 + $0x950] sm:$0xff] }
0x1c97   : > { %v20170_v31 = vpack.c.bf16 %v13363_v39, %v13356_v44  ;;  %v13442_v55 = vld [vmem:[#allocation17 + $0x928] sm:$0xff]  ;;  %v13449_v44 = vld [vmem:[#allocation17 + $0x960] sm:$0xff]  ;;  %v13455_v39 = vld [vmem:[#allocation17 + $0x990] sm:$0xff] }
0x1c98   : > { %20095 = vmatpush1.bf16.msra.mxu1 %v20094_v59  ;;  %v20225_v59 = vpack.c.bf16 %v13365_v24, %v13358_v57  ;;  %v20243_v24 = vpack.c.bf16 %v13449_v44, %v13442_v55  ;;  %v13538_v44 = vld [vmem:[#allocation17 + $0xc28] sm:$0xff] }
0x1c99   : > { %20151 = vmatpush1.bf16.msra.mxu0 %v20150_v38  ;;  %20097 = vmatprep.subr.bf16.mxu1 %v20096_v8  ;;  %v13370_v38 = vld [vmem:[#allocation17 + $0x6e8] sm:$0xff]  ;;  %v13377_v8 = vld [vmem:[#allocation17 + $0x720] sm:$0xff] }
0x1c9a   : > { %20153 = vmatprep.subr.bf16.mxu0 %v20152_v34  ;;  %v13385_v34 = vld [vmem:[#allocation17 + $0x760] sm:$0xff]  ;;  %v20174_v22 = vpack.c.bf16 %v13377_v8, %v13370_v38  ;;  %v13476_v38 = vld [vmem:[#allocation17 + $0xa38] sm:$0xff] }
0x1c9b   : > { %v20176_v36 = vpack.c.bf16 %v13392_v43, %v13385_v34  ;;  %v13475_v34 = vld [vmem:[#allocation17 + $0xa30] sm:$0xff]  ;;  %v13470_v43 = vld [vmem:[#allocation17 + $0xa08] sm:$0xff] }
0x1c9c   : > { %20099 = vmatpush1.bf16.msra.mxu1 %v20098_v54  ;;  %v13391_v54 = vld [vmem:[#allocation17 + $0x790] sm:$0xff] }
0x1c9d   : > { %20155 = vmatpush1.bf16.msra.mxu0 %v20154_v60  ;;  %20101 = vmatprep.subr.bf16.mxu1 %v20100_v0  ;;  %v13386_v60 = vld [vmem:[#allocation17 + $0x768] sm:$0xff]  ;;  %v13393_v0 = vld [vmem:[#allocation17 + $0x7a0] sm:$0xff]  ;;  %v20178_v58 = vpack.c.bf16 %v13391_v54, %v13384_v51  ;;  %v20202_v51 = vpack.c.bf16 %v13475_v34, %v13468_v46  ;;  %v14434_v46 = vld [vmem:[#allocation17 + $0xcb0] sm:$0xff] }
0x1c9e   : > { %20157 = vmatprep.subr.bf16.mxu0 %v20156_v32  ;;  %v20231_v32 = vpack.c.bf16 %v13393_v0, %v13386_v60  ;;  %v13482_v0 = vld [vmem:[#allocation17 + $0xa68] sm:$0xff] }
0x1c9f   : > { %v14441_v34 = vld [vmem:[#allocation17 + $0xce8] sm:$0xff] }
0x1ca0   : > { %20103 = vmatpush1.bf16.msra.mxu1 %v20102_v45  ;;  %v13413_v45 = vld [vmem:[#allocation17 + $0x840] sm:$0xff] }
0x1ca1   : > { %20159 = vmatpush1.bf16.msra.mxu0 %v20158_v20  ;;  %20105 = vmatprep.subr.bf16.mxu1 %v20104_v15  ;;  %v13420_v20 = vld [vmem:[#allocation17 + $0x878] sm:$0xff]  ;;  %v20182_v15 = vpack.c.bf16 %v13405_v37, %v13398_v50  ;;  %v20206_v50 = vpack.c.bf16 %v13489_v30, %v13482_v0  ;;  %v14448_v30 = vld [vmem:[#allocation17 + $0xd20] sm:$0xff] }
0x1ca2   : > { %20161 = vmatprep.subr.bf16.mxu0 %v20160_v53  ;;  %v20184_v3 = vpack.c.bf16 %v13420_v20, %v13413_v45  ;;  %v13419_v53 = vld [vmem:[#allocation17 + $0x870] sm:$0xff]  ;;  %v13498_v20 = vld [vmem:[#allocation17 + $0xae8] sm:$0xff] }
0x1ca3   : > { %v20186_v52 = vpack.c.bf16 %v13419_v53, %v13412_v7  ;;  %v13503_v45 = vld [vmem:[#allocation17 + $0xb10] sm:$0xff] }
0x1ca4   : > { %20107 = vmatpush1.bf16.msra.mxu1 %v20106_v21  ;;  %v20237_v21 = vpack.c.bf16 %v13421_v10, %v13414_v35  ;;  %v20210_v7 = vpack.c.bf16 %v13503_v45, %v13496_v42  ;;  %v13510_v10 = vld [vmem:[#allocation17 + $0xb48] sm:$0xff]  ;;  %v14462_v42 = vld [vmem:[#allocation17 + $0xd90] sm:$0xff] }
0x1ca5   : > { %20163 = vmatpush1.bf16.msra.mxu0 %v20162_v16  ;;  %20109 = vmatprep.subr.bf16.mxu1 %v20108_v18  ;;  %v20188_v16 = vpack.c.bf16 %v13434_v14, %v13427_v12  ;;  %v13426_v18 = vld [vmem:[#allocation17 + $0x8a8] sm:$0xff]  ;;  %v13517_v12 = vld [vmem:[#allocation17 + $0xb80] sm:$0xff]  ;;  %v13512_v14 = vld [vmem:[#allocation17 + $0xb58] sm:$0xff] }
0x1ca6   : > { %20165 = vmatprep.subr.bf16.mxu0 %v20164_v26  ;;  %v13435_v26 = vld [vmem:[#allocation17 + $0x8f0] sm:$0xff]  ;;  %v14469_v45 = vld [vmem:[#allocation17 + $0xdc8] sm:$0xff] }
0x1ca8   : > { %20111 = vmatpush1.bf16.msra.mxu1 %v20110_v41  ;;  %v20190_v41 = vpack.c.bf16 %v13433_v19, %v13426_v18  ;;  %v20214_v18 = vpack.c.bf16 %v13517_v12, %v13510_v10  ;;  %v14498_v10 = vld [vmem:[#allocation17 + $0xeb0] sm:$0xff] }
0x1ca9   : > { %20167 = vmatpush1.bf16.msra.mxu0 %v20166_v23  ;;  %16596 = vmatprep.subr.msk.mxu1 %vm1527_vm3, %v13549_v6  ;;  %v20240_v23 = vpack.c.bf16 %v13435_v26, %v13428_v61  ;;  %v20192_v6 = vpack.c.bf16 %v13448_v28, %v13441_v25  ;;  %v13524_v26 = vld [vmem:[#allocation17 + $0xbb8] sm:$0xff]  ;;  %v13531_v25 = vld [vmem:[#allocation17 + $0xbf0] sm:$0xff]  ;;  %v13526_v28 = vld [vmem:[#allocation17 + $0xbc8] sm:$0xff] }
0x1caa   : > { %16599 = vmatprep.subr.msk.mxu0 %vm1527_vm3, %v13551_v56  ;;  %v13440_v56 = vld [vmem:[#allocation17 + $0x918] sm:$0xff] }
0x1cab   : > { %v20194_v57 = vpack.c.bf16 %v13447_v13, %v13440_v56  ;;  %v20218_v56 = vpack.c.bf16 %v13531_v25, %v13524_v26  ;;  %v14504_v26 = vld [vmem:[#allocation17 + $0xee0] sm:$0xff]  ;;  %v14511_v25 = vld [vmem:[#allocation17 + $0xf18] sm:$0xff] }
0x1cac   : > { %16597 = vmatpush1.msk.msra.mxu1 %vm1527_vm3, %v13548_v48  ;;  %v13462_v48 = vld [vmem:[#allocation17 + $0x9c8] sm:$0xff] }
0x1cad   : > { %16600 = vmatpush1.msk.msra.mxu0 %vm1527_vm3, %v13550_v5  ;;  %13641 = vmatmul.mubr.f32.vlgmr.msra.gmra.mrb[144].mxu1 %v22796_v4  ;;  %v20196_v5 = vpack.c.bf16 %v13462_v48, %v13455_v39  ;;  %v13545_v39 = vld [vmem:[#allocation17 + $0xc60] sm:$0xff]  ;;  %v13540_v48 = vld [vmem:[#allocation17 + $0xc38] sm:$0xff] }
0x1cae   : > { %13712 = vmatmul.mubr.f32.vlgmr.msra.gmra.mrb[112].mxu0 %v22796_v4  ;;  %20169 = vmatprep.subr.bf16.mxu1 %v20168_v9  ;;  %v13454_v9 = vld [vmem:[#allocation17 + $0x988] sm:$0xff] }
0x1caf   : > { %20224 = vmatprep.subr.bf16.mxu0 %v23164_v2  ;;  %20171 = vmatpush1.bf16.msra.mxu1 %v20170_v31  ;;  %v13463_v31 = vld [vmem:[#allocation17 + $0x9d0] sm:$0xff]  ;;  %v20198_v8 = vpack.c.bf16 %v13461_v27, %v13454_v9  ;;  %v13553_v9 = vld [vmem:[#allocation17 + $0xca0] sm:$0x1]  ;;  %v13552_v27 = vld [vmem:[#allocation17 + $0xc98] sm:$0x1] }
0x1cb0   : > { %16604 = vmatprep.mubr.msk.f32.mxu1 %vm13042_vm12, %v22794_v49  ;;  %20226 = vmatpush1.bf16.msra.mxu0 %v20225_v59  ;;  %v13469_v59 = vld [vmem:[#allocation17 + $0xa00] sm:$0xff]  ;;  %v20246_v11 = vpack.c.bf16 %v13463_v31, %v13456_v1  ;;  %v13554_v1 = vld [vmem:[#allocation17 + $0xca8] sm:$0x1] }
0x1cb1   : > { %16606 = vmatprep.mubr.msk.f32.mxu0 %vm13042_vm12, %v22794_v49  ;;  %20173 = vmatprep.subr.bf16.mxu1 %v20172_v40  ;;  %v20200_v40 = vpack.c.bf16 %v13476_v38, %v13469_v59 }
0x1cb2   : > { %20227 = vmatprep.subr.bf16.mxu0 %v23164_v2 }
0x1cb3   : > { %20175 = vmatpush1.bf16.msra.mxu1 %v20174_v22  ;;  %v13477_v22 = vld [vmem:[#allocation17 + $0xa40] sm:$0xff] }
0x1cb4   : > { %20229 = vmatpush1.bf16.msra.mxu0 %v20228_v62  ;;  %20177 = vmatprep.subr.bf16.mxu1 %v20176_v36  ;;  %v13483_v62 = vld [vmem:[#allocation17 + $0xa70] sm:$0xff]  ;;  %v13490_v36 = vld [vmem:[#allocation17 + $0xaa8] sm:$0xff]  ;;  %v20249_v54 = vpack.c.bf16 %v13477_v22, %v13470_v43  ;;  %v14456_v22 = vld [vmem:[#allocation17 + $0xd60] sm:$0xff] }
0x1cb5   : > { %20230 = vmatprep.subr.bf16.mxu0 %v23164_v2  ;;  %v20204_v60 = vpack.c.bf16 %v13490_v36, %v13483_v62  ;;  %v14449_v43 = vld [vmem:[#allocation17 + $0xd28] sm:$0xff]  ;;  %v22873_v36 = vld [vmem:[#allocation16] sm:$0x1] }
0x1cb6   : > { %v20270_v0 = vpack.c.bf16 %v14456_v22, %v14449_v43 }
0x1cb7   : > { %20179 = vmatpush1.bf16.msra.mxu1 %v20178_v58  ;;  %v13491_v58 = vld [vmem:[#allocation17 + $0xab0] sm:$0xff] }
0x1cb8   : > { %20232 = vmatpush1.bf16.msra.mxu0 %v20231_v32  ;;  %20181 = vmatprep.subr.bf16.mxu1 %v20180_v33  ;;  %v13497_v32 = vld [vmem:[#allocation17 + $0xae0] sm:$0xff]  ;;  %v13504_v33 = vld [vmem:[#allocation17 + $0xb18] sm:$0xff]  ;;  %v20252_v37 = vpack.c.bf16 %v13491_v58, %v13484_v29 }
0x1cb9   : > { %20233 = vmatprep.subr.bf16.mxu0 %v23164_v2  ;;  %v20208_v17 = vpack.c.bf16 %v13504_v33, %v13497_v32  ;;  %v14455_v29 = vld [vmem:[#allocation17 + $0xd58] sm:$0xff] }
0x1cba   : > { %v14463_v33 = vld [vmem:[#allocation17 + $0xd98] sm:$0xff] }
0x1cbb   : > { %20183 = vmatpush1.bf16.msra.mxu1 %v20182_v15  ;;  %v13505_v15 = vld [vmem:[#allocation17 + $0xb20] sm:$0xff] }
0x1cbc   : > { %20235 = vmatpush1.bf16.msra.mxu0 %v20234_v47  ;;  %20185 = vmatprep.subr.bf16.mxu1 %v20184_v3  ;;  %v13511_v47 = vld [vmem:[#allocation17 + $0xb50] sm:$0xff]  ;;  %v13518_v3 = vld [vmem:[#allocation17 + $0xb88] sm:$0xff]  ;;  %v20255_v53 = vpack.c.bf16 %v13505_v15, %v13498_v20  ;;  %v14484_v15 = vld [vmem:[#allocation17 + $0xe40] sm:$0xff] }
0x1cbd   : > { %20236 = vmatprep.subr.bf16.mxu0 %v23164_v2  ;;  %v20212_v35 = vpack.c.bf16 %v13518_v3, %v13511_v47  ;;  %v14477_v20 = vld [vmem:[#allocation17 + $0xe08] sm:$0xff]  ;;  %v20276_v47 = vpack.c.bf16 %v14469_v45, %v14462_v42  ;;  %v14588_v45 = vld [vmem:[#allocation17 + $0x1180] sm:$0xff] }
0x1cbe   : > { %v20278_v3 = vpack.c.bf16 %v14484_v15, %v14477_v20  ;;  %v14595_v20 = vld [vmem:[#allocation17 + $0x11b8] sm:$0xff] }
0x1cbf   : > { %20187 = vmatpush1.bf16.msra.mxu1 %v20186_v52  ;;  %v13519_v52 = vld [vmem:[#allocation17 + $0xb90] sm:$0xff]  ;;  %v14603_v15 = vld [vmem:[#allocation17 + $0x11f8] sm:$0xff] }
0x1cc0   : > { %20238 = vmatpush1.bf16.msra.mxu0 %v20237_v21  ;;  %20189 = vmatprep.subr.bf16.mxu1 %v20188_v16  ;;  %v13525_v21 = vld [vmem:[#allocation17 + $0xbc0] sm:$0xff]  ;;  %v13532_v16 = vld [vmem:[#allocation17 + $0xbf8] sm:$0xff]  ;;  %v20258_v19 = vpack.c.bf16 %v13519_v52, %v13512_v14  ;;  %v14490_v52 = vld [vmem:[#allocation17 + $0xe70] sm:$0xff] }
0x1cc1   : > { %20239 = vmatprep.subr.bf16.mxu0 %v23164_v2  ;;  %v20216_v61 = vpack.c.bf16 %v13532_v16, %v13525_v21  ;;  %v14497_v21 = vld [vmem:[#allocation17 + $0xea8] sm:$0xff] }
0x1cc2   : > { %v14505_v16 = vld [vmem:[#allocation17 + $0xee8] sm:$0xff] }
0x1cc3   : > { %20191 = vmatpush1.bf16.msra.mxu1 %v20190_v41  ;;  %v13533_v41 = vld [vmem:[#allocation17 + $0xc00] sm:$0xff] }
0x1cc4   : > { %20241 = vmatpush1.bf16.msra.mxu0 %v20240_v23  ;;  %20193 = vmatprep.subr.bf16.mxu1 %v20192_v6  ;;  %v13539_v23 = vld [vmem:[#allocation17 + $0xc30] sm:$0xff]  ;;  %v13546_v6 = vld [vmem:[#allocation17 + $0xc68] sm:$0xff]  ;;  %v20261_v13 = vpack.c.bf16 %v13533_v41, %v13526_v28  ;;  %v14519_v28 = vld [vmem:[#allocation17 + $0xf58] sm:$0xff] }
0x1cc5   : > { %20242 = vmatprep.subr.bf16.mxu0 %v23164_v2  ;;  %v20220_v55 = vpack.c.bf16 %v13546_v6, %v13539_v23  ;;  %v14526_v41 = vld [vmem:[#allocation17 + $0xf90] sm:$0xff]  ;;  %v20288_v23 = vpack.c.bf16 %v14511_v25, %v14504_v26 }
0x1cc6   : > { %v20290_v6 = vpack.c.bf16 %v14526_v41, %v14519_v28  ;;  %v14446_v26 = vld [vmem:[#allocation17 + $0xd10] sm:$0xff]  ;;  %v14445_v28 = vld [vmem:[#allocation17 + $0xd08] sm:$0xff] }
0x1cc7   : > { %20195 = vmatpush1.bf16.msra.mxu1 %v20194_v57  ;;  %v13547_v57 = vld [vmem:[#allocation17 + $0xc70] sm:$0xff] }
0x1cc8   : > { %20244 = vmatpush1.bf16.msra.mxu0 %v20243_v24  ;;  %20197 = vmatprep.subr.bf16.mxu1 %v20196_v5  ;;  %v20222_v24 = vpack.c.bf16 %v13545_v39, %v13538_v44  ;;  %v20264_v5 = vpack.c.bf16 %v13547_v57, %v13540_v48  ;;  %v14540_v44 = vld [vmem:[#allocation17 + $0x1000] sm:$0xff]  ;;  %v14438_v25 = vld [vmem:[#allocation17 + $0xcd0] sm:$0xff] }
0x1cc9   : > { %20245 = vmatprep.subr.bf16.mxu0 %v23164_v2  ;;  %v14532_v57 = vld [vmem:[#allocation17 + $0xfc0] sm:$0xff]  ;;  %v14630_v41 = vld [vmem:[#allocation17 + $0x12d0] sm:$0x1] }
0x1ccb   : > { %20199 = vmatpush1.bf16.msra.mxu1 %v20198_v8 }
0x1ccc   : > { %20247 = vmatpush1.bf16.msra.mxu0 %v20246_v11  ;;  %20201 = vmatprep.subr.bf16.mxu1 %v20200_v40  ;;  %v14435_v11 = vld [vmem:[#allocation17 + $0xcb8] sm:$0xff]  ;;  %v14442_v40 = vld [vmem:[#allocation17 + $0xcf0] sm:$0xff] }
0x1ccd   : > { %20248 = vmatprep.subr.bf16.mxu0 %v23164_v2  ;;  %v20266_v62 = vpack.c.bf16 %v14442_v40, %v14435_v11  ;;  %v14546_v11 = vld [vmem:[#allocation17 + $0x1030] sm:$0xff]  ;;  %v14553_v40 = vld [vmem:[#allocation17 + $0x1068] sm:$0xff] }
0x1cce   : > { %v20300_v43 = vpack.c.bf16 %v14553_v40, %v14546_v11 }
0x1ccf   : > { %20203 = vmatpush1.bf16.msra.mxu1 %v20202_v51  ;;  %v20268_v51 = vpack.c.bf16 %v14441_v34, %v14434_v46  ;;  %v14561_v46 = vld [vmem:[#allocation17 + $0x10a8] sm:$0xff]  ;;  %v14568_v34 = vld [vmem:[#allocation17 + $0x10e0] sm:$0xff] }
0x1cd0   : > { %20250 = vmatpush1.bf16.msra.mxu0 %v20249_v54  ;;  %20205 = vmatprep.subr.bf16.mxu1 %v20204_v60  ;;  %v20302_v22 = vpack.c.bf16 %v14568_v34, %v14561_v46  ;;  %v14466_v46 = vld [vmem:[#allocation17 + $0xdb0] sm:$0xff]  ;;  %v14473_v34 = vld [vmem:[#allocation17 + $0xde8] sm:$0xff] }
0x1cd1   : > { %20251 = vmatprep.subr.bf16.mxu0 %v23164_v2 }
0x1cd3   : > { %20207 = vmatpush1.bf16.msra.mxu1 %v20206_v50  ;;  %v14470_v50 = vld [vmem:[#allocation17 + $0xdd0] sm:$0xff] }
0x1cd4   : > { %20253 = vmatpush1.bf16.msra.mxu0 %v20252_v37  ;;  %20209 = vmatprep.subr.bf16.mxu1 %v20208_v17  ;;  %v20272_v37 = vpack.c.bf16 %v14455_v29, %v14448_v30  ;;  %v20274_v17 = vpack.c.bf16 %v14470_v50, %v14463_v33  ;;  %v14581_v33 = vld [vmem:[#allocation17 + $0x1148] sm:$0xff] }
0x1cd5   : > { %20254 = vmatprep.subr.bf16.mxu0 %v23164_v2  ;;  %v14589_v50 = vld [vmem:[#allocation17 + $0x1188] sm:$0xff] }
0x1cd7   : > { %20211 = vmatpush1.bf16.msra.mxu1 %v20210_v7  ;;  %v14476_v7 = vld [vmem:[#allocation17 + $0xe00] sm:$0xff] }
0x1cd8   : > { %20256 = vmatpush1.bf16.msra.mxu0 %v20255_v53  ;;  %20213 = vmatprep.subr.bf16.mxu1 %v20212_v35  ;;  %v14483_v53 = vld [vmem:[#allocation17 + $0xe38] sm:$0xff] }
0x1cd9   : > { %20257 = vmatprep.subr.bf16.mxu0 %v23164_v2  ;;  %v14491_v35 = vld [vmem:[#allocation17 + $0xe78] sm:$0xff]  ;;  %v20280_v12 = vpack.c.bf16 %v14483_v53, %v14476_v7  ;;  %v14602_v53 = vld [vmem:[#allocation17 + $0x11f0] sm:$0xff] }
0x1cda   : > { %v20282_v14 = vpack.c.bf16 %v14498_v10, %v14491_v35  ;;  %v14609_v35 = vld [vmem:[#allocation17 + $0x1228] sm:$0xff] }
0x1cdb   : > { %20215 = vmatpush1.bf16.msra.mxu1 %v20214_v18  ;;  %v14512_v18 = vld [vmem:[#allocation17 + $0xf20] sm:$0xff]  ;;  %v14617_v10 = vld [vmem:[#allocation17 + $0x1268] sm:$0xff] }
0x1cdc   : > { %20259 = vmatpush1.bf16.msra.mxu0 %v20258_v19  ;;  %20217 = vmatprep.subr.bf16.mxu1 %v20216_v61  ;;  %v20284_v19 = vpack.c.bf16 %v14497_v21, %v14490_v52  ;;  %v20286_v61 = vpack.c.bf16 %v14512_v18, %v14505_v16  ;;  %v14616_v21 = vld [vmem:[#allocation17 + $0x1260] sm:$0xff]  ;;  %v14623_v16 = vld [vmem:[#allocation17 + $0x1298] sm:$0xff] }
0x1cdd   : > { %20260 = vmatprep.subr.bf16.mxu0 %v23164_v2  ;;  %v20320_v18 = vpack.c.bf16 %v14623_v16, %v14616_v21 }
0x1cdf   : > { %20219 = vmatpush1.bf16.msra.mxu1 %v20218_v56  ;;  %v14518_v56 = vld [vmem:[#allocation17 + $0xf50] sm:$0xff] }
0x1ce0   : > { %20262 = vmatpush1.bf16.msra.mxu0 %v20261_v13  ;;  %20221 = vmatprep.subr.bf16.mxu1 %v20220_v55  ;;  %v14525_v13 = vld [vmem:[#allocation17 + $0xf88] sm:$0xff] }
0x1ce1   : > { %20263 = vmatprep.subr.bf16.mxu0 %v23164_v2  ;;  %v14533_v55 = vld [vmem:[#allocation17 + $0xfc8] sm:$0xff]  ;;  %v20292_v39 = vpack.c.bf16 %v14525_v13, %v14518_v56  ;;  %v14460_v13 = vld [vmem:[#allocation17 + $0xd80] sm:$0xff] }
0x1ce2   : > { %v20294_v48 = vpack.c.bf16 %v14540_v44, %v14533_v55  ;;  %v14453_v56 = vld [vmem:[#allocation17 + $0xd48] sm:$0xff]  ;;  %v14452_v55 = vld [vmem:[#allocation17 + $0xd40] sm:$0xff]  ;;  %v14459_v44 = vld [vmem:[#allocation17 + $0xd78] sm:$0xff] }
0x1ce3   : > { %20223 = vmatpush1.bf16.msra.mxu1 %v20222_v24  ;;  %v14539_v24 = vld [vmem:[#allocation17 + $0xff8] sm:$0xff]  ;;  %v20384_v11 = vpack.c.bf16 %v14459_v44, %v14452_v55  ;;  %v14564_v44 = vld [vmem:[#allocation17 + $0x10c0] sm:$0xff] }
0x1ce4   : > { %20265 = vmatpush1.bf16.msra.mxu0 %v20264_v5  ;;  %16602 = vmatprep.subr.msk.mxu1 %vm1527_vm3, %v13553_v9  ;;  %v14547_v5 = vld [vmem:[#allocation17 + $0x1038] sm:$0xff]  ;;  %v14554_v9 = vld [vmem:[#allocation17 + $0x1070] sm:$0xff] }
0x1ce5   : > { %13845 = vmatprep.subr.mxu0 %v23120_v63 }
0x1ce7   : > { %16603 = vmatpush1.msk.msra.mxu1 %vm1527_vm3, %v13552_v27  ;;  %v20296_v27 = vpack.c.bf16 %v14539_v24, %v14532_v57  ;;  %v14474_v57 = vld [vmem:[#allocation17 + $0xdf0] sm:$0xff] }
0x1ce8   : > { %16605 = vmatpush1.msk.msra.mxu0 %vm1527_vm3, %v13554_v1  ;;  %13783 = vmatmul.mubr.f32.vlgmr.msra.gmra.mrb[146].mxu1 %v22796_v4  ;;  %v20298_v1 = vpack.c.bf16 %v14554_v9, %v14547_v5  ;;  %v22886_v9 = vld [vmem:[#allocation16 + $0x1] sm:$0x1] }
0x1ce9   : > { %13854 = vmatmul.mubr.f32.vlgmr.msra.gmra.mrb[114].mxu0 %v22796_v4  ;;  %18361 = vmatprep.subr.mxu0 %v23120_v63 }
0x1cea   : > { %18363 = vmatprep.mubr.msk.f32.mxu0 %vm21257_vm0, %v23120_v63  ;;  %13928 = vmatprep.mubr.f32.mxu1 %v23120_v63 }
0x1d0b   : > { %v22865_v31 = vpop.f32.mrb[140].mxu1  ;;  %v22867_v59 = vpop.f32.mrb[108].mxu0 }
0x1d0c   : > { %v22869_v38 = vpop.f32.mrb[141].mxu1  ;;  %v22871_v8 = vpop.f32.mrb[109].mxu0 }
0x1d45   : > { %v22875_v54 = vpop.f32.mrb[142].mxu1  ;;  %v13346_v60 = vpop.f32.mrb[110].mxu0 }
0x1d46   : > { %v22877_v58 = vpop.f32.mrb[143].mxu1  ;;  %v13348_v32 = vpop.f32.mrb[111].mxu0  ;;  %18362 = vmatpush3.msra.mxu0 %v13346_v60  ;;  %v14575_v60 = vld [vmem:[#allocation17 + $0x1118] sm:$0xff] }
0x1d47   : > { %18364 = vmatmul.mubr.msk.f32.vlgmr.msra.gmra.mrb[116].mxu0 %vm7273_vm11, %v22873_v36  ;;  %20267 = vmatprep.subr.bf16.mxu0 %v20266_v62  ;;  %v14560_v62 = vld [vmem:[#allocation17 + $0x10a0] sm:$0xff]  ;;  %v14574_v32 = vld [vmem:[#allocation17 + $0x1110] sm:$0xff] }
0x1d48   : > { %20269 = vmatpush1.bf16.msra.mxu0 %v20268_v51  ;;  %16617 = vmatprep.mubr.msk.f32.mxu0 %vm13042_vm12, %v22794_v49  ;;  %v14567_v51 = vld [vmem:[#allocation17 + $0x10d8] sm:$0xff] }
0x1d49   : > { %20271 = vmatprep.subr.bf16.mxu0 %v20270_v0  ;;  %v14582_v0 = vld [vmem:[#allocation17 + $0x1150] sm:$0xff]  ;;  %v20304_v30 = vpack.c.bf16 %v14567_v51, %v14560_v62  ;;  %v20388_v62 = vpack.c.bf16 %v14473_v34, %v14466_v46 }
0x1d4a   : > { %v20306_v29 = vpack.c.bf16 %v14582_v0, %v14575_v60  ;;  %v14480_v60 = vld [vmem:[#allocation17 + $0xe20] sm:$0xff]  ;;  %v14487_v0 = vld [vmem:[#allocation17 + $0xe58] sm:$0xff] }
0x1d4c   : > { %20273 = vmatpush1.bf16.msra.mxu0 %v20272_v37  ;;  %v14596_v37 = vld [vmem:[#allocation17 + $0x11c0] sm:$0xff] }
0x1d4d   : > { %20275 = vmatprep.subr.bf16.mxu0 %v20274_v17  ;;  %v20308_v17 = vpack.c.bf16 %v14581_v33, %v14574_v32  ;;  %v20310_v42 = vpack.c.bf16 %v14596_v37, %v14589_v50  ;;  %v20392_v32 = vpack.c.bf16 %v14487_v0, %v14480_v60  ;;  %v14494_v50 = vld [vmem:[#allocation17 + $0xe90] sm:$0xff]  ;;  %v14501_v37 = vld [vmem:[#allocation17 + $0xec8] sm:$0xff] }
0x1d50   : > { %20277 = vmatpush1.bf16.msra.mxu0 %v20276_v47  ;;  %v14610_v47 = vld [vmem:[#allocation17 + $0x1230] sm:$0xff] }
0x1d51   : > { %20279 = vmatprep.subr.bf16.mxu0 %v20278_v3  ;;  %v20312_v3 = vpack.c.bf16 %v14595_v20, %v14588_v45  ;;  %v20314_v7 = vpack.c.bf16 %v14610_v47, %v14603_v15  ;;  %v20396_v45 = vpack.c.bf16 %v14501_v37, %v14494_v50  ;;  %v14508_v15 = vld [vmem:[#allocation17 + $0xf00] sm:$0xff]  ;;  %v14515_v47 = vld [vmem:[#allocation17 + $0xf38] sm:$0xff] }
0x1d54   : > { %20281 = vmatpush1.bf16.msra.mxu0 %v20280_v12  ;;  %v14624_v12 = vld [vmem:[#allocation17 + $0x12a0] sm:$0xff] }
0x1d55   : > { %20283 = vmatprep.subr.bf16.mxu0 %v20282_v14  ;;  %v20316_v14 = vpack.c.bf16 %v14609_v35, %v14602_v53  ;;  %v20318_v52 = vpack.c.bf16 %v14624_v12, %v14617_v10  ;;  %v20400_v53 = vpack.c.bf16 %v14515_v47, %v14508_v15  ;;  %v14522_v10 = vld [vmem:[#allocation17 + $0xf70] sm:$0xff]  ;;  %v14529_v12 = vld [vmem:[#allocation17 + $0xfa8] sm:$0xff] }
0x1d56   : > { %v20404_v21 = vpack.c.bf16 %v14529_v12, %v14522_v10  ;;  %v14634_v15 = vld [vmem:[#allocation17 + $0x12f0] sm:$0x1]  ;;  %v14444_v10 = vld [vmem:[#allocation17 + $0xd00] sm:$0xff] }
0x1d57   : > { %v14436_v12 = vld [vmem:[#allocation17 + $0xcc0] sm:$0xff] }
0x1d58   : > { %20285 = vmatpush1.bf16.msra.mxu0 %v20284_v19  ;;  %v14631_v19 = vld [vmem:[#allocation17 + $0x12d8] sm:$0x1] }
0x1d59   : > { %20287 = vmatprep.subr.bf16.mxu0 %v20286_v61  ;;  %v14439_v61 = vld [vmem:[#allocation17 + $0xcd8] sm:$0xff] }
0x1d5c   : > { %20289 = vmatpush1.bf16.msra.mxu0 %v20288_v23  ;;  %v20378_v23 = vpack.c.bf16 %v14446_v26, %v14439_v61  ;;  %v14551_v61 = vld [vmem:[#allocation17 + $0x1058] sm:$0xff]  ;;  %v14558_v26 = vld [vmem:[#allocation17 + $0x1090] sm:$0xff] }
0x1d5d   : > { %20291 = vmatprep.subr.bf16.mxu0 %v20290_v6  ;;  %v20380_v6 = vpack.c.bf16 %v14445_v28, %v14438_v25  ;;  %v20410_v28 = vpack.c.bf16 %v14558_v26, %v14551_v61  ;;  %v14471_v61 = vld [vmem:[#allocation17 + $0xdd8] sm:$0xff] }
0x1d5e   : > { %v14479_v26 = vld [vmem:[#allocation17 + $0xe18] sm:$0xff] }
0x1d60   : > { %20293 = vmatpush1.bf16.msra.mxu0 %v20292_v39 }
0x1d61   : > { %20295 = vmatprep.subr.bf16.mxu0 %v20294_v48  ;;  %v14467_v48 = vld [vmem:[#allocation17 + $0xdb8] sm:$0xff] }
0x1d62   : > { %v20386_v40 = vpack.c.bf16 %v14474_v57, %v14467_v48  ;;  %v14579_v48 = vld [vmem:[#allocation17 + $0x1138] sm:$0xff]  ;;  %v14586_v57 = vld [vmem:[#allocation17 + $0x1170] sm:$0xff] }
0x1d64   : > { %20297 = vmatpush1.bf16.msra.mxu0 %v20296_v27  ;;  %v20382_v27 = vpack.c.bf16 %v14460_v13, %v14453_v56  ;;  %v14572_v56 = vld [vmem:[#allocation17 + $0x1100] sm:$0xff] }
0x1d65   : > { %20299 = vmatprep.subr.bf16.mxu0 %v20298_v1 }
0x1d68   : > { %20301 = vmatpush1.bf16.msra.mxu0 %v20300_v43  ;;  %v14481_v43 = vld [vmem:[#allocation17 + $0xe28] sm:$0xff] }
0x1d69   : > { %20303 = vmatprep.subr.bf16.mxu0 %v20302_v22  ;;  %v14488_v22 = vld [vmem:[#allocation17 + $0xe60] sm:$0xff] }
0x1d6a   : > { %v20390_v51 = vpack.c.bf16 %v14488_v22, %v14481_v43  ;;  %v14592_v43 = vld [vmem:[#allocation17 + $0x11a0] sm:$0xff]  ;;  %v14599_v22 = vld [vmem:[#allocation17 + $0x11d8] sm:$0xff] }
0x1d6b   : > { %v20424_v60 = vpack.c.bf16 %v14599_v22, %v14592_v43  ;;  %v14520_v43 = vld [vmem:[#allocation17 + $0xf60] sm:$0xff]  ;;  %v14527_v22 = vld [vmem:[#allocation17 + $0xf98] sm:$0xff] }
0x1d6c   : > { %20305 = vmatpush1.bf16.msra.mxu0 %v20304_v30  ;;  %v14495_v30 = vld [vmem:[#allocation17 + $0xe98] sm:$0xff] }
0x1d6d   : > { %20307 = vmatprep.subr.bf16.mxu0 %v20306_v29  ;;  %v14502_v29 = vld [vmem:[#allocation17 + $0xed0] sm:$0xff] }
0x1d6e   : > { %v20394_v33 = vpack.c.bf16 %v14502_v29, %v14495_v30  ;;  %v14606_v30 = vld [vmem:[#allocation17 + $0x1210] sm:$0xff]  ;;  %v14613_v29 = vld [vmem:[#allocation17 + $0x1248] sm:$0xff] }
0x1d6f   : > { %v20428_v50 = vpack.c.bf16 %v14613_v29, %v14606_v30  ;;  %v14534_v30 = vld [vmem:[#allocation17 + $0xfd0] sm:$0xff]  ;;  %v14541_v29 = vld [vmem:[#allocation17 + $0x1008] sm:$0xff] }
0x1d70   : > { %20309 = vmatpush1.bf16.msra.mxu0 %v20308_v17  ;;  %v14509_v17 = vld [vmem:[#allocation17 + $0xf08] sm:$0xff] }
0x1d71   : > { %20311 = vmatprep.subr.bf16.mxu0 %v20310_v42  ;;  %v14516_v42 = vld [vmem:[#allocation17 + $0xf40] sm:$0xff] }
0x1d72   : > { %v20398_v20 = vpack.c.bf16 %v14516_v42, %v14509_v17  ;;  %v14620_v17 = vld [vmem:[#allocation17 + $0x1280] sm:$0xff]  ;;  %v14627_v42 = vld [vmem:[#allocation17 + $0x12b8] sm:$0xff] }
0x1d74   : > { %20313 = vmatpush1.bf16.msra.mxu0 %v20312_v3  ;;  %v14523_v3 = vld [vmem:[#allocation17 + $0xf78] sm:$0xff] }
0x1d75   : > { %20315 = vmatprep.subr.bf16.mxu0 %v20314_v7  ;;  %v14530_v7 = vld [vmem:[#allocation17 + $0xfb0] sm:$0xff] }
0x1d76   : > { %v20402_v35 = vpack.c.bf16 %v14530_v7, %v14523_v3 }
0x1d78   : > { %20317 = vmatpush1.bf16.msra.mxu0 %v20316_v14  ;;  %v14537_v14 = vld [vmem:[#allocation17 + $0xfe8] sm:$0xff] }
0x1d79   : > { %20319 = vmatprep.subr.bf16.mxu0 %v20318_v52  ;;  %v14544_v52 = vld [vmem:[#allocation17 + $0x1020] sm:$0xff] }
0x1d7a   : > { %v20406_v16 = vpack.c.bf16 %v14544_v52, %v14537_v14  ;;  %v14451_v14 = vld [vmem:[#allocation17 + $0xd38] sm:$0xff] }
0x1d7c   : > { %20321 = vmatpush1.bf16.msra.mxu0 %v20320_v18  ;;  %v14536_v18 = vld [vmem:[#allocation17 + $0xfe0] sm:$0xff] }
0x1d7d   : > { %16615 = vmatprep.subr.msk.mxu0 %vm1527_vm3, %v14631_v19  ;;  %v14543_v19 = vld [vmem:[#allocation17 + $0x1018] sm:$0xff] }
0x1d7e   : > { %v20408_v25 = vpack.c.bf16 %v14543_v19, %v14536_v18  ;;  %v14472_v18 = vld [vmem:[#allocation17 + $0xde0] sm:$0xff] }
0x1d80   : > { %v13642_v39 = vpop.f32.mrb[144].mxu1  ;;  %16616 = vmatpush1.msk.msra.mxu0 %vm1527_vm3, %v14630_v41  ;;  %v14550_v41 = vld [vmem:[#allocation17 + $0x1050] sm:$0xff] }
0x1d81   : > { %v13713_v24 = vpop.f32.mrb[112].mxu0  ;;  %v13644_v5 = vpop.f32.mrb[145].mxu1  ;;  %14723 = vmatmul.mubr.f32.vlgmr.msra.gmra.mrb[118].mxu0 %v22796_v4  ;;  %20379 = vmatprep.subr.bf16.mxu0 %v20378_v23  ;;  %v14557_v23 = vld [vmem:[#allocation17 + $0x1088] sm:$0xff] }
0x1d82   : > { %v13715_v1 = vpop.f32.mrb[113].mxu0  ;;  %13864 = vmatprep.subr.mxu1 %v13644_v5  ;;  %20381 = vmatpush1.bf16.msra.mxu0 %v20380_v6  ;;  %v14565_v6 = vld [vmem:[#allocation17 + $0x10c8] sm:$0xff]  ;;  %v20412_v13 = vpack.c.bf16 %v14557_v23, %v14550_v41  ;;  %v20418_v5 = vpack.c.bf16 %v14586_v57, %v14579_v48  ;;  %v14478_v23 = vld [vmem:[#allocation17 + $0xe10] sm:$0xff]  ;;  %v14507_v48 = vld [vmem:[#allocation17 + $0xef8] sm:$0xff] }
0x1d83   : > { %13865 = vmatpush1.msra.mxu1 %v13642_v39  ;;  %16623 = vmatprep.mubr.msk.f32.mxu0 %vm13042_vm12, %v22794_v49  ;;  %v20414_v55 = vpack.c.bf16 %v14572_v56, %v14565_v6  ;;  %v14571_v39 = vld [vmem:[#allocation17 + $0x10f8] sm:$0xff]  ;;  %v14485_v6 = vld [vmem:[#allocation17 + $0xe48] sm:$0xff]  ;;  %v14514_v57 = vld [vmem:[#allocation17 + $0xf30] sm:$0xff] }
0x1d84   : > { %13935 = vmatprep.subr.mxu1 %v13715_v1  ;;  %16607 = vmatmul.mubr.msk.f32.vlgmr.msra.gmra.mrb[148].mxu1 %vm7273_vm11, %v22886_v9  ;;  %v14585_v1 = vld [vmem:[#allocation17 + $0x1168] sm:$0xff] }
0x1d85   : > { %13936 = vmatpush1.msra.mxu1 %v13713_v24  ;;  %20383 = vmatprep.subr.bf16.mxu0 %v20382_v27  ;;  %v20416_v24 = vpack.c.bf16 %v14571_v39, %v14564_v44  ;;  %v14578_v27 = vld [vmem:[#allocation17 + $0x1130] sm:$0xff]  ;;  %v14493_v56 = vld [vmem:[#allocation17 + $0xe88] sm:$0xff]  ;;  %v14492_v44 = vld [vmem:[#allocation17 + $0xe80] sm:$0xff] }
0x1d86   : > { %20385 = vmatpush1.bf16.msra.mxu0 %v20384_v11  ;;  %13999 = vmatprep.mubr.f32.mxu1 %v23120_v63  ;;  %v14593_v11 = vld [vmem:[#allocation17 + $0x11a8] sm:$0xff]  ;;  %v20420_v46 = vpack.c.bf16 %v14585_v1, %v14578_v27  ;;  %v14499_v39 = vld [vmem:[#allocation17 + $0xeb8] sm:$0xff]  ;;  %v14506_v27 = vld [vmem:[#allocation17 + $0xef0] sm:$0xff] }
0x1d87   : > { %20387 = vmatprep.subr.bf16.mxu0 %v20386_v40  ;;  %v14600_v40 = vld [vmem:[#allocation17 + $0x11e0] sm:$0xff]  ;;  %v14513_v1 = vld [vmem:[#allocation17 + $0xf28] sm:$0xff] }
0x1d88   : > { %16608 = vmatmul.mubr.msk.f32.vlgmr.msra.gmra.mrb[150].mxu1 %vm7273_vm11, %v22886_v9  ;;  %v20422_v34 = vpack.c.bf16 %v14600_v40, %v14593_v11  ;;  %v14521_v11 = vld [vmem:[#allocation17 + $0xf68] sm:$0xff]  ;;  %v14528_v40 = vld [vmem:[#allocation17 + $0xfa0] sm:$0xff] }
0x1d89   : > { %14070 = vmatprep.mubr.f32.mxu1 %v23120_v63 }
0x1d8a   : > { %20389 = vmatpush1.bf16.msra.mxu0 %v20388_v62  ;;  %v14607_v62 = vld [vmem:[#allocation17 + $0x1218] sm:$0xff] }
0x1d8b   : > { %20391 = vmatprep.subr.bf16.mxu0 %v20390_v51  ;;  %v14614_v51 = vld [vmem:[#allocation17 + $0x1250] sm:$0xff] }
0x1d8c   : > { %v20426_v0 = vpack.c.bf16 %v14614_v51, %v14607_v62  ;;  %v14535_v62 = vld [vmem:[#allocation17 + $0xfd8] sm:$0xff]  ;;  %v14542_v51 = vld [vmem:[#allocation17 + $0x1010] sm:$0xff] }
0x1d8e   : > { %20393 = vmatpush1.bf16.msra.mxu0 %v20392_v32  ;;  %v14621_v32 = vld [vmem:[#allocation17 + $0x1288] sm:$0xff] }
0x1d8f   : > { %20395 = vmatprep.subr.bf16.mxu0 %v20394_v33  ;;  %v14628_v33 = vld [vmem:[#allocation17 + $0x12c0] sm:$0xff] }
0x1d90   : > { %v20430_v37 = vpack.c.bf16 %v14628_v33, %v14621_v32  ;;  %v14549_v32 = vld [vmem:[#allocation17 + $0x1048] sm:$0xff]  ;;  %v14556_v33 = vld [vmem:[#allocation17 + $0x1080] sm:$0xff] }
0x1d92   : > { %20397 = vmatpush1.bf16.msra.mxu0 %v20396_v45  ;;  %v20432_v45 = vpack.c.bf16 %v14627_v42, %v14620_v17  ;;  %v14548_v17 = vld [vmem:[#allocation17 + $0x1040] sm:$0xff]  ;;  %v14555_v42 = vld [vmem:[#allocation17 + $0x1078] sm:$0xff] }
0x1d93   : > { %20399 = vmatprep.subr.bf16.mxu0 %v20398_v20  ;;  %v14635_v20 = vld [vmem:[#allocation17 + $0x12f8] sm:$0x1] }
0x1d96   : > { %20401 = vmatpush1.bf16.msra.mxu0 %v20400_v53 }
0x1d97   : > { %20403 = vmatprep.subr.bf16.mxu0 %v20402_v35  ;;  %v14437_v35 = vld [vmem:[#allocation17 + $0xcc8] sm:$0xff] }
0x1d9a   : > { %20405 = vmatpush1.bf16.msra.mxu0 %v20404_v21  ;;  %v14457_v21 = vld [vmem:[#allocation17 + $0xd68] sm:$0xff] }
0x1d9b   : > { %20407 = vmatprep.subr.bf16.mxu0 %v20406_v16  ;;  %v14465_v16 = vld [vmem:[#allocation17 + $0xda8] sm:$0xff] }
0x1d9c   : > { %v20330_v19 = vpack.c.bf16 %v14472_v18, %v14465_v16  ;;  %v14605_v16 = vld [vmem:[#allocation17 + $0x1208] sm:$0xff]  ;;  %v14612_v18 = vld [vmem:[#allocation17 + $0x1240] sm:$0xff] }
0x1d9e   : > { %20409 = vmatpush1.bf16.msra.mxu0 %v20408_v25  ;;  %v14486_v25 = vld [vmem:[#allocation17 + $0xe50] sm:$0xff] }
0x1d9f   : > { %20411 = vmatprep.subr.bf16.mxu0 %v20410_v28  ;;  %v20334_v41 = vpack.c.bf16 %v14486_v25, %v14479_v26  ;;  %v14619_v26 = vld [vmem:[#allocation17 + $0x1278] sm:$0xff]  ;;  %v14626_v25 = vld [vmem:[#allocation17 + $0x12b0] sm:$0xff] }
0x1da2   : > { %20413 = vmatpush1.bf16.msra.mxu0 %v20412_v13  ;;  %v14500_v13 = vld [vmem:[#allocation17 + $0xec0] sm:$0xff] }
0x1da3   : > { %20415 = vmatprep.subr.bf16.mxu0 %v20414_v55  ;;  %v20338_v55 = vpack.c.bf16 %v14500_v13, %v14493_v56  ;;  %v14633_v13 = vld [vmem:[#allocation17 + $0x12e8] sm:$0x1] }
0x1da6   : > { %20417 = vmatpush1.bf16.msra.mxu0 %v20416_v24  ;;  %v20340_v24 = vpack.c.bf16 %v14499_v39, %v14492_v44  ;;  %v14632_v44 = vld [vmem:[#allocation17 + $0x12e0] sm:$0x1] }
0x1da7   : > { %20419 = vmatprep.subr.bf16.mxu0 %v20418_v5  ;;  %v20342_v5 = vpack.c.bf16 %v14514_v57, %v14507_v48  ;;  %v14454_v48 = vld [vmem:[#allocation17 + $0xd50] sm:$0xff]  ;;  %v14461_v57 = vld [vmem:[#allocation17 + $0xd88] sm:$0xff] }
0x1daa   : > { %20421 = vmatpush1.bf16.msra.mxu0 %v20420_v46  ;;  %v20344_v46 = vpack.c.bf16 %v14513_v1, %v14506_v27  ;;  %v14475_v27 = vld [vmem:[#allocation17 + $0xdf8] sm:$0xff] }
0x1dab   : > { %20423 = vmatprep.subr.bf16.mxu0 %v20422_v34  ;;  %v20346_v34 = vpack.c.bf16 %v14528_v40, %v14521_v11  ;;  %v14482_v11 = vld [vmem:[#allocation17 + $0xe30] sm:$0xff]  ;;  %v14489_v40 = vld [vmem:[#allocation17 + $0xe68] sm:$0xff] }
0x1dae   : > { %20425 = vmatpush1.bf16.msra.mxu0 %v20424_v60  ;;  %v20348_v60 = vpack.c.bf16 %v14527_v22, %v14520_v43  ;;  %v14503_v43 = vld [vmem:[#allocation17 + $0xed8] sm:$0xff] }
0x1daf   : > { %20427 = vmatprep.subr.bf16.mxu0 %v20426_v0  ;;  %v20350_v0 = vpack.c.bf16 %v14542_v51, %v14535_v62  ;;  %v14510_v62 = vld [vmem:[#allocation17 + $0xf10] sm:$0xff]  ;;  %v14517_v51 = vld [vmem:[#allocation17 + $0xf48] sm:$0xff] }
0x1db2   : > { %20429 = vmatpush1.bf16.msra.mxu0 %v20428_v50  ;;  %v20352_v50 = vpack.c.bf16 %v14541_v29, %v14534_v30  ;;  %v14524_v30 = vld [vmem:[#allocation17 + $0xf80] sm:$0xff]  ;;  %v14531_v29 = vld [vmem:[#allocation17 + $0xfb8] sm:$0xff] }
0x1db3   : > { %20431 = vmatprep.subr.bf16.mxu0 %v20430_v37  ;;  %v20354_v37 = vpack.c.bf16 %v14556_v33, %v14549_v32  ;;  %v20453_v33 = vpack.c.bf16 %v14531_v29, %v14524_v30  ;;  %v15303_v30 = vld [vmem:[#allocation17 + $0x1518] sm:$0xff] }
0x1db6   : > { %20433 = vmatpush1.bf16.msra.mxu0 %v20432_v45  ;;  %v14563_v45 = vld [vmem:[#allocation17 + $0x10b8] sm:$0xff] }
0x1db7   : > { %16621 = vmatprep.subr.msk.mxu0 %vm1527_vm3, %v14635_v20  ;;  %v14570_v20 = vld [vmem:[#allocation17 + $0x10f0] sm:$0xff] }
0x1dba   : > { %16622 = vmatpush1.msk.msra.mxu0 %vm1527_vm3, %v14634_v15  ;;  %v20356_v15 = vpack.c.bf16 %v14555_v42, %v14548_v17  ;;  %v14552_v42 = vld [vmem:[#allocation17 + $0x1060] sm:$0xff] }
0x1dbb   : > { %v13784_v47 = vpop.f32.mrb[146].mxu1  ;;  %14865 = vmatmul.mubr.f32.vlgmr.msra.gmra.mrb[120].mxu0 %v22796_v4  ;;  %18366 = vmatprep.subr.mxu0 %v23120_v63 }
0x1dbc   : > { %v13855_v3 = vpop.f32.mrb[114].mxu0  ;;  %v13786_v7 = vpop.f32.mrb[147].mxu1  ;;  %18368 = vmatprep.mubr.msk.f32.mxu0 %vm21257_vm0, %v23120_v63 }
0x1dbd   : > { %v13857_v53 = vpop.f32.mrb[115].mxu0  ;;  %14006 = vmatprep.subr.mxu1 %v13786_v7  ;;  %v14569_v7 = vld [vmem:[#allocation17 + $0x10e8] sm:$0xff] }
0x1dbe   : > { %14007 = vmatpush1.msra.mxu1 %v13784_v47  ;;  %v20358_v47 = vpack.c.bf16 %v14570_v20, %v14563_v45  ;;  %v14577_v53 = vld [vmem:[#allocation17 + $0x1128] sm:$0xff]  ;;  %v14559_v45 = vld [vmem:[#allocation17 + $0x1098] sm:$0xff] }
0x1dbf   : > { %16609 = vmatmul.mubr.msk.f32.vlgmr.msra.gmra.mrb[152].mxu1 %vm7273_vm11, %v22886_v9  ;;  %18356 = vmatprep.subr.mxu1 %v23120_v63  ;;  %v20459_v20 = vpack.c.bf16 %v14559_v45, %v14552_v42 }
0x1dc0   : > { %18357 = vmatpush3.msra.mxu1 %v13855_v3  ;;  %18358 = vmatprep.mubr.msk.f32.mxu1 %vm21257_vm0, %v23120_v63  ;;  %v14562_v3 = vld [vmem:[#allocation17 + $0x10b0] sm:$0xff] }
0x1dc1   : > { %14150 = vmatprep.subr.mxu1 %v22869_v38  ;;  %v20322_v38 = vpack.c.bf16 %v14444_v10, %v14437_v35  ;;  %v14584_v35 = vld [vmem:[#allocation17 + $0x1160] sm:$0xff]  ;;  %v20360_v10 = vpack.c.bf16 %v14569_v7, %v14562_v3 }
0x1dc2   : > { %v14580_v7 = vld [vmem:[#allocation17 + $0x1140] sm:$0xff] }
0x1dc3   : > { %18359 = vmatmul.mubr.msk.f32.vlgmr.msra.gmra.mrb[154].mxu1 %vm7273_vm11, %v22886_v9  ;;  %v14443_v9 = vld [vmem:[#allocation17 + $0xcf8] sm:$0xff] }
0x1dc4   : > { %14151 = vmatpush1.msra.mxu1 %v22865_v31  ;;  %14214 = vmatprep.mubr.f32.mxu1 %v23120_v63  ;;  %v14458_v31 = vld [vmem:[#allocation17 + $0xd70] sm:$0xff] }
0x1dc5   : > { %14221 = vmatprep.subr.mxu1 %v22871_v8  ;;  %v20324_v8 = vpack.c.bf16 %v14443_v9, %v14436_v12  ;;  %v20326_v52 = vpack.c.bf16 %v14458_v31, %v14451_v14  ;;  %v14576_v12 = vld [vmem:[#allocation17 + $0x1120] sm:$0xff]  ;;  %v14583_v9 = vld [vmem:[#allocation17 + $0x1158] sm:$0xff]  ;;  %v14598_v31 = vld [vmem:[#allocation17 + $0x11d0] sm:$0xff] }
0x1dc6   : > { %v14591_v14 = vld [vmem:[#allocation17 + $0x1198] sm:$0xff] }
0x1dc7   : > { %16611 = vmatmul.mubr.msk.f32.vlgmr.msra.gmra.mrb[148].mxu1 %vm7273_vm11, %v22873_v36 }
0x1dc8   : > { %14222 = vmatpush1.msra.mxu1 %v22867_v59  ;;  %14285 = vmatprep.mubr.f32.mxu1 %v23120_v63  ;;  %v14450_v59 = vld [vmem:[#allocation17 + $0xd30] sm:$0xff] }
0x1dc9   : > { %14292 = vmatprep.subr.mxu1 %v22877_v58  ;;  %v20328_v58 = vpack.c.bf16 %v14457_v21, %v14450_v59  ;;  %v14590_v59 = vld [vmem:[#allocation17 + $0x1190] sm:$0xff]  ;;  %v14597_v21 = vld [vmem:[#allocation17 + $0x11c8] sm:$0xff] }
0x1dcb   : > { %16612 = vmatmul.mubr.msk.f32.vlgmr.msra.gmra.mrb[150].mxu1 %vm7273_vm11, %v22873_v36 }
0x1dcc   : > { %14293 = vmatpush1.msra.mxu1 %v22875_v54  ;;  %14356 = vmatprep.mubr.f32.mxu1 %v23120_v63  ;;  %v14464_v54 = vld [vmem:[#allocation17 + $0xda0] sm:$0xff] }
0x1dcd   : > { %20323 = vmatprep.subr.bf16.mxu1 %v20322_v38  ;;  %v20332_v28 = vpack.c.bf16 %v14471_v61, %v14464_v54  ;;  %v20362_v38 = vpack.c.bf16 %v14584_v35, %v14577_v53  ;;  %v14604_v54 = vld [vmem:[#allocation17 + $0x1200] sm:$0xff]  ;;  %v14611_v61 = vld [vmem:[#allocation17 + $0x1238] sm:$0xff] }
0x1dce   : > { %v14587_v53 = vld [vmem:[#allocation17 + $0x1178] sm:$0xff] }
0x1dcf   : > { %16613 = vmatmul.mubr.msk.f32.vlgmr.msra.gmra.mrb[152].mxu1 %vm7273_vm11, %v22873_v36  ;;  %v20336_v36 = vpack.c.bf16 %v14485_v6, %v14478_v23  ;;  %v14618_v23 = vld [vmem:[#allocation17 + $0x1270] sm:$0xff]  ;;  %v14625_v6 = vld [vmem:[#allocation17 + $0x12a8] sm:$0xff]  ;;  %v20465_v35 = vpack.c.bf16 %v14587_v53, %v14580_v7 }
0x1dd0   : > { %20325 = vmatpush1.bf16.msra.mxu1 %v20324_v8  ;;  %16620 = vmatprep.mubr.msk.f32.mxu1 %vm13042_vm12, %v22794_v49  ;;  %v20364_v8 = vpack.c.bf16 %v14583_v9, %v14576_v12  ;;  %v20376_v56 = vpack.c.bf16 %v14625_v6, %v14618_v23  ;;  %v14608_v9 = vld [vmem:[#allocation17 + $0x1220] sm:$0xff] }
0x1dd1   : > { %20327 = vmatprep.subr.bf16.mxu1 %v20326_v52  ;;  %v20366_v52 = vpack.c.bf16 %v14598_v31, %v14591_v14  ;;  %v14615_v14 = vld [vmem:[#allocation17 + $0x1258] sm:$0xff] }
0x1dd2   : > { %v20471_v31 = vpack.c.bf16 %v14615_v14, %v14608_v9 }
0x1dd4   : > { %20329 = vmatpush1.bf16.msra.mxu1 %v20328_v58  ;;  %v20368_v58 = vpack.c.bf16 %v14597_v21, %v14590_v59  ;;  %v14636_v21 = vld [vmem:[#allocation17 + $0x1300] sm:$0x1] }
0x1dd5   : > { %20331 = vmatprep.subr.bf16.mxu1 %v20330_v19  ;;  %v20370_v19 = vpack.c.bf16 %v14612_v18, %v14605_v16 }
0x1dd8   : > { %20333 = vmatpush1.bf16.msra.mxu1 %v20332_v28  ;;  %v20372_v28 = vpack.c.bf16 %v14611_v61, %v14604_v54 }
0x1dd9   : > { %20335 = vmatprep.subr.bf16.mxu1 %v20334_v41  ;;  %v20374_v41 = vpack.c.bf16 %v14626_v25, %v14619_v26 }
0x1ddc   : > { %20337 = vmatpush1.bf16.msra.mxu1 %v20336_v36  ;;  %v14440_v36 = vld [vmem:[#allocation17 + $0xce0] sm:$0xff] }
0x1ddd   : > { %20339 = vmatprep.subr.bf16.mxu1 %v20338_v55  ;;  %v14447_v55 = vld [vmem:[#allocation17 + $0xd18] sm:$0xff] }
0x1dde   : > { %v20435_v39 = vpack.c.bf16 %v14447_v55, %v14440_v36  ;;  %v15246_v36 = vld [vmem:[#allocation17 + $0x1350] sm:$0xff] }
0x1ddf   : > { %v15254_v55 = vld [vmem:[#allocation17 + $0x1390] sm:$0xff] }
0x1de0   : > { %20341 = vmatpush1.bf16.msra.mxu1 %v20340_v24  ;;  %v20438_v24 = vpack.c.bf16 %v14461_v57, %v14454_v48  ;;  %v15253_v57 = vld [vmem:[#allocation17 + $0x1388] sm:$0xff] }
0x1de1   : > { %20343 = vmatprep.subr.bf16.mxu1 %v20342_v5  ;;  %v14468_v5 = vld [vmem:[#allocation17 + $0xdc0] sm:$0xff] }
0x1de2   : > { %v20441_v1 = vpack.c.bf16 %v14475_v27, %v14468_v5  ;;  %v15268_v5 = vld [vmem:[#allocation17 + $0x1400] sm:$0xff]  ;;  %v15275_v27 = vld [vmem:[#allocation17 + $0x1438] sm:$0xff] }
0x1de4   : > { %20345 = vmatpush1.bf16.msra.mxu1 %v20344_v46  ;;  %v20444_v46 = vpack.c.bf16 %v14489_v40, %v14482_v11  ;;  %v20540_v11 = vpack.c.bf16 %v15275_v27, %v15268_v5  ;;  %v15267_v40 = vld [vmem:[#allocation17 + $0x13f8] sm:$0xff]  ;;  %v15393_v5 = vld [vmem:[#allocation17 + $0x17e8] sm:$0xff]  ;;  %v15400_v27 = vld [vmem:[#allocation17 + $0x1820] sm:$0xff] }
0x1de5   : > { %20347 = vmatprep.subr.bf16.mxu1 %v20346_v34  ;;  %v14496_v34 = vld [vmem:[#allocation17 + $0xea0] sm:$0xff] }
0x1de6   : > { %v20447_v22 = vpack.c.bf16 %v14503_v43, %v14496_v34  ;;  %v15282_v34 = vld [vmem:[#allocation17 + $0x1470] sm:$0xff]  ;;  %v15289_v43 = vld [vmem:[#allocation17 + $0x14a8] sm:$0xff] }
0x1de8   : > { %20349 = vmatpush1.bf16.msra.mxu1 %v20348_v60  ;;  %v20450_v60 = vpack.c.bf16 %v14517_v51, %v14510_v62  ;;  %v20544_v62 = vpack.c.bf16 %v15289_v43, %v15282_v34  ;;  %v15281_v51 = vld [vmem:[#allocation17 + $0x1468] sm:$0xff]  ;;  %v15407_v34 = vld [vmem:[#allocation17 + $0x1858] sm:$0xff]  ;;  %v15414_v43 = vld [vmem:[#allocation17 + $0x1890] sm:$0xff] }
0x1de9   : > { %20351 = vmatprep.subr.bf16.mxu1 %v20350_v0 }
0x1dec   : > { %20353 = vmatpush1.bf16.msra.mxu1 %v20352_v50  ;;  %v14538_v50 = vld [vmem:[#allocation17 + $0xff0] sm:$0xff] }
0x1ded   : > { %20355 = vmatprep.subr.bf16.mxu1 %v20354_v37  ;;  %v14545_v37 = vld [vmem:[#allocation17 + $0x1028] sm:$0xff] }
0x1dee   : > { %v20456_v17 = vpack.c.bf16 %v14545_v37, %v14538_v50  ;;  %v15302_v50 = vld [vmem:[#allocation17 + $0x1510] sm:$0xff] }
0x1def   : > { %v15310_v37 = vld [vmem:[#allocation17 + $0x1550] sm:$0xff] }
0x1df0   : > { %20357 = vmatpush1.bf16.msra.mxu1 %v20356_v15  ;;  %v14566_v15 = vld [vmem:[#allocation17 + $0x10d0] sm:$0xff] }
0x1df1   : > { %20359 = vmatprep.subr.bf16.mxu1 %v20358_v47  ;;  %v14573_v47 = vld [vmem:[#allocation17 + $0x1108] sm:$0xff] }
0x1df2   : > { %v20462_v3 = vpack.c.bf16 %v14573_v47, %v14566_v15  ;;  %v15316_v15 = vld [vmem:[#allocation17 + $0x1580] sm:$0xff] }
0x1df3   : > { %v15324_v47 = vld [vmem:[#allocation17 + $0x15c0] sm:$0xff] }
0x1df4   : > { %20361 = vmatpush1.bf16.msra.mxu1 %v20360_v10  ;;  %v14594_v10 = vld [vmem:[#allocation17 + $0x11b0] sm:$0xff] }
0x1df5   : > { %20363 = vmatprep.subr.bf16.mxu1 %v20362_v38  ;;  %v14601_v38 = vld [vmem:[#allocation17 + $0x11e8] sm:$0xff] }
0x1df6   : > { %v20468_v12 = vpack.c.bf16 %v14601_v38, %v14594_v10  ;;  %v15330_v10 = vld [vmem:[#allocation17 + $0x15f0] sm:$0xff] }
0x1df7   : > { %v15338_v38 = vld [vmem:[#allocation17 + $0x1630] sm:$0xff] }
0x1df8   : > { %20365 = vmatpush1.bf16.msra.mxu1 %v20364_v8  ;;  %v14622_v8 = vld [vmem:[#allocation17 + $0x1290] sm:$0xff] }
0x1df9   : > { %20367 = vmatprep.subr.bf16.mxu1 %v20366_v52  ;;  %v14629_v52 = vld [vmem:[#allocation17 + $0x12c8] sm:$0xff] }
0x1dfa   : > { %v20474_v59 = vpack.c.bf16 %v14629_v52, %v14622_v8  ;;  %v15344_v8 = vld [vmem:[#allocation17 + $0x1660] sm:$0xff] }
0x1dfb   : > { %v15352_v52 = vld [vmem:[#allocation17 + $0x16a0] sm:$0xff] }
0x1dfc   : > { %20369 = vmatpush1.bf16.msra.mxu1 %v20368_v58  ;;  %v22949_v58 = vld [vmem:[#allocation16 + $0x2] sm:$0x1] }
0x1dfd   : > { %20371 = vmatprep.subr.bf16.mxu1 %v20370_v19 }
0x1e00   : > { %20373 = vmatpush1.bf16.msra.mxu1 %v20372_v28  ;;  %v15240_v28 = vld [vmem:[#allocation17 + $0x1320] sm:$0xff] }
0x1e01   : > { %20375 = vmatprep.subr.bf16.mxu1 %v20374_v41  ;;  %v15247_v41 = vld [vmem:[#allocation17 + $0x1358] sm:$0xff] }
0x1e04   : > { %20377 = vmatpush1.bf16.msra.mxu1 %v20376_v56  ;;  %v20532_v56 = vpack.c.bf16 %v15247_v41, %v15240_v28  ;;  %v15365_v41 = vld [vmem:[#allocation17 + $0x1708] sm:$0xff] }
0x1e05   : > { %16618 = vmatprep.subr.msk.mxu1 %vm1527_vm3, %v14633_v13  ;;  %v15239_v13 = vld [vmem:[#allocation17 + $0x1318] sm:$0xff] }
0x1e08   : > { %16619 = vmatpush1.msk.msra.mxu1 %vm1527_vm3, %v14632_v44  ;;  %v15261_v44 = vld [vmem:[#allocation17 + $0x13c8] sm:$0xff] }
0x1e09   : > { %14794 = vmatmul.mubr.f32.vlgmr.msra.gmra.mrb[156].mxu1 %v22796_v4  ;;  %20434 = vmatprep.subr.bf16.mxu1 %v23164_v2  ;;  %v20536_v48 = vpack.c.bf16 %v15261_v44, %v15254_v55  ;;  %v15379_v55 = vld [vmem:[#allocation17 + $0x1778] sm:$0xff]  ;;  %v15386_v44 = vld [vmem:[#allocation17 + $0x17b0] sm:$0xff] }
0x1e0a   : > { %20436 = vmatpush1.bf16.msra.mxu1 %v20435_v39  ;;  %16625 = vmatprep.mubr.msk.f32.mxu1 %vm13042_vm12, %v22794_v49  ;;  %v20534_v39 = vpack.c.bf16 %v15246_v36, %v15239_v13 }
0x1e0b   : > { %20437 = vmatprep.subr.bf16.mxu1 %v23164_v2 }
0x1e0e   : > { %20439 = vmatpush1.bf16.msra.mxu1 %v20438_v24  ;;  %v15260_v24 = vld [vmem:[#allocation17 + $0x13c0] sm:$0xff] }
0x1e0f   : > { %20440 = vmatprep.subr.bf16.mxu1 %v23164_v2 }
0x1e12   : > { %20442 = vmatpush1.bf16.msra.mxu1 %v20441_v1  ;;  %v20538_v1 = vpack.c.bf16 %v15260_v24, %v15253_v57  ;;  %v20574_v57 = vpack.c.bf16 %v15386_v44, %v15379_v55  ;;  %v15293_v44 = vld [vmem:[#allocation17 + $0x14c8] sm:$0xff] }
0x1e13   : > { %20443 = vmatprep.subr.bf16.mxu1 %v23164_v2 }
0x1e16   : > { %20445 = vmatpush1.bf16.msra.mxu1 %v20444_v46  ;;  %v15274_v46 = vld [vmem:[#allocation17 + $0x1430] sm:$0xff] }
0x1e17   : > { %20446 = vmatprep.subr.bf16.mxu1 %v23164_v2 }
0x1e1a   : > { %20448 = vmatpush1.bf16.msra.mxu1 %v20447_v22  ;;  %v14429_v0 = vpop.f32.mrb[116].mxu0  ;;  %v20542_v22 = vpack.c.bf16 %v15274_v46, %v15267_v40  ;;  %v20578_v40 = vpack.c.bf16 %v15400_v27, %v15393_v5  ;;  %v15285_v5 = vld [vmem:[#allocation17 + $0x1488] sm:$0xff]  ;;  %v15292_v27 = vld [vmem:[#allocation17 + $0x14c0] sm:$0xff] }
0x1e1b   : > { %20449 = vmatprep.subr.bf16.mxu1 %v23164_v2  ;;  %v18365_v32 = vpop.f32.mrb[117].mxu0 }
0x1e1e   : > { %20451 = vmatpush1.bf16.msra.mxu1 %v20450_v60  ;;  %v15288_v60 = vld [vmem:[#allocation17 + $0x14a0] sm:$0xff] }
0x1e1f   : > { %20452 = vmatprep.subr.bf16.mxu1 %v23164_v2  ;;  %v20546_v29 = vpack.c.bf16 %v15288_v60, %v15281_v51  ;;  %v20582_v51 = vpack.c.bf16 %v15414_v43, %v15407_v34  ;;  %v15238_v60 = vld [vmem:[#allocation17 + $0x1310] sm:$0xff]  ;;  %v20654_v34 = vpack.c.bf16 %v15292_v27, %v15285_v5 }
0x1e20   : > { %v15322_v43 = vld [vmem:[#allocation17 + $0x15b0] sm:$0xff] }
0x1e21   : > { %v15398_v5 = vld [vmem:[#allocation17 + $0x1810] sm:$0xff] }
0x1e22   : > { %20454 = vmatpush1.bf16.msra.mxu1 %v20453_v33  ;;  %v15295_v33 = vld [vmem:[#allocation17 + $0x14d8] sm:$0xff] }
0x1e23   : > { %20455 = vmatprep.subr.bf16.mxu1 %v23164_v2  ;;  %v20550_v42 = vpack.c.bf16 %v15302_v50, %v15295_v33  ;;  %v15237_v33 = vld [vmem:[#allocation17 + $0x1308] sm:$0xff]  ;;  %v15244_v50 = vld [vmem:[#allocation17 + $0x1340] sm:$0xff] }
0x1e26   : > { %20457 = vmatpush1.bf16.msra.mxu1 %v20456_v17  ;;  %v15317_v17 = vld [vmem:[#allocation17 + $0x1588] sm:$0xff] }
0x1e27   : > { %20458 = vmatprep.subr.bf16.mxu1 %v23164_v2  ;;  %v20552_v45 = vpack.c.bf16 %v15317_v17, %v15310_v37  ;;  %v15252_v17 = vld [vmem:[#allocation17 + $0x1380] sm:$0xff] }
0x1e2a   : > { %20460 = vmatpush1.bf16.msra.mxu1 %v20459_v20  ;;  %v15309_v20 = vld [vmem:[#allocation17 + $0x1548] sm:$0xff] }
0x1e2b   : > { %20461 = vmatprep.subr.bf16.mxu1 %v23164_v2  ;;  %v20554_v7 = vpack.c.bf16 %v15316_v15, %v15309_v20  ;;  %v20478_v20 = vpack.c.bf16 %v15244_v50, %v15237_v33  ;;  %v15336_v33 = vld [vmem:[#allocation17 + $0x1620] sm:$0xff]  ;;  %v15343_v50 = vld [vmem:[#allocation17 + $0x1658] sm:$0xff] }
0x1e2e   : > { %20463 = vmatpush1.bf16.msra.mxu1 %v20462_v3  ;;  %v15331_v3 = vld [vmem:[#allocation17 + $0x15f8] sm:$0xff] }
0x1e2f   : > { %20464 = vmatprep.subr.bf16.mxu1 %v23164_v2  ;;  %v20556_v53 = vpack.c.bf16 %v15331_v3, %v15324_v47  ;;  %v15251_v47 = vld [vmem:[#allocation17 + $0x1378] sm:$0xff]  ;;  %v15258_v3 = vld [vmem:[#allocation17 + $0x13b0] sm:$0xff] }
0x1e32   : > { %20466 = vmatpush1.bf16.msra.mxu1 %v20465_v35  ;;  %v15323_v35 = vld [vmem:[#allocation17 + $0x15b8] sm:$0xff] }
0x1e33   : > { %20467 = vmatprep.subr.bf16.mxu1 %v23164_v2  ;;  %v20558_v9 = vpack.c.bf16 %v15330_v10, %v15323_v35  ;;  %v15243_v10 = vld [vmem:[#allocation17 + $0x1338] sm:$0xff] }
0x1e36   : > { %20469 = vmatpush1.bf16.msra.mxu1 %v20468_v12  ;;  %v15345_v12 = vld [vmem:[#allocation17 + $0x1668] sm:$0xff] }
0x1e37   : > { %20470 = vmatprep.subr.bf16.mxu1 %v23164_v2  ;;  %v20560_v14 = vpack.c.bf16 %v15345_v12, %v15338_v38  ;;  %v15250_v38 = vld [vmem:[#allocation17 + $0x1370] sm:$0xff]  ;;  %v20482_v12 = vpack.c.bf16 %v15258_v3, %v15251_v47 }
0x1e38   : > { %v15350_v3 = vld [vmem:[#allocation17 + $0x1690] sm:$0xff] }
0x1e3a   : > { %20472 = vmatpush1.bf16.msra.mxu1 %v20471_v31  ;;  %v15337_v31 = vld [vmem:[#allocation17 + $0x1628] sm:$0xff] }
0x1e3b   : > { %20473 = vmatprep.subr.bf16.mxu1 %v23164_v2 }
0x1e3e   : > { %20475 = vmatpush1.bf16.msra.mxu1 %v20474_v59  ;;  %v15359_v59 = vld [vmem:[#allocation17 + $0x16d8] sm:$0xff] }
0x1e3f   : > { %14927 = vmatprep.subr.mxu1 %v23120_v63 }
0x1e42   : > { %16624 = vmatpush1.msk.msra.mxu1 %vm1527_vm3, %v14636_v21  ;;  %v20562_v21 = vpack.c.bf16 %v15344_v8, %v15337_v31  ;;  %v15435_v31 = vld [vmem:[#allocation17 + $0x1938] sm:$0x1]  ;;  %v15265_v8 = vld [vmem:[#allocation17 + $0x13e8] sm:$0xff] }
0x1e43   : > { %14936 = vmatmul.mubr.f32.vlgmr.msra.gmra.mrb[158].mxu1 %v22796_v4 }
0x1e44   : > { %15010 = vmatprep.mubr.f32.mxu1 %v23120_v63 }
0x1e54   : > { %v14724_v16 = vpop.f32.mrb[118].mxu0 }
0x1e55   : > { %v14726_v18 = vpop.f32.mrb[119].mxu0 }
0x1e56   : > { %14946 = vmatprep.subr.mxu1 %v14726_v18  ;;  %v15351_v18 = vld [vmem:[#allocation17 + $0x1698] sm:$0xff] }
0x1e57   : > { %14947 = vmatpush1.msra.mxu1 %v14724_v16  ;;  %v20564_v16 = vpack.c.bf16 %v15359_v59, %v15352_v52  ;;  %v15272_v52 = vld [vmem:[#allocation17 + $0x1420] sm:$0xff]  ;;  %v20645_v59 = vpack.c.bf16 %v15250_v38, %v15243_v10 }
0x1e58   : > { %16626 = vmatmul.mubr.msk.f32.vlgmr.msra.gmra.mrb[148].mxu1 %vm7273_vm11, %v22949_v58 }
0x1e59   : > { %15081 = vmatprep.mubr.f32.mxu1 %v23120_v63 }
0x1e8e   : > { %v14866_v19 = vpop.f32.mrb[120].mxu0 }
0x1e8f   : > { %v14868_v54 = vpop.f32.mrb[121].mxu0 }
0x1e96   : > { %v14143_v61 = vpop.f32.mrb[154].mxu1 }
0x1e97   : > { %v22954_v26 = vadd.f32 %v14429_v0, %v14143_v61  ;;  %v18360_v25 = vpop.f32.mrb[155].mxu1  ;;  %v15296_v0 = vld [vmem:[#allocation17 + $0x14e0] sm:$0xff]  ;;  %v15373_v61 = vld [vmem:[#allocation17 + $0x1748] sm:$0xff] }
0x1e98   : > { %v20548_v32 = vpack.c.bf16 %v15303_v30, %v15296_v0  ;;  %v15245_v0 = vld [vmem:[#allocation17 + $0x1348] sm:$0xff] }
0x1e99   : > { %v15421_v30 = vld [vmem:[#allocation17 + $0x18c8] sm:$0xff]  ;;  %v20476_v37 = vpack.c.bf16 %v15245_v0, %v15238_v60 }
0x1edc   : > { %v14795_v23 = vpop.f32.mrb[156].mxu1 }
0x1edd   : > { %v14797_v6 = vpop.f32.mrb[157].mxu1 }
0x1ede   : > { %15017 = vmatprep.subr.mxu1 %v14797_v6  ;;  %v15380_v6 = vld [vmem:[#allocation17 + $0x1780] sm:$0xff] }
0x1edf   : > { %15018 = vmatpush1.msra.mxu1 %v14795_v23  ;;  %v15372_v23 = vld [vmem:[#allocation17 + $0x1740] sm:$0xff] }
0x1ee0   : > { %16627 = vmatmul.mubr.msk.f32.vlgmr.msra.gmra.mrb[150].mxu1 %vm7273_vm11, %v22949_v58  ;;  %15088 = vmatprep.subr.mxu1 %v14868_v54  ;;  %v15366_v54 = vld [vmem:[#allocation17 + $0x1710] sm:$0xff]  ;;  %v20570_v13 = vpack.c.bf16 %v15372_v23, %v15365_v41 }
0x1ee1   : > { %15089 = vmatpush1.msra.mxu1 %v14866_v19  ;;  %15152 = vmatprep.mubr.f32.mxu1 %v23120_v63  ;;  %v15358_v19 = vld [vmem:[#allocation17 + $0x16d0] sm:$0xff]  ;;  %v20568_v28 = vpack.c.bf16 %v15373_v61, %v15366_v54  ;;  %v20486_v54 = vpack.c.bf16 %v15272_v52, %v15265_v8  ;;  %v15371_v8 = vld [vmem:[#allocation17 + $0x1738] sm:$0xff]  ;;  %v15341_v52 = vld [vmem:[#allocation17 + $0x1648] sm:$0xff] }
0x1ee2   : > { %20533 = vmatprep.subr.bf16.mxu1 %v20532_v56  ;;  %v20566_v25 = vpack.c.bf16 %v15358_v19, %v15351_v18  ;;  %v15387_v56 = vld [vmem:[#allocation17 + $0x17b8] sm:$0xff]  ;;  %v15257_v18 = vld [vmem:[#allocation17 + $0x13a8] sm:$0xff]  ;;  %v15264_v19 = vld [vmem:[#allocation17 + $0x13e0] sm:$0xff] }
0x1ee3   : > { %v20572_v36 = vpack.c.bf16 %v15387_v56, %v15380_v6  ;;  %v20648_v41 = vpack.c.bf16 %v15264_v19, %v15257_v18  ;;  %v15294_v23 = vld [vmem:[#allocation17 + $0x14d0] sm:$0xff]  ;;  %v15301_v6 = vld [vmem:[#allocation17 + $0x1508] sm:$0xff]  ;;  %v15271_v56 = vld [vmem:[#allocation17 + $0x1418] sm:$0xff] }
0x1ee4   : > { %16628 = vmatmul.mubr.msk.f32.vlgmr.msra.gmra.mrb[152].mxu1 %vm7273_vm11, %v22949_v58  ;;  %v20492_v55 = vpack.c.bf16 %v15301_v6, %v15294_v23  ;;  %v15370_v18 = vld [vmem:[#allocation17 + $0x1730] sm:$0xff]  ;;  %v15377_v6 = vld [vmem:[#allocation17 + $0x1768] sm:$0xff] }
0x1ee5   : > { %20535 = vmatpush1.bf16.msra.mxu1 %v20534_v39  ;;  %16635 = vmatprep.mubr.msk.f32.mxu1 %vm13042_vm12, %v22794_v49  ;;  %v15394_v39 = vld [vmem:[#allocation17 + $0x17f0] sm:$0xff] }
0x1ee6   : > { %20537 = vmatprep.subr.bf16.mxu1 %v20536_v48  ;;  %v15401_v48 = vld [vmem:[#allocation17 + $0x1828] sm:$0xff] }
0x1ee7   : > { %v20576_v24 = vpack.c.bf16 %v15401_v48, %v15394_v39  ;;  %v15300_v39 = vld [vmem:[#allocation17 + $0x1500] sm:$0xff] }
0x1ee9   : > { %20539 = vmatpush1.bf16.msra.mxu1 %v20538_v1  ;;  %v15408_v1 = vld [vmem:[#allocation17 + $0x1860] sm:$0xff] }
0x1eea   : > { %20541 = vmatprep.subr.bf16.mxu1 %v20540_v11  ;;  %v15415_v11 = vld [vmem:[#allocation17 + $0x1898] sm:$0xff] }
0x1eeb   : > { %v20580_v46 = vpack.c.bf16 %v15415_v11, %v15408_v1  ;;  %v20494_v1 = vpack.c.bf16 %v15300_v39, %v15293_v44  ;;  %v15369_v44 = vld [vmem:[#allocation17 + $0x1728] sm:$0xff]  ;;  %v15376_v39 = vld [vmem:[#allocation17 + $0x1760] sm:$0xff] }
0x1eec   : > { %v20672_v27 = vpack.c.bf16 %v15376_v39, %v15369_v44  ;;  %v15297_v39 = vld [vmem:[#allocation17 + $0x14e8] sm:$0xff] }
0x1eed   : > { %20543 = vmatpush1.bf16.msra.mxu1 %v20542_v22  ;;  %v15422_v22 = vld [vmem:[#allocation17 + $0x18d0] sm:$0xff] }
0x1eee   : > { %20545 = vmatprep.subr.bf16.mxu1 %v20544_v62  ;;  %v15429_v62 = vld [vmem:[#allocation17 + $0x1908] sm:$0xff] }
0x1ef1   : > { %20547 = vmatpush1.bf16.msra.mxu1 %v20546_v29  ;;  %v20584_v29 = vpack.c.bf16 %v15429_v62, %v15422_v22  ;;  %v15329_v22 = vld [vmem:[#allocation17 + $0x15e8] sm:$0xff]  ;;  %v15299_v62 = vld [vmem:[#allocation17 + $0x14f8] sm:$0xff] }
0x1ef2   : > { %20549 = vmatprep.subr.bf16.mxu1 %v20548_v32  ;;  %v15428_v32 = vld [vmem:[#allocation17 + $0x1900] sm:$0xff]  ;;  %v20500_v0 = vpack.c.bf16 %v15329_v22, %v15322_v43  ;;  %v15405_v22 = vld [vmem:[#allocation17 + $0x1848] sm:$0xff] }
0x1ef5   : > { %20551 = vmatpush1.bf16.msra.mxu1 %v20550_v42  ;;  %v15259_v42 = vld [vmem:[#allocation17 + $0x13b8] sm:$0xff] }
0x1ef6   : > { %20553 = vmatprep.subr.bf16.mxu1 %v20552_v45  ;;  %v20586_v45 = vpack.c.bf16 %v15428_v32, %v15421_v30  ;;  %v20480_v35 = vpack.c.bf16 %v15259_v42, %v15252_v17  ;;  %v15321_v30 = vld [vmem:[#allocation17 + $0x15a8] sm:$0xff]  ;;  %v15320_v17 = vld [vmem:[#allocation17 + $0x15a0] sm:$0xff] }
0x1ef9   : > { %20555 = vmatpush1.bf16.msra.mxu1 %v20554_v7 }
0x1efa   : > { %20557 = vmatprep.subr.bf16.mxu1 %v20556_v53  ;;  %v15436_v53 = vld [vmem:[#allocation17 + $0x1940] sm:$0x1] }
0x1efd   : > { %20559 = vmatpush1.bf16.msra.mxu1 %v20558_v9  ;;  %v15266_v9 = vld [vmem:[#allocation17 + $0x13f0] sm:$0xff] }
0x1efe   : > { %20561 = vmatprep.subr.bf16.mxu1 %v20560_v14  ;;  %v15273_v14 = vld [vmem:[#allocation17 + $0x1428] sm:$0xff] }
0x1f01   : > { %20563 = vmatpush1.bf16.msra.mxu1 %v20562_v21  ;;  %v15280_v21 = vld [vmem:[#allocation17 + $0x1460] sm:$0xff] }
0x1f02   : > { %20565 = vmatprep.subr.bf16.mxu1 %v20564_v16  ;;  %v20484_v16 = vpack.c.bf16 %v15273_v14, %v15266_v9  ;;  %v15356_v9 = vld [vmem:[#allocation17 + $0x16c0] sm:$0xff] }
0x1f05   : > { %20567 = vmatpush1.bf16.msra.mxu1 %v20566_v25  ;;  %v15279_v25 = vld [vmem:[#allocation17 + $0x1458] sm:$0xff] }
0x1f06   : > { %20569 = vmatprep.subr.bf16.mxu1 %v20568_v28  ;;  %v15286_v28 = vld [vmem:[#allocation17 + $0x1490] sm:$0xff] }
0x1f09   : > { %20571 = vmatpush1.bf16.msra.mxu1 %v20570_v13  ;;  %v15278_v13 = vld [vmem:[#allocation17 + $0x1450] sm:$0xff] }
0x1f0a   : > { %20573 = vmatprep.subr.bf16.mxu1 %v20572_v36  ;;  %v20490_v36 = vpack.c.bf16 %v15286_v28, %v15279_v25  ;;  %v20651_v48 = vpack.c.bf16 %v15278_v13, %v15271_v56  ;;  %v15355_v25 = vld [vmem:[#allocation17 + $0x16b8] sm:$0xff]  ;;  %v15362_v28 = vld [vmem:[#allocation17 + $0x16f0] sm:$0xff]  ;;  %v15384_v56 = vld [vmem:[#allocation17 + $0x17a0] sm:$0xff] }
0x1f0b   : > { %v20669_v13 = vpack.c.bf16 %v15362_v28, %v15355_v25  ;;  %v15276_v25 = vld [vmem:[#allocation17 + $0x1440] sm:$0xff] }
0x1f0c   : > { %v15284_v28 = vld [vmem:[#allocation17 + $0x1480] sm:$0xff] }
0x1f0d   : > { %20575 = vmatpush1.bf16.msra.mxu1 %v20574_v57  ;;  %v15308_v57 = vld [vmem:[#allocation17 + $0x1540] sm:$0xff] }
0x1f0e   : > { %20577 = vmatprep.subr.bf16.mxu1 %v20576_v24  ;;  %v15315_v24 = vld [vmem:[#allocation17 + $0x1578] sm:$0xff] }
0x1f0f   : > { %v20496_v11 = vpack.c.bf16 %v15315_v24, %v15308_v57  ;;  %v15391_v24 = vld [vmem:[#allocation17 + $0x17d8] sm:$0xff] }
0x1f11   : > { %20579 = vmatpush1.bf16.msra.mxu1 %v20578_v40  ;;  %v15307_v40 = vld [vmem:[#allocation17 + $0x1538] sm:$0xff] }
0x1f12   : > { %20581 = vmatprep.subr.bf16.mxu1 %v20580_v46  ;;  %v15314_v46 = vld [vmem:[#allocation17 + $0x1570] sm:$0xff] }
0x1f13   : > { %v20498_v60 = vpack.c.bf16 %v15314_v46, %v15307_v40  ;;  %v15383_v40 = vld [vmem:[#allocation17 + $0x1798] sm:$0xff]  ;;  %v15390_v46 = vld [vmem:[#allocation17 + $0x17d0] sm:$0xff] }
0x1f15   : > { %20583 = vmatpush1.bf16.msra.mxu1 %v20582_v51  ;;  %v15306_v51 = vld [vmem:[#allocation17 + $0x1530] sm:$0xff] }
0x1f16   : > { %v14937_v15 = vpop.f32.mrb[158].mxu1  ;;  %20585 = vmatprep.subr.bf16.mxu1 %v20584_v29  ;;  %v15328_v29 = vld [vmem:[#allocation17 + $0x15e0] sm:$0xff]  ;;  %v20657_v32 = vpack.c.bf16 %v15306_v51, %v15299_v62  ;;  %v20675_v51 = vpack.c.bf16 %v15390_v46, %v15383_v40  ;;  %v15326_v40 = vld [vmem:[#allocation17 + $0x15d0] sm:$0xff]  ;;  %v15333_v46 = vld [vmem:[#allocation17 + $0x1608] sm:$0xff] }
0x1f17   : > { %v14939_v7 = vpop.f32.mrb[159].mxu1  ;;  %18367 = vmatpush3.msra.mxu0 %v14937_v15  ;;  %v20502_v42 = vpack.c.bf16 %v15328_v29, %v15321_v30  ;;  %v15342_v15 = vld [vmem:[#allocation17 + $0x1650] sm:$0xff]  ;;  %v15412_v62 = vld [vmem:[#allocation17 + $0x1880] sm:$0xff]  ;;  %v15397_v30 = vld [vmem:[#allocation17 + $0x1808] sm:$0xff] }
0x1f18   : > { %18369 = vmatmul.mubr.msk.f32.vlgmr.msra.gmra.mrb[122].mxu0 %vm7273_vm11, %v22949_v58  ;;  %20477 = vmatprep.subr.bf16.mxu0 %v20476_v37  ;;  %v15287_v58 = vld [vmem:[#allocation17 + $0x1498] sm:$0xff]  ;;  %v15313_v37 = vld [vmem:[#allocation17 + $0x1568] sm:$0xff]  ;;  %v15404_v29 = vld [vmem:[#allocation17 + $0x1840] sm:$0xff] }
0x1f19   : > { %20587 = vmatpush1.bf16.msra.mxu1 %v20586_v45  ;;  %20479 = vmatpush1.bf16.msra.mxu0 %v20478_v20  ;;  %v20488_v61 = vpack.c.bf16 %v15287_v58, %v15280_v21  ;;  %v20504_v45 = vpack.c.bf16 %v15343_v50, %v15336_v33  ;;  %v15335_v20 = vld [vmem:[#allocation17 + $0x1618] sm:$0xff]  ;;  %v20660_v47 = vpack.c.bf16 %v15320_v17, %v15313_v37  ;;  %v15357_v7 = vld [vmem:[#allocation17 + $0x16c8] sm:$0xff]  ;;  %v15426_v37 = vld [vmem:[#allocation17 + $0x18f0] sm:$0xff] }
0x1f1a   : > { %16632 = vmatprep.mubr.msk.f32.mxu0 %vm13042_vm12, %v22794_v49  ;;  %16633 = vmatprep.subr.msk.mxu1 %vm1527_vm3, %v15436_v53  ;;  %v15327_v53 = vld [vmem:[#allocation17 + $0x15d8] sm:$0xff]  ;;  %v20506_v10 = vpack.c.bf16 %v15342_v15, %v15335_v20  ;;  %v20508_v38 = vpack.c.bf16 %v15357_v7, %v15350_v3  ;;  %v20678_v17 = vpack.c.bf16 %v15404_v29, %v15397_v30  ;;  %v15434_v15 = vld [vmem:[#allocation17 + $0x1930] sm:$0x1]  ;;  %v15249_v7 = vld [vmem:[#allocation17 + $0x1368] sm:$0xff] }
0x1f1b   : > { %20481 = vmatprep.subr.bf16.mxu0 %v20480_v35  ;;  %v15334_v35 = vld [vmem:[#allocation17 + $0x1610] sm:$0xff]  ;;  %v15419_v50 = vld [vmem:[#allocation17 + $0x18b8] sm:$0xff] }
0x1f1c   : > { %v20663_v14 = vpack.c.bf16 %v15334_v35, %v15327_v53  ;;  %v20530_v20 = vpack.c.bf16 %v15426_v37, %v15419_v50  ;;  %v15242_v3 = vld [vmem:[#allocation17 + $0x1330] sm:$0xff]  ;;  %v15425_v53 = vld [vmem:[#allocation17 + $0x18e8] sm:$0xff]  ;;  %v15432_v35 = vld [vmem:[#allocation17 + $0x1920] sm:$0xff] }
0x1f1d   : > { %16634 = vmatpush1.msk.msra.mxu1 %vm1527_vm3, %v15435_v31  ;;  %20483 = vmatpush1.bf16.msra.mxu0 %v20482_v12  ;;  %v15349_v12 = vld [vmem:[#allocation17 + $0x1688] sm:$0xff]  ;;  %v15364_v31 = vld [vmem:[#allocation17 + $0x1700] sm:$0xff]  ;;  %v15339_v29 = vld [vmem:[#allocation17 + $0x1638] sm:$0xff] }
0x1f1e   : > { %15597 = vmatmul.mubr.f32.vlgmr.msra.gmra.mrb[160].mxu1 %v22796_v4  ;;  %20644 = vmatprep.subr.bf16.mxu1 %v23164_v2  ;;  %v20510_v21 = vpack.c.bf16 %v15356_v9, %v15349_v12  ;;  %v20512_v58 = vpack.c.bf16 %v15371_v8, %v15364_v31  ;;  %v15433_v12 = vld [vmem:[#allocation17 + $0x1928] sm:$0x1]  ;;  %v20588_v9 = vpack.c.bf16 %v15249_v7, %v15242_v3  ;;  %v15263_v31 = vld [vmem:[#allocation17 + $0x13d8] sm:$0xff] }
0x1f1f   : > { %20646 = vmatpush1.bf16.msra.mxu1 %v20645_v59  ;;  %16640 = vmatprep.mubr.msk.f32.mxu1 %vm13042_vm12, %v22794_v49  ;;  %v15348_v59 = vld [vmem:[#allocation17 + $0x1680] sm:$0xff]  ;;  %v20684_v8 = vpack.c.bf16 %v15432_v35, %v15425_v53  ;;  %v15361_v50 = vld [vmem:[#allocation17 + $0x16e8] sm:$0xff]  ;;  %v15367_v7 = vld [vmem:[#allocation17 + $0x1718] sm:$0xff] }
0x1f20   : > { %20485 = vmatprep.subr.bf16.mxu0 %v20484_v16  ;;  %20647 = vmatprep.subr.bf16.mxu1 %v23164_v2  ;;  %v15363_v16 = vld [vmem:[#allocation17 + $0x16f8] sm:$0xff]  ;;  %v20666_v19 = vpack.c.bf16 %v15348_v59, %v15341_v52  ;;  %v15374_v53 = vld [vmem:[#allocation17 + $0x1750] sm:$0xff] }
0x1f21   : > { %20487 = vmatpush1.bf16.msra.mxu0 %v20486_v54  ;;  %v15378_v54 = vld [vmem:[#allocation17 + $0x1770] sm:$0xff]  ;;  %v15255_v59 = vld [vmem:[#allocation17 + $0x1398] sm:$0xff] }
0x1f22   : > { %20489 = vmatprep.subr.bf16.mxu0 %v20488_v61  ;;  %v15385_v61 = vld [vmem:[#allocation17 + $0x17a8] sm:$0xff]  ;;  %v15382_v35 = vld [vmem:[#allocation17 + $0x1790] sm:$0xff] }
0x1f23   : > { %20649 = vmatpush1.bf16.msra.mxu1 %v20648_v41  ;;  %v20514_v41 = vpack.c.bf16 %v15370_v18, %v15363_v16  ;;  %v20516_v23 = vpack.c.bf16 %v15385_v61, %v15378_v54  ;;  %v15270_v16 = vld [vmem:[#allocation17 + $0x1410] sm:$0xff]  ;;  %v15277_v18 = vld [vmem:[#allocation17 + $0x1448] sm:$0xff]  ;;  %v15439_v54 = vld [vmem:[#allocation17 + $0x1958] sm:$0x1] }
0x1f24   : > { %20650 = vmatprep.subr.bf16.mxu1 %v23164_v2  ;;  %v15269_v61 = vld [vmem:[#allocation17 + $0x1408] sm:$0xff] }
0x1f25   : > { %20491 = vmatpush1.bf16.msra.mxu0 %v20490_v36  ;;  %v15392_v36 = vld [vmem:[#allocation17 + $0x17e0] sm:$0xff] }
0x1f26   : > { %20493 = vmatprep.subr.bf16.mxu0 %v20492_v55  ;;  %v15399_v55 = vld [vmem:[#allocation17 + $0x1818] sm:$0xff] }
0x1f27   : > { %20652 = vmatpush1.bf16.msra.mxu1 %v20651_v48  ;;  %v20518_v48 = vpack.c.bf16 %v15384_v56, %v15377_v6  ;;  %v20520_v57 = vpack.c.bf16 %v15399_v55, %v15392_v36  ;;  %v15283_v56 = vld [vmem:[#allocation17 + $0x1478] sm:$0xff]  ;;  %v15305_v36 = vld [vmem:[#allocation17 + $0x1528] sm:$0xff] }
0x1f28   : > { %20653 = vmatprep.subr.bf16.mxu1 %v23164_v2 }
0x1f29   : > { %20495 = vmatpush1.bf16.msra.mxu0 %v20494_v1  ;;  %v15406_v1 = vld [vmem:[#allocation17 + $0x1850] sm:$0xff] }
0x1f2a   : > { %20497 = vmatprep.subr.bf16.mxu0 %v20496_v11  ;;  %v15413_v11 = vld [vmem:[#allocation17 + $0x1888] sm:$0xff] }
0x1f2b   : > { %20655 = vmatpush1.bf16.msra.mxu1 %v20654_v34  ;;  %v20522_v34 = vpack.c.bf16 %v15398_v5, %v15391_v24  ;;  %v20524_v43 = vpack.c.bf16 %v15413_v11, %v15406_v1  ;;  %v15319_v24 = vld [vmem:[#allocation17 + $0x1598] sm:$0xff]  ;;  %v15318_v11 = vld [vmem:[#allocation17 + $0x1590] sm:$0xff] }
0x1f2c   : > { %20656 = vmatprep.subr.bf16.mxu1 %v23164_v2  ;;  %v15311_v1 = vld [vmem:[#allocation17 + $0x1558] sm:$0xff] }
0x1f2d   : > { %20499 = vmatpush1.bf16.msra.mxu0 %v20498_v60  ;;  %v15420_v60 = vld [vmem:[#allocation17 + $0x18c0] sm:$0xff] }
0x1f2e   : > { %20501 = vmatprep.subr.bf16.mxu0 %v20500_v0  ;;  %v15427_v0 = vld [vmem:[#allocation17 + $0x18f8] sm:$0xff] }
0x1f2f   : > { %20658 = vmatpush1.bf16.msra.mxu1 %v20657_v32  ;;  %v20526_v32 = vpack.c.bf16 %v15412_v62, %v15405_v22  ;;  %v20528_v33 = vpack.c.bf16 %v15427_v0, %v15420_v60  ;;  %v15325_v22 = vld [vmem:[#allocation17 + $0x15c8] sm:$0xff]  ;;  %v15332_v62 = vld [vmem:[#allocation17 + $0x1600] sm:$0xff]  ;;  %v15347_v60 = vld [vmem:[#allocation17 + $0x1678] sm:$0xff] }
0x1f30   : > { %20659 = vmatprep.subr.bf16.mxu1 %v23164_v2  ;;  %v20614_v0 = vpack.c.bf16 %v15332_v62, %v15325_v22 }
0x1f31   : > { %20503 = vmatpush1.bf16.msra.mxu0 %v20502_v42  ;;  %v15411_v42 = vld [vmem:[#allocation17 + $0x1878] sm:$0xff] }
0x1f32   : > { %20505 = vmatprep.subr.bf16.mxu0 %v20504_v45  ;;  %v15418_v45 = vld [vmem:[#allocation17 + $0x18b0] sm:$0xff] }
0x1f33   : > { %20661 = vmatpush1.bf16.msra.mxu1 %v20660_v47  ;;  %v20681_v47 = vpack.c.bf16 %v15418_v45, %v15411_v42  ;;  %v15353_v42 = vld [vmem:[#allocation17 + $0x16a8] sm:$0xff]  ;;  %v15360_v45 = vld [vmem:[#allocation17 + $0x16e0] sm:$0xff] }
0x1f34   : > { %20662 = vmatprep.subr.bf16.mxu1 %v23164_v2 }
0x1f35   : > { %20507 = vmatpush1.bf16.msra.mxu0 %v20506_v10  ;;  %v15241_v10 = vld [vmem:[#allocation17 + $0x1328] sm:$0xff] }
0x1f36   : > { %20509 = vmatprep.subr.bf16.mxu0 %v20508_v38  ;;  %v15248_v38 = vld [vmem:[#allocation17 + $0x1360] sm:$0xff] }
0x1f37   : > { %20664 = vmatpush1.bf16.msra.mxu1 %v20663_v14  ;;  %v15256_v14 = vld [vmem:[#allocation17 + $0x13a0] sm:$0xff]  ;;  %v20590_v52 = vpack.c.bf16 %v15248_v38, %v15241_v10  ;;  %v15389_v10 = vld [vmem:[#allocation17 + $0x17c8] sm:$0xff]  ;;  %v20626_v38 = vpack.c.bf16 %v15374_v53, %v15367_v7 }
0x1f38   : > { %20665 = vmatprep.subr.bf16.mxu1 %v23164_v2 }
0x1f39   : > { %20511 = vmatpush1.bf16.msra.mxu0 %v20510_v21  ;;  %v15262_v21 = vld [vmem:[#allocation17 + $0x13d0] sm:$0xff] }
0x1f3a   : > { %20513 = vmatprep.subr.bf16.mxu0 %v20512_v58  ;;  %v20592_v58 = vpack.c.bf16 %v15263_v31, %v15256_v14  ;;  %v15388_v14 = vld [vmem:[#allocation17 + $0x17c0] sm:$0xff] }
0x1f3b   : > { %20667 = vmatpush1.bf16.msra.mxu1 %v20666_v19  ;;  %v20594_v19 = vpack.c.bf16 %v15262_v21, %v15255_v59  ;;  %v15396_v31 = vld [vmem:[#allocation17 + $0x1800] sm:$0xff]  ;;  %v15395_v21 = vld [vmem:[#allocation17 + $0x17f8] sm:$0xff] }
0x1f3c   : > { %20668 = vmatprep.subr.bf16.mxu1 %v23164_v2 }
0x1f3d   : > { %20515 = vmatpush1.bf16.msra.mxu0 %v20514_v41  ;;  %v15291_v41 = vld [vmem:[#allocation17 + $0x14b8] sm:$0xff] }
0x1f3e   : > { %20517 = vmatprep.subr.bf16.mxu0 %v20516_v23  ;;  %v20598_v23 = vpack.c.bf16 %v15276_v25, %v15269_v61  ;;  %v20600_v6 = vpack.c.bf16 %v15291_v41, %v15284_v28  ;;  %v15416_v61 = vld [vmem:[#allocation17 + $0x18a0] sm:$0xff]  ;;  %v15431_v28 = vld [vmem:[#allocation17 + $0x1918] sm:$0xff] }
0x1f3f   : > { %20670 = vmatpush1.bf16.msra.mxu1 %v20669_v13  ;;  %v15290_v13 = vld [vmem:[#allocation17 + $0x14b0] sm:$0xff]  ;;  %v15424_v25 = vld [vmem:[#allocation17 + $0x18e0] sm:$0xff] }
0x1f40   : > { %20671 = vmatprep.subr.bf16.mxu1 %v23164_v2  ;;  %v20602_v55 = vpack.c.bf16 %v15290_v13, %v15283_v56  ;;  %v15430_v56 = vld [vmem:[#allocation17 + $0x1910] sm:$0xff] }
0x1f41   : > { %20519 = vmatpush1.bf16.msra.mxu0 %v20518_v48  ;;  %v15304_v48 = vld [vmem:[#allocation17 + $0x1520] sm:$0xff] }
0x1f42   : > { %20521 = vmatprep.subr.bf16.mxu0 %v20520_v57  ;;  %v15312_v57 = vld [vmem:[#allocation17 + $0x1560] sm:$0xff]  ;;  %v20606_v5 = vpack.c.bf16 %v15304_v48, %v15297_v39 }
0x1f43   : > { %20673 = vmatpush1.bf16.msra.mxu1 %v20672_v27  ;;  %v20608_v27 = vpack.c.bf16 %v15319_v24, %v15312_v57 }
0x1f44   : > { %20674 = vmatprep.subr.bf16.mxu1 %v23164_v2 }
0x1f45   : > { %20523 = vmatpush1.bf16.msra.mxu0 %v20522_v34  ;;  %v20610_v34 = vpack.c.bf16 %v15318_v11, %v15311_v1 }
0x1f46   : > { %20525 = vmatprep.subr.bf16.mxu0 %v20524_v43  ;;  %v20612_v43 = vpack.c.bf16 %v15333_v46, %v15326_v40  ;;  %v16043_v40 = vpop.permute.xlu0 %16042  ;;  %v23165_v46 = vld [vmem:[#allocation26_spill] sm:$0xff] }
0x1f47   : > { %20676 = vmatpush1.bf16.msra.mxu1 %v20675_v51  ;;  %v15340_v51 = vld [vmem:[#allocation17 + $0x1640] sm:$0xff] }
0x1f48   : > { %20677 = vmatprep.subr.bf16.mxu1 %v23164_v2  ;;  %v20616_v30 = vpack.c.bf16 %v15347_v60, %v15340_v51 }
0x1f49   : > { %20527 = vmatpush1.bf16.msra.mxu0 %v20526_v32  ;;  %v15346_v32 = vld [vmem:[#allocation17 + $0x1670] sm:$0xff] }
0x1f4a   : > { %20529 = vmatprep.subr.bf16.mxu0 %v20528_v33  ;;  %v15354_v33 = vld [vmem:[#allocation17 + $0x16b0] sm:$0xff]  ;;  %v20618_v37 = vpack.c.bf16 %v15346_v32, %v15339_v29 }
0x1f4b   : > { %20679 = vmatpush1.bf16.msra.mxu1 %v20678_v17  ;;  %v20620_v17 = vpack.c.bf16 %v15361_v50, %v15354_v33 }
0x1f4c   : > { %20680 = vmatprep.subr.bf16.mxu1 %v23164_v2 }
0x1f4d   : > { %20531 = vmatpush1.bf16.msra.mxu0 %v20530_v20  ;;  %v15368_v20 = vld [vmem:[#allocation17 + $0x1720] sm:$0xff] }
0x1f4e   : > { %16630 = vmatprep.subr.msk.mxu0 %vm1527_vm3, %v15434_v15  ;;  %v15375_v15 = vld [vmem:[#allocation17 + $0x1758] sm:$0xff] }
0x1f4f   : > { %20682 = vmatpush1.bf16.msra.mxu1 %v20681_v47  ;;  %v20622_v47 = vpack.c.bf16 %v15360_v45, %v15353_v42  ;;  %v20624_v3 = vpack.c.bf16 %v15375_v15, %v15368_v20 }
0x1f50   : > { %20683 = vmatprep.subr.bf16.mxu1 %v23164_v2  ;;  %v20596_v2 = vpack.c.bf16 %v15277_v18, %v15270_v16  ;;  %v15410_v16 = vld [vmem:[#allocation17 + $0x1870] sm:$0xff]  ;;  %v15417_v18 = vld [vmem:[#allocation17 + $0x18a8] sm:$0xff] }
0x1f51   : > { %16631 = vmatpush1.msk.msra.mxu0 %vm1527_vm3, %v15433_v12  ;;  %v20628_v12 = vpack.c.bf16 %v15389_v10, %v15382_v35 }
0x1f52   : > { %15526 = vmatmul.mubr.f32.vlgmr.msra.gmra.mrb[124].mxu0 %v22796_v4  ;;  %20589 = vmatprep.subr.bf16.mxu0 %v20588_v9  ;;  %v15381_v9 = vld [vmem:[#allocation17 + $0x1788] sm:$0xff] }
0x1f53   : > { %20685 = vmatpush1.bf16.msra.mxu1 %v20684_v8  ;;  %20591 = vmatpush1.bf16.msra.mxu0 %v20590_v52  ;;  %v15403_v8 = vld [vmem:[#allocation17 + $0x1838] sm:$0xff]  ;;  %v20630_v52 = vpack.c.bf16 %v15388_v14, %v15381_v9 }
0x1f54   : > { %16638 = vmatprep.mubr.msk.f32.mxu0 %vm13042_vm12, %v22794_v49  ;;  %15730 = vmatprep.subr.mxu1 %v23120_v63  ;;  %v15298_v49 = vld [vmem:[#allocation17 + $0x14f0] sm:$0xff]  ;;  %v20632_v59 = vpack.c.bf16 %v15403_v8, %v15396_v31 }
0x1f55   : > { %20593 = vmatprep.subr.bf16.mxu0 %v20592_v58  ;;  %v20604_v44 = vpack.c.bf16 %v15305_v36, %v15298_v49  ;;  %v15402_v58 = vld [vmem:[#allocation17 + $0x1830] sm:$0xff]  ;;  %v15437_v36 = vld [vmem:[#allocation17 + $0x1948] sm:$0x1] }
0x1f56   : > { %v15438_v49 = vld [vmem:[#allocation17 + $0x1950] sm:$0x1] }
0x1f57   : > { %16639 = vmatpush1.msk.msra.mxu1 %vm1527_vm3, %v15439_v54  ;;  %20595 = vmatpush1.bf16.msra.mxu0 %v20594_v19  ;;  %v20634_v19 = vpack.c.bf16 %v15402_v58, %v15395_v21  ;;  %v20636_v54 = vpack.c.bf16 %v15417_v18, %v15410_v16 }
0x1f58   : > { %15739 = vmatmul.mubr.f32.vlgmr.msra.gmra.mrb[162].mxu1 %v22796_v4  ;;  %20597 = vmatprep.subr.bf16.mxu0 %v20596_v2  ;;  %v15409_v2 = vld [vmem:[#allocation17 + $0x1868] sm:$0xff] }
0x1f59   : > { %15813 = vmatprep.mubr.f32.mxu1 %v23120_v63  ;;  %v20638_v41 = vpack.c.bf16 %v15416_v61, %v15409_v2  ;;  %v23168_v61 = vlaneseq }
0x1f5b   : > { %20599 = vmatpush1.bf16.msra.mxu0 %v20598_v23  ;;  %v20640_v23 = vpack.c.bf16 %v15431_v28, %v15424_v25  ;;  %vm16121_vm13 = vcmp.lt.s32.totalorder %v23168_v61, 784 }
0x1f5c   : > { %20601 = vmatprep.subr.bf16.mxu0 %v20600_v6  ;;  %v15423_v6 = vld [vmem:[#allocation17 + $0x18d8] sm:$0xff] }
0x1f5d   : > { %v20642_v13 = vpack.c.bf16 %v15430_v56, %v15423_v6 }
0x1f5f   : > { %20603 = vmatpush1.bf16.msra.mxu0 %v20602_v55 }
0x1f60   : > { %20605 = vmatprep.subr.bf16.mxu0 %v20604_v44 }
0x1f63   : > { %20607 = vmatpush1.bf16.msra.mxu0 %v20606_v5 }
0x1f64   : > { %20609 = vmatprep.subr.bf16.mxu0 %v20608_v27  ;;  %v15745_v27 = vld [vmem:[#allocation16 + $0x3] sm:$0x1] }
0x1f67   : > { %20611 = vmatpush1.bf16.msra.mxu0 %v20610_v34  ;;  %v23166_v34 = vsub.s32 0, %v23165_v46 }
0x1f68   : > { %20613 = vmatprep.subr.bf16.mxu0 %v20612_v43 }
0x1f69   : > { %v16048_v43 = vrot.slane %v16043_v40, %v23166_v34 }
0x1f6b   : > { %20615 = vmatpush1.bf16.msra.mxu0 %v20614_v0 }
0x1f6c   : > { %20617 = vmatprep.subr.bf16.mxu0 %v20616_v30 }
0x1f6f   : > { %20619 = vmatpush1.bf16.msra.mxu0 %v20618_v37  ;;  %v21261_v37 = vmov 1966171168  }
0x1f70   : > { %20621 = vmatprep.subr.bf16.mxu0 %v20620_v17  ;;  %v16074_v17 = vunpack.c.l.s4 %v21261_v37 }
0x1f72   : > { %v16075_v45 = vunpack.c.0.s8 %v16074_v17 }
0x1f73   : > { %20623 = vmatpush1.bf16.msra.mxu0 %v20622_v47 }
0x1f74   : > { %20625 = vmatprep.subr.bf16.mxu0 %v20624_v3  ;;  %v16078_v3 = vsub.s32 %v16075_v45, %v23165_v46 }
0x1f77   : > { %20627 = vmatpush1.bf16.msra.mxu0 %v20626_v38 }
0x1f78   : > { %20629 = vmatprep.subr.bf16.mxu0 %v20628_v12 }
0x1f7b   : > { %20631 = vmatpush1.bf16.msra.mxu0 %v20630_v52 }
0x1f7c   : > { %20633 = vmatprep.subr.bf16.mxu0 %v20632_v59 }
0x1f7f   : > { %20635 = vmatpush1.bf16.msra.mxu0 %v20634_v19 }
0x1f80   : > { %20637 = vmatprep.subr.bf16.mxu0 %v20636_v54 }
0x1f83   : > { %20639 = vmatpush1.bf16.msra.mxu0 %v20638_v41 }
0x1f84   : > { %20641 = vmatprep.subr.bf16.mxu0 %v20640_v23 }
0x1f87   : > { %20643 = vmatpush1.bf16.msra.mxu0 %v20642_v13 }
0x1f88   : > { %16636 = vmatprep.subr.msk.mxu0 %vm1527_vm3, %v15438_v49 }
0x1f8b   : > { %16637 = vmatpush1.msk.msra.mxu0 %vm1527_vm3, %v15437_v36 }
0x1f8c   : > { %15668 = vmatmul.mubr.f32.vlgmr.msra.gmra.mrb[126].mxu0 %v22796_v4  ;;  %18371 = vmatprep.subr.mxu0 %v23120_v63 }
0x1f8d   : > { %18373 = vmatprep.mubr.msk.f32.mxu0 %vm21257_vm0, %v23120_v63 }
0x1feb   : > { %v15225_v55 = vpop.f32.mrb[122].mxu0 }
0x1fec   : > { %v15235_v44 = vadd.f32 %v15225_v55, %v22954_v26  ;;  %v18370_v39 = vpop.f32.mrb[123].mxu0 }
0x1ff1   : > { %v15598_v48 = vpop.f32.mrb[160].mxu1 }
0x1ff2   : > { %v15600_v57 = vpop.f32.mrb[161].mxu1 }
0x2025   : > { %v15527_v24 = vpop.f32.mrb[124].mxu0 }
0x2026   : > { %v15529_v5 = vpop.f32.mrb[125].mxu0 }
0x2027   : > { %15749 = vmatprep.subr.mxu1 %v15529_v5 }
0x2028   : > { %15750 = vmatpush1.msra.mxu1 %v15527_v24 }
0x2029   : > { %16641 = vmatmul.mubr.msk.f32.vlgmr.msra.gmra.mrb[148].mxu1 %vm7273_vm11, %v15745_v27  ;;  %15820 = vmatprep.subr.mxu1 %v15600_v57 }
0x202a   : > { %15821 = vmatpush1.msra.mxu1 %v15598_v48  ;;  %15884 = vmatprep.mubr.f32.mxu1 %v23120_v63 }
0x202b   : > { %v15740_v4 = vpop.f32.mrb[162].mxu1 }
0x202c   : > { %v15742_v1 = vpop.f32.mrb[163].mxu1  ;;  %18372 = vmatpush3.msra.mxu0 %v15740_v4 }
0x202d   : > { %18374 = vmatmul.mubr.msk.f32.vlgmr.msra.gmra.mrb[128].mxu0 %vm7273_vm11, %v15745_v27  ;;  %16642 = vmatmul.mubr.msk.f32.vlgmr.msra.gmra.mrb[150].mxu1 %vm7273_vm11, %v15745_v27 }
0x202e   : > { %15955 = vmatprep.mubr.f32.mxu1 %v23120_v63 }
0x205f   : > { %v15669_v26 = vpop.f32.mrb[126].mxu0 }
0x2060   : > { %v15671_v11 = vpop.f32.mrb[127].mxu0 }
0x2061   : > { %15891 = vmatprep.subr.mxu1 %v15671_v11 }
0x2062   : > { %15892 = vmatpush1.msra.mxu1 %v15669_v26 }
0x2063   : > { %16643 = vmatmul.mubr.msk.f32.vlgmr.msra.gmra.mrb[152].mxu1 %vm7273_vm11, %v15745_v27 }
0x20fc   : > { %v15815_v22 = vpop.f32.mrb[148].mxu1 }
0x20fd   : > { %v16049_v62 = vadd.f32 %v16048_v43, %v15815_v22  ;;  %v15817_v51 = vpop.f32.mrb[149].mxu1 }
0x20fe   : > { %v16050_v60 = vadd.f32 %v16048_v43, %v15817_v51 }
0x20ff   : > { %20911 = vtanh.f32 %v16049_v62 }
0x2100   : > { %20913 = vtanh.f32 %v16050_v60  ;;  %v16028_v0 = vpop.f32.mrb[128].mxu0  ;;  %v15886_v30 = vpop.f32.mrb[150].mxu1 }
0x2101   : > { %v16038_v29 = vadd.f32 %v16028_v0, %v15235_v44  ;;  %v16051_v63 = vadd.f32 %v16048_v43, %v15886_v30  ;;  %v15888_v32 = vpop.f32.mrb[151].mxu1  ;;  %v18375_v33 = vpop.f32.mrb[129].mxu0 }
0x2102   : > { %v16052_v50 = vadd.f32 %v16048_v43, %v15888_v32 }
0x2103   : > { %20915 = vtanh.f32 %v16051_v63  ;;  %v16055_v12 = vadd.f32 %v16048_v43, %v16038_v29 }
0x2104   : > { %20917 = vtanh.f32 %v16052_v50 }
0x2105   : > { %20919 = vtanh.f32 %v16055_v12 }
0x2109   : > { %v20912_v42 = vpop.eup %20911 }
0x210a   : > { %v20914_v20 = vpop.eup %20913 }
0x210b   : > { %v16070_v15 = vcombine.low %v20912_v42, %v20914_v20 }
0x210d   : > { %v20916_v47 = vpop.eup %20915  ;;  %v16079_v35 = vrot.slane %v16070_v15, %v16078_v3 }
0x210e   : > { %v20918_v7 = vpop.eup %20917 }
0x210f   : > { %v16071_v53 = vcombine.low %v20916_v47, %v20918_v7  ;;  %v20920_v52 = vpop.eup %20919 }
0x2110   : > { %v16100_v16 = vrot.slane %v20920_v52, %v16078_v3 }
0x2111   : > { %v16086_v10 = vrot.slane %v16071_v53, %v16078_v3 }
0x2113   : > { %v16101_v38 = vcombine.low %v16079_v35, %v16086_v10 }
0x2115   : > { %v16109_v54 = vrot.slane %v16101_v38, %v16078_v3 }
0x2136   : > { %v15957_v9 = vpop.f32.mrb[152].mxu1 }
0x2137   : > { %v16053_v14 = vadd.f32 %v16048_v43, %v15957_v9  ;;  %v15959_v31 = vpop.f32.mrb[153].mxu1 }
0x2138   : > { %v16054_v8 = vadd.f32 %v16048_v43, %v15959_v31 }
0x2139   : > { %20921 = vtanh.f32 %v16053_v14 }
0x213a   : > { %20923 = vtanh.f32 %v16054_v8 }
0x2143   : > { %v20922_v59 = vpop.eup %20921 }
0x2144   : > { %v20924_v21 = vpop.eup %20923 }
0x2145   : > { %v16072_v58 = vcombine.low %v20922_v59, %v20924_v21 }
0x2147   : > { %v16093_v18 = vrot.slane %v16072_v58, %v16078_v3 }
0x2149   : > { %v16102_v19 = vcombine.low %v16093_v18, %v16100_v16 }
0x214b   : > { %v16116_v2 = vrot.slane %v16102_v19, %v16078_v3 }
0x214d   : > { %v16117_v25 = vcombine.low %v16109_v54, %v16116_v2 }
0x214f   : > { %16123 = vst.msk [vmem:[%s718_s4] sm:$0x7f] %vm16121_vm13, %v16117_v25 }
0x2150 PF: > { %s23169_s2 = sld [smem:[#allocation25_spill]] }
0x2156   : > { %s36_s29 = sadd.s32 1, %s23169_s2  }
0x2157   : > { %p33_p2 = scmp.ge.s32.totalorder %s36_s29, 4  }
0x2159   :  { %35 = sbr.rel (!%p33_p2) target bundleno = 14 (0xe), region = 271 }
0x2160   :  { %16143 = vsyncpa [#allocation4], 1 }
0x2161   :  { %16145 = vsyncpa [#allocation4 + $0x1], 1 }
0x2162   :  { %16146 = vsyncpa [#allocation6], 1 }
0x2163   :  { %16147 = vsyncpa [#allocation9], 1 }
0x2164   :  { %16148 = vsyncpa [#allocation12], 1 }
0x2165   :  { %16149 = vsyncpa [#allocation15], 1 }
0x2166   :  { %16150 = vsyncpa [#allocation18], 1 }

</bundles_post_ra>
